<compile_context>
chip_gen: v6e
topology: v6e:2x2x1
jax: 0.10.0
libtpu: 0.0.40
codegen_flags: <defaults>
</compile_context>

<pallas_src>
import functools

import jax
import jax.numpy as jnp
from jax.experimental import pallas as pl
from jax.experimental.pallas import tpu as pltpu

ND = 1024
HEAD_PAD = 128          # lane-dense padded width of the combined head output
LN_EPS = 1e-5
LRELU_SLOPE = 0.2
MAX_TILE_B = 256        # batch tile cap; multiple of 16 (bf16 sublane tile)


def _round_up(x, m):
    return ((x + m - 1) // m) * m


# ---------------------------------------------------------------------------
# Single fused kernel: 4x (Linear -> LayerNorm -> LeakyReLU) -> combined heads
# Runs once per batch tile; weights are VMEM-resident across grid steps.
# ---------------------------------------------------------------------------
def _fused_kernel(eps, slope,
                  x_ref,
                  w1, b1, g1, be1,
                  w2, b2, g2, be2,
                  w3, b3, g3, be3,
                  w4, b4, g4, be4,
                  wh, bh,
                  out_ref):
    def layer(h_bf16, w_ref, b_ref, g_ref, beta_ref):
        d = w_ref.shape[1]
        y = jnp.dot(h_bf16, w_ref[...], preferred_element_type=jnp.float32)
        y = y + b_ref[...]                                   # (B, D) + (1, D)
        # Two-pass (centered) LayerNorm statistics in f32.
        mean = jnp.sum(y, axis=-1, keepdims=True) * (1.0 / d)
        yc = y - mean
        var = jnp.sum(yc * yc, axis=-1, keepdims=True) * (1.0 / d)
        yn = yc * jax.lax.rsqrt(var + eps)
        yn = yn * g_ref[...] + beta_ref[...]
        act = jnp.maximum(yn, slope * yn)                    # LeakyReLU(0.2)
        return act.astype(jnp.bfloat16)

    h = x_ref[...]                                           # already bf16
    h = layer(h, w1, b1, g1, be1)
    h = layer(h, w2, b2, g2, be2)
    h = layer(h, w3, b3, g3, be3)
    h = layer(h, w4, b4, g4, be4)
    # Combined heads: one lane-dense (TILE_B, 128) store. Column 0 = dis,
    # columns [1, 1+aud_size) = reg, remaining columns are zero padding.
    out_ref[...] = (
        jnp.dot(h, wh[...], preferred_element_type=jnp.float32) + bh[...]
    )


# ---------------------------------------------------------------------------
# Parameter construction (deterministic, PyTorch-default-like uniform init).
# Matmul weights are stored bf16; biases / LN affine params stay f32.
# ---------------------------------------------------------------------------
def init_params(key, dim_z_movement, aud_size):
    nd = ND
    assert 1 + aud_size <= HEAD_PAD, "aud_size too large for packed head"
    dims = [dim_z_movement * 6, nd * 2, nd, nd // 2, nd // 4]

    def linear_init(k, din, dout):
        kw, kb = jax.random.split(k)
        bound = 1.0 / jnp.sqrt(jnp.float32(din))
        w = jax.random.uniform(kw, (din, dout), jnp.float32, -bound, bound)
        b = jax.random.uniform(kb, (1, dout), jnp.float32, -bound, bound)
        return w, b

    keys = jax.random.split(key, 6)
    mlp = []
    for i in range(4):
        w, b = linear_init(keys[i], dims[i], dims[i + 1])
        gamma = jnp.ones((1, dims[i + 1]), jnp.float32)   # LayerNorm weight
        beta = jnp.zeros((1, dims[i + 1]), jnp.float32)   # LayerNorm bias
        mlp.append((w.astype(jnp.bfloat16), b, gamma, beta))

    wd, bd = linear_init(keys[4], nd // 4, 1)
    wr, br = linear_init(keys[5], nd // 4, aud_size)
    # Pack the two heads into one lane-dense padded weight/bias.
    head_w = jnp.zeros((nd // 4, HEAD_PAD), jnp.float32)
    head_w = head_w.at[:, 0:1].set(wd).at[:, 1:1 + aud_size].set(wr)
    head_b = jnp.zeros((1, HEAD_PAD), jnp.float32)
    head_b = head_b.at[:, 0:1].set(bd).at[:, 1:1 + aud_size].set(br)

    return {"mlp": mlp, "head_w": head_w.astype(jnp.bfloat16), "head_b": head_b}


# ---------------------------------------------------------------------------
# Forward wrapper: pad batch to a bf16-sublane multiple, tile the batch over
# a "parallel" grid with VMEM-resident weights, slice dis / reg from the
# lane-dense output slab.
# ---------------------------------------------------------------------------
def dance_aud_infodis_forward(params, movements, aud, *, aud_size):
    # movements: (B, 6, dim_z_movement) -> flatten to (B, 6*dim_z_movement)
    # aud is accepted but unused, exactly as in the PyTorch module.
    del aud
    B = movements.shape[0]
    in_dim = movements.shape[1] * movements.shape[2]
    x = movements.reshape(B, in_dim).astype(jnp.bfloat16)

    # Pad batch to a multiple of 16 (bf16 sublane tile), then to a multiple
    # of the batch tile.
    B16 = max(16, _round_up(B, 16))
    if B16 <= MAX_TILE_B:
        tile_b, Bp = B16, B16
    else:
        tile_b = MAX_TILE_B
        Bp = _round_up(B16, tile_b)
    if Bp != B:
        x = jnp.pad(x, ((0, Bp - B), (0, 0)))

    flat_inputs = [x]
    for (w, b, g, be) in params["mlp"]:
        flat_inputs += [w, b, g, be]
    flat_inputs += [params["head_w"], params["head_b"]]

    def const_spec(a):
        nd = a.ndim
        # Constant index_map: block never changes -> weight stays VMEM-resident
        # across batch grid steps (no re-DMA).
        return pl.BlockSpec(a.shape, lambda i, _nd=nd: (0,) * _nd)

    in_specs = [pl.BlockSpec((tile_b, in_dim), lambda i: (i, 0))]
    in_specs += [const_spec(a) for a in flat_inputs[1:]]

    out = pl.pallas_call(
        functools.partial(_fused_kernel, LN_EPS, LRELU_SLOPE),
        out_shape=jax.ShapeDtypeStruct((Bp, HEAD_PAD), jnp.float32),
        grid=(Bp // tile_b,),
        in_specs=in_specs,
        out_specs=pl.BlockSpec((tile_b, HEAD_PAD), lambda i: (i, 0)),
        compiler_params=pltpu.CompilerParams(
            dimension_semantics=("parallel",),
            vmem_limit_bytes=32 << 20),
    )(*flat_inputs)

    # Note: out[:B, 0] mirrors .squeeze() for B > 1; for B == 1 PyTorch's
    # squeeze() would also drop the batch dim (shape semantics only).
    dis = out[:B, 0]
    reg = out[:B, 1:1 + aud_size]
    return dis, reg


# ---------------------------------------------------------------------------
# Pure-JAX reference (same bf16 weights, same LN form) for a sanity check.
# ---------------------------------------------------------------------------
def _reference_forward(params, movements, aud_size):
    B = movements.shape[0]
    h = movements.reshape(B, -1).astype(jnp.bfloat16)
    for (w, b, g, be) in params["mlp"]:
        y = jnp.dot(h, w, preferred_element_type=jnp.float32) + b
        mean = jnp.mean(y, axis=-1, keepdims=True)
        var = jnp.mean(jnp.square(y - mean), axis=-1, keepdims=True)
        yn = (y - mean) * jax.lax.rsqrt(var + LN_EPS) * g + be
        h = jnp.maximum(yn, LRELU_SLOPE * yn).astype(jnp.bfloat16)
    out = (jnp.dot(h, params["head_w"], preferred_element_type=jnp.float32)
           + params["head_b"])
    return out[:, 0], out[:, 1:1 + aud_size]


if __name__ == "__main__":
    aud_size = 16
    dim_z_movement = 32
    length = 8          # unused by forward (kept for signature fidelity)
    B = 2

    key = jax.random.PRNGKey(0)
    kp, km, ka = jax.random.split(key, 3)

    params = init_params(kp, dim_z_movement, aud_size)
    movements = jax.random.normal(km, (B, 6, dim_z_movement), jnp.float32)
    aud = jax.random.normal(ka, (B, length, aud_size), jnp.float32)

    fwd = jax.jit(functools.partial(dance_aud_infodis_forward, aud_size=aud_size))
    dis, reg = fwd(params, movements, aud)
    jax.block_until_ready((dis, reg))

    assert dis.shape == (B,), dis.shape
    assert reg.shape == (B, aud_size), reg.shape
    assert jnp.all(jnp.isfinite(dis)) and jnp.all(jnp.isfinite(reg))

    # Sanity check against a pure-JAX reference using the same bf16 weights.
    dis_ref, reg_ref = _reference_forward(params, movements, aud_size)
    assert jnp.max(jnp.abs(dis - dis_ref)) < 0.1, float(jnp.max(jnp.abs(dis - dis_ref)))
    assert jnp.max(jnp.abs(reg - reg_ref)) < 0.1, float(jnp.max(jnp.abs(reg - reg_ref)))

    print("KERNEL_OK")
</pallas_src>

<mosaic_0001>
module attributes {stable_mosaic.version = 11 : i64} {
  func.func @_fused_kernel(%arg0: i32, %arg1: memref<16x192xbf16, #tpu.memory_space<vmem>>, %arg2: memref<192x2048xbf16, #tpu.memory_space<vmem>>, %arg3: memref<1x2048xf32, #tpu.memory_space<vmem>>, %arg4: memref<1x2048xf32, #tpu.memory_space<vmem>>, %arg5: memref<1x2048xf32, #tpu.memory_space<vmem>>, %arg6: memref<2048x1024xbf16, #tpu.memory_space<vmem>>, %arg7: memref<1x1024xf32, #tpu.memory_space<vmem>>, %arg8: memref<1x1024xf32, #tpu.memory_space<vmem>>, %arg9: memref<1x1024xf32, #tpu.memory_space<vmem>>, %arg10: memref<1024x512xbf16, #tpu.memory_space<vmem>>, %arg11: memref<1x512xf32, #tpu.memory_space<vmem>>, %arg12: memref<1x512xf32, #tpu.memory_space<vmem>>, %arg13: memref<1x512xf32, #tpu.memory_space<vmem>>, %arg14: memref<512x256xbf16, #tpu.memory_space<vmem>>, %arg15: memref<1x256xf32, #tpu.memory_space<vmem>>, %arg16: memref<1x256xf32, #tpu.memory_space<vmem>>, %arg17: memref<1x256xf32, #tpu.memory_space<vmem>>, %arg18: memref<256x128xbf16, #tpu.memory_space<vmem>>, %arg19: memref<1x128xf32, #tpu.memory_space<vmem>>, %arg20: memref<16x128xf32, #tpu.memory_space<vmem>>) attributes {dimension_semantics = [#tpu.dimension_semantics<parallel>], iteration_bounds = array<i64: 1>, scalar_prefetch = 0 : i64, scratch_operands = 0 : i64, tpu.core_type = #tpu.core_type<tc>, window_params = [{transform_indices = @transform_0, window_bounds = array<i64: 16, 192>}, {pipeline_mode = #tpu.pipeline_mode<synchronous>, transform_indices = @transform_1, window_bounds = array<i64: 192, 2048>}, {pipeline_mode = #tpu.pipeline_mode<synchronous>, transform_indices = @transform_2, window_bounds = array<i64: 1, 2048>}, {pipeline_mode = #tpu.pipeline_mode<synchronous>, transform_indices = @transform_3, window_bounds = array<i64: 1, 2048>}, {pipeline_mode = #tpu.pipeline_mode<synchronous>, transform_indices = @transform_4, window_bounds = array<i64: 1, 2048>}, {pipeline_mode = #tpu.pipeline_mode<synchronous>, transform_indices = @transform_5, window_bounds = array<i64: 2048, 1024>}, {pipeline_mode = #tpu.pipeline_mode<synchronous>, transform_indices = @transform_6, window_bounds = array<i64: 1, 1024>}, {pipeline_mode = #tpu.pipeline_mode<synchronous>, transform_indices = @transform_7, window_bounds = array<i64: 1, 1024>}, {pipeline_mode = #tpu.pipeline_mode<synchronous>, transform_indices = @transform_8, window_bounds = array<i64: 1, 1024>}, {pipeline_mode = #tpu.pipeline_mode<synchronous>, transform_indices = @transform_9, window_bounds = array<i64: 1024, 512>}, {pipeline_mode = #tpu.pipeline_mode<synchronous>, transform_indices = @transform_10, window_bounds = array<i64: 1, 512>}, {pipeline_mode = #tpu.pipeline_mode<synchronous>, transform_indices = @transform_11, window_bounds = array<i64: 1, 512>}, {pipeline_mode = #tpu.pipeline_mode<synchronous>, transform_indices = @transform_12, window_bounds = array<i64: 1, 512>}, {pipeline_mode = #tpu.pipeline_mode<synchronous>, transform_indices = @transform_13, window_bounds = array<i64: 512, 256>}, {pipeline_mode = #tpu.pipeline_mode<synchronous>, transform_indices = @transform_14, window_bounds = array<i64: 1, 256>}, {pipeline_mode = #tpu.pipeline_mode<synchronous>, transform_indices = @transform_15, window_bounds = array<i64: 1, 256>}, {pipeline_mode = #tpu.pipeline_mode<synchronous>, transform_indices = @transform_16, window_bounds = array<i64: 1, 256>}, {pipeline_mode = #tpu.pipeline_mode<synchronous>, transform_indices = @transform_17, window_bounds = array<i64: 256, 128>}, {pipeline_mode = #tpu.pipeline_mode<synchronous>, transform_indices = @transform_18, window_bounds = array<i64: 1, 128>}, {transform_indices = @transform_19, window_bounds = array<i64: 16, 128>}]} {
    %c0 = arith.constant 0 : index
    %c0_0 = arith.constant 0 : index
    %0 = vector.load %arg1[%c0, %c0_0] : memref<16x192xbf16, #tpu.memory_space<vmem>>, vector<16x192xbf16>
    %c0_1 = arith.constant 0 : index
    %c0_2 = arith.constant 0 : index
    %1 = vector.load %arg2[%c0_1, %c0_2] : memref<192x2048xbf16, #tpu.memory_space<vmem>>, vector<192x2048xbf16>
    %cst = arith.constant dense<0.000000e+00> : vector<16x2048xf32>
    %2 = tpu.matmul %0, %1, %cst {dimension_numbers = #tpu.dot_dimension_numbers<[1], [0], [0], [1], [0, 0, 1, 1], [], []>} : vector<16x192xbf16>, vector<192x2048xbf16>, vector<16x2048xf32> -> vector<16x2048xf32>
    %c0_3 = arith.constant 0 : index
    %c0_4 = arith.constant 0 : index
    %3 = vector.load %arg3[%c0_3, %c0_4] : memref<1x2048xf32, #tpu.memory_space<vmem>>, vector<1x2048xf32>
    %4 = vector.broadcast %3 : vector<1x2048xf32> to vector<16x2048xf32>
    %5 = arith.addf %2, %4 : vector<16x2048xf32>
    %cst_5 = arith.constant dense<0.000000e+00> : vector<16xf32>
    %6 = vector.multi_reduction <add>, %5, %cst_5 [1] : vector<16x2048xf32> to vector<16xf32>
    %7 = vector.shape_cast %6 : vector<16xf32> to vector<16x1xf32>
    %cst_6 = arith.constant 4.8828125E-4 : f32
    %8 = vector.broadcast %cst_6 : f32 to vector<16x1xf32>
    %9 = arith.mulf %7, %8 : vector<16x1xf32>
    %10 = vector.broadcast %9 : vector<16x1xf32> to vector<16x2048xf32>
    %11 = arith.subf %5, %10 : vector<16x2048xf32>
    %12 = arith.mulf %11, %11 : vector<16x2048xf32>
    %cst_7 = arith.constant dense<0.000000e+00> : vector<16xf32>
    %13 = vector.multi_reduction <add>, %12, %cst_7 [1] : vector<16x2048xf32> to vector<16xf32>
    %14 = vector.shape_cast %13 : vector<16xf32> to vector<16x1xf32>
    %cst_8 = arith.constant 4.8828125E-4 : f32
    %15 = vector.broadcast %cst_8 : f32 to vector<16x1xf32>
    %16 = arith.mulf %14, %15 : vector<16x1xf32>
    %cst_9 = arith.constant 9.99999974E-6 : f32
    %17 = vector.broadcast %cst_9 : f32 to vector<16x1xf32>
    %18 = arith.addf %16, %17 : vector<16x1xf32>
    %19 = math.rsqrt %18 : vector<16x1xf32>
    %20 = vector.broadcast %19 : vector<16x1xf32> to vector<16x2048xf32>
    %21 = arith.mulf %11, %20 : vector<16x2048xf32>
    %c0_10 = arith.constant 0 : index
    %c0_11 = arith.constant 0 : index
    %22 = vector.load %arg4[%c0_10, %c0_11] : memref<1x2048xf32, #tpu.memory_space<vmem>>, vector<1x2048xf32>
    %23 = vector.broadcast %22 : vector<1x2048xf32> to vector<16x2048xf32>
    %24 = arith.mulf %21, %23 : vector<16x2048xf32>
    %c0_12 = arith.constant 0 : index
    %c0_13 = arith.constant 0 : index
    %25 = vector.load %arg5[%c0_12, %c0_13] : memref<1x2048xf32, #tpu.memory_space<vmem>>, vector<1x2048xf32>
    %26 = vector.broadcast %25 : vector<1x2048xf32> to vector<16x2048xf32>
    %27 = arith.addf %24, %26 : vector<16x2048xf32>
    %cst_14 = arith.constant 2.000000e-01 : f32
    %28 = vector.broadcast %cst_14 : f32 to vector<16x2048xf32>
    %29 = arith.mulf %28, %27 : vector<16x2048xf32>
    %30 = arith.maximumf %27, %29 : vector<16x2048xf32>
    %31 = arith.truncf %30 : vector<16x2048xf32> to vector<16x2048xbf16>
    %c0_15 = arith.constant 0 : index
    %c0_16 = arith.constant 0 : index
    %32 = vector.load %arg6[%c0_15, %c0_16] : memref<2048x1024xbf16, #tpu.memory_space<vmem>>, vector<2048x1024xbf16>
    %cst_17 = arith.constant dense<0.000000e+00> : vector<16x1024xf32>
    %33 = tpu.matmul %31, %32, %cst_17 {dimension_numbers = #tpu.dot_dimension_numbers<[1], [0], [0], [1], [0, 0, 1, 1], [], []>} : vector<16x2048xbf16>, vector<2048x1024xbf16>, vector<16x1024xf32> -> vector<16x1024xf32>
    %c0_18 = arith.constant 0 : index
    %c0_19 = arith.constant 0 : index
    %34 = vector.load %arg7[%c0_18, %c0_19] : memref<1x1024xf32, #tpu.memory_space<vmem>>, vector<1x1024xf32>
    %35 = vector.broadcast %34 : vector<1x1024xf32> to vector<16x1024xf32>
    %36 = arith.addf %33, %35 : vector<16x1024xf32>
    %cst_20 = arith.constant dense<0.000000e+00> : vector<16xf32>
    %37 = vector.multi_reduction <add>, %36, %cst_20 [1] : vector<16x1024xf32> to vector<16xf32>
    %38 = vector.shape_cast %37 : vector<16xf32> to vector<16x1xf32>
    %cst_21 = arith.constant 9.765625E-4 : f32
    %39 = vector.broadcast %cst_21 : f32 to vector<16x1xf32>
    %40 = arith.mulf %38, %39 : vector<16x1xf32>
    %41 = vector.broadcast %40 : vector<16x1xf32> to vector<16x1024xf32>
    %42 = arith.subf %36, %41 : vector<16x1024xf32>
    %43 = arith.mulf %42, %42 : vector<16x1024xf32>
    %cst_22 = arith.constant dense<0.000000e+00> : vector<16xf32>
    %44 = vector.multi_reduction <add>, %43, %cst_22 [1] : vector<16x1024xf32> to vector<16xf32>
    %45 = vector.shape_cast %44 : vector<16xf32> to vector<16x1xf32>
    %cst_23 = arith.constant 9.765625E-4 : f32
    %46 = vector.broadcast %cst_23 : f32 to vector<16x1xf32>
    %47 = arith.mulf %45, %46 : vector<16x1xf32>
    %cst_24 = arith.constant 9.99999974E-6 : f32
    %48 = vector.broadcast %cst_24 : f32 to vector<16x1xf32>
    %49 = arith.addf %47, %48 : vector<16x1xf32>
    %50 = math.rsqrt %49 : vector<16x1xf32>
    %51 = vector.broadcast %50 : vector<16x1xf32> to vector<16x1024xf32>
    %52 = arith.mulf %42, %51 : vector<16x1024xf32>
    %c0_25 = arith.constant 0 : index
    %c0_26 = arith.constant 0 : index
    %53 = vector.load %arg8[%c0_25, %c0_26] : memref<1x1024xf32, #tpu.memory_space<vmem>>, vector<1x1024xf32>
    %54 = vector.broadcast %53 : vector<1x1024xf32> to vector<16x1024xf32>
    %55 = arith.mulf %52, %54 : vector<16x1024xf32>
    %c0_27 = arith.constant 0 : index
    %c0_28 = arith.constant 0 : index
    %56 = vector.load %arg9[%c0_27, %c0_28] : memref<1x1024xf32, #tpu.memory_space<vmem>>, vector<1x1024xf32>
    %57 = vector.broadcast %56 : vector<1x1024xf32> to vector<16x1024xf32>
    %58 = arith.addf %55, %57 : vector<16x1024xf32>
    %cst_29 = arith.constant 2.000000e-01 : f32
    %59 = vector.broadcast %cst_29 : f32 to vector<16x1024xf32>
    %60 = arith.mulf %59, %58 : vector<16x1024xf32>
    %61 = arith.maximumf %58, %60 : vector<16x1024xf32>
    %62 = arith.truncf %61 : vector<16x1024xf32> to vector<16x1024xbf16>
    %c0_30 = arith.constant 0 : index
    %c0_31 = arith.constant 0 : index
    %63 = vector.load %arg10[%c0_30, %c0_31] : memref<1024x512xbf16, #tpu.memory_space<vmem>>, vector<1024x512xbf16>
    %cst_32 = arith.constant dense<0.000000e+00> : vector<16x512xf32>
    %64 = tpu.matmul %62, %63, %cst_32 {dimension_numbers = #tpu.dot_dimension_numbers<[1], [0], [0], [1], [0, 0, 1, 1], [], []>} : vector<16x1024xbf16>, vector<1024x512xbf16>, vector<16x512xf32> -> vector<16x512xf32>
    %c0_33 = arith.constant 0 : index
    %c0_34 = arith.constant 0 : index
    %65 = vector.load %arg11[%c0_33, %c0_34] : memref<1x512xf32, #tpu.memory_space<vmem>>, vector<1x512xf32>
    %66 = vector.broadcast %65 : vector<1x512xf32> to vector<16x512xf32>
    %67 = arith.addf %64, %66 : vector<16x512xf32>
    %cst_35 = arith.constant dense<0.000000e+00> : vector<16xf32>
    %68 = vector.multi_reduction <add>, %67, %cst_35 [1] : vector<16x512xf32> to vector<16xf32>
    %69 = vector.shape_cast %68 : vector<16xf32> to vector<16x1xf32>
    %cst_36 = arith.constant 0.001953125 : f32
    %70 = vector.broadcast %cst_36 : f32 to vector<16x1xf32>
    %71 = arith.mulf %69, %70 : vector<16x1xf32>
    %72 = vector.broadcast %71 : vector<16x1xf32> to vector<16x512xf32>
    %73 = arith.subf %67, %72 : vector<16x512xf32>
    %74 = arith.mulf %73, %73 : vector<16x512xf32>
    %cst_37 = arith.constant dense<0.000000e+00> : vector<16xf32>
    %75 = vector.multi_reduction <add>, %74, %cst_37 [1] : vector<16x512xf32> to vector<16xf32>
    %76 = vector.shape_cast %75 : vector<16xf32> to vector<16x1xf32>
    %cst_38 = arith.constant 0.001953125 : f32
    %77 = vector.broadcast %cst_38 : f32 to vector<16x1xf32>
    %78 = arith.mulf %76, %77 : vector<16x1xf32>
    %cst_39 = arith.constant 9.99999974E-6 : f32
    %79 = vector.broadcast %cst_39 : f32 to vector<16x1xf32>
    %80 = arith.addf %78, %79 : vector<16x1xf32>
    %81 = math.rsqrt %80 : vector<16x1xf32>
    %82 = vector.broadcast %81 : vector<16x1xf32> to vector<16x512xf32>
    %83 = arith.mulf %73, %82 : vector<16x512xf32>
    %c0_40 = arith.constant 0 : index
    %c0_41 = arith.constant 0 : index
    %84 = vector.load %arg12[%c0_40, %c0_41] : memref<1x512xf32, #tpu.memory_space<vmem>>, vector<1x512xf32>
    %85 = vector.broadcast %84 : vector<1x512xf32> to vector<16x512xf32>
    %86 = arith.mulf %83, %85 : vector<16x512xf32>
    %c0_42 = arith.constant 0 : index
    %c0_43 = arith.constant 0 : index
    %87 = vector.load %arg13[%c0_42, %c0_43] : memref<1x512xf32, #tpu.memory_space<vmem>>, vector<1x512xf32>
    %88 = vector.broadcast %87 : vector<1x512xf32> to vector<16x512xf32>
    %89 = arith.addf %86, %88 : vector<16x512xf32>
    %cst_44 = arith.constant 2.000000e-01 : f32
    %90 = vector.broadcast %cst_44 : f32 to vector<16x512xf32>
    %91 = arith.mulf %90, %89 : vector<16x512xf32>
    %92 = arith.maximumf %89, %91 : vector<16x512xf32>
    %93 = arith.truncf %92 : vector<16x512xf32> to vector<16x512xbf16>
    %c0_45 = arith.constant 0 : index
    %c0_46 = arith.constant 0 : index
    %94 = vector.load %arg14[%c0_45, %c0_46] : memref<512x256xbf16, #tpu.memory_space<vmem>>, vector<512x256xbf16>
    %cst_47 = arith.constant dense<0.000000e+00> : vector<16x256xf32>
    %95 = tpu.matmul %93, %94, %cst_47 {dimension_numbers = #tpu.dot_dimension_numbers<[1], [0], [0], [1], [0, 0, 1, 1], [], []>} : vector<16x512xbf16>, vector<512x256xbf16>, vector<16x256xf32> -> vector<16x256xf32>
    %c0_48 = arith.constant 0 : index
    %c0_49 = arith.constant 0 : index
    %96 = vector.load %arg15[%c0_48, %c0_49] : memref<1x256xf32, #tpu.memory_space<vmem>>, vector<1x256xf32>
    %97 = vector.broadcast %96 : vector<1x256xf32> to vector<16x256xf32>
    %98 = arith.addf %95, %97 : vector<16x256xf32>
    %cst_50 = arith.constant dense<0.000000e+00> : vector<16xf32>
    %99 = vector.multi_reduction <add>, %98, %cst_50 [1] : vector<16x256xf32> to vector<16xf32>
    %100 = vector.shape_cast %99 : vector<16xf32> to vector<16x1xf32>
    %cst_51 = arith.constant 3.906250e-03 : f32
    %101 = vector.broadcast %cst_51 : f32 to vector<16x1xf32>
    %102 = arith.mulf %100, %101 : vector<16x1xf32>
    %103 = vector.broadcast %102 : vector<16x1xf32> to vector<16x256xf32>
    %104 = arith.subf %98, %103 : vector<16x256xf32>
    %105 = arith.mulf %104, %104 : vector<16x256xf32>
    %cst_52 = arith.constant dense<0.000000e+00> : vector<16xf32>
    %106 = vector.multi_reduction <add>, %105, %cst_52 [1] : vector<16x256xf32> to vector<16xf32>
    %107 = vector.shape_cast %106 : vector<16xf32> to vector<16x1xf32>
    %cst_53 = arith.constant 3.906250e-03 : f32
    %108 = vector.broadcast %cst_53 : f32 to vector<16x1xf32>
    %109 = arith.mulf %107, %108 : vector<16x1xf32>
    %cst_54 = arith.constant 9.99999974E-6 : f32
    %110 = vector.broadcast %cst_54 : f32 to vector<16x1xf32>
    %111 = arith.addf %109, %110 : vector<16x1xf32>
    %112 = math.rsqrt %111 : vector<16x1xf32>
    %113 = vector.broadcast %112 : vector<16x1xf32> to vector<16x256xf32>
    %114 = arith.mulf %104, %113 : vector<16x256xf32>
    %c0_55 = arith.constant 0 : index
    %c0_56 = arith.constant 0 : index
    %115 = vector.load %arg16[%c0_55, %c0_56] : memref<1x256xf32, #tpu.memory_space<vmem>>, vector<1x256xf32>
    %116 = vector.broadcast %115 : vector<1x256xf32> to vector<16x256xf32>
    %117 = arith.mulf %114, %116 : vector<16x256xf32>
    %c0_57 = arith.constant 0 : index
    %c0_58 = arith.constant 0 : index
    %118 = vector.load %arg17[%c0_57, %c0_58] : memref<1x256xf32, #tpu.memory_space<vmem>>, vector<1x256xf32>
    %119 = vector.broadcast %118 : vector<1x256xf32> to vector<16x256xf32>
    %120 = arith.addf %117, %119 : vector<16x256xf32>
    %cst_59 = arith.constant 2.000000e-01 : f32
    %121 = vector.broadcast %cst_59 : f32 to vector<16x256xf32>
    %122 = arith.mulf %121, %120 : vector<16x256xf32>
    %123 = arith.maximumf %120, %122 : vector<16x256xf32>
    %124 = arith.truncf %123 : vector<16x256xf32> to vector<16x256xbf16>
    %c0_60 = arith.constant 0 : index
    %c0_61 = arith.constant 0 : index
    %125 = vector.load %arg18[%c0_60, %c0_61] : memref<256x128xbf16, #tpu.memory_space<vmem>>, vector<256x128xbf16>
    %cst_62 = arith.constant dense<0.000000e+00> : vector<16x128xf32>
    %126 = tpu.matmul %124, %125, %cst_62 {dimension_numbers = #tpu.dot_dimension_numbers<[1], [0], [0], [1], [0, 0, 1, 1], [], []>} : vector<16x256xbf16>, vector<256x128xbf16>, vector<16x128xf32> -> vector<16x128xf32>
    %c0_63 = arith.constant 0 : index
    %c0_64 = arith.constant 0 : index
    %127 = vector.load %arg19[%c0_63, %c0_64] : memref<1x128xf32, #tpu.memory_space<vmem>>, vector<1x128xf32>
    %128 = vector.broadcast %127 : vector<1x128xf32> to vector<16x128xf32>
    %129 = arith.addf %126, %128 : vector<16x128xf32>
    %c0_65 = arith.constant 0 : index
    %c0_66 = arith.constant 0 : index
    %130 = vector.load %arg20[%c0_65, %c0_66] : memref<16x128xf32, #tpu.memory_space<vmem>>, vector<16x128xf32>
    tpu.vector_store %arg20[%c0_65, %c0_66], %129 {strides = array<i32>} : memref<16x128xf32, #tpu.memory_space<vmem>>, vector<16x128xf32>,
    return
  }
  func.func @transform_0(%arg0: i32) -> (i32, i32) {
    %c0_i32 = arith.constant 0 : i32
    %c0_i32_0 = arith.constant 0 : i32
    return %arg0, %c0_i32 : i32, i32
  }
  func.func @transform_1(%arg0: i32) -> (i32, i32) {
    %c0_i32 = arith.constant 0 : i32
    %c0_i32_0 = arith.constant 0 : i32
    %c0_i32_1 = arith.constant 0 : i32
    return %c0_i32, %c0_i32_0 : i32, i32
  }
  func.func @transform_2(%arg0: i32) -> (i32, i32) {
    %c0_i32 = arith.constant 0 : i32
    %c0_i32_0 = arith.constant 0 : i32
    %c0_i32_1 = arith.constant 0 : i32
    return %c0_i32, %c0_i32_0 : i32, i32
  }
  func.func @transform_3(%arg0: i32) -> (i32, i32) {
    %c0_i32 = arith.constant 0 : i32
    %c0_i32_0 = arith.constant 0 : i32
    %c0_i32_1 = arith.constant 0 : i32
    return %c0_i32, %c0_i32_0 : i32, i32
  }
  func.func @transform_4(%arg0: i32) -> (i32, i32) {
    %c0_i32 = arith.constant 0 : i32
    %c0_i32_0 = arith.constant 0 : i32
    %c0_i32_1 = arith.constant 0 : i32
    return %c0_i32, %c0_i32_0 : i32, i32
  }
  func.func @transform_5(%arg0: i32) -> (i32, i32) {
    %c0_i32 = arith.constant 0 : i32
    %c0_i32_0 = arith.constant 0 : i32
    %c0_i32_1 = arith.constant 0 : i32
    return %c0_i32, %c0_i32_0 : i32, i32
  }
  func.func @transform_6(%arg0: i32) -> (i32, i32) {
    %c0_i32 = arith.constant 0 : i32
    %c0_i32_0 = arith.constant 0 : i32
    %c0_i32_1 = arith.constant 0 : i32
    return %c0_i32, %c0_i32_0 : i32, i32
  }
  func.func @transform_7(%arg0: i32) -> (i32, i32) {
    %c0_i32 = arith.constant 0 : i32
    %c0_i32_0 = arith.constant 0 : i32
    %c0_i32_1 = arith.constant 0 : i32
    return %c0_i32, %c0_i32_0 : i32, i32
  }
  func.func @transform_8(%arg0: i32) -> (i32, i32) {
    %c0_i32 = arith.constant 0 : i32
    %c0_i32_0 = arith.constant 0 : i32
    %c0_i32_1 = arith.constant 0 : i32
    return %c0_i32, %c0_i32_0 : i32, i32
  }
  func.func @transform_9(%arg0: i32) -> (i32, i32) {
    %c0_i32 = arith.constant 0 : i32
    %c0_i32_0 = arith.constant 0 : i32
    %c0_i32_1 = arith.constant 0 : i32
    return %c0_i32, %c0_i32_0 : i32, i32
  }
  func.func @transform_10(%arg0: i32) -> (i32, i32) {
    %c0_i32 = arith.constant 0 : i32
    %c0_i32_0 = arith.constant 0 : i32
    %c0_i32_1 = arith.constant 0 : i32
    return %c0_i32, %c0_i32_0 : i32, i32
  }
  func.func @transform_11(%arg0: i32) -> (i32, i32) {
    %c0_i32 = arith.constant 0 : i32
    %c0_i32_0 = arith.constant 0 : i32
    %c0_i32_1 = arith.constant 0 : i32
    return %c0_i32, %c0_i32_0 : i32, i32
  }
  func.func @transform_12(%arg0: i32) -> (i32, i32) {
    %c0_i32 = arith.constant 0 : i32
    %c0_i32_0 = arith.constant 0 : i32
    %c0_i32_1 = arith.constant 0 : i32
    return %c0_i32, %c0_i32_0 : i32, i32
  }
  func.func @transform_13(%arg0: i32) -> (i32, i32) {
    %c0_i32 = arith.constant 0 : i32
    %c0_i32_0 = arith.constant 0 : i32
    %c0_i32_1 = arith.constant 0 : i32
    return %c0_i32, %c0_i32_0 : i32, i32
  }
  func.func @transform_14(%arg0: i32) -> (i32, i32) {
    %c0_i32 = arith.constant 0 : i32
    %c0_i32_0 = arith.constant 0 : i32
    %c0_i32_1 = arith.constant 0 : i32
    return %c0_i32, %c0_i32_0 : i32, i32
  }
  func.func @transform_15(%arg0: i32) -> (i32, i32) {
    %c0_i32 = arith.constant 0 : i32
    %c0_i32_0 = arith.constant 0 : i32
    %c0_i32_1 = arith.constant 0 : i32
    return %c0_i32, %c0_i32_0 : i32, i32
  }
  func.func @transform_16(%arg0: i32) -> (i32, i32) {
    %c0_i32 = arith.constant 0 : i32
    %c0_i32_0 = arith.constant 0 : i32
    %c0_i32_1 = arith.constant 0 : i32
    return %c0_i32, %c0_i32_0 : i32, i32
  }
  func.func @transform_17(%arg0: i32) -> (i32, i32) {
    %c0_i32 = arith.constant 0 : i32
    %c0_i32_0 = arith.constant 0 : i32
    %c0_i32_1 = arith.constant 0 : i32
    return %c0_i32, %c0_i32_0 : i32, i32
  }
  func.func @transform_18(%arg0: i32) -> (i32, i32) {
    %c0_i32 = arith.constant 0 : i32
    %c0_i32_0 = arith.constant 0 : i32
    %c0_i32_1 = arith.constant 0 : i32
    return %c0_i32, %c0_i32_0 : i32, i32
  }
  func.func @transform_19(%arg0: i32) -> (i32, i32) {
    %c0_i32 = arith.constant 0 : i32
    %c0_i32_0 = arith.constant 0 : i32
    return %arg0, %c0_i32 : i32, i32
  }
}

</mosaic_0001>

<bundles_post_ra>
// kernel: dance_aud_infodis_forward.1
= control target key start
LH: loop header
LB: loop body
LE: loop exit
PB: predicated region body
PF: predicated region fallthrough
CT: control target
= control target key end

     0   :  { %s16979_s0 = inlined_call_operand.vmem [shape: bf16[16,192], index: 0, kind: input, shape index: {}]   ;;  %s16980_s1 = inlined_call_operand.hbm [shape: bf16[192,2048], index: 1, kind: input, shape index: {}]   ;;  %s16981_s2 = inlined_call_operand.hbm [shape: f32[1,2048], index: 2, kind: input, shape index: {}]   ;;  %s16982_s3 = inlined_call_operand.hbm [shape: f32[1,2048], index: 3, kind: input, shape index: {}]   ;;  %s16983_s4 = inlined_call_operand.hbm [shape: f32[1,2048], index: 4, kind: input, shape index: {}]   ;;  %s16984_s5 = inlined_call_operand.hbm [shape: bf16[2048,1024], index: 5, kind: input, shape index: {}]   ;;  %s16985_s6 = inlined_call_operand.hbm [shape: f32[1,1024], index: 6, kind: input, shape index: {}]   ;;  %s16986_s7 = inlined_call_operand.hbm [shape: f32[1,1024], index: 7, kind: input, shape index: {}]   ;;  %s16987_s8 = inlined_call_operand.hbm [shape: f32[1,1024], index: 8, kind: input, shape index: {}]   ;;  %s16988_s9 = inlined_call_operand.hbm [shape: bf16[1024,512], index: 9, kind: input, shape index: {}]   ;;  %s16989_s10 = inlined_call_operand.hbm [shape: f32[1,512], index: 10, kind: input, shape index: {}]   ;;  %s16990_s11 = inlined_call_operand.hbm [shape: f32[1,512], index: 11, kind: input, shape index: {}]   ;;  %s16991_s12 = inlined_call_operand.hbm [shape: f32[1,512], index: 12, kind: input, shape index: {}]   ;;  %s16992_s13 = inlined_call_operand.hbm [shape: bf16[512,256], index: 13, kind: input, shape index: {}]   ;;  %s16993_s14 = inlined_call_operand.hbm [shape: f32[1,256], index: 14, kind: input, shape index: {}]   ;;  %s16994_s15 = inlined_call_operand.hbm [shape: f32[1,256], index: 15, kind: input, shape index: {}]   ;;  %s16995_s16 = inlined_call_operand.hbm [shape: f32[1,256], index: 16, kind: input, shape index: {}]   ;;  %s16996_s17 = inlined_call_operand.hbm [shape: bf16[256,128], index: 17, kind: input, shape index: {}]   ;;  %s16997_s18 = inlined_call_operand.hbm [shape: f32[1,128], index: 18, kind: input, shape index: {}]   ;;  %s16998_s19 = inlined_call_operand.vmem [shape: f32[16,128], index: 19, kind: output, shape index: {}]  }
   0x1   :  { %17052 = sst [smem:[#allocation69_spill]] %s16979_s0 }
   0x2   :  { %17053 = sst [smem:[#allocation70_spill]] %s16980_s1 }
   0x3   :  { %17054 = sst [smem:[#allocation71_spill]] %s16981_s2 }
   0x4   :  { %17055 = sst [smem:[#allocation72_spill]] %s16982_s3 }
   0x5   :  { %24 = vsyncpa [#allocation3], 0 }
   0x6   :  { %25 = vsyncpa [#allocation5], 0 }
   0x7   :  { %26 = vsyncpa [#allocation8], 0 }
   0x8   :  { %27 = vsyncpa [#allocation11], 0 }
   0x9   :  { %28 = vsyncpa [#allocation14], 0 }
   0xa   :  { %29 = vsyncpa [#allocation17], 0 }
   0xb   :  { %30 = vsyncpa [#allocation20], 0 }
   0xc   :  { %31 = vsyncpa [#allocation23], 0 }
   0xd   :  { %32 = vsyncpa [#allocation26], 0 }
   0xe   :  { %33 = vsyncpa [#allocation29], 0  ;;  %s15463_s0 = smov [#allocation4]   ;;  %s15464_s20 = smov [#allocation7]  }
   0xf   :  { %s54_s30 = sshll.u32 %s15463_s0, 4  ;;  %s74_s21 = sshll.u32 %s15464_s20, 4  ;;  %s55_s30 = int_to_ptr.vmem [resolvable:$true] %s54_s30  ;;  %s75_s21 = int_to_ptr.vmem [resolvable:$true] %s74_s21 }
  0x10   :  { %s15091_s1 = scalar_lea.vmem %s55_s30, 256  ;;  %p15096_p1 = scmp.lt.s32.totalorder %s55_s30, %s55_s30 }
  0x11   :  { %p15092_p0 = scmp.ne.s32.totalorder %s55_s30, %s15091_s1  ;;  %p15097_p2 = scmp.lt.s32.totalorder %s15091_s1, %s15091_s1 }
  0x13   :  { %p15098_p3 = por %p15097_p2, %p15096_p1 }
  0x15   :  { %p15099_p4 = pnand %p15098_p3, %p15092_p0 }
  0x17   :  { %15102 = shalt.err (!%p15099_p4)
}
  0x18   :  { %s17056_s23 = sld [smem:[#allocation71_spill]]  ;;  %s15111_s24 = scalar_lea.vmem %s75_s21, 256 }
  0x19   :  { %p15112_p5 = scmp.ne.s32.totalorder %s75_s21, %s15111_s24  ;;  %p15116_p6 = scmp.lt.s32.totalorder %s75_s21, %s75_s21 }
  0x1a   :  { %p15117_p7 = scmp.lt.s32.totalorder %s15111_s24, %s15111_s24 }
  0x1c   :  { %p15118_p8 = por %p15117_p7, %p15116_p6 }
  0x1e   :  { %57 = dma.hbm_to_vmem [thread:$0]  %s17056_s23, 256, %s55_s30, [#allocation5]  }
  0x1f   :  { %p15119_p9 = pnand %p15118_p8, %p15112_p5 }
  0x21   :  { %15122 = shalt.err (!%p15119_p9)
}
  0x22   :  { %77 = dma.hbm_to_vmem [thread:$0]  %s16983_s4, 256, %s75_s21, [#allocation8]  }
  0x23   :  { %s15465_s26 = smov [#allocation10]   ;;  %s15466_s28 = smov [#allocation13]  }
  0x24   :  { %s96_s27 = sshll.u32 %s15465_s26, 4  ;;  %s116_s29 = sshll.u32 %s15466_s28, 4  ;;  %s97_s27 = int_to_ptr.vmem [resolvable:$true] %s96_s27  ;;  %s117_s29 = int_to_ptr.vmem [resolvable:$true] %s116_s29 }
  0x25   :  { %s15131_s0 = scalar_lea.vmem %s97_s27, 128  ;;  %p15136_p11 = scmp.lt.s32.totalorder %s97_s27, %s97_s27 }
  0x26   :  { %p15132_p10 = scmp.ne.s32.totalorder %s97_s27, %s15131_s0  ;;  %p15137_p12 = scmp.lt.s32.totalorder %s15131_s0, %s15131_s0 }
  0x28   :  { %p15138_p13 = por %p15137_p12, %p15136_p11 }
  0x2a   :  { %p15139_p0 = pnand %p15138_p13, %p15132_p10 }
  0x2c   :  { %15142 = shalt.err (!%p15139_p0)
}
  0x2d   :  { %99 = dma.hbm_to_vmem [thread:$0]  %s16985_s6, 128, %s97_s27, [#allocation11]  }
  0x2e   :  { %s15151_s1 = scalar_lea.vmem %s117_s29, 128  ;;  %p15156_p2 = scmp.lt.s32.totalorder %s117_s29, %s117_s29 }
  0x2f   :  { %p15152_p1 = scmp.ne.s32.totalorder %s117_s29, %s15151_s1  ;;  %p15157_p3 = scmp.lt.s32.totalorder %s15151_s1, %s15151_s1 }
  0x31   :  { %p15158_p4 = por %p15157_p3, %p15156_p2 }
  0x33   :  { %p15159_p5 = pnand %p15158_p4, %p15152_p1 }
  0x35   :  { %15162 = shalt.err (!%p15159_p5)
}
  0x36   :  { %119 = dma.hbm_to_vmem [thread:$0]  %s16987_s8, 128, %s117_s29, [#allocation14]  }
  0x37   :  { %s15467_s22 = smov [#allocation16]   ;;  %s15468_s23 = smov [#allocation19]  }
  0x38   :  { %s138_s2 = sshll.u32 %s15467_s22, 4  ;;  %s158_s24 = sshll.u32 %s15468_s23, 4  ;;  %s139_s2 = int_to_ptr.vmem [resolvable:$true] %s138_s2  ;;  %s159_s24 = int_to_ptr.vmem [resolvable:$true] %s158_s24 }
  0x39   :  { %s15171_s25 = scalar_lea.vmem %s139_s2, 64  ;;  %p15176_p7 = scmp.lt.s32.totalorder %s139_s2, %s139_s2 }
  0x3a   :  { %p15172_p6 = scmp.ne.s32.totalorder %s139_s2, %s15171_s25  ;;  %p15177_p8 = scmp.lt.s32.totalorder %s15171_s25, %s15171_s25 }
  0x3c   :  { %p15178_p9 = por %p15177_p8, %p15176_p7 }
  0x3e   :  { %p15179_p10 = pnand %p15178_p9, %p15172_p6 }
  0x40   :  { %15182 = shalt.err (!%p15179_p10)
}
  0x41   :  { %141 = dma.hbm_to_vmem [thread:$0]  %s16989_s10, 64, %s139_s2, [#allocation17]  }
  0x42   :  { %s15191_s26 = scalar_lea.vmem %s159_s24, 64  ;;  %p15196_p12 = scmp.lt.s32.totalorder %s159_s24, %s159_s24 }
  0x43   :  { %p15192_p11 = scmp.ne.s32.totalorder %s159_s24, %s15191_s26  ;;  %p15197_p13 = scmp.lt.s32.totalorder %s15191_s26, %s15191_s26 }
  0x45   :  { %p15198_p0 = por %p15197_p13, %p15196_p12 }
  0x47   :  { %p15199_p1 = pnand %p15198_p0, %p15192_p11 }
  0x49   :  { %15202 = shalt.err (!%p15199_p1)
}
  0x4a   :  { %161 = dma.hbm_to_vmem [thread:$0]  %s16991_s12, 64, %s159_s24, [#allocation20]  }
  0x4b   :  { %s15469_s28 = smov [#allocation22]   ;;  %s15470_s0 = smov [#allocation25]  }
  0x4c   :  { %s180_s29 = sshll.u32 %s15469_s28, 4  ;;  %s200_s30 = sshll.u32 %s15470_s0, 4  ;;  %s181_s29 = int_to_ptr.vmem [resolvable:$true] %s180_s29  ;;  %s201_s30 = int_to_ptr.vmem [resolvable:$true] %s200_s30 }
  0x4d   :  { %s15211_s20 = scalar_lea.vmem %s181_s29, 32  ;;  %p15216_p3 = scmp.lt.s32.totalorder %s181_s29, %s181_s29 }
  0x4e   :  { %p15212_p2 = scmp.ne.s32.totalorder %s181_s29, %s15211_s20  ;;  %p15217_p4 = scmp.lt.s32.totalorder %s15211_s20, %s15211_s20 }
  0x50   :  { %p15218_p5 = por %p15217_p4, %p15216_p3 }
  0x52   :  { %p15219_p6 = pnand %p15218_p5, %p15212_p2 }
  0x54   :  { %15222 = shalt.err (!%p15219_p6)
}
  0x55   :  { %183 = dma.hbm_to_vmem [thread:$0]  %s16993_s14, 32, %s181_s29, [#allocation23]  }
  0x56   :  { %s15231_s4 = scalar_lea.vmem %s201_s30, 32  ;;  %p15236_p8 = scmp.lt.s32.totalorder %s201_s30, %s201_s30 }
  0x57   :  { %p15232_p7 = scmp.ne.s32.totalorder %s201_s30, %s15231_s4  ;;  %p15237_p9 = scmp.lt.s32.totalorder %s15231_s4, %s15231_s4 }
  0x59   :  { %p15238_p10 = por %p15237_p9, %p15236_p8 }
  0x5b   :  { %p15239_p11 = pnand %p15238_p10, %p15232_p7 }
  0x5d   :  { %15242 = shalt.err (!%p15239_p11)
}
  0x5e   :  { %203 = dma.hbm_to_vmem [thread:$0]  %s16995_s16, 32, %s201_s30, [#allocation26]  }
  0x5f   :  { %s15471_s22 = smov [#allocation2]  }
  0x60   :  { %s41_s2 = sshll.u32 %s15471_s22, 4  ;;  %s42_s2 = int_to_ptr.vmem [resolvable:$true] %s41_s2 }
  0x61   :  { %s15251_s23 = scalar_lea.vmem %s42_s2, 24576  ;;  %p15256_p13 = scmp.lt.s32.totalorder %s42_s2, %s42_s2 }
  0x62   :  { %p15252_p12 = scmp.ne.s32.totalorder %s42_s2, %s15251_s23  ;;  %p15257_p0 = scmp.lt.s32.totalorder %s15251_s23, %s15251_s23 }
  0x64   :  { %p15258_p1 = por %p15257_p0, %p15256_p13 }
  0x66   :  { %p15259_p2 = pnand %p15258_p1, %p15252_p12 }
  0x68   :  { %15262 = shalt.err (!%p15259_p2)
}
  0x69   :  { %s15472_s14 = smov 1024   ;;  %s15473_s24 = smov 64  }
  0x6a   :  { %s17057_s3 = sld [smem:[#allocation70_spill]]  ;;  %s15474_s26 = smov [#allocation6]  }
  0x6b   :  { %s64_s8 = sshll.u32 %s15474_s26, 4  ;;  %s15475_s16 = smov [#allocation9]   ;;  %s65_s8 = int_to_ptr.vmem [resolvable:$true] %s64_s8 }
  0x6c   :  { %s83_s27 = sshll.u32 %s15475_s16, 4  ;;  %s15271_s28 = scalar_lea.vmem %s65_s8, 256  ;;  %s84_s27 = int_to_ptr.vmem [resolvable:$true] %s83_s27 }
  0x6d   :  { %p15272_p3 = scmp.ne.s32.totalorder %s65_s8, %s15271_s28  ;;  %p15276_p4 = scmp.lt.s32.totalorder %s65_s8, %s65_s8 }
  0x6e   :  { %p15277_p5 = scmp.lt.s32.totalorder %s15271_s28, %s15271_s28 }
  0x70   :  { %47 = dma.hbm_to_vmem [thread:$0]  %s17057_s3, 24576, %s42_s2, [#allocation3], %s15472_s14, %s15472_s14, %s15473_s24  }
  0x71   :  { %p15278_p6 = por %p15277_p5, %p15276_p4 }
  0x73   :  { %p15279_p7 = pnand %p15278_p6, %p15272_p3 }
  0x75   :  { %15282 = shalt.err (!%p15279_p7)
}
  0x76   :  { %s17058_s30 = sld [smem:[#allocation72_spill]]  ;;  %s15291_s20 = scalar_lea.vmem %s84_s27, 131072 }
  0x77   :  { %p15292_p8 = scmp.ne.s32.totalorder %s84_s27, %s15291_s20  ;;  %p15296_p9 = scmp.lt.s32.totalorder %s84_s27, %s84_s27 }
  0x78   :  { %p15297_p10 = scmp.lt.s32.totalorder %s15291_s20, %s15291_s20 }
  0x7a   :  { %p15298_p11 = por %p15297_p10, %p15296_p9 }
  0x7c   :  { %67 = dma.hbm_to_vmem [thread:$0]  %s17058_s30, 256, %s65_s8, [#allocation5]  }
  0x7d   :  { %p15299_p12 = pnand %p15298_p11, %p15292_p8 }
  0x7f   :  { %15302 = shalt.err (!%p15299_p12)
}
  0x80   :  { %s15476_s10 = smov 512   ;;  %s15477_s1 = smov 32  }
  0x81   :  { %89 = dma.hbm_to_vmem [thread:$0]  %s16984_s5, 131072, %s84_s27, [#allocation8], %s15476_s10, %s15476_s10, %s15477_s1  }
  0x82   :  { %s15478_s21 = smov [#allocation12]   ;;  %s15479_s2 = smov [#allocation15]  }
  0x83   :  { %s106_s22 = sshll.u32 %s15478_s21, 4  ;;  %s125_s23 = sshll.u32 %s15479_s2, 4  ;;  %s107_s22 = int_to_ptr.vmem [resolvable:$true] %s106_s22  ;;  %s126_s23 = int_to_ptr.vmem [resolvable:$true] %s125_s23 }
  0x84   :  { %s15311_s14 = scalar_lea.vmem %s107_s22, 128  ;;  %p15316_p0 = scmp.lt.s32.totalorder %s107_s22, %s107_s22 }
  0x85   :  { %p15312_p13 = scmp.ne.s32.totalorder %s107_s22, %s15311_s14  ;;  %p15317_p1 = scmp.lt.s32.totalorder %s15311_s14, %s15311_s14 }
  0x87   :  { %p15318_p2 = por %p15317_p1, %p15316_p0 }
  0x89   :  { %p15319_p3 = pnand %p15318_p2, %p15312_p13 }
  0x8b   :  { %15322 = shalt.err (!%p15319_p3)
}
  0x8c   :  { %109 = dma.hbm_to_vmem [thread:$0]  %s16986_s7, 128, %s107_s22, [#allocation11]  }
  0x8d   :  { %s15331_s3 = scalar_lea.vmem %s126_s23, 32768  ;;  %p15336_p5 = scmp.lt.s32.totalorder %s126_s23, %s126_s23 }
  0x8e   :  { %p15332_p4 = scmp.ne.s32.totalorder %s126_s23, %s15331_s3  ;;  %p15337_p6 = scmp.lt.s32.totalorder %s15331_s3, %s15331_s3 }
  0x90   :  { %p15338_p7 = por %p15337_p6, %p15336_p5 }
  0x92   :  { %p15339_p8 = pnand %p15338_p7, %p15332_p4 }
  0x94   :  { %15342 = shalt.err (!%p15339_p8)
}
  0x95   :  { %s15480_s5 = smov 256   ;;  %s15481_s26 = smov 16  }
  0x96   :  { %131 = dma.hbm_to_vmem [thread:$0]  %s16988_s9, 32768, %s126_s23, [#allocation14], %s15480_s5, %s15480_s5, %s15481_s26  }
  0x97   :  { %s15482_s27 = smov [#allocation18]   ;;  %s15483_s29 = smov [#allocation21]  }
  0x98   :  { %s148_s28 = sshll.u32 %s15482_s27, 4  ;;  %s167_s0 = sshll.u32 %s15483_s29, 4  ;;  %s149_s28 = int_to_ptr.vmem [resolvable:$true] %s148_s28  ;;  %s168_s0 = int_to_ptr.vmem [resolvable:$true] %s167_s0 }
  0x99   :  { %s15351_s7 = scalar_lea.vmem %s149_s28, 64  ;;  %p15356_p10 = scmp.lt.s32.totalorder %s149_s28, %s149_s28 }
  0x9a   :  { %p15352_p9 = scmp.ne.s32.totalorder %s149_s28, %s15351_s7  ;;  %p15357_p11 = scmp.lt.s32.totalorder %s15351_s7, %s15351_s7 }
  0x9c   :  { %p15358_p12 = por %p15357_p11, %p15356_p10 }
  0x9e   :  { %p15359_p13 = pnand %p15358_p12, %p15352_p9 }
  0xa0   :  { %15362 = shalt.err (!%p15359_p13)
}
  0xa1   :  { %151 = dma.hbm_to_vmem [thread:$0]  %s16990_s11, 64, %s149_s28, [#allocation17]  }
  0xa2   :  { %s15371_s10 = scalar_lea.vmem %s168_s0, 8192  ;;  %p15376_p1 = scmp.lt.s32.totalorder %s168_s0, %s168_s0 }
  0xa3   :  { %p15372_p0 = scmp.ne.s32.totalorder %s168_s0, %s15371_s10  ;;  %p15377_p2 = scmp.lt.s32.totalorder %s15371_s10, %s15371_s10 }
  0xa5   :  { %p15378_p3 = por %p15377_p2, %p15376_p1 }
  0xa7   :  { %p15379_p4 = pnand %p15378_p3, %p15372_p0 }
  0xa9   :  { %15382 = shalt.err (!%p15379_p4)
}
  0xaa   :  { %s15484_s9 = smov 128   ;;  %s15485_s1 = smov 8  }
  0xab   :  { %173 = dma.hbm_to_vmem [thread:$0]  %s16992_s13, 8192, %s168_s0, [#allocation20], %s15484_s9, %s15484_s9, %s15485_s1  }
  0xac   :  { %s15486_s21 = smov [#allocation24]   ;;  %s15487_s2 = smov [#allocation27]  }
  0xad   :  { %s190_s22 = sshll.u32 %s15486_s21, 4  ;;  %s209_s23 = sshll.u32 %s15487_s2, 4  ;;  %s191_s22 = int_to_ptr.vmem [resolvable:$true] %s190_s22  ;;  %s210_s23 = int_to_ptr.vmem [resolvable:$true] %s209_s23 }
  0xae   :  { %s15391_s11 = scalar_lea.vmem %s191_s22, 32  ;;  %p15396_p6 = scmp.lt.s32.totalorder %s191_s22, %s191_s22 }
  0xaf   :  { %p15392_p5 = scmp.ne.s32.totalorder %s191_s22, %s15391_s11  ;;  %p15397_p7 = scmp.lt.s32.totalorder %s15391_s11, %s15391_s11 }
  0xb1   :  { %p15398_p8 = por %p15397_p7, %p15396_p6 }
  0xb3   :  { %p15399_p9 = pnand %p15398_p8, %p15392_p5 }
  0xb5   :  { %15402 = shalt.err (!%p15399_p9)
}
  0xb6   :  { %193 = dma.hbm_to_vmem [thread:$0]  %s16994_s15, 32, %s191_s22, [#allocation23]  }
  0xb7   :  { %s15411_s6 = scalar_lea.vmem %s210_s23, 2048  ;;  %p15416_p11 = scmp.lt.s32.totalorder %s210_s23, %s210_s23 }
  0xb8   :  { %p15412_p10 = scmp.ne.s32.totalorder %s210_s23, %s15411_s6  ;;  %p15417_p12 = scmp.lt.s32.totalorder %s15411_s6, %s15411_s6 }
  0xba   :  { %p15418_p13 = por %p15417_p12, %p15416_p11 }
  0xbc   :  { %p15419_p0 = pnand %p15418_p13, %p15412_p10 }
  0xbe   :  { %15422 = shalt.err (!%p15419_p0)
}
  0xbf   :  { %s15488_s13 = smov 4   ;;  %s15489_s26 = smov [#allocation28]  }
  0xc0   :  { %215 = dma.hbm_to_vmem [thread:$0]  %s16996_s17, 2048, %s210_s23, [#allocation26], %s15473_s24, %s15473_s24, %s15488_s13  }
  0xc1   :  { %s222_s8 = sshll.u32 %s15489_s26, 4  ;;  %s223_s8 = int_to_ptr.vmem [resolvable:$true] %s222_s8 }
  0xc2   :  { %s15431_s16 = scalar_lea.vmem %s223_s8, 16  ;;  %s15435_s15 = scalar_lea.vmem %s223_s8, 32 }
  0xc3   :  { %p15432_p1 = scmp.ne.s32.totalorder %s223_s8, %s15431_s16  ;;  %p15436_p2 = scmp.lt.s32.totalorder %s223_s8, %s223_s8 }
  0xc4   :  { %p15437_p3 = scmp.lt.s32.totalorder %s15435_s15, %s15431_s16 }
  0xc6   :  { %p15438_p4 = por %p15437_p3, %p15436_p2 }
  0xc8   :  { %p15439_p5 = pnand %p15438_p4, %p15432_p1 }
  0xca   :  { %15442 = shalt.err (!%p15439_p5)
}
  0xcb   :  { %225 = dma.hbm_to_vmem [thread:$0]  %s16997_s18, 16, %s223_s8, [#allocation29]  }
  0xcc   :  { %15443 = dma.done.wait [#allocation3], 24576  }
  0xcd   :  { %15444 = vsyncadd [#allocation3], 4294942720 }
  0xce   :  { %15445 = dma.done.wait [#allocation5], 512  }
  0xcf   :  { %15446 = vsyncadd [#allocation5], 4294966784 }
  0xd0   :  { %15447 = dma.done.wait [#allocation8], 131328  }
  0xd1   :  { %15448 = vsyncadd [#allocation8], 4294835968 }
  0xd2   :  { %15449 = dma.done.wait [#allocation11], 256  }
  0xd3   :  { %15450 = vsyncadd [#allocation11], 4294967040 }
  0xd4   :  { %15451 = dma.done.wait [#allocation14], 32896  }
  0xd5   :  { %15452 = vsyncadd [#allocation14], 4294934400 }
  0xd6   :  { %15453 = dma.done.wait [#allocation17], 128  }
  0xd7   :  { %15454 = vsyncadd [#allocation17], 4294967168 }
  0xd8   :  { %15455 = dma.done.wait [#allocation20], 8256  }
  0xd9   :  { %15456 = vsyncadd [#allocation20], 4294959040 }
  0xda   :  { %15457 = dma.done.wait [#allocation23], 64  }
  0xdb   :  { %15458 = vsyncadd [#allocation23], 4294967232 }
  0xdc   :  { %15459 = dma.done.wait [#allocation26], 2080  }
  0xdd   :  { %15460 = vsyncadd [#allocation26], 4294965216 }
  0xde   :  { %15461 = dma.done.wait [#allocation29], 16  }
  0xdf   :  { %15462 = vsyncadd [#allocation29], 4294967280  ;;  %v395_v0 = vld [vmem:[#allocation2 + $0x380] sm:$0xff]  ;;  %v396_v2 = vld [vmem:[#allocation2 + $0x388] sm:$0xff]  ;;  %vm1528_vm0 = vcmask 523264   ;;  %s17059_s24 = sld [smem:[#allocation69_spill]] }
  0xe0   :  { %v403_v1 = vld [vmem:[#allocation2 + $0x3c0] sm:$0xff]  ;;  %v404_v4 = vld [vmem:[#allocation2 + $0x3c8] sm:$0xff] }
  0xe1   :  { %v13067_v3 = vcombine.high %v395_v0, %v403_v1  ;;  %v13066_v5 = vcombine.low %v395_v0, %v403_v1  ;;  %v379_v6 = vld [vmem:[#allocation2 + $0x300] sm:$0xff]  ;;  %v13069_v8 = vcombine.high %v396_v2, %v404_v4  ;;  %v13068_v9 = vcombine.low %v396_v2, %v404_v4  ;;  %v380_v11 = vld [vmem:[#allocation2 + $0x308] sm:$0xff] }
  0xe2   :  { %v387_v7 = vld [vmem:[#allocation2 + $0x340] sm:$0xff]  ;;  %v388_v12 = vld [vmem:[#allocation2 + $0x348] sm:$0xff] }
  0xe3   :  { %v13051_v10 = vcombine.high %v379_v6, %v387_v7  ;;  %v363_v13 = vld [vmem:[#allocation2 + $0x280] sm:$0xff]  ;;  %1532 = vmatprep.subr.bf16.mxu0 %v13067_v3  ;;  %v13053_v14 = vcombine.high %v380_v11, %v388_v12  ;;  %v364_v16 = vld [vmem:[#allocation2 + $0x288] sm:$0xff]  ;;  %1575 = vmatprep.subr.bf16.mxu1 %v13069_v8  ;;  %v13050_v18 = vcombine.low %v379_v6, %v387_v7 }
  0xe4   :  { %v371_v15 = vld [vmem:[#allocation2 + $0x2c0] sm:$0xff]  ;;  %v372_v17 = vld [vmem:[#allocation2 + $0x2c8] sm:$0xff]  ;;  %1533 = vmatpush1.bf16.msra.mxu0 %v13066_v5  ;;  %1576 = vmatpush1.bf16.msra.mxu1 %v13068_v9  ;;  %v13052_v19 = vcombine.low %v380_v11, %v388_v12 }
  0xe5   :  { %1534 = vmatprep.subr.bf16.mxu0 %v13051_v10  ;;  %v13035_v20 = vcombine.high %v363_v13, %v371_v15  ;;  %1577 = vmatprep.subr.bf16.mxu1 %v13053_v14  ;;  %v13037_v21 = vcombine.high %v364_v16, %v372_v17  ;;  %v347_v22 = vld [vmem:[#allocation2 + $0x200] sm:$0xff]  ;;  %v348_v24 = vld [vmem:[#allocation2 + $0x208] sm:$0xff]  ;;  %v13034_v26 = vcombine.low %v363_v13, %v371_v15 }
  0xe6   :  { %v355_v23 = vld [vmem:[#allocation2 + $0x240] sm:$0xff]  ;;  %v356_v25 = vld [vmem:[#allocation2 + $0x248] sm:$0xff]  ;;  %v13036_v27 = vcombine.low %v364_v16, %v372_v17 }
  0xe7   :  { %v13019_v28 = vcombine.high %v347_v22, %v355_v23  ;;  %v13021_v29 = vcombine.high %v348_v24, %v356_v25  ;;  %v331_v30 = vld [vmem:[#allocation2 + $0x180] sm:$0xff]  ;;  %v332_v32 = vld [vmem:[#allocation2 + $0x188] sm:$0xff]  ;;  %v13018_v34 = vcombine.low %v347_v22, %v355_v23  ;;  %v13020_v35 = vcombine.low %v348_v24, %v356_v25 }
  0xe8   :  { %1535 = vmatpush1.bf16.msra.mxu0 %v13050_v18  ;;  %1578 = vmatpush1.bf16.msra.mxu1 %v13052_v19  ;;  %v339_v31 = vld [vmem:[#allocation2 + $0x1c0] sm:$0xff]  ;;  %v340_v33 = vld [vmem:[#allocation2 + $0x1c8] sm:$0xff] }
  0xe9   :  { %1536 = vmatprep.subr.bf16.mxu0 %v13035_v20  ;;  %1579 = vmatprep.subr.bf16.mxu1 %v13037_v21  ;;  %v13003_v36 = vcombine.high %v331_v30, %v339_v31  ;;  %v13005_v37 = vcombine.high %v332_v32, %v340_v33  ;;  %v315_v38 = vld [vmem:[#allocation2 + $0x100] sm:$0xff]  ;;  %v316_v40 = vld [vmem:[#allocation2 + $0x108] sm:$0xff]  ;;  %v13002_v42 = vcombine.low %v331_v30, %v339_v31  ;;  %v397_v31 = vld [vmem:[#allocation2 + $0x390] sm:$0xff] }
  0xea   :  { %v323_v39 = vld [vmem:[#allocation2 + $0x140] sm:$0xff]  ;;  %v324_v41 = vld [vmem:[#allocation2 + $0x148] sm:$0xff]  ;;  %v13004_v44 = vcombine.low %v332_v32, %v340_v33  ;;  %v405_v32 = vld [vmem:[#allocation2 + $0x3d0] sm:$0xff] }
  0xeb   :  { %v15650_v43 = vld [vmem:[%s17059_s24 + $0x4] ss:$8 sps:$4 sm:$0xff]   ;;  %v12987_v45 = vcombine.high %v315_v38, %v323_v39  ;;  %v12989_v46 = vcombine.high %v316_v40, %v324_v41  ;;  %v12986_v51 = vcombine.low %v315_v38, %v323_v39  ;;  %v12988_v52 = vcombine.low %v316_v40, %v324_v41  ;;  %v398_v33 = vld [vmem:[#allocation2 + $0x398] sm:$0xff]  ;;  %v381_v39 = vld [vmem:[#allocation2 + $0x310] sm:$0xff] }
  0xec   :  { %1537 = vmatpush1.bf16.msra.mxu0 %v13034_v26  ;;  %1580 = vmatpush1.bf16.msra.mxu1 %v13036_v27  ;;  %v299_v47 = vld [vmem:[#allocation2 + $0x80] sm:$0xff]  ;;  %v300_v49 = vld [vmem:[#allocation2 + $0x88] sm:$0xff]  ;;  %v389_v40 = vld [vmem:[#allocation2 + $0x350] sm:$0xff] }
  0xed   :  { %1538 = vmatprep.subr.bf16.mxu0 %v13019_v28  ;;  %1581 = vmatprep.subr.bf16.mxu1 %v13021_v29  ;;  %v307_v48 = vld [vmem:[#allocation2 + $0xc0] sm:$0xff]  ;;  %v308_v50 = vld [vmem:[#allocation2 + $0xc8] sm:$0xff] }
  0xee   :  { %13146 = vmatprep.mubr.msk.bf16.mxu0 %vm1528_vm0, %v15650_v43  ;;  %13147 = vmatprep.mubr.msk.bf16.mxu1 %vm1528_vm0, %v15650_v43  ;;  %v12971_v53 = vcombine.high %v299_v47, %v307_v48  ;;  %v12973_v54 = vcombine.high %v300_v49, %v308_v50  ;;  %v283_v55 = vld [vmem:[#allocation2] sm:$0xff]  ;;  %v284_v57 = vld [vmem:[#allocation2 + $0x8] sm:$0xff]  ;;  %v12970_v59 = vcombine.low %v299_v47, %v307_v48 }
  0xef   :  { %v291_v56 = vld [vmem:[#allocation2 + $0x40] sm:$0xff]  ;;  %v292_v58 = vld [vmem:[#allocation2 + $0x48] sm:$0xff]  ;;  %v12972_v60 = vcombine.low %v300_v49, %v308_v50  ;;  %v13055_v47 = vcombine.high %v381_v39, %v389_v40  ;;  %v365_v49 = vld [vmem:[#allocation2 + $0x290] sm:$0xff] }
  0xf0   :  { %1539 = vmatpush1.bf16.msra.mxu0 %v13018_v34  ;;  %1582 = vmatpush1.bf16.msra.mxu1 %v13020_v35  ;;  %v12955_v61 = vcombine.high %v283_v55, %v291_v56  ;;  %v12957_v62 = vcombine.high %v284_v57, %v292_v58  ;;  %v459_v63 = vld [vmem:[#allocation2 + $0x580] sm:$0xff]  ;;  %v460_v1 = vld [vmem:[#allocation2 + $0x588] sm:$0xff]  ;;  %v12954_v3 = vcombine.low %v283_v55, %v291_v56  ;;  %v406_v34 = vld [vmem:[#allocation2 + $0x3d8] sm:$0xff] }
  0xf1   :  { %1540 = vmatprep.subr.bf16.mxu0 %v13003_v36  ;;  %1583 = vmatprep.subr.bf16.mxu1 %v13005_v37  ;;  %v467_v0 = vld [vmem:[#allocation2 + $0x5c0] sm:$0xff]  ;;  %v468_v2 = vld [vmem:[#allocation2 + $0x5c8] sm:$0xff]  ;;  %v12956_v4 = vcombine.low %v284_v57, %v292_v58  ;;  %v13071_v37 = vcombine.high %v397_v31, %v405_v32  ;;  %v13073_v38 = vcombine.high %v398_v33, %v406_v34  ;;  %v373_v50 = vld [vmem:[#allocation2 + $0x2d0] sm:$0xff] }
  0xf2   :  { %v13131_v5 = vcombine.high %v459_v63, %v467_v0  ;;  %v13133_v6 = vcombine.high %v460_v1, %v468_v2  ;;  %v443_v7 = vld [vmem:[#allocation2 + $0x500] sm:$0xff]  ;;  %v444_v9 = vld [vmem:[#allocation2 + $0x508] sm:$0xff]  ;;  %v13130_v11 = vcombine.low %v459_v63, %v467_v0  ;;  %v13132_v12 = vcombine.low %v460_v1, %v468_v2  ;;  %v349_v57 = vld [vmem:[#allocation2 + $0x210] sm:$0xff] }
  0xf3   :  { %v451_v8 = vld [vmem:[#allocation2 + $0x540] sm:$0xff]  ;;  %v452_v10 = vld [vmem:[#allocation2 + $0x548] sm:$0xff]  ;;  %v13039_v55 = vcombine.high %v365_v49, %v373_v50  ;;  %v357_v58 = vld [vmem:[#allocation2 + $0x250] sm:$0xff] }
  0xf4   :  { %1541 = vmatpush1.bf16.msra.mxu0 %v13002_v42  ;;  %1584 = vmatpush1.bf16.msra.mxu1 %v13004_v44  ;;  %v13115_v13 = vcombine.high %v443_v7, %v451_v8  ;;  %v13117_v14 = vcombine.high %v444_v9, %v452_v10  ;;  %v427_v15 = vld [vmem:[#allocation2 + $0x480] sm:$0xff]  ;;  %v428_v17 = vld [vmem:[#allocation2 + $0x488] sm:$0xff]  ;;  %v13114_v19 = vcombine.low %v443_v7, %v451_v8  ;;  %v382_v42 = vld [vmem:[#allocation2 + $0x318] sm:$0xff] }
  0xf5   :  { %1542 = vmatprep.subr.bf16.mxu0 %v12987_v45  ;;  %1585 = vmatprep.subr.bf16.mxu1 %v12989_v46  ;;  %v435_v16 = vld [vmem:[#allocation2 + $0x4c0] sm:$0xff]  ;;  %v436_v18 = vld [vmem:[#allocation2 + $0x4c8] sm:$0xff]  ;;  %v13116_v20 = vcombine.low %v444_v9, %v452_v10  ;;  %v390_v44 = vld [vmem:[#allocation2 + $0x358] sm:$0xff]  ;;  %v13070_v45 = vcombine.low %v397_v31, %v405_v32  ;;  %v13072_v46 = vcombine.low %v398_v33, %v406_v34 }
  0xf6   :  { %v13099_v21 = vcombine.high %v427_v15, %v435_v16  ;;  %v13101_v22 = vcombine.high %v428_v17, %v436_v18  ;;  %v411_v23 = vld [vmem:[#allocation2 + $0x400] sm:$0xff]  ;;  %v412_v25 = vld [vmem:[#allocation2 + $0x408] sm:$0xff]  ;;  %v13098_v27 = vcombine.low %v427_v15, %v435_v16  ;;  %v13100_v28 = vcombine.low %v428_v17, %v436_v18  ;;  %v333_v1 = vld [vmem:[#allocation2 + $0x190] sm:$0xff] }
  0xf7   :  { %v419_v24 = vld [vmem:[#allocation2 + $0x440] sm:$0xff]  ;;  %v420_v26 = vld [vmem:[#allocation2 + $0x448] sm:$0xff]  ;;  %v13057_v48 = vcombine.high %v382_v42, %v390_v44  ;;  %v13023_v63 = vcombine.high %v349_v57, %v357_v58  ;;  %v341_v2 = vld [vmem:[#allocation2 + $0x1d0] sm:$0xff] }
  0xf8   :  { %1543 = vmatpush1.bf16.msra.mxu0 %v12986_v51  ;;  %1586 = vmatpush1.bf16.msra.mxu1 %v12988_v52  ;;  %v13083_v29 = vcombine.high %v411_v23, %v419_v24  ;;  %v13085_v30 = vcombine.high %v412_v25, %v420_v26  ;;  %v13082_v35 = vcombine.low %v411_v23, %v419_v24  ;;  %v15659_v41 = vld [vmem:[%s17059_s24] ss:$8 sps:$4 sm:$0xff]   ;;  %v366_v51 = vld [vmem:[#allocation2 + $0x298] sm:$0xff]  ;;  %v317_v9 = vld [vmem:[#allocation2 + $0x110] sm:$0xff] }
  0xf9   :  { %1544 = vmatprep.subr.bf16.mxu0 %v12971_v53  ;;  %1587 = vmatprep.subr.bf16.mxu1 %v12973_v54  ;;  %v13084_v36 = vcombine.low %v412_v25, %v420_v26  ;;  %v374_v52 = vld [vmem:[#allocation2 + $0x2d8] sm:$0xff]  ;;  %v13054_v53 = vcombine.low %v381_v39, %v389_v40  ;;  %v13056_v54 = vcombine.low %v382_v42, %v390_v44  ;;  %v325_v10 = vld [vmem:[#allocation2 + $0x150] sm:$0xff] }
  0xfa   :  { %v13041_v56 = vcombine.high %v366_v51, %v374_v52  ;;  %v13007_v7 = vcombine.high %v333_v1, %v341_v2  ;;  %v309_v15 = vld [vmem:[#allocation2 + $0xd0] sm:$0xff]  ;;  %v12991_v17 = vcombine.high %v317_v9, %v325_v10  ;;  %v302_v18 = vld [vmem:[#allocation2 + $0x98] sm:$0xff] }
  0xfb   :  { %v293_v23 = vld [vmem:[#allocation2 + $0x50] sm:$0xff]  ;;  %v286_v26 = vld [vmem:[#allocation2 + $0x18] sm:$0xff] }
  0xfc   :  { %1545 = vmatpush1.bf16.msra.mxu0 %v12970_v59  ;;  %1588 = vmatpush1.bf16.msra.mxu1 %v12972_v60  ;;  %v350_v59 = vld [vmem:[#allocation2 + $0x218] sm:$0xff]  ;;  %v469_v31 = vld [vmem:[#allocation2 + $0x5d0] sm:$0xff] }
  0xfd   :  { %1546 = vmatprep.subr.bf16.mxu0 %v12955_v61  ;;  %1589 = vmatprep.subr.bf16.mxu1 %v12957_v62  ;;  %v358_v60 = vld [vmem:[#allocation2 + $0x258] sm:$0xff]  ;;  %v13038_v61 = vcombine.low %v365_v49, %v373_v50  ;;  %v13040_v62 = vcombine.low %v366_v51, %v374_v52  ;;  %v453_v39 = vld [vmem:[#allocation2 + $0x550] sm:$0xff] }
  0xfe   :  { %v13025_v0 = vcombine.high %v350_v59, %v358_v60  ;;  %v462_v34 = vld [vmem:[#allocation2 + $0x598] sm:$0xff]  ;;  %v437_v49 = vld [vmem:[#allocation2 + $0x4d0] sm:$0xff] }
  0xff   :  { %v446_v44 = vld [vmem:[#allocation2 + $0x518] sm:$0xff] }
 0x100   :  { %1547 = vmatpush1.bf16.msra.mxu0 %v12954_v3  ;;  %1590 = vmatpush1.bf16.msra.mxu1 %v12956_v4  ;;  %v334_v3 = vld [vmem:[#allocation2 + $0x198] sm:$0xff] }
 0x101   :  { %1556 = vmatprep.subr.bf16.mxu0 %v13131_v5  ;;  %1599 = vmatprep.subr.bf16.mxu1 %v13133_v6  ;;  %v342_v4 = vld [vmem:[#allocation2 + $0x1d8] sm:$0xff]  ;;  %v13022_v5 = vcombine.low %v349_v57, %v357_v58  ;;  %v13024_v6 = vcombine.low %v350_v59, %v358_v60  ;;  %v421_v57 = vld [vmem:[#allocation2 + $0x450] sm:$0xff] }
 0x102   :  { %v13009_v8 = vcombine.high %v334_v3, %v342_v4  ;;  %v13008_v16 = vcombine.low %v334_v3, %v342_v4  ;;  %v430_v52 = vld [vmem:[#allocation2 + $0x498] sm:$0xff]  ;;  %v400_v4 = vld [vmem:[#allocation2 + $0x3a8] sm:$0xff] }
 0x103   :  { %v414_v60 = vld [vmem:[#allocation2 + $0x418] sm:$0xff] }
 0x104   :  { %1557 = vmatpush2.bf16.msra.mxu0 %v13130_v11  ;;  %1600 = vmatpush2.bf16.msra.mxu1 %v13132_v12  ;;  %v318_v11 = vld [vmem:[#allocation2 + $0x118] sm:$0xff] }
 0x105   :  { %1558 = vmatprep.subr.bf16.mxu0 %v13115_v13  ;;  %1601 = vmatprep.subr.bf16.mxu1 %v13117_v14  ;;  %v326_v12 = vld [vmem:[#allocation2 + $0x158] sm:$0xff]  ;;  %v13006_v13 = vcombine.low %v333_v1, %v341_v2  ;;  %v301_v14 = vld [vmem:[#allocation2 + $0x90] sm:$0xff]  ;;  %v407_v1 = vld [vmem:[#allocation2 + $0x3e0] sm:$0xff] }
 0x106   :  { %v12992_v24 = vcombine.low %v318_v11, %v326_v12  ;;  %v12975_v25 = vcombine.high %v301_v14, %v309_v15 }
 0x108   :  { %1559 = vmatpush2.bf16.msra.mxu0 %v13114_v19  ;;  %1602 = vmatpush2.bf16.msra.mxu1 %v13116_v20  ;;  %v310_v19 = vld [vmem:[#allocation2 + $0xd8] sm:$0xff]  ;;  %v12993_v20 = vcombine.high %v318_v11, %v326_v12  ;;  %v384_v12 = vld [vmem:[#allocation2 + $0x328] sm:$0xff] }
 0x109   :  { %1560 = vmatprep.subr.bf16.mxu0 %v13099_v21  ;;  %1603 = vmatprep.subr.bf16.mxu1 %v13101_v22  ;;  %v12990_v21 = vcombine.low %v317_v9, %v325_v10  ;;  %v285_v22 = vld [vmem:[#allocation2 + $0x10] sm:$0xff]  ;;  %v12976_v32 = vcombine.low %v302_v18, %v310_v19  ;;  %v391_v9 = vld [vmem:[#allocation2 + $0x360] sm:$0xff] }
 0x10a   :  { %v12959_v33 = vcombine.high %v285_v22, %v293_v23 }
 0x10c   :  { %1561 = vmatpush2.bf16.msra.mxu0 %v13098_v27  ;;  %1604 = vmatpush2.bf16.msra.mxu1 %v13100_v28  ;;  %v294_v27 = vld [vmem:[#allocation2 + $0x58] sm:$0xff]  ;;  %v12977_v28 = vcombine.high %v302_v18, %v310_v19 }
 0x10d   :  { %1562 = vmatprep.subr.bf16.mxu0 %v13083_v29  ;;  %1605 = vmatprep.subr.bf16.mxu1 %v13085_v30  ;;  %v12974_v29 = vcombine.low %v301_v14, %v309_v15  ;;  %v461_v30 = vld [vmem:[#allocation2 + $0x590] sm:$0xff]  ;;  %v12960_v40 = vcombine.low %v286_v26, %v294_v27 }
 0x10e   :  { %v13135_v42 = vcombine.high %v461_v30, %v469_v31 }
 0x110   :  { %1563 = vmatpush2.bf16.msra.mxu0 %v13082_v35  ;;  %1606 = vmatpush2.bf16.msra.mxu1 %v13084_v36  ;;  %v470_v35 = vld [vmem:[#allocation2 + $0x5d8] sm:$0xff]  ;;  %v12961_v36 = vcombine.high %v286_v26, %v294_v27 }
 0x111   :  { %1618 = vmatprep.subr.bf16.mxu0 %v13071_v37  ;;  %1661 = vmatprep.subr.bf16.mxu1 %v13073_v38  ;;  %v12958_v37 = vcombine.low %v285_v22, %v293_v23  ;;  %v445_v38 = vld [vmem:[#allocation2 + $0x510] sm:$0xff]  ;;  %v13136_v50 = vcombine.low %v462_v34, %v470_v35 }
 0x112   :  { %v13119_v51 = vcombine.high %v445_v38, %v453_v39 }
 0x113   :  { %1565 = vmatmul.mubr.bf16.vlgmr.msra.gmra.mxu0 %v15659_v41  ;;  %1608 = vmatmul.mubr.bf16.vlgmr.msra.gmra.mxu1 %v15659_v41 }
 0x114   :  { %1619 = vmatpush1.bf16.msra.mxu0 %v13070_v45  ;;  %1662 = vmatpush1.bf16.msra.mxu1 %v13072_v46  ;;  %v454_v45 = vld [vmem:[#allocation2 + $0x558] sm:$0xff]  ;;  %v13137_v46 = vcombine.high %v462_v34, %v470_v35  ;;  %v336_v35 = vld [vmem:[#allocation2 + $0x1a8] sm:$0xff] }
 0x115   :  { %1620 = vmatprep.subr.bf16.mxu0 %v13055_v47  ;;  %1663 = vmatprep.subr.bf16.mxu1 %v13057_v48  ;;  %v13134_v47 = vcombine.low %v461_v30, %v469_v31  ;;  %v429_v48 = vld [vmem:[#allocation2 + $0x490] sm:$0xff]  ;;  %v13120_v58 = vcombine.low %v446_v44, %v454_v45  ;;  %v335_v31 = vld [vmem:[#allocation2 + $0x1a0] sm:$0xff] }
 0x116   :  { %13148 = vmatprep.mubr.msk.bf16.mxu0 %vm1528_vm0, %v15650_v43  ;;  %13149 = vmatprep.mubr.msk.bf16.mxu1 %vm1528_vm0, %v15650_v43  ;;  %v13103_v59 = vcombine.high %v429_v48, %v437_v49 }
 0x118   :  { %1621 = vmatpush1.bf16.msra.mxu0 %v13054_v53  ;;  %1664 = vmatpush1.bf16.msra.mxu1 %v13056_v54  ;;  %v438_v53 = vld [vmem:[#allocation2 + $0x4d8] sm:$0xff]  ;;  %v13121_v54 = vcombine.high %v446_v44, %v454_v45  ;;  %v320_v44 = vld [vmem:[#allocation2 + $0x128] sm:$0xff] }
 0x119   :  { %1622 = vmatprep.subr.bf16.mxu0 %v13039_v55  ;;  %1665 = vmatprep.subr.bf16.mxu1 %v13041_v56  ;;  %v13118_v55 = vcombine.low %v445_v38, %v453_v39  ;;  %v413_v56 = vld [vmem:[#allocation2 + $0x410] sm:$0xff]  ;;  %v13104_v2 = vcombine.low %v430_v52, %v438_v53  ;;  %v319_v39 = vld [vmem:[#allocation2 + $0x120] sm:$0xff]  ;;  %v328_v45 = vld [vmem:[#allocation2 + $0x168] sm:$0xff] }
 0x11a   :  { %v13087_v3 = vcombine.high %v413_v56, %v421_v57 }
 0x11c   :  { %1623 = vmatpush1.bf16.msra.mxu0 %v13038_v61  ;;  %1666 = vmatpush1.bf16.msra.mxu1 %v13040_v62  ;;  %v422_v61 = vld [vmem:[#allocation2 + $0x458] sm:$0xff]  ;;  %v13105_v62 = vcombine.high %v430_v52, %v438_v53  ;;  %v304_v52 = vld [vmem:[#allocation2 + $0xa8] sm:$0xff] }
 0x11d   :  { %1624 = vmatprep.subr.bf16.mxu0 %v13023_v63  ;;  %1667 = vmatprep.subr.bf16.mxu1 %v13025_v0  ;;  %v13102_v63 = vcombine.low %v429_v48, %v437_v49  ;;  %v399_v0 = vld [vmem:[#allocation2 + $0x3a0] sm:$0xff]  ;;  %v13088_v10 = vcombine.low %v414_v60, %v422_v61  ;;  %v312_v53 = vld [vmem:[#allocation2 + $0xe8] sm:$0xff] }
 0x11e   :  { %v13075_v11 = vcombine.high %v399_v0, %v407_v1  ;;  %v13074_v15 = vcombine.low %v399_v0, %v407_v1  ;;  %v303_v48 = vld [vmem:[#allocation2 + $0xa0] sm:$0xff] }
 0x11f   :  { %v311_v49 = vld [vmem:[#allocation2 + $0xe0] sm:$0xff] }
 0x120   :  { %1625 = vmatpush1.bf16.msra.mxu0 %v13022_v5  ;;  %1668 = vmatpush1.bf16.msra.mxu1 %v13024_v6  ;;  %v408_v5 = vld [vmem:[#allocation2 + $0x3e8] sm:$0xff]  ;;  %v13089_v6 = vcombine.high %v414_v60, %v422_v61  ;;  %v463_v0 = vld [vmem:[#allocation2 + $0x5a0] sm:$0xff] }
 0x121   :  { %1626 = vmatprep.subr.bf16.mxu0 %v13007_v7  ;;  %1669 = vmatprep.subr.bf16.mxu1 %v13009_v8  ;;  %v13086_v7 = vcombine.low %v413_v56, %v421_v57  ;;  %v383_v8 = vld [vmem:[#allocation2 + $0x320] sm:$0xff]  ;;  %v13077_v14 = vcombine.high %v400_v4, %v408_v5  ;;  %v13076_v18 = vcombine.low %v400_v4, %v408_v5  ;;  %v288_v60 = vld [vmem:[#allocation2 + $0x28] sm:$0xff] }
 0x122   :  { %v13059_v19 = vcombine.high %v383_v8, %v391_v9  ;;  %v13058_v23 = vcombine.low %v383_v8, %v391_v9  ;;  %v287_v56 = vld [vmem:[#allocation2 + $0x20] sm:$0xff]  ;;  %v296_v61 = vld [vmem:[#allocation2 + $0x68] sm:$0xff] }
 0x123   :  { %v295_v57 = vld [vmem:[#allocation2 + $0x60] sm:$0xff]  ;;  %v464_v4 = vld [vmem:[#allocation2 + $0x5a8] sm:$0xff] }
 0x124   :  { %1627 = vmatpush1.bf16.msra.mxu0 %v13006_v13  ;;  %1670 = vmatpush1.bf16.msra.mxu1 %v13008_v16  ;;  %v392_v13 = vld [vmem:[#allocation2 + $0x368] sm:$0xff]  ;;  %v367_v16 = vld [vmem:[#allocation2 + $0x2a0] sm:$0xff] }
 0x125   :  { %1628 = vmatprep.subr.bf16.mxu0 %v12991_v17  ;;  %1671 = vmatprep.subr.bf16.mxu1 %v12993_v20  ;;  %v375_v17 = vld [vmem:[#allocation2 + $0x2e0] sm:$0xff]  ;;  %v368_v20 = vld [vmem:[#allocation2 + $0x2a8] sm:$0xff]  ;;  %v13061_v22 = vcombine.high %v384_v12, %v392_v13  ;;  %v13060_v26 = vcombine.low %v384_v12, %v392_v13 }
 0x126   :  { %v13043_v27 = vcombine.high %v367_v16, %v375_v17  ;;  %v471_v1 = vld [vmem:[#allocation2 + $0x5e0] sm:$0xff]  ;;  %v472_v5 = vld [vmem:[#allocation2 + $0x5e8] sm:$0xff] }
 0x127   :  { %v447_v8 = vld [vmem:[#allocation2 + $0x520] sm:$0xff]  ;;  %v448_v12 = vld [vmem:[#allocation2 + $0x528] sm:$0xff] }
 0x128   :  { %1629 = vmatpush1.bf16.msra.mxu0 %v12990_v21  ;;  %1672 = vmatpush1.bf16.msra.mxu1 %v12992_v24  ;;  %v376_v21 = vld [vmem:[#allocation2 + $0x2e8] sm:$0xff]  ;;  %v351_v24 = vld [vmem:[#allocation2 + $0x220] sm:$0xff] }
 0x129   :  { %1630 = vmatprep.subr.bf16.mxu0 %v12975_v25  ;;  %1673 = vmatprep.subr.bf16.mxu1 %v12977_v28  ;;  %v359_v25 = vld [vmem:[#allocation2 + $0x260] sm:$0xff]  ;;  %v352_v28 = vld [vmem:[#allocation2 + $0x228] sm:$0xff]  ;;  %v13045_v30 = vcombine.high %v368_v20, %v376_v21 }
 0x12a   :  { %v13027_v34 = vcombine.high %v351_v24, %v359_v25  ;;  %v13026_v38 = vcombine.low %v351_v24, %v359_v25  ;;  %v455_v9 = vld [vmem:[#allocation2 + $0x560] sm:$0xff]  ;;  %v456_v13 = vld [vmem:[#allocation2 + $0x568] sm:$0xff] }
 0x12b   :  { %v415_v24 = vld [vmem:[#allocation2 + $0x420] sm:$0xff] }
 0x12c   :  { %1631 = vmatpush1.bf16.msra.mxu0 %v12974_v29  ;;  %1674 = vmatpush1.bf16.msra.mxu1 %v12976_v32  ;;  %v360_v29 = vld [vmem:[#allocation2 + $0x268] sm:$0xff]  ;;  %v343_v32 = vld [vmem:[#allocation2 + $0x1e0] sm:$0xff] }
 0x12d   :  { %1632 = vmatprep.subr.bf16.mxu0 %v12959_v33  ;;  %1675 = vmatprep.subr.bf16.mxu1 %v12961_v36  ;;  %v13044_v33 = vcombine.low %v368_v20, %v376_v21  ;;  %v344_v36 = vld [vmem:[#allocation2 + $0x1e8] sm:$0xff]  ;;  %v423_v25 = vld [vmem:[#allocation2 + $0x460] sm:$0xff] }
 0x12e   :  { %v432_v20 = vld [vmem:[#allocation2 + $0x4a8] sm:$0xff] }
 0x12f   :  { %v440_v21 = vld [vmem:[#allocation2 + $0x4e8] sm:$0xff] }
 0x130   :  { %1633 = vmatpush1.bf16.msra.mxu0 %v12958_v37  ;;  %1676 = vmatpush1.bf16.msra.mxu1 %v12960_v40  ;;  %v13029_v37 = vcombine.high %v352_v28, %v360_v29  ;;  %v327_v40 = vld [vmem:[#allocation2 + $0x160] sm:$0xff] }
 0x131   :  { %1642 = vmatprep.subr.bf16.mxu0 %v13135_v42  ;;  %1685 = vmatprep.subr.bf16.mxu1 %v13137_v46  ;;  %v13028_v42 = vcombine.low %v352_v28, %v360_v29  ;;  %v13013_v46 = vcombine.high %v336_v35, %v344_v36  ;;  %v416_v28 = vld [vmem:[#allocation2 + $0x428] sm:$0xff] }
 0x132   :  { %v424_v29 = vld [vmem:[#allocation2 + $0x468] sm:$0xff] }
 0x134   :  { %1643 = vmatpush2.bf16.msra.mxu0 %v13134_v47  ;;  %1686 = vmatpush2.bf16.msra.mxu1 %v13136_v50  ;;  %v13010_v47 = vcombine.low %v335_v31, %v343_v32  ;;  %v13012_v50 = vcombine.low %v336_v35, %v344_v36  ;;  %v402_v35 = vld [vmem:[#allocation2 + $0x3b8] sm:$0xff] }
 0x135   :  { %1644 = vmatprep.subr.bf16.mxu0 %v13119_v51  ;;  %1687 = vmatprep.subr.bf16.mxu1 %v13121_v54  ;;  %v12995_v51 = vcombine.high %v319_v39, %v327_v40  ;;  %v12997_v54 = vcombine.high %v320_v44, %v328_v45  ;;  %v410_v36 = vld [vmem:[#allocation2 + $0x3f8] sm:$0xff] }
 0x138   :  { %1645 = vmatpush2.bf16.msra.mxu0 %v13118_v55  ;;  %1688 = vmatpush2.bf16.msra.mxu1 %v13120_v58  ;;  %v12994_v55 = vcombine.low %v319_v39, %v327_v40  ;;  %v12996_v58 = vcombine.low %v320_v44, %v328_v45  ;;  %v385_v39 = vld [vmem:[#allocation2 + $0x330] sm:$0xff]  ;;  %v386_v44 = vld [vmem:[#allocation2 + $0x338] sm:$0xff] }
 0x139   :  { %1646 = vmatprep.subr.bf16.mxu0 %v13103_v59  ;;  %1689 = vmatprep.subr.bf16.mxu1 %v13105_v62  ;;  %v12979_v59 = vcombine.high %v303_v48, %v311_v49  ;;  %v12981_v62 = vcombine.high %v304_v52, %v312_v53  ;;  %v393_v40 = vld [vmem:[#allocation2 + $0x370] sm:$0xff]  ;;  %v394_v45 = vld [vmem:[#allocation2 + $0x378] sm:$0xff] }
 0x13c   :  { %1647 = vmatpush2.bf16.msra.mxu0 %v13102_v63  ;;  %1690 = vmatpush2.bf16.msra.mxu1 %v13104_v2  ;;  %v12978_v63 = vcombine.low %v303_v48, %v311_v49  ;;  %v12980_v2 = vcombine.low %v304_v52, %v312_v53  ;;  %v369_v48 = vld [vmem:[#allocation2 + $0x2b0] sm:$0xff]  ;;  %v370_v52 = vld [vmem:[#allocation2 + $0x2b8] sm:$0xff] }
 0x13d   :  { %1648 = vmatprep.subr.bf16.mxu0 %v13087_v3  ;;  %1691 = vmatprep.subr.bf16.mxu1 %v13089_v6  ;;  %v12963_v3 = vcombine.high %v287_v56, %v295_v57  ;;  %v12965_v6 = vcombine.high %v288_v60, %v296_v61  ;;  %v377_v49 = vld [vmem:[#allocation2 + $0x2f0] sm:$0xff]  ;;  %v378_v53 = vld [vmem:[#allocation2 + $0x2f8] sm:$0xff] }
 0x140   :  { %1649 = vmatpush2.bf16.msra.mxu0 %v13086_v7  ;;  %1692 = vmatpush2.bf16.msra.mxu1 %v13088_v10  ;;  %v12962_v7 = vcombine.low %v287_v56, %v295_v57  ;;  %v12964_v10 = vcombine.low %v288_v60, %v296_v61  ;;  %v13062_v56 = vcombine.low %v385_v39, %v393_v40  ;;  %v353_v57 = vld [vmem:[#allocation2 + $0x230] sm:$0xff]  ;;  %v354_v61 = vld [vmem:[#allocation2 + $0x238] sm:$0xff] }
 0x141   :  { %1704 = vmatprep.subr.bf16.mxu0 %v13075_v11  ;;  %1747 = vmatprep.subr.bf16.mxu1 %v13077_v14  ;;  %v13139_v11 = vcombine.high %v463_v0, %v471_v1  ;;  %v13141_v14 = vcombine.high %v464_v4, %v472_v5  ;;  %v13047_v60 = vcombine.high %v369_v48, %v377_v49 }
 0x143   :  { %1651 = vmatmul.mubr.bf16.vlgmr.msra.gmra.mxu0 %v15659_v41  ;;  %1694 = vmatmul.mubr.bf16.vlgmr.msra.gmra.mxu1 %v15659_v41  ;;  %v13042_v41 = vcombine.low %v367_v16, %v375_v17  ;;  %v431_v16 = vld [vmem:[#allocation2 + $0x4a0] sm:$0xff] }
 0x144   :  { %1705 = vmatpush1.bf16.msra.mxu0 %v13074_v15  ;;  %1748 = vmatpush1.bf16.msra.mxu1 %v13076_v18  ;;  %v13138_v15 = vcombine.low %v463_v0, %v471_v1  ;;  %v439_v17 = vld [vmem:[#allocation2 + $0x4e0] sm:$0xff]  ;;  %v13140_v18 = vcombine.low %v464_v4, %v472_v5  ;;  %v13046_v1 = vcombine.low %v369_v48, %v377_v49 }
 0x145   :  { %1706 = vmatprep.subr.bf16.mxu0 %v13059_v19  ;;  %1749 = vmatprep.subr.bf16.mxu1 %v13061_v22  ;;  %v13123_v19 = vcombine.high %v447_v8, %v455_v9  ;;  %v13125_v22 = vcombine.high %v448_v12, %v456_v13  ;;  %v15080_v0 = vld [vmem:[%s17059_s24 + $0x4] ss:$8 sps:$4 sm:$0xff]   ;;  %v13048_v4 = vcombine.low %v370_v52, %v378_v53 }
 0x146   :  { %13150 = vmatprep.mubr.msk.bf16.mxu0 %vm1528_vm0, %v15650_v43  ;;  %13151 = vmatprep.mubr.msk.bf16.mxu1 %vm1528_vm0, %v15650_v43  ;;  %v13011_v43 = vcombine.high %v335_v31, %v343_v32  ;;  %v401_v31 = vld [vmem:[#allocation2 + $0x3b0] sm:$0xff] }
 0x147   :  { %v409_v32 = vld [vmem:[#allocation2 + $0x3f0] sm:$0xff] }
 0x148   :  { %1707 = vmatpush1.bf16.msra.mxu0 %v13058_v23  ;;  %1750 = vmatpush1.bf16.msra.mxu1 %v13060_v26  ;;  %v13122_v23 = vcombine.low %v447_v8, %v455_v9  ;;  %v13124_v26 = vcombine.low %v448_v12, %v456_v13 }
 0x149   :  { %1708 = vmatprep.subr.bf16.mxu0 %v13043_v27  ;;  %1751 = vmatprep.subr.bf16.mxu1 %v13045_v30  ;;  %v13107_v27 = vcombine.high %v431_v16, %v439_v17  ;;  %v13109_v30 = vcombine.high %v432_v20, %v440_v21 }
 0x14c   :  { %1709 = vmatpush1.bf16.msra.mxu0 %v13042_v41  ;;  %1752 = vmatpush1.bf16.msra.mxu1 %v13044_v33  ;;  %v13106_v41 = vcombine.low %v431_v16, %v439_v17  ;;  %v13108_v33 = vcombine.low %v432_v20, %v440_v21 }
 0x14d   :  { %1710 = vmatprep.subr.bf16.mxu0 %v13027_v34  ;;  %1753 = vmatprep.subr.bf16.mxu1 %v13029_v37  ;;  %v13091_v34 = vcombine.high %v415_v24, %v423_v25  ;;  %v13093_v37 = vcombine.high %v416_v28, %v424_v29 }
 0x150   :  { %1711 = vmatpush1.bf16.msra.mxu0 %v13026_v38  ;;  %1754 = vmatpush1.bf16.msra.mxu1 %v13028_v42  ;;  %v13090_v38 = vcombine.low %v415_v24, %v423_v25  ;;  %v13092_v42 = vcombine.low %v416_v28, %v424_v29 }
 0x151   :  { %1712 = vmatprep.subr.bf16.mxu0 %v13011_v43  ;;  %1755 = vmatprep.subr.bf16.mxu1 %v13013_v46  ;;  %v13079_v43 = vcombine.high %v401_v31, %v409_v32  ;;  %v13081_v46 = vcombine.high %v402_v35, %v410_v36 }
 0x154   :  { %1713 = vmatpush1.bf16.msra.mxu0 %v13010_v47  ;;  %1756 = vmatpush1.bf16.msra.mxu1 %v13012_v50  ;;  %v13078_v47 = vcombine.low %v401_v31, %v409_v32  ;;  %v13080_v50 = vcombine.low %v402_v35, %v410_v36 }
 0x155   :  { %1714 = vmatprep.subr.bf16.mxu0 %v12995_v51  ;;  %1757 = vmatprep.subr.bf16.mxu1 %v12997_v54  ;;  %v13063_v51 = vcombine.high %v385_v39, %v393_v40  ;;  %v13065_v54 = vcombine.high %v386_v44, %v394_v45 }
 0x158   :  { %1715 = vmatpush1.bf16.msra.mxu0 %v12994_v55  ;;  %1758 = vmatpush1.bf16.msra.mxu1 %v12996_v58  ;;  %v15676_v55 = vld [vmem:[%s17059_s24] ss:$8 sps:$4 sm:$0xff]   ;;  %v361_v58 = vld [vmem:[#allocation2 + $0x270] sm:$0xff] }
 0x159   :  { %1716 = vmatprep.subr.bf16.mxu0 %v12979_v59  ;;  %1759 = vmatprep.subr.bf16.mxu1 %v12981_v62  ;;  %v13064_v59 = vcombine.low %v386_v44, %v394_v45  ;;  %v362_v62 = vld [vmem:[#allocation2 + $0x278] sm:$0xff]  ;;  %v13031_v5 = vcombine.high %v353_v57, %v361_v58  ;;  %v13030_v9 = vcombine.low %v353_v57, %v361_v58 }
 0x15a   :  { %v13033_v8 = vcombine.high %v354_v61, %v362_v62  ;;  %v13032_v12 = vcombine.low %v354_v61, %v362_v62 }
 0x15c   :  { %1717 = vmatpush1.bf16.msra.mxu0 %v12978_v63  ;;  %1760 = vmatpush1.bf16.msra.mxu1 %v12980_v2  ;;  %v13049_v63 = vcombine.high %v370_v52, %v378_v53  ;;  %v337_v2 = vld [vmem:[#allocation2 + $0x1b0] sm:$0xff] }
 0x15d   :  { %1718 = vmatprep.subr.bf16.mxu0 %v12963_v3  ;;  %1761 = vmatprep.subr.bf16.mxu1 %v12965_v6  ;;  %v345_v3 = vld [vmem:[#allocation2 + $0x1f0] sm:$0xff]  ;;  %v338_v6 = vld [vmem:[#allocation2 + $0x1b8] sm:$0xff] }
 0x15e   :  { %v13015_v13 = vcombine.high %v337_v2, %v345_v3  ;;  %v13014_v17 = vcombine.low %v337_v2, %v345_v3 }
 0x160   :  { %1719 = vmatpush1.bf16.msra.mxu0 %v12962_v7  ;;  %1762 = vmatpush1.bf16.msra.mxu1 %v12964_v10  ;;  %v346_v7 = vld [vmem:[#allocation2 + $0x1f8] sm:$0xff]  ;;  %v321_v10 = vld [vmem:[#allocation2 + $0x130] sm:$0xff] }
 0x161   :  { %1728 = vmatprep.subr.bf16.mxu0 %v13139_v11  ;;  %1771 = vmatprep.subr.bf16.mxu1 %v13141_v14  ;;  %v329_v11 = vld [vmem:[#allocation2 + $0x170] sm:$0xff]  ;;  %v322_v14 = vld [vmem:[#allocation2 + $0x138] sm:$0xff]  ;;  %v13017_v16 = vcombine.high %v338_v6, %v346_v7  ;;  %v13016_v20 = vcombine.low %v338_v6, %v346_v7 }
 0x162   :  { %v12999_v21 = vcombine.high %v321_v10, %v329_v11  ;;  %v12998_v25 = vcombine.low %v321_v10, %v329_v11 }
 0x164   :  { %1729 = vmatpush2.bf16.msra.mxu0 %v13138_v15  ;;  %1772 = vmatpush2.bf16.msra.mxu1 %v13140_v18  ;;  %v330_v15 = vld [vmem:[#allocation2 + $0x178] sm:$0xff]  ;;  %v305_v18 = vld [vmem:[#allocation2 + $0xb0] sm:$0xff] }
 0x165   :  { %1730 = vmatprep.subr.bf16.mxu0 %v13123_v19  ;;  %1773 = vmatprep.subr.bf16.mxu1 %v13125_v22  ;;  %v313_v19 = vld [vmem:[#allocation2 + $0xf0] sm:$0xff]  ;;  %v306_v22 = vld [vmem:[#allocation2 + $0xb8] sm:$0xff]  ;;  %v13001_v24 = vcombine.high %v322_v14, %v330_v15  ;;  %v13000_v28 = vcombine.low %v322_v14, %v330_v15 }
 0x166   :  { %v12983_v29 = vcombine.high %v305_v18, %v313_v19  ;;  %v12982_v32 = vcombine.low %v305_v18, %v313_v19 }
 0x168   :  { %1731 = vmatpush2.bf16.msra.mxu0 %v13122_v23  ;;  %1774 = vmatpush2.bf16.msra.mxu1 %v13124_v26  ;;  %v314_v23 = vld [vmem:[#allocation2 + $0xf8] sm:$0xff]  ;;  %v289_v26 = vld [vmem:[#allocation2 + $0x30] sm:$0xff] }
 0x169   :  { %1732 = vmatprep.subr.bf16.mxu0 %v13107_v27  ;;  %1775 = vmatprep.subr.bf16.mxu1 %v13109_v30  ;;  %v297_v27 = vld [vmem:[#allocation2 + $0x70] sm:$0xff]  ;;  %v290_v30 = vld [vmem:[#allocation2 + $0x38] sm:$0xff]  ;;  %v12985_v31 = vcombine.high %v306_v22, %v314_v23  ;;  %v12984_v35 = vcombine.low %v306_v22, %v314_v23 }
 0x16a   :  { %v12967_v36 = vcombine.high %v289_v26, %v297_v27  ;;  %v12966_v40 = vcombine.low %v289_v26, %v297_v27 }
 0x16c   :  { %1733 = vmatpush2.bf16.msra.mxu0 %v13106_v41  ;;  %1776 = vmatpush2.bf16.msra.mxu1 %v13108_v33  ;;  %v298_v41 = vld [vmem:[#allocation2 + $0x78] sm:$0xff]  ;;  %v465_v33 = vld [vmem:[#allocation2 + $0x5b0] sm:$0xff] }
 0x16d   :  { %1734 = vmatprep.subr.bf16.mxu0 %v13091_v34  ;;  %1777 = vmatprep.subr.bf16.mxu1 %v13093_v37  ;;  %v473_v34 = vld [vmem:[#allocation2 + $0x5f0] sm:$0xff]  ;;  %v466_v37 = vld [vmem:[#allocation2 + $0x5b8] sm:$0xff]  ;;  %v12969_v39 = vcombine.high %v290_v30, %v298_v41  ;;  %v12968_v44 = vcombine.low %v290_v30, %v298_v41 }
 0x16e   :  { %v13143_v45 = vcombine.high %v465_v33, %v473_v34  ;;  %v13142_v49 = vcombine.low %v465_v33, %v473_v34 }
 0x170   :  { %1735 = vmatpush2.bf16.msra.mxu0 %v13090_v38  ;;  %1778 = vmatpush2.bf16.msra.mxu1 %v13092_v42  ;;  %v474_v38 = vld [vmem:[#allocation2 + $0x5f8] sm:$0xff]  ;;  %v449_v42 = vld [vmem:[#allocation2 + $0x530] sm:$0xff] }
 0x171   :  { %1790 = vmatprep.subr.bf16.mxu0 %v13079_v43  ;;  %1833 = vmatprep.subr.bf16.mxu1 %v13081_v46  ;;  %v457_v43 = vld [vmem:[#allocation2 + $0x570] sm:$0xff]  ;;  %v450_v46 = vld [vmem:[#allocation2 + $0x538] sm:$0xff]  ;;  %v13145_v48 = vcombine.high %v466_v37, %v474_v38  ;;  %v13144_v52 = vcombine.low %v466_v37, %v474_v38 }
 0x172   :  { %v13127_v53 = vcombine.high %v449_v42, %v457_v43  ;;  %v13126_v58 = vcombine.low %v449_v42, %v457_v43 }
 0x173   :  { %1737 = vmatmul.mubr.bf16.vlgmr.msra.gmra.mxu0 %v15676_v55  ;;  %1780 = vmatmul.mubr.bf16.vlgmr.msra.gmra.mxu1 %v15676_v55 }
 0x174   :  { %1791 = vmatpush1.bf16.msra.mxu0 %v13078_v47  ;;  %1834 = vmatpush1.bf16.msra.mxu1 %v13080_v50  ;;  %v458_v47 = vld [vmem:[#allocation2 + $0x578] sm:$0xff]  ;;  %v433_v50 = vld [vmem:[#allocation2 + $0x4b0] sm:$0xff] }
 0x175   :  { %1792 = vmatprep.subr.bf16.mxu0 %v13063_v51  ;;  %1835 = vmatprep.subr.bf16.mxu1 %v13065_v54  ;;  %v441_v51 = vld [vmem:[#allocation2 + $0x4f0] sm:$0xff]  ;;  %v434_v54 = vld [vmem:[#allocation2 + $0x4b8] sm:$0xff]  ;;  %v13129_v57 = vcombine.high %v450_v46, %v458_v47  ;;  %v13128_v61 = vcombine.low %v450_v46, %v458_v47 }
 0x176   :  { %13152 = vmatprep.mubr.msk.bf16.mxu0 %vm1528_vm0, %v15080_v0  ;;  %13153 = vmatprep.mubr.msk.bf16.mxu1 %vm1528_vm0, %v15080_v0  ;;  %v13111_v62 = vcombine.high %v433_v50, %v441_v51  ;;  %v418_v0 = vld [vmem:[#allocation2 + $0x438] sm:$0xff]  ;;  %v13110_v2 = vcombine.low %v433_v50, %v441_v51 }
 0x178   :  { %1793 = vmatpush1.bf16.msra.mxu0 %v13062_v56  ;;  %1836 = vmatpush1.bf16.msra.mxu1 %v13064_v59  ;;  %v442_v56 = vld [vmem:[#allocation2 + $0x4f8] sm:$0xff]  ;;  %v417_v59 = vld [vmem:[#allocation2 + $0x430] sm:$0xff] }
 0x179   :  { %1794 = vmatprep.subr.bf16.mxu0 %v13047_v60  ;;  %1837 = vmatprep.subr.bf16.mxu1 %v13049_v63  ;;  %v425_v60 = vld [vmem:[#allocation2 + $0x470] sm:$0xff]  ;;  %v13113_v63 = vcombine.high %v434_v54, %v442_v56  ;;  %v13112_v3 = vcombine.low %v434_v54, %v442_v56 }
 0x17a   :  { %v13094_v6 = vcombine.low %v417_v59, %v425_v60 }
 0x17c   :  { %1795 = vmatpush1.bf16.msra.mxu0 %v13046_v1  ;;  %1838 = vmatpush1.bf16.msra.mxu1 %v13048_v4  ;;  %v426_v1 = vld [vmem:[#allocation2 + $0x478] sm:$0xff]  ;;  %v13095_v4 = vcombine.high %v417_v59, %v425_v60  ;;  %v476_v59 = vld [vmem:[#allocation4 + $0x8] sm:$0xff] }
 0x17d   :  { %1796 = vmatprep.subr.bf16.mxu0 %v13031_v5  ;;  %1839 = vmatprep.subr.bf16.mxu1 %v13033_v8  ;;  %v13097_v5 = vcombine.high %v418_v0, %v426_v1  ;;  %v13096_v7 = vcombine.low %v418_v0, %v426_v1  ;;  %v479_v8 = vlaneseq }
 0x180   :  { %1797 = vmatpush1.bf16.msra.mxu0 %v13030_v9  ;;  %1840 = vmatpush1.bf16.msra.mxu1 %v13032_v12  ;;  %v480_v9 = vshrl.u32 %v479_v8, 7 }
 0x181   :  { %1798 = vmatprep.subr.bf16.mxu0 %v13015_v13  ;;  %1841 = vmatprep.subr.bf16.mxu1 %v13017_v16  ;;  %v475_v13 = vld [vmem:[#allocation4] sm:$0xff] }
 0x182   :  { %v15687_v11 = vsub.s32 0, %v480_v9  ;;  %v15689_v12 = vsub.s32 1, %v480_v9  ;;  %v15692_v16 = vsub.s32 2, %v480_v9  ;;  %v15700_v22 = vsub.s32 3, %v480_v9 }
 0x183   :  { %v15714_v33 = vsub.s32 5, %v480_v9  ;;  %v15721_v38 = vsub.s32 6, %v480_v9 }
 0x184   :  { %1799 = vmatpush1.bf16.msra.mxu0 %v13014_v17  ;;  %1842 = vmatpush1.bf16.msra.mxu1 %v13016_v20  ;;  %17060 = vst [vmem:[#allocation40_spill] sm:$0xff] %v15687_v11  ;;  %17061 = vst [vmem:[#allocation41_spill] sm:$0xff] %v15689_v12  ;;  %v482_v15 = vrot.slane %v475_v13, %v15687_v11  ;;  %v486_v17 = vrot.slane %v475_v13, %v15689_v12 }
 0x185   :  { %1800 = vmatprep.subr.bf16.mxu0 %v12999_v21  ;;  %1843 = vmatprep.subr.bf16.mxu1 %v13001_v24  ;;  %17062 = vst [vmem:[#allocation42_spill] sm:$0xff] %v15692_v16  ;;  %17063 = vst [vmem:[#allocation43_spill] sm:$0xff] %v15700_v22  ;;  %v502_v43 = vrot.slane %v475_v13, %v15714_v33 }
 0x186   :  { %17065 = vst [vmem:[#allocation45_spill] sm:$0xff] %v15714_v33  ;;  %17066 = vst [vmem:[#allocation46_spill] sm:$0xff] %v15721_v38 }
 0x188   :  { %1801 = vmatpush1.bf16.msra.mxu0 %v12998_v25  ;;  %1844 = vmatpush1.bf16.msra.mxu1 %v13000_v28  ;;  %v15702_v25 = vsub.s32 4, %v480_v9 }
 0x189   :  { %1802 = vmatprep.subr.bf16.mxu0 %v12983_v29  ;;  %1845 = vmatprep.subr.bf16.mxu1 %v12985_v31  ;;  %v494_v29 = vrot.slane %v475_v13, %v15700_v22 }
 0x18a   :  { %17064 = vst [vmem:[#allocation44_spill] sm:$0xff] %v15702_v25 }
 0x18c   :  { %1803 = vmatpush1.bf16.msra.mxu0 %v12982_v32  ;;  %1846 = vmatpush1.bf16.msra.mxu1 %v12984_v35  ;;  %v498_v32 = vrot.slane %v475_v13, %v15702_v25 }
 0x18d   :  { %1804 = vmatprep.subr.bf16.mxu0 %v12967_v36  ;;  %1847 = vmatprep.subr.bf16.mxu1 %v12969_v39 }
 0x190   :  { %1805 = vmatpush1.bf16.msra.mxu0 %v12966_v40  ;;  %1848 = vmatpush1.bf16.msra.mxu1 %v12968_v44 }
 0x191   :  { %1814 = vmatprep.subr.bf16.mxu0 %v13143_v45  ;;  %1857 = vmatprep.subr.bf16.mxu1 %v13145_v48  ;;  %v506_v48 = vrot.slane %v475_v13, %v15721_v38 }
 0x194   :  { %1815 = vmatpush2.bf16.msra.mxu0 %v13142_v49  ;;  %1858 = vmatpush2.bf16.msra.mxu1 %v13144_v52  ;;  %v15731_v49 = vsub.s32 7, %v480_v9 }
 0x195   :  { %1816 = vmatprep.subr.bf16.mxu0 %v13127_v53  ;;  %1859 = vmatprep.subr.bf16.mxu1 %v13129_v57 }
 0x196   :  { %17067 = vst [vmem:[#allocation47_spill] sm:$0xff] %v15731_v49 }
 0x198   :  { %1817 = vmatpush2.bf16.msra.mxu0 %v13126_v58  ;;  %1860 = vmatpush2.bf16.msra.mxu1 %v13128_v61  ;;  %v510_v58 = vrot.slane %v475_v13, %v15731_v49 }
 0x199   :  { %1818 = vmatprep.subr.bf16.mxu0 %v13111_v62  ;;  %1861 = vmatprep.subr.bf16.mxu1 %v13113_v63 }
 0x19c   :  { %1819 = vmatpush2.bf16.msra.mxu0 %v13110_v2  ;;  %1862 = vmatpush2.bf16.msra.mxu1 %v13112_v3  ;;  %v514_v2 = vrot.slane %v476_v59, %v15687_v11 }
 0x19d   :  { %1820 = vmatprep.subr.bf16.mxu0 %v13095_v4  ;;  %1863 = vmatprep.subr.bf16.mxu1 %v13097_v5 }
 0x1a0   :  { %1821 = vmatpush2.bf16.msra.mxu0 %v13094_v6  ;;  %1864 = vmatpush2.bf16.msra.mxu1 %v13096_v7 }
 0x1a3   :  { %1823 = vmatmul.mubr.bf16.vlgmr.msra.gmra.mxu0 %v15676_v55  ;;  %1866 = vmatmul.mubr.bf16.vlgmr.msra.gmra.mxu1 %v15676_v55  ;;  %v490_v55 = vrot.slane %v475_v13, %v15692_v16 }
 0x1d3   :  { %v1566_v10 = vpop.f32.mrf.mxu0  ;;  %v1609_v19 = vpop.f32.mrf.mxu1 }
 0x1d4   :  { %v15695_v20 = vadd.f32 %v1566_v10, %v482_v15  ;;  %v15704_v27 = vadd.f32 %v1609_v19, %v490_v55  ;;  %v518_v10 = vrot.slane %v476_v59, %v15689_v12 }
 0x1d5   :  { %v1568_v14 = vpop.f32.mrf.mxu0  ;;  %v1611_v24 = vpop.f32.mrf.mxu1 }
 0x1d6   :  { %v15698_v21 = vadd.f32 %v1568_v14, %v486_v17  ;;  %v15716_v35 = vadd.f32 %v1611_v24, %v494_v29 }
 0x1d7   :  { %v1570_v18 = vpop.f32.mrf.mxu0  ;;  %v1613_v31 = vpop.f32.mrf.mxu1 }
 0x1d8   :  { %v1876_v28 = vadd.f32 %v15698_v21, %v15695_v20  ;;  %v15711_v41 = vadd.f32 %v1570_v18, %v482_v15  ;;  %v15723_v39 = vadd.f32 %v1613_v31, %v490_v55  ;;  %v522_v18 = vrot.slane %v476_v59, %v15692_v16 }
 0x1d9   :  { %v1572_v23 = vpop.f32.mrf.mxu0  ;;  %v1615_v40 = vpop.f32.mrf.mxu1  ;;  %v526_v31 = vrot.slane %v476_v59, %v15700_v22 }
 0x1da   :  { %v15709_v30 = vadd.f32 %v1572_v23, %v486_v17  ;;  %v1877_v36 = vadd.f32 %v1876_v28, %v15704_v27  ;;  %v15733_v50 = vadd.f32 %v1615_v40, %v494_v29 }
 0x1dc   :  { %v1893_v37 = vadd.f32 %v15709_v30, %v15711_v41  ;;  %v1878_v45 = vadd.f32 %v1877_v36, %v15716_v35 }
 0x1de   :  { %v1894_v46 = vadd.f32 %v1893_v37, %v15723_v39 }
 0x1e0   :  { %v1895_v56 = vadd.f32 %v1894_v46, %v15733_v50  ;;  %v530_v46 = vrot.slane %v476_v59, %v15702_v25 }
 0x203   :  { %v1652_v26 = vpop.f32.mrf.mxu0  ;;  %v1695_v47 = vpop.f32.mrf.mxu1 }
 0x204   :  { %v15725_v42 = vadd.f32 %v1652_v26, %v498_v32  ;;  %v15742_v61 = vadd.f32 %v1695_v47, %v506_v48 }
 0x205   :  { %v1654_v34 = vpop.f32.mrf.mxu0  ;;  %v1697_v57 = vpop.f32.mrf.mxu1 }
 0x206   :  { %v1879_v51 = vadd.f32 %v1878_v45, %v15725_v42  ;;  %v15736_v52 = vadd.f32 %v1654_v34, %v502_v43  ;;  %v15749_v4 = vadd.f32 %v1697_v57, %v510_v58 }
 0x207   :  { %v1656_v44 = vpop.f32.mrf.mxu0  ;;  %v1699_v1 = vpop.f32.mrf.mxu1 }
 0x208   :  { %v15738_v53 = vadd.f32 %v1656_v44, %v498_v32  ;;  %v1880_v62 = vadd.f32 %v1879_v51, %v15736_v52  ;;  %v15753_v7 = vadd.f32 %v1699_v1, %v506_v48  ;;  %v538_v51 = vrot.slane %v476_v59, %v15721_v38 }
 0x209   :  { %v1658_v54 = vpop.f32.mrf.mxu0  ;;  %v1701_v8 = vpop.f32.mrf.mxu1  ;;  %v542_v1 = vrot.slane %v476_v59, %v15731_v49 }
 0x20a   :  { %v1896_v63 = vadd.f32 %v1895_v56, %v15738_v53  ;;  %v15746_v0 = vadd.f32 %v1658_v54, %v502_v43  ;;  %v1881_v5 = vadd.f32 %v1880_v62, %v15742_v61  ;;  %v15761_v19 = vadd.f32 %v1701_v8, %v510_v58 }
 0x20b   :  { %v534_v54 = vrot.slane %v476_v59, %v15714_v33 }
 0x20c   :  { %v1897_v6 = vadd.f32 %v1896_v63, %v15746_v0  ;;  %v1882_v14 = vadd.f32 %v1881_v5, %v15749_v4 }
 0x20e   :  { %v1898_v15 = vadd.f32 %v1897_v6, %v15753_v7 }
 0x210   :  { %v1899_v28 = vadd.f32 %v1898_v15, %v15761_v19 }
 0x233   :  { %v1738_v60 = vpop.f32.mrf.mxu0  ;;  %v1781_v17 = vpop.f32.mrf.mxu1 }
 0x234   :  { %v15755_v9 = vadd.f32 %v1738_v60, %v514_v2  ;;  %v15770_v32 = vadd.f32 %v1781_v17, %v522_v18 }
 0x235   :  { %v1740_v3 = vpop.f32.mrf.mxu0  ;;  %v1783_v29 = vpop.f32.mrf.mxu1 }
 0x236   :  { %v1883_v55 = vadd.f32 %v1882_v14, %v15755_v9  ;;  %v15764_v23 = vadd.f32 %v1740_v3, %v518_v10  ;;  %v15776_v43 = vadd.f32 %v1783_v29, %v526_v31 }
 0x237   :  { %v1742_v13 = vpop.f32.mrf.mxu0  ;;  %v1785_v40 = vpop.f32.mrf.mxu1 }
 0x238   :  { %v15766_v24 = vadd.f32 %v1742_v13, %v514_v2  ;;  %v1884_v34 = vadd.f32 %v1883_v55, %v15764_v23  ;;  %v15781_v47 = vadd.f32 %v1785_v40, %v522_v18 }
 0x239   :  { %v1744_v26 = vpop.f32.mrf.mxu0  ;;  %v1787_v48 = vpop.f32.mrf.mxu1 }
 0x23a   :  { %v1900_v36 = vadd.f32 %v1899_v28, %v15766_v24  ;;  %v15774_v37 = vadd.f32 %v1744_v26, %v518_v10  ;;  %v1885_v44 = vadd.f32 %v1884_v34, %v15770_v32  ;;  %v15790_v2 = vadd.f32 %v1787_v48, %v526_v31  ;;  %v2420_v48 = vld [vmem:[#allocation9 + $0x1e0] sm:$0xff] }
 0x23c   :  { %v1901_v45 = vadd.f32 %v1900_v36, %v15774_v37  ;;  %v1886_v57 = vadd.f32 %v1885_v44, %v15776_v43 }
 0x23e   :  { %v1902_v58 = vadd.f32 %v1901_v45, %v15781_v47 }
 0x240   :  { %v1903_v13 = vadd.f32 %v1902_v58, %v15790_v2  ;;  %v2548_v58 = vld [vmem:[#allocation9 + $0x5e0] sm:$0xff] }
 0x263   :  { %v1824_v56 = vpop.f32.mrf.mxu0  ;;  %v1867_v62 = vpop.f32.mrf.mxu1 }
 0x264   :  { %v15787_v60 = vadd.f32 %v1824_v56, %v530_v46  ;;  %v15793_v5 = vadd.f32 %v1867_v62, %v538_v51  ;;  %v2412_v62 = vld [vmem:[#allocation9 + $0x1a0] sm:$0xff] }
 0x265   :  { %v1826_v63 = vpop.f32.mrf.mxu0  ;;  %v1869_v8 = vpop.f32.mrf.mxu1 }
 0x266   :  { %v1887_v3 = vadd.f32 %v1886_v57, %v15787_v60  ;;  %v15795_v6 = vadd.f32 %v1826_v63, %v534_v54  ;;  %v15801_v55 = vadd.f32 %v1869_v8, %v542_v1 }
 0x267   :  { %v1828_v10 = vpop.f32.mrf.mxu0  ;;  %v1871_v17 = vpop.f32.mrf.mxu1 }
 0x268   :  { %v1888_v14 = vadd.f32 %v1887_v3, %v15795_v6  ;;  %v15799_v15 = vadd.f32 %v1828_v10, %v530_v46  ;;  %v15807_v31 = vadd.f32 %v1871_v17, %v538_v51  ;;  %v2416_v46 = vld [vmem:[#allocation9 + $0x1c0] sm:$0xff] }
 0x269   :  { %v1830_v18 = vpop.f32.mrf.mxu0  ;;  %v1873_v29 = vpop.f32.mrf.mxu1  ;;  %v13210_v56 = vcombine.low %v2416_v46, %v2420_v48  ;;  %v13211_v57 = vcombine.high %v2416_v46, %v2420_v48  ;;  %v2408_v51 = vld [vmem:[#allocation9 + $0x180] sm:$0xff] }
 0x26a   :  { %v1904_v59 = vadd.f32 %v1903_v13, %v15799_v15  ;;  %v15804_v26 = vadd.f32 %v1830_v18, %v534_v54  ;;  %v1889_v28 = vadd.f32 %v1888_v14, %v15793_v5  ;;  %v15811_v40 = vadd.f32 %v1873_v29, %v542_v1  ;;  %v2544_v54 = vld [vmem:[#allocation9 + $0x5c0] sm:$0xff] }
 0x26b   :  { %v13338_v63 = vcombine.low %v2544_v54, %v2548_v58  ;;  %v13339_v3 = vcombine.high %v2544_v54, %v2548_v58  ;;  %v13203_v8 = vcombine.high %v2408_v51, %v2412_v62  ;;  %v2536_v10 = vld [vmem:[#allocation9 + $0x580] sm:$0xff]  ;;  %8546 = vmatprep.subr.bf16.mxu0 %v13211_v57 }
 0x26c   :  { %v1905_v34 = vadd.f32 %v1904_v59, %v15804_v26  ;;  %v1890_v36 = vadd.f32 %v1889_v28, %v15801_v55  ;;  %v2540_v1 = vld [vmem:[#allocation9 + $0x5a0] sm:$0xff]  ;;  %8547 = vmatpush1.bf16.msra.mxu0 %v13210_v56  ;;  %v13202_v28 = vcombine.low %v2408_v51, %v2412_v62 }
 0x26d   :  { %v2400_v13 = vld [vmem:[#allocation9 + $0x140] sm:$0xff]  ;;  %v13331_v14 = vcombine.high %v2536_v10, %v2540_v1  ;;  %8589 = vmatprep.subr.bf16.mxu1 %v13339_v3  ;;  %8548 = vmatprep.subr.bf16.mxu0 %v13203_v8  ;;  %v13330_v29 = vcombine.low %v2536_v10, %v2540_v1 }
 0x26e   :  { %1891 = vadd.xlane.f32.xlu0 %v1890_v36  ;;  %v1906_v44 = vadd.f32 %v1905_v34, %v15807_v31  ;;  %v2404_v17 = vld [vmem:[#allocation9 + $0x160] sm:$0xff]  ;;  %8590 = vmatpush1.bf16.msra.mxu1 %v13338_v63 }
 0x26f   :  { %v2528_v18 = vld [vmem:[#allocation9 + $0x540] sm:$0xff]  ;;  %v13195_v34 = vcombine.high %v2400_v13, %v2404_v17  ;;  %8591 = vmatprep.subr.bf16.mxu1 %v13331_v14  ;;  %v13194_v54 = vcombine.low %v2400_v13, %v2404_v17 }
 0x270   :  { %v1907_v45 = vadd.f32 %v1906_v44, %v15811_v40  ;;  %v2532_v59 = vld [vmem:[#allocation9 + $0x560] sm:$0xff]  ;;  %8549 = vmatpush1.bf16.msra.mxu0 %v13202_v28 }
 0x271   :  { %v13323_v36 = vcombine.high %v2528_v18, %v2532_v59  ;;  %v2392_v44 = vld [vmem:[#allocation9 + $0x100] sm:$0xff]  ;;  %8550 = vmatprep.subr.bf16.mxu0 %v13195_v34  ;;  %v13322_v57 = vcombine.low %v2528_v18, %v2532_v59 }
 0x272   :  { %1908 = vadd.xlane.f32.xlu0 %v1907_v45  ;;  %v2396_v45 = vld [vmem:[#allocation9 + $0x120] sm:$0xff]  ;;  %8592 = vmatpush1.bf16.msra.mxu1 %v13330_v29 }
 0x273   :  { %v2520_v46 = vld [vmem:[#allocation9 + $0x500] sm:$0xff]  ;;  %v13187_v58 = vcombine.high %v2392_v44, %v2396_v45  ;;  %8593 = vmatprep.subr.bf16.mxu1 %v13323_v36  ;;  %v13186_v8 = vcombine.low %v2392_v44, %v2396_v45 }
 0x274   :  { %v2524_v48 = vld [vmem:[#allocation9 + $0x520] sm:$0xff]  ;;  %8551 = vmatpush1.bf16.msra.mxu0 %v13194_v54 }
 0x275   :  { %v13315_v3 = vcombine.high %v2520_v46, %v2524_v48  ;;  %v2384_v56 = vld [vmem:[#allocation9 + $0xc0] sm:$0xff]  ;;  %8552 = vmatprep.subr.bf16.mxu0 %v13187_v58  ;;  %v13314_v10 = vcombine.low %v2520_v46, %v2524_v48 }
 0x276   :  { %v2388_v51 = vld [vmem:[#allocation9 + $0xe0] sm:$0xff]  ;;  %8594 = vmatpush1.bf16.msra.mxu1 %v13322_v57 }
 0x277   :  { %v2512_v62 = vld [vmem:[#allocation9 + $0x4c0] sm:$0xff]  ;;  %v13179_v1 = vcombine.high %v2384_v56, %v2388_v51  ;;  %8595 = vmatprep.subr.bf16.mxu1 %v13315_v3  ;;  %v13178_v18 = vcombine.low %v2384_v56, %v2388_v51 }
 0x278   :  { %v2516_v63 = vld [vmem:[#allocation9 + $0x4e0] sm:$0xff]  ;;  %8553 = vmatpush1.bf16.msra.mxu0 %v13186_v8 }
 0x279   :  { %v13307_v14 = vcombine.high %v2512_v62, %v2516_v63  ;;  %v2376_v28 = vld [vmem:[#allocation9 + $0x80] sm:$0xff]  ;;  %8554 = vmatprep.subr.bf16.mxu0 %v13179_v1  ;;  %v13306_v59 = vcombine.low %v2512_v62, %v2516_v63 }
 0x27a   :  { %v2380_v13 = vld [vmem:[#allocation9 + $0xa0] sm:$0xff]  ;;  %8596 = vmatpush1.bf16.msra.mxu1 %v13314_v10 }
 0x27b   :  { %v2504_v17 = vld [vmem:[#allocation9 + $0x480] sm:$0xff]  ;;  %v13171_v34 = vcombine.high %v2376_v28, %v2380_v13  ;;  %8597 = vmatprep.subr.bf16.mxu1 %v13307_v14  ;;  %v13170_v46 = vcombine.low %v2376_v28, %v2380_v13 }
 0x27c   :  { %v2508_v29 = vld [vmem:[#allocation9 + $0x4a0] sm:$0xff]  ;;  %8555 = vmatpush1.bf16.msra.mxu0 %v13178_v18 }
 0x27d   :  { %v13299_v36 = vcombine.high %v2504_v17, %v2508_v29  ;;  %v2368_v54 = vld [vmem:[#allocation9 + $0x40] sm:$0xff]  ;;  %8556 = vmatprep.subr.bf16.mxu0 %v13171_v34  ;;  %v13298_v48 = vcombine.low %v2504_v17, %v2508_v29 }
 0x27e   :  { %v2372_v44 = vld [vmem:[#allocation9 + $0x60] sm:$0xff]  ;;  %8598 = vmatpush1.bf16.msra.mxu1 %v13306_v59 }
 0x27f   :  { %v2496_v45 = vld [vmem:[#allocation9 + $0x440] sm:$0xff]  ;;  %v13163_v58 = vcombine.high %v2368_v54, %v2372_v44  ;;  %8599 = vmatprep.subr.bf16.mxu1 %v13299_v36  ;;  %v13162_v62 = vcombine.low %v2368_v54, %v2372_v44 }
 0x280   :  { %v2500_v57 = vld [vmem:[#allocation9 + $0x460] sm:$0xff]  ;;  %8557 = vmatpush1.bf16.msra.mxu0 %v13170_v46 }
 0x281   :  { %v13291_v3 = vcombine.high %v2496_v45, %v2500_v57  ;;  %v2360_v8 = vld [vmem:[#allocation9] sm:$0xff]  ;;  %8558 = vmatprep.subr.bf16.mxu0 %v13163_v58  ;;  %v13290_v63 = vcombine.low %v2496_v45, %v2500_v57 }
 0x282   :  { %v2364_v56 = vld [vmem:[#allocation9 + $0x20] sm:$0xff]  ;;  %8600 = vmatpush1.bf16.msra.mxu1 %v13298_v48 }
 0x283   :  { %v2488_v51 = vld [vmem:[#allocation9 + $0x400] sm:$0xff]  ;;  %v13155_v1 = vcombine.high %v2360_v8, %v2364_v56  ;;  %8601 = vmatprep.subr.bf16.mxu1 %v13291_v3  ;;  %v13154_v28 = vcombine.low %v2360_v8, %v2364_v56 }
 0x284   :  { %v2492_v10 = vld [vmem:[#allocation9 + $0x420] sm:$0xff]  ;;  %8559 = vmatpush1.bf16.msra.mxu0 %v13162_v62 }
 0x285   :  { %v13283_v14 = vcombine.high %v2488_v51, %v2492_v10  ;;  %8560 = vmatprep.subr.bf16.mxu0 %v13155_v1  ;;  %v13282_v13 = vcombine.low %v2488_v51, %v2492_v10 }
 0x286   :  { %8602 = vmatpush1.bf16.msra.mxu1 %v13290_v63 }
 0x287   :  { %8603 = vmatprep.subr.bf16.mxu1 %v13283_v14 }
 0x288   :  { %8561 = vmatpush1.bf16.msra.mxu0 %v13154_v28 }
 0x28a   :  { %8604 = vmatpush1.bf16.msra.mxu1 %v13282_v13 }
 0x2f7   :  { %v1892_v17 = vpop.xlane.xlu0 %1891 }
 0x2f8   :  { %v15815_v29 = vmul.f32 0.00048828125, %v1892_v17 }
 0x2fa   :  { %v15819_v18 = vsub.f32 %v15695_v20, %v15815_v29  ;;  %v15823_v59 = vsub.f32 %v15698_v21, %v15815_v29  ;;  %v15827_v36 = vsub.f32 %v15704_v27, %v15815_v29  ;;  %v15837_v20 = vsub.f32 %v15716_v35, %v15815_v29 }
 0x2fb   :  { %v1909_v34 = vpop.xlane.xlu0 %1908  ;;  %v15841_v21 = vsub.f32 %v15725_v42, %v15815_v29  ;;  %v15855_v35 = vsub.f32 %v15736_v52, %v15815_v29  ;;  %v15861_v3 = vsub.f32 %v15742_v61, %v15815_v29  ;;  %v15875_v51 = vsub.f32 %v15749_v4, %v15815_v29 }
 0x2fc   :  { %v1944_v54 = vmul.f32 %v15819_v18, %v15819_v18  ;;  %v1945_v44 = vmul.f32 %v15823_v59, %v15823_v59  ;;  %v15833_v45 = vmul.f32 0.00048828125, %v1909_v34  ;;  %v1946_v27 = vmul.f32 %v15827_v36, %v15827_v36 }
 0x2fd   :  { %v1947_v42 = vmul.f32 %v15837_v20, %v15837_v20  ;;  %v1949_v61 = vmul.f32 %v15855_v35, %v15855_v35  ;;  %v1950_v63 = vmul.f32 %v15861_v3, %v15861_v3 }
 0x2fe   :  { %v1976_v57 = vadd.f32 %v1945_v44, %v1944_v54  ;;  %v15847_v46 = vsub.f32 %v15711_v41, %v15833_v45  ;;  %v15851_v48 = vsub.f32 %v15709_v30, %v15833_v45  ;;  %v1948_v41 = vmul.f32 %v15841_v21, %v15841_v21 }
 0x2ff   :  { %v15867_v30 = vsub.f32 %v15723_v39, %v15833_v45  ;;  %v15881_v62 = vsub.f32 %v15733_v50, %v15833_v45  ;;  %v15885_v39 = vsub.f32 %v15755_v9, %v15815_v29  ;;  %v15891_v4 = vsub.f32 %v15738_v53, %v15833_v45 }
 0x300   :  { %v1977_v58 = vadd.f32 %v1976_v57, %v1946_v27  ;;  %v1960_v52 = vmul.f32 %v15847_v46, %v15847_v46  ;;  %v1961_v56 = vmul.f32 %v15851_v48, %v15851_v48  ;;  %v15897_v50 = vsub.f32 %v15764_v23, %v15815_v29 }
 0x301   :  { %17068 = vst [vmem:[#allocation48_spill] sm:$0xff] %v15885_v39  ;;  %v1962_v14 = vmul.f32 %v15867_v30, %v15867_v30  ;;  %v1951_v9 = vmul.f32 %v15875_v51, %v15875_v51  ;;  %v15903_v17 = vsub.f32 %v15746_v0, %v15833_v45  ;;  %v1963_v53 = vmul.f32 %v15881_v62, %v15881_v62 }
 0x302   :  { %v1978_v8 = vadd.f32 %v1977_v58, %v1947_v42  ;;  %v1993_v28 = vadd.f32 %v1961_v56, %v1960_v52  ;;  %v15909_v54 = vsub.f32 %v15770_v32, %v15815_v29  ;;  %v1952_v23 = vmul.f32 %v15885_v39, %v15885_v39 }
 0x303   :  { %v15915_v27 = vsub.f32 %v15753_v7, %v15833_v45  ;;  %v1964_v0 = vmul.f32 %v15891_v4, %v15891_v4  ;;  %v15921_v42 = vsub.f32 %v15776_v43, %v15815_v29  ;;  %v1953_v32 = vmul.f32 %v15897_v50, %v15897_v50 }
 0x304   :  { %v1979_v10 = vadd.f32 %v1978_v8, %v1948_v41  ;;  %v1994_v34 = vadd.f32 %v1993_v28, %v1962_v14  ;;  %17069 = vst [vmem:[#allocation49_spill] sm:$0xff] %v15909_v54  ;;  %v15927_v41 = vsub.f32 %v15761_v19, %v15833_v45  ;;  %v1965_v7 = vmul.f32 %v15903_v17, %v15903_v17 }
 0x305   :  { %v15933_v52 = vsub.f32 %v15787_v60, %v15815_v29  ;;  %v1954_v43 = vmul.f32 %v15909_v54, %v15909_v54  ;;  %v1966_v19 = vmul.f32 %v15915_v27, %v15915_v27  ;;  %v1955_v60 = vmul.f32 %v15921_v42, %v15921_v42 }
 0x306   :  { %v1980_v1 = vadd.f32 %v1979_v10, %v1949_v61  ;;  %v1995_v57 = vadd.f32 %v1994_v34, %v1963_v53  ;;  %v15939_v61 = vsub.f32 %v15766_v24, %v15833_v45  ;;  %v15951_v14 = vsub.f32 %v15774_v37, %v15833_v45 }
 0x307   :  { %17070 = vst [vmem:[#allocation50_spill] sm:$0xff] %v15933_v52  ;;  %v1967_v24 = vmul.f32 %v15927_v41, %v15927_v41  ;;  %v15963_v53 = vsub.f32 %v15781_v47, %v15833_v45 }
 0x308   :  { %v1981_v13 = vadd.f32 %v1980_v1, %v1950_v63  ;;  %v1996_v8 = vadd.f32 %v1995_v57, %v1964_v0  ;;  %17071 = vst [vmem:[#allocation51_spill] sm:$0xff] %v15939_v61  ;;  %v15945_v63 = vsub.f32 %v15795_v6, %v15815_v29  ;;  %v1956_v6 = vmul.f32 %v15933_v52, %v15933_v52  ;;  %v16080_v52 = vld [vmem:[#allocation9 + $0x960] sm:$0xff] }
 0x309   :  { %17074 = vst [vmem:[#allocation54_spill] sm:$0xff] %v15963_v53  ;;  %v1968_v37 = vmul.f32 %v15939_v61, %v15939_v61  ;;  %v15975_v0 = vsub.f32 %v15790_v2, %v15833_v45  ;;  %v1969_v47 = vmul.f32 %v15951_v14, %v15951_v14  ;;  %17083 = vst [vmem:[#allocation63_spill] sm:$0xff] %v16080_v52 }
 0x30a   :  { %v1982_v44 = vadd.f32 %v1981_v13, %v1951_v9  ;;  %v1997_v10 = vadd.f32 %v1996_v8, %v1965_v7  ;;  %17072 = vst [vmem:[#allocation52_spill] sm:$0xff] %v15945_v63  ;;  %v15957_v9 = vsub.f32 %v15793_v5, %v15815_v29  ;;  %v1957_v5 = vmul.f32 %v15945_v63, %v15945_v63 }
 0x30c   :  { %v1983_v58 = vadd.f32 %v1982_v44, %v1952_v23  ;;  %v1998_v28 = vadd.f32 %v1997_v10, %v1966_v19  ;;  %17073 = vst [vmem:[#allocation53_spill] sm:$0xff] %v15957_v9  ;;  %v15969_v23 = vsub.f32 %v15801_v55, %v15815_v29  ;;  %v15983_v55 = vsub.f32 %v15799_v15, %v15833_v45 }
 0x30d   :  { %v1970_v29 = vmul.f32 %v15963_v53, %v15963_v53  ;;  %v15997_v15 = vsub.f32 %v15807_v31, %v15833_v45 }
 0x30e   :  { %v1984_v56 = vadd.f32 %v1983_v58, %v1953_v32  ;;  %v1999_v34 = vadd.f32 %v1998_v28, %v1967_v24  ;;  %17075 = vst [vmem:[#allocation55_spill] sm:$0xff] %v15969_v23  ;;  %v1958_v32 = vmul.f32 %v15957_v9, %v15957_v9  ;;  %17076 = vst [vmem:[#allocation56_spill] sm:$0xff] %v15983_v55 }
 0x30f   :  { %v1959_v2 = vmul.f32 %v15969_v23, %v15969_v23  ;;  %17078 = vst [vmem:[#allocation58_spill] sm:$0xff] %v15997_v15  ;;  %v16003_v24 = vsub.f32 %v15811_v40, %v15833_v45  ;;  %v16084_v23 = vld [vmem:[#allocation9 + $0xd60] sm:$0xff] }
 0x310   :  { %v1985_v1 = vadd.f32 %v1984_v56, %v1954_v43  ;;  %v2000_v57 = vadd.f32 %v1999_v34, %v1968_v37  ;;  %v15991_v43 = vsub.f32 %v15804_v26, %v15833_v45  ;;  %v1971_v56 = vmul.f32 %v15975_v0, %v15975_v0  ;;  %v2612_v45 = vld [vmem:[#allocation9 + $0x7e0] sm:$0xff]  ;;  %17085 = vst [vmem:[#allocation65_spill] sm:$0xff] %v16084_v23 }
 0x311   :  { %17079 = vst [vmem:[#allocation59_spill] sm:$0xff] %v16003_v24  ;;  %v1975_v31 = vmul.f32 %v16003_v24, %v16003_v24  ;;  %v16082_v24 = vld [vmem:[#allocation9 + $0xd40] sm:$0xff] }
 0x312   :  { %v1986_v13 = vadd.f32 %v1985_v1, %v1955_v60  ;;  %v2001_v7 = vadd.f32 %v2000_v57, %v1969_v47  ;;  %17077 = vst [vmem:[#allocation57_spill] sm:$0xff] %v15991_v43  ;;  %v1972_v60 = vmul.f32 %v15983_v55, %v15983_v55  ;;  %v1973_v26 = vmul.f32 %v15991_v43, %v15991_v43  ;;  %v2608_v47 = vld [vmem:[#allocation9 + $0x7c0] sm:$0xff] }
 0x313   :  { %v16078_v55 = vld [vmem:[#allocation9 + $0x940] sm:$0xff]  ;;  %17084 = vst [vmem:[#allocation64_spill] sm:$0xff] %v16082_v24 }
 0x314   :  { %v1987_v44 = vadd.f32 %v1986_v13, %v1956_v6  ;;  %v2002_v19 = vadd.f32 %v2001_v7, %v1970_v29  ;;  %v1974_v6 = vmul.f32 %v15997_v15, %v15997_v15  ;;  %v2472_v29 = vld [vmem:[#allocation9 + $0x380] sm:$0xff]  ;;  %17082 = vst [vmem:[#allocation62_spill] sm:$0xff] %v16078_v55 }
 0x315   :  { %v2476_v7 = vld [vmem:[#allocation9 + $0x3a0] sm:$0xff] }
 0x316   :  { %v1988_v58 = vadd.f32 %v1987_v44, %v1957_v5  ;;  %v2003_v1 = vadd.f32 %v2002_v19, %v1971_v56  ;;  %v2480_v5 = vld [vmem:[#allocation9 + $0x3c0] sm:$0xff]  ;;  %v13266_v19 = vcombine.low %v2472_v29, %v2476_v7 }
 0x317   :  { %v2484_v44 = vld [vmem:[#allocation9 + $0x3e0] sm:$0xff] }
 0x318   :  { %v1989_v8 = vadd.f32 %v1988_v58, %v1958_v32  ;;  %v2004_v28 = vadd.f32 %v2003_v1, %v1972_v60  ;;  %v13274_v57 = vcombine.low %v2480_v5, %v2484_v44  ;;  %v13275_v40 = vcombine.high %v2480_v5, %v2484_v44  ;;  %v2604_v56 = vld [vmem:[#allocation9 + $0x7a0] sm:$0xff] }
 0x319   :  { %v13402_v32 = vcombine.low %v2608_v47, %v2612_v45  ;;  %v13403_v58 = vcombine.high %v2608_v47, %v2612_v45  ;;  %v2464_v1 = vld [vmem:[#allocation9 + $0x340] sm:$0xff] }
 0x31a   :  { %v1990_v10 = vadd.f32 %v1989_v8, %v1959_v2  ;;  %v2005_v13 = vadd.f32 %v2004_v28, %v1973_v26  ;;  %8562 = vmatprep.subr.bf16.mxu0 %v13275_v40  ;;  %v2600_v2 = vld [vmem:[#allocation9 + $0x780] sm:$0xff]  ;;  %v13267_v8 = vcombine.high %v2472_v29, %v2476_v7 }
 0x31b   :  { %8605 = vmatprep.subr.bf16.mxu1 %v13403_v58  ;;  %8563 = vmatpush2.bf16.msra.mxu0 %v13274_v57  ;;  %v13395_v60 = vcombine.high %v2600_v2, %v2604_v56  ;;  %v2468_v26 = vld [vmem:[#allocation9 + $0x360] sm:$0xff] }
 0x31c   :  { %1991 = vadd.xlane.f32.xlu1 %v1990_v10  ;;  %v2006_v37 = vadd.f32 %v2005_v13, %v1974_v6  ;;  %8606 = vmatpush2.bf16.msra.mxu1 %v13402_v32  ;;  %v13394_v10 = vcombine.low %v2600_v2, %v2604_v56  ;;  %v2592_v28 = vld [vmem:[#allocation9 + $0x740] sm:$0xff]  ;;  %v13258_v6 = vcombine.low %v2464_v1, %v2468_v26 }
 0x31d   :  { %8564 = vmatprep.subr.bf16.mxu0 %v13267_v8  ;;  %8607 = vmatprep.subr.bf16.mxu1 %v13395_v60  ;;  %v13259_v13 = vcombine.high %v2464_v1, %v2468_v26  ;;  %v2584_v57 = vld [vmem:[#allocation9 + $0x700] sm:$0xff] }
 0x31e   :  { %v2007_v34 = vadd.f32 %v2006_v37, %v1975_v31  ;;  %v2596_v31 = vld [vmem:[#allocation9 + $0x760] sm:$0xff] }
 0x31f   :  { %8565 = vmatpush2.bf16.msra.mxu0 %v13266_v19  ;;  %v2456_v37 = vld [vmem:[#allocation9 + $0x300] sm:$0xff]  ;;  %v13386_v5 = vcombine.low %v2592_v28, %v2596_v31  ;;  %v13387_v44 = vcombine.high %v2592_v28, %v2596_v31 }
 0x320   :  { %2008 = vadd.xlane.f32.xlu1 %v2007_v34  ;;  %v2460_v34 = vld [vmem:[#allocation9 + $0x320] sm:$0xff]  ;;  %8608 = vmatpush2.bf16.msra.mxu1 %v13394_v10 }
 0x321   :  { %v13251_v47 = vcombine.high %v2456_v37, %v2460_v34  ;;  %v2588_v40 = vld [vmem:[#allocation9 + $0x720] sm:$0xff]  ;;  %8566 = vmatprep.subr.bf16.mxu0 %v13259_v13  ;;  %8609 = vmatprep.subr.bf16.mxu1 %v13387_v44  ;;  %v13250_v2 = vcombine.low %v2456_v37, %v2460_v34 }
 0x322   :  { %v13379_v45 = vcombine.high %v2584_v57, %v2588_v40  ;;  %v2448_v32 = vld [vmem:[#allocation9 + $0x2c0] sm:$0xff]  ;;  %v13378_v8 = vcombine.low %v2584_v57, %v2588_v40 }
 0x323   :  { %v2452_v58 = vld [vmem:[#allocation9 + $0x2e0] sm:$0xff]  ;;  %8567 = vmatpush2.bf16.msra.mxu0 %v13258_v6 }
 0x324   :  { %v2576_v29 = vld [vmem:[#allocation9 + $0x6c0] sm:$0xff]  ;;  %8610 = vmatpush2.bf16.msra.mxu1 %v13386_v5  ;;  %8568 = vmatprep.subr.bf16.mxu0 %v13251_v47  ;;  %v13243_v56 = vcombine.high %v2448_v32, %v2452_v58  ;;  %v13242_v28 = vcombine.low %v2448_v32, %v2452_v58 }
 0x325   :  { %v2580_v7 = vld [vmem:[#allocation9 + $0x6e0] sm:$0xff]  ;;  %8611 = vmatprep.subr.bf16.mxu1 %v13379_v45 }
 0x326   :  { %v13371_v19 = vcombine.high %v2576_v29, %v2580_v7  ;;  %v2440_v10 = vld [vmem:[#allocation9 + $0x280] sm:$0xff]  ;;  %v13370_v13 = vcombine.low %v2576_v29, %v2580_v7 }
 0x327   :  { %v2444_v60 = vld [vmem:[#allocation9 + $0x2a0] sm:$0xff]  ;;  %8569 = vmatpush2.bf16.msra.mxu0 %v13250_v2 }
 0x328   :  { %v2568_v1 = vld [vmem:[#allocation9 + $0x680] sm:$0xff]  ;;  %8612 = vmatpush2.bf16.msra.mxu1 %v13378_v8  ;;  %8570 = vmatprep.subr.bf16.mxu0 %v13243_v56  ;;  %v13235_v31 = vcombine.high %v2440_v10, %v2444_v60  ;;  %v13234_v47 = vcombine.low %v2440_v10, %v2444_v60 }
 0x329   :  { %v2572_v26 = vld [vmem:[#allocation9 + $0x6a0] sm:$0xff]  ;;  %8613 = vmatprep.subr.bf16.mxu1 %v13371_v19 }
 0x32a   :  { %v13363_v44 = vcombine.high %v2568_v1, %v2572_v26  ;;  %v2432_v6 = vld [vmem:[#allocation9 + $0x240] sm:$0xff]  ;;  %v13362_v57 = vcombine.low %v2568_v1, %v2572_v26 }
 0x32b   :  { %v2436_v37 = vld [vmem:[#allocation9 + $0x260] sm:$0xff]  ;;  %8571 = vmatpush2.bf16.msra.mxu0 %v13242_v28 }
 0x32c   :  { %v2560_v34 = vld [vmem:[#allocation9 + $0x640] sm:$0xff]  ;;  %8614 = vmatpush2.bf16.msra.mxu1 %v13370_v13  ;;  %8572 = vmatprep.subr.bf16.mxu0 %v13235_v31  ;;  %v13227_v40 = vcombine.high %v2432_v6, %v2436_v37  ;;  %v13226_v29 = vcombine.low %v2432_v6, %v2436_v37 }
 0x32d   :  { %v2564_v5 = vld [vmem:[#allocation9 + $0x660] sm:$0xff]  ;;  %8615 = vmatprep.subr.bf16.mxu1 %v13363_v44 }
 0x32e   :  { %v13355_v45 = vcombine.high %v2560_v34, %v2564_v5  ;;  %v2424_v2 = vld [vmem:[#allocation9 + $0x200] sm:$0xff]  ;;  %v13354_v7 = vcombine.low %v2560_v34, %v2564_v5 }
 0x32f   :  { %v2428_v32 = vld [vmem:[#allocation9 + $0x220] sm:$0xff]  ;;  %8573 = vmatpush2.bf16.msra.mxu0 %v13234_v47 }
 0x330   :  { %v2552_v58 = vld [vmem:[#allocation9 + $0x600] sm:$0xff]  ;;  %8616 = vmatpush2.bf16.msra.mxu1 %v13362_v57  ;;  %8574 = vmatprep.subr.bf16.mxu0 %v13227_v40  ;;  %v13219_v56 = vcombine.high %v2424_v2, %v2428_v32  ;;  %v13218_v10 = vcombine.low %v2424_v2, %v2428_v32  ;;  %v2164_v2 = vld [vmem:[#allocation7] sm:$0xff] }
 0x331   :  { %v2556_v8 = vld [vmem:[#allocation9 + $0x620] sm:$0xff]  ;;  %8617 = vmatprep.subr.bf16.mxu1 %v13355_v45  ;;  %v16070_v13 = vrot.slane %v2164_v2, %v15692_v16  ;;  %v16073_v15 = vrot.slane %v2164_v2, %v15714_v33  ;;  %v16076_v9 = vrot.slane %v2164_v2, %v15731_v49  ;;  %v16091_v63 = vrot.slane %v2164_v2, %v15702_v25 }
 0x332   :  { %v13347_v19 = vcombine.high %v2552_v58, %v2556_v8  ;;  %v13346_v60 = vcombine.low %v2552_v58, %v2556_v8  ;;  %v16011_v1 = vld [vmem:[#allocation9 + $0x9c0] sm:$0xff]  ;;  %v16097_v54 = vrot.slane %v2164_v2, %v15721_v38 }
 0x333   :  { %8575 = vmatpush2.bf16.msra.mxu0 %v13226_v29  ;;  %v16013_v26 = vld [vmem:[#allocation9 + $0x9e0] sm:$0xff] }
 0x334   :  { %8618 = vmatpush2.bf16.msra.mxu1 %v13354_v7  ;;  %8576 = vmatprep.subr.bf16.mxu0 %v13219_v56  ;;  %v16015_v28 = vld [vmem:[#allocation9 + $0xdc0] sm:$0xff]  ;;  %v13467_v31 = vcombine.high %v16011_v1, %v16013_v26 }
 0x335   :  { %8619 = vmatprep.subr.bf16.mxu1 %v13347_v19  ;;  %v16021_v44 = vld [vmem:[#allocation9 + $0xde0] sm:$0xff] }
 0x336   :  { %v13595_v37 = vcombine.high %v16015_v28, %v16021_v44  ;;  %v2048_v57 = vld [vmem:[#allocation6] sm:$0xff] }
 0x337   :  { %8577 = vmatpush2.bf16.msra.mxu0 %v13218_v10  ;;  %v16028_v32 = vrot.slane %v2048_v57, %v15689_v12  ;;  %v16031_v58 = vrot.slane %v2048_v57, %v15700_v22  ;;  %v16034_v8 = vrot.slane %v2048_v57, %v15687_v11  ;;  %v16037_v7 = vrot.slane %v2048_v57, %v15692_v16  ;;  %v16045_v10 = vld [vmem:[#allocation9 + $0x980] sm:$0xff] }
 0x338   :  { %8620 = vmatpush2.bf16.msra.mxu1 %v13346_v60  ;;  %8632 = vmatprep.subr.bf16.mxu0 %v13467_v31  ;;  %v16040_v56 = vrot.slane %v2048_v57, %v15714_v33  ;;  %v16043_v19 = vrot.slane %v2048_v57, %v15731_v49  ;;  %v16047_v60 = vld [vmem:[#allocation6 + $0x8] sm:$0xff]  ;;  %v16049_v31 = vld [vmem:[#allocation7 + $0x8] sm:$0xff]  ;;  %v16067_v6 = vrot.slane %v2048_v57, %v15702_v25  ;;  %v16086_v43 = vld [vmem:[#allocation9 + $0x900] sm:$0xff] }
 0x339   :  { %8675 = vmatprep.subr.bf16.mxu1 %v13595_v37  ;;  %17080 = vst [vmem:[#allocation60_spill] sm:$0xff] %v16047_v60  ;;  %17081 = vst [vmem:[#allocation61_spill] sm:$0xff] %v16049_v31  ;;  %v16052_v37 = vrot.slane %v2164_v2, %v15689_v12  ;;  %v16094_v53 = vrot.slane %v2048_v57, %v15721_v38  ;;  %v16101_v61 = vrot.slane %v16047_v60, %v15689_v12 }
 0x33a   :  { %17086 = vst [vmem:[#allocation66_spill] sm:$0xff] %v16086_v43  ;;  %v16107_v49 = vrot.slane %v16049_v31, %v15689_v12  ;;  %v16111_v25 = vrot.slane %v16047_v60, %v15700_v22  ;;  %v16115_v57 = vrot.slane %v16049_v31, %v15700_v22 }
 0x3a5   :  { %v1992_v34 = vpop.xlane.xlu1 %1991 }
 0x3a6   :  { %v2010_v5 = vmul.f32 0.00048828125, %v1992_v34  ;;  %v16055_v34 = vrot.slane %v2164_v2, %v15700_v22 }
 0x3a8   :  { %v2012_v47 = vadd.f32 1e-05, %v2010_v5  ;;  %v16058_v5 = vrot.slane %v2164_v2, %v15687_v11 }
 0x3a9   :  { %v2009_v40 = vpop.xlane.xlu1 %2008 }
 0x3aa   :  { %15063 = vrsqrt.f32 %v2012_v47  ;;  %v2011_v45 = vmul.f32 0.00048828125, %v2009_v40  ;;  %v16060_v47 = vld [vmem:[#allocation9 + $0x9a0] sm:$0xff] }
 0x3ab   :  { %v16062_v40 = vld [vmem:[#allocation9 + $0xd80] sm:$0xff] }
 0x3ac   :  { %v2013_v29 = vadd.f32 1e-05, %v2011_v45  ;;  %v16064_v45 = vld [vmem:[#allocation9 + $0xda0] sm:$0xff] }
 0x3ae   :  { %15065 = vrsqrt.f32 %v2013_v29  ;;  %v16088_v29 = vld [vmem:[#allocation9 + $0x920] sm:$0xff] }
 0x3af   :  { %17087 = vst [vmem:[#allocation67_spill] sm:$0xff] %v16088_v29 }
 0x3b7   :  { %v16125_v33 = vpop.eup %15063 }
 0x3b8   :  { %17088 = vst [vmem:[#allocation68_spill] sm:$0xff] %v16125_v33  ;;  %v2017_v39 = vmul.f32 %v16125_v33, %v15823_v59  ;;  %v2019_v12 = vmul.f32 %v16125_v33, %v15837_v20  ;;  %v2016_v31 = vmul.f32 %v16125_v33, %v15819_v18  ;;  %v2018_v16 = vmul.f32 %v16125_v33, %v15827_v36 }
 0x3b9   :  { %v2021_v22 = vmul.f32 %v16125_v33, %v15855_v35  ;;  %v2023_v2 = vmul.f32 %v16125_v33, %v15875_v51  ;;  %v2020_v38 = vmul.f32 %v16125_v33, %v15841_v21  ;;  %v2022_v59 = vmul.f32 %v16125_v33, %v15861_v3 }
 0x3ba   :  { %v2133_v20 = vmul.f32 %v16028_v32, %v2017_v39  ;;  %v2135_v23 = vmul.f32 %v16031_v58, %v2019_v12  ;;  %v2132_v18 = vmul.f32 %v16034_v8, %v2016_v31  ;;  %v2134_v36 = vmul.f32 %v16037_v7, %v2018_v16 }
 0x3bb   :  { %v2137_v24 = vmul.f32 %v16040_v56, %v2021_v22  ;;  %v2139_v35 = vmul.f32 %v16043_v19, %v2023_v2  ;;  %v2136_v51 = vmul.f32 %v16067_v6, %v2020_v38  ;;  %v2138_v52 = vmul.f32 %v16094_v53, %v2022_v59 }
 0x3bc   :  { %v2249_v21 = vadd.f32 %v16052_v37, %v2133_v20  ;;  %v2251_v3 = vadd.f32 %v16055_v34, %v2135_v23  ;;  %v2248_v39 = vadd.f32 %v16058_v5, %v2132_v18  ;;  %v16163_v12 = vadd.f32 %v16070_v13, %v2134_v36 }
 0x3bd   :  { %v16166_v31 = vadd.f32 %v16073_v15, %v2137_v24  ;;  %v16169_v16 = vadd.f32 %v16076_v9, %v2139_v35  ;;  %v16172_v22 = vadd.f32 %v16091_v63, %v2136_v51  ;;  %v16175_v38 = vadd.f32 %v16097_v54, %v2138_v52  ;;  %v16188_v51 = vpop.eup %15065 }
 0x3be   :  { %v2281_v2 = vmul.f32 0.2, %v2249_v21  ;;  %v2283_v59 = vmul.f32 0.2, %v2251_v3  ;;  %v2280_v23 = vmul.f32 0.2, %v2248_v39  ;;  %v16179_v20 = vmul.f32 %v16125_v33, %v15897_v50 }
 0x3bf   :  { %v2282_v18 = vmul.f32 0.2, %v16163_v12  ;;  %v2285_v24 = vmul.f32 0.2, %v16166_v31  ;;  %v2287_v36 = vmul.f32 0.2, %v16169_v16  ;;  %v16186_v35 = vmul.f32 %v16125_v33, %v15921_v42 }
 0x3c0   :  { %v2313_v52 = vmax.f32 %v2249_v21, %v2281_v2  ;;  %v2315_v55 = vmax.f32 %v2251_v3, %v2283_v59  ;;  %v2312_v60 = vmax.f32 %v2248_v39, %v2280_v23  ;;  %v2284_v11 = vmul.f32 0.2, %v16172_v22 }
 0x3c1   :  { %v2033_v50 = vmul.f32 %v16188_v51, %v15851_v48  ;;  %v2035_v43 = vmul.f32 %v16188_v51, %v15881_v62  ;;  %v2032_v29 = vmul.f32 %v16188_v51, %v15847_v46  ;;  %v2034_v42 = vmul.f32 %v16188_v51, %v15867_v30 }
 0x3c2   :  { %v2314_v33 = vmax.f32 %v16163_v12, %v2282_v18  ;;  %v2037_v21 = vmul.f32 %v16188_v51, %v15903_v17  ;;  %v2317_v3 = vmax.f32 %v16166_v31, %v2285_v24  ;;  %v2039_v39 = vmul.f32 %v16188_v51, %v15927_v41 }
 0x3c3   :  { %v2149_v48 = vmul.f32 %v16028_v32, %v2033_v50  ;;  %v2151_v62 = vmul.f32 %v16031_v58, %v2035_v43  ;;  %v2148_v2 = vmul.f32 %v16034_v8, %v2032_v29  ;;  %v2150_v46 = vmul.f32 %v16037_v7, %v2034_v42 }
 0x3c4   :  { %v2153_v30 = vmul.f32 %v16040_v56, %v2037_v21  ;;  %v2155_v12 = vmul.f32 %v16043_v19, %v2039_v39  ;;  %v2319_v59 = vmax.f32 %v16169_v16, %v2287_v36  ;;  %v2036_v17 = vmul.f32 %v16188_v51, %v15891_v4 }
 0x3c5   :  { %v2265_v31 = vadd.f32 %v16052_v37, %v2149_v48  ;;  %v2267_v41 = vadd.f32 %v16055_v34, %v2151_v62  ;;  %v2264_v32 = vadd.f32 %v16058_v5, %v2148_v2  ;;  %v2266_v43 = vadd.f32 %v16070_v13, %v2150_v46  ;;  %v16262_v2 = vld [vmem:[#allocation9 + $0xd20] sm:$0xff] }
 0x3c6   :  { %v2269_v58 = vadd.f32 %v16073_v15, %v2153_v30  ;;  %v2271_v8 = vadd.f32 %v16076_v9, %v2155_v12  ;;  %v2152_v7 = vmul.f32 %v16067_v6, %v2036_v17  ;;  %v2316_v56 = vmax.f32 %v16172_v22, %v2284_v11  ;;  %v16281_v17 = vld [vmem:[#allocation9 + $0x8e0] sm:$0xff] }
 0x3c7   :  { %v2297_v19 = vmul.f32 0.2, %v2265_v31  ;;  %v2299_v29 = vmul.f32 0.2, %v2267_v41  ;;  %v2296_v16 = vmul.f32 0.2, %v2264_v32  ;;  %v2038_v4 = vmul.f32 %v16188_v51, %v15915_v27 }
 0x3c8   :  { %v2298_v37 = vmul.f32 0.2, %v2266_v43  ;;  %v2301_v34 = vmul.f32 0.2, %v2269_v58  ;;  %v2303_v23 = vmul.f32 0.2, %v2271_v8  ;;  %v2268_v5 = vadd.f32 %v16091_v63, %v2152_v7 }
 0x3c9   :  { %v2329_v13 = vmax.f32 %v2265_v31, %v2297_v19  ;;  %v2331_v18 = vmax.f32 %v2267_v41, %v2299_v29  ;;  %v2328_v15 = vmax.f32 %v2264_v32, %v2296_v16  ;;  %v2154_v9 = vmul.f32 %v16094_v53, %v2038_v4  ;;  %v16288_v32 = vld [vmem:[#allocation9 + $0xcc0] sm:$0xff]  ;;  %v17097_v16 = vld [vmem:[#allocation40_spill] sm:$0xff] }
 0x3ca   :  { %v2330_v24 = vmax.f32 %v2266_v43, %v2298_v37  ;;  %v2333_v6 = vmax.f32 %v2269_v58, %v2301_v34  ;;  %v2335_v36 = vmax.f32 %v2271_v8, %v2303_v23  ;;  %v2300_v11 = vmul.f32 0.2, %v2268_v5  ;;  %v16290_v43 = vld [vmem:[#allocation9 + $0xce0] sm:$0xff]  ;;  %v17098_v4 = vld [vmem:[#allocation60_spill] sm:$0xff] }
 0x3cb   :  { %v16226_v22 = vpack.c.bf16 %v2329_v13, %v2313_v52  ;;  %v16228_v50 = vpack.c.bf16 %v2331_v18, %v2315_v55  ;;  %v16230_v42 = vpack.c.bf16 %v2328_v15, %v2312_v60  ;;  %v2270_v27 = vadd.f32 %v16097_v54, %v2154_v9  ;;  %v17099_v34 = vld [vmem:[#allocation42_spill] sm:$0xff]  ;;  %v17106_v9 = vld [vmem:[#allocation61_spill] sm:$0xff] }
 0x3cc   :  { %v16233_v21 = vpack.c.bf16 %v2330_v24, %v2314_v33  ;;  %v16235_v63 = vpack.c.bf16 %v2333_v6, %v2317_v3  ;;  %v16237_v39 = vpack.c.bf16 %v2335_v36, %v2319_v59  ;;  %v2332_v48 = vmax.f32 %v2268_v5, %v2300_v11  ;;  %v16279_v59 = vld [vmem:[#allocation9 + $0x8c0] sm:$0xff] }
 0x3cd   :  { %8578 = vmatprep.mubr.bf16.mxu0 %v16226_v22  ;;  %8621 = vmatprep.mubr.bf16.mxu1 %v16228_v50  ;;  %v2286_v53 = vmul.f32 0.2, %v16175_v38  ;;  %v2302_v52 = vmul.f32 0.2, %v2270_v27  ;;  %v2041_v55 = vmul.f32 %v16188_v51, %v15951_v14  ;;  %v2141_v54 = vmul.f32 %v16101_v61, %v16179_v20  ;;  %v16260_v20 = vld [vmem:[#allocation9 + $0xd00] sm:$0xff] }
 0x3ce   :  { %8579 = vmatmul.mubr.bf16.vlgmr.msra.gmra.mxu0 %v16230_v42  ;;  %8622 = vmatmul.mubr.bf16.vlgmr.msra.gmra.mxu1 %v16233_v21  ;;  %v16248_v33 = vpack.c.bf16 %v2332_v48, %v2316_v56  ;;  %v2043_v60 = vmul.f32 %v16188_v51, %v15975_v0  ;;  %v2143_v3 = vmul.f32 %v16111_v25, %v16186_v35  ;;  %v17093_v35 = vld [vmem:[#allocation67_spill] sm:$0xff] }
 0x3cf   :  { %v17089_v62 = vcombine.low %v16011_v1, %v16013_v26  ;;  %v17090_v14 = vcombine.low %v16015_v28, %v16021_v44  ;;  %v2318_v46 = vmax.f32 %v16175_v38, %v2286_v53  ;;  %v2334_v30 = vmax.f32 %v2270_v27, %v2302_v52  ;;  %8664 = vmatprep.mubr.bf16.mxu0 %v16235_v63  ;;  %v17101_v5 = vld [vmem:[#allocation63_spill] sm:$0xff] }
 0x3d0   :  { %v2157_v0 = vmul.f32 %v16101_v61, %v2041_v55  ;;  %8707 = vmatprep.mubr.bf16.mxu1 %v16237_v39  ;;  %v2257_v1 = vadd.f32 %v16107_v49, %v2141_v54  ;;  %v2159_v26 = vmul.f32 %v16111_v25, %v2043_v60  ;;  %v2259_v28 = vadd.f32 %v16115_v57, %v2143_v3  ;;  %v17094_v61 = vld [vmem:[#allocation66_spill] sm:$0xff] }
 0x3d1   :  { %8633 = vmatpush1.bf16.msra.mxu0 %v17089_v62  ;;  %8676 = vmatpush1.bf16.msra.mxu1 %v17090_v14  ;;  %v17091_v44 = vcombine.high %v16045_v10, %v16060_v47  ;;  %v17092_v38 = vcombine.high %v16062_v40, %v16064_v45  ;;  %v13443_v12 = vcombine.high %v17094_v61, %v17093_v35  ;;  %v16319_v36 = vld [vmem:[#allocation9 + $0x880] sm:$0xff] }
 0x3d2   :  { %v16283_v31 = vpack.c.bf16 %v2334_v30, %v2318_v46  ;;  %v2273_v25 = vadd.f32 %v16107_v49, %v2157_v0  ;;  %v13570_v41 = vcombine.low %v16260_v20, %v16262_v2  ;;  %v2289_v58 = vmul.f32 0.2, %v2257_v1  ;;  %v16321_v11 = vld [vmem:[#allocation9 + $0x8a0] sm:$0xff] }
 0x3d3   :  { %8634 = vmatprep.subr.bf16.mxu0 %v17091_v44  ;;  %8677 = vmatprep.subr.bf16.mxu1 %v17092_v38  ;;  %v2275_v8 = vadd.f32 %v16115_v57, %v2159_v26  ;;  %v2291_v7 = vmul.f32 0.2, %v2259_v28  ;;  %v17095_v56 = vcombine.low %v16045_v10, %v16060_v47  ;;  %v17096_v19 = vcombine.low %v16062_v40, %v16064_v45  ;;  %v17100_v57 = vld [vmem:[#allocation62_spill] sm:$0xff]  ;;  %v17103_v10 = vld [vmem:[#allocation64_spill] sm:$0xff]  ;;  %v17104_v47 = vld [vmem:[#allocation65_spill] sm:$0xff] }
 0x3d4   :  { %v13571_v49 = vcombine.high %v16260_v20, %v16262_v2  ;;  %v2305_v29 = vmul.f32 0.2, %v2273_v25  ;;  %v2087_v37 = vrot.slane %v17098_v4, %v17097_v16  ;;  %v2095_v23 = vrot.slane %v17098_v4, %v17099_v34  ;;  %v16323_v27 = vld [vmem:[#allocation9 + $0xc80] sm:$0xff]  ;;  %v17107_v20 = vld [vmem:[#allocation45_spill] sm:$0xff] }
 0x3d5   :  { %8635 = vmatpush1.bf16.msra.mxu0 %v17095_v56  ;;  %8678 = vmatpush1.bf16.msra.mxu1 %v17096_v19  ;;  %v17102_v13 = vcombine.high %v17100_v57, %v17101_v5  ;;  %v17105_v18 = vcombine.high %v17103_v10, %v17104_v47  ;;  %v13434_v40 = vcombine.low %v16279_v59, %v16281_v17  ;;  %v2307_v15 = vmul.f32 0.2, %v2275_v8  ;;  %v16329_v54 = vld [vmem:[#allocation9 + $0xca0] sm:$0xff]  ;;  %v17111_v56 = vld [vmem:[#allocation48_spill] sm:$0xff] }
 0x3d6   :  { %v13435_v45 = vcombine.high %v16279_v59, %v16281_v17  ;;  %v2203_v24 = vrot.slane %v17106_v9, %v17097_v16  ;;  %v13562_v6 = vcombine.low %v16288_v32, %v16290_v43  ;;  %v2321_v48 = vmax.f32 %v2257_v1, %v2289_v58  ;;  %v16331_v60 = vld [vmem:[#allocation9 + $0x840] sm:$0xff]  ;;  %v17112_v19 = vld [vmem:[#allocation68_spill] sm:$0xff] }
 0x3d7   :  { %8636 = vmatprep.subr.bf16.mxu0 %v17102_v13  ;;  %8679 = vmatprep.subr.bf16.mxu1 %v17105_v18  ;;  %v2337_v53 = vmax.f32 %v2273_v25, %v2305_v29  ;;  %v2211_v52 = vrot.slane %v17106_v9, %v17099_v34  ;;  %v13563_v55 = vcombine.high %v16288_v32, %v16290_v43  ;;  %v16333_v3 = vld [vmem:[#allocation9 + $0x860] sm:$0xff] }
 0x3d8   :  { %v2323_v62 = vmax.f32 %v2259_v28, %v2291_v7  ;;  %v2339_v14 = vmax.f32 %v2275_v8, %v2307_v15  ;;  %v2107_v2 = vrot.slane %v17098_v4, %v17107_v20  ;;  %v17108_v46 = vcombine.low %v17100_v57, %v17101_v5  ;;  %v17110_v26 = vld [vmem:[#allocation47_spill] sm:$0xff]  ;;  %v17114_v5 = vld [vmem:[#allocation49_spill] sm:$0xff] }
 0x3d9   :  { %v17109_v30 = vcombine.low %v17103_v10, %v17104_v47  ;;  %v16343_v0 = vpack.c.bf16 %v2337_v53, %v2321_v48  ;;  %v2223_v1 = vrot.slane %v17106_v9, %v17107_v20  ;;  %v2115_v28 = vrot.slane %v17098_v4, %v17110_v26  ;;  %v16353_v59 = vld [vmem:[#allocation9 + $0xc40] sm:$0xff] }
 0x3da   :  { %8637 = vmatpush1.bf16.msra.mxu0 %v17108_v46  ;;  %v13426_v44 = vcombine.low %v16319_v36, %v16321_v11  ;;  %v13427_v38 = vcombine.high %v16319_v36, %v16321_v11  ;;  %v16355_v17 = vld [vmem:[#allocation9 + $0xc60] sm:$0xff]  ;;  %v16357_v25 = vpack.c.bf16 %v2339_v14, %v2323_v62  ;;  %v13554_v32 = vcombine.low %v16323_v27, %v16329_v54  ;;  %v17118_v62 = vld [vmem:[#allocation57_spill] sm:$0xff] }
 0x3db   :  { %8680 = vmatpush1.bf16.msra.mxu1 %v17109_v30  ;;  %8638 = vmatprep.subr.bf16.mxu0 %v13443_v12  ;;  %v13555_v43 = vcombine.high %v16323_v27, %v16329_v54  ;;  %v13418_v12 = vcombine.low %v16331_v60, %v16333_v3  ;;  %v2231_v58 = vrot.slane %v17106_v9, %v17110_v26  ;;  %v16367_v8 = vld [vmem:[#allocation9 + $0x800] sm:$0xff] }
 0x3dc   :  { %8681 = vmatprep.subr.bf16.mxu1 %v13571_v49  ;;  %v16369_v7 = vld [vmem:[#allocation9 + $0x820] sm:$0xff]  ;;  %v2024_v49 = vmul.f32 %v17112_v19, %v17111_v56  ;;  %v2026_v13 = vmul.f32 %v17112_v19, %v17114_v5  ;;  %v17116_v18 = vcombine.low %v17094_v61, %v17093_v35  ;;  %v13419_v15 = vcombine.high %v16331_v60, %v16333_v3  ;;  %v17117_v61 = vld [vmem:[#allocation52_spill] sm:$0xff] }
 0x3dd   :  { %v17113_v29 = vld [vmem:[#allocation51_spill] sm:$0xff]  ;;  %v17115_v10 = vld [vmem:[#allocation54_spill] sm:$0xff]  ;;  %v13546_v36 = vcombine.low %v16353_v59, %v16355_v17  ;;  %v13547_v11 = vcombine.high %v16353_v59, %v16355_v17  ;;  %v13411_v54 = vcombine.high %v16367_v8, %v16369_v7  ;;  %v2045_v14 = vmul.f32 %v16188_v51, %v17118_v62 }
 0x3de   :  { %v2040_v57 = vmul.f32 %v16188_v51, %v17113_v29  ;;  %v2042_v47 = vmul.f32 %v16188_v51, %v17115_v10  ;;  %8639 = vmatpush1.bf16.msra.mxu0 %v17116_v18  ;;  %v2140_v27 = vmul.f32 %v2087_v37, %v2024_v49  ;;  %v2142_v53 = vmul.f32 %v2095_v23, %v2026_v13  ;;  %v17119_v29 = vld [vmem:[#allocation55_spill] sm:$0xff] }
 0x3df   :  { %8682 = vmatpush1.bf16.msra.mxu1 %v13570_v41  ;;  %8640 = vmatprep.subr.bf16.mxu0 %v13435_v45  ;;  %v2029_v41 = vmul.f32 %v17112_v19, %v17117_v61  ;;  %v2031_v45 = vmul.f32 %v17112_v19, %v17119_v29  ;;  %v2161_v59 = vmul.f32 %v2107_v2, %v2045_v14  ;;  %v2744_v13 = vld [vmem:[#allocation9 + $0xc00] sm:$0xff] }
 0x3e0   :  { %8683 = vmatprep.subr.bf16.mxu1 %v13563_v55  ;;  %v2156_v48 = vmul.f32 %v2087_v37, %v2040_v57  ;;  %v2158_v35 = vmul.f32 %v2095_v23, %v2042_v47  ;;  %v2256_v46 = vadd.f32 %v2203_v24, %v2140_v27  ;;  %v2258_v56 = vadd.f32 %v2211_v52, %v2142_v53  ;;  %v17120_v57 = vld [vmem:[#allocation59_spill] sm:$0xff] }
 0x3e1   :  { %v2145_v55 = vmul.f32 %v2107_v2, %v2029_v41  ;;  %v2047_v5 = vmul.f32 %v16188_v51, %v17120_v57  ;;  %v2748_v10 = vld [vmem:[#allocation9 + $0xc20] sm:$0xff]  ;;  %v2277_v18 = vadd.f32 %v2223_v1, %v2161_v59  ;;  %v2147_v27 = vmul.f32 %v2115_v28, %v2031_v45 }
 0x3e2   :  { %v2272_v30 = vadd.f32 %v2203_v24, %v2156_v48  ;;  %8641 = vmatpush1.bf16.msra.mxu0 %v13434_v40  ;;  %v2274_v37 = vadd.f32 %v2211_v52, %v2158_v35  ;;  %v2288_v23 = vmul.f32 0.2, %v2256_v46  ;;  %v2290_v49 = vmul.f32 0.2, %v2258_v56  ;;  %v2736_v61 = vld [vmem:[#allocation9 + $0xbc0] sm:$0xff] }
 0x3e3   :  { %8684 = vmatpush1.bf16.msra.mxu1 %v13562_v6  ;;  %8642 = vmatprep.subr.bf16.mxu0 %v13427_v38  ;;  %v2261_v47 = vadd.f32 %v2223_v1, %v2145_v55  ;;  %v2163_v52 = vmul.f32 %v2115_v28, %v2047_v5  ;;  %v2263_v53 = vadd.f32 %v2231_v58, %v2147_v27  ;;  %v2740_v41 = vld [vmem:[#allocation9 + $0xbe0] sm:$0xff] }
 0x3e4   :  { %8685 = vmatprep.subr.bf16.mxu1 %v13555_v43  ;;  %v2304_v17 = vmul.f32 0.2, %v2272_v30  ;;  %v2306_v24 = vmul.f32 0.2, %v2274_v37  ;;  %v2320_v48 = vmax.f32 %v2256_v46, %v2288_v23  ;;  %v2322_v6 = vmax.f32 %v2258_v56, %v2290_v49  ;;  %v2864_v1 = vld [vmem:[#allocation9 + $0xfc0] sm:$0xff] }
 0x3e5   :  { %v2293_v38 = vmul.f32 0.2, %v2261_v47  ;;  %v2309_v43 = vmul.f32 0.2, %v2277_v18  ;;  %v13539_v35 = vcombine.high %v2744_v13, %v2748_v10  ;;  %v2279_v14 = vadd.f32 %v2231_v58, %v2163_v52  ;;  %v2868_v29 = vld [vmem:[#allocation9 + $0xfe0] sm:$0xff] }
 0x3e6   :  { %v2336_v40 = vmax.f32 %v2272_v30, %v2304_v17  ;;  %8643 = vmatpush1.bf16.msra.mxu0 %v13426_v44  ;;  %v2338_v2 = vmax.f32 %v2274_v37, %v2306_v24  ;;  %v2295_v44 = vmul.f32 0.2, %v2263_v53  ;;  %v13659_v58 = vcombine.high %v2864_v1, %v2868_v29  ;;  %v2728_v37 = vld [vmem:[#allocation9 + $0xb80] sm:$0xff]  ;;  %v17121_v24 = vld [vmem:[#allocation44_spill] sm:$0xff] }
 0x3e7   :  { %8686 = vmatpush1.bf16.msra.mxu1 %v13554_v32  ;;  %8644 = vmatprep.subr.bf16.mxu0 %v13419_v15  ;;  %v2325_v30 = vmax.f32 %v2261_v47, %v2293_v38  ;;  %v2341_v28 = vmax.f32 %v2277_v18, %v2309_v43  ;;  %v13410_v32 = vcombine.low %v16367_v8, %v16369_v7  ;;  %v2311_v56 = vmul.f32 0.2, %v2279_v14  ;;  %v2732_v23 = vld [vmem:[#allocation9 + $0xba0] sm:$0xff] }
 0x3e8   :  { %8687 = vmatprep.subr.bf16.mxu1 %v13547_v11  ;;  %v16398_v62 = vpack.c.bf16 %v2336_v40, %v2320_v48  ;;  %v16400_v46 = vpack.c.bf16 %v2338_v2, %v2322_v6  ;;  %v13538_v15 = vcombine.low %v2744_v13, %v2748_v10  ;;  %v13531_v11 = vcombine.high %v2736_v61, %v2740_v41  ;;  %v2856_v17 = vld [vmem:[#allocation9 + $0xf80] sm:$0xff] }
 0x3e9   :  { %v16407_v45 = vpack.c.bf16 %v2341_v28, %v2325_v30  ;;  %v2327_v55 = vmax.f32 %v2263_v53, %v2295_v44  ;;  %v2343_v59 = vmax.f32 %v2279_v14, %v2311_v56  ;;  %v2860_v49 = vld [vmem:[#allocation9 + $0xfa0] sm:$0xff]  ;;  %v13530_v60 = vcombine.low %v2736_v61, %v2740_v41  ;;  %v17124_v53 = vld [vmem:[#allocation56_spill] sm:$0xff]  ;;  %v17125_v14 = vld [vmem:[#allocation53_spill] sm:$0xff] }
 0x3ea   :  { %8645 = vmatpush1.bf16.msra.mxu0 %v13418_v12  ;;  %v13658_v3 = vcombine.low %v2864_v1, %v2868_v29  ;;  %v13523_v12 = vcombine.high %v2728_v37, %v2732_v23  ;;  %v13651_v7 = vcombine.high %v2856_v17, %v2860_v49  ;;  %v2848_v57 = vld [vmem:[#allocation9 + $0xf40] sm:$0xff]  ;;  %v13522_v13 = vcombine.low %v2728_v37, %v2732_v23 }
 0x3eb   :  { %8688 = vmatpush1.bf16.msra.mxu1 %v13546_v36  ;;  %8646 = vmatprep.subr.bf16.mxu0 %v13411_v54  ;;  %v16409_v8 = vpack.c.bf16 %v2343_v59, %v2327_v55  ;;  %v2720_v36 = vld [vmem:[#allocation9 + $0xb40] sm:$0xff]  ;;  %v13650_v10 = vcombine.low %v2856_v17, %v2860_v49  ;;  %v2103_v47 = vrot.slane %v17098_v4, %v17121_v24 }
 0x3ec   :  { %8689 = vmatprep.subr.bf16.mxu1 %v13539_v35  ;;  %v2724_v54 = vld [vmem:[#allocation9 + $0xb60] sm:$0xff]  ;;  %v2219_v27 = vrot.slane %v17106_v9, %v17121_v24  ;;  %v2044_v35 = vmul.f32 %v16188_v51, %v17124_v53  ;;  %v2030_v1 = vmul.f32 %v17112_v19, %v17125_v14 }
 0x3ed   :  { %v2852_v5 = vld [vmem:[#allocation9 + $0xf60] sm:$0xff]  ;;  %v13515_v18 = vcombine.high %v2720_v36, %v2724_v54  ;;  %v13514_v28 = vcombine.low %v2720_v36, %v2724_v54 }
 0x3ee   :  { %8647 = vmatpush1.bf16.msra.mxu0 %v13410_v32  ;;  %v17122_v48 = vld [vmem:[#allocation46_spill] sm:$0xff]  ;;  %v13643_v6 = vcombine.high %v2848_v57, %v2852_v5  ;;  %v13642_v44 = vcombine.low %v2848_v57, %v2852_v5  ;;  %v2160_v56 = vmul.f32 %v2103_v47, %v2044_v35 }
 0x3ef   :  { %8690 = vmatpush1.bf16.msra.mxu1 %v13538_v15  ;;  %8648 = vmatprep.subr.bf16.mxu0 %v13531_v11  ;;  %v2111_v40 = vrot.slane %v17098_v4, %v17122_v48  ;;  %v2712_v52 = vld [vmem:[#allocation9 + $0xb00] sm:$0xff]  ;;  %v2227_v4 = vrot.slane %v17106_v9, %v17122_v48 }
 0x3f0   :  { %8691 = vmatprep.subr.bf16.mxu1 %v13659_v58  ;;  %v2716_v2 = vld [vmem:[#allocation9 + $0xb20] sm:$0xff]  ;;  %v2276_v23 = vadd.f32 %v2219_v27, %v2160_v56 }
 0x3f1   :  { %v17123_v38 = vld [vmem:[#allocation50_spill] sm:$0xff]  ;;  %v13507_v15 = vcombine.high %v2712_v52, %v2716_v2  ;;  %v2146_v11 = vmul.f32 %v2111_v40, %v2030_v1 }
 0x3f2   :  { %8649 = vmatpush2.bf16.msra.mxu0 %v13530_v60  ;;  %v2028_v43 = vmul.f32 %v17112_v19, %v17123_v38  ;;  %v2840_v61 = vld [vmem:[#allocation9 + $0xf00] sm:$0xff]  ;;  %v13506_v60 = vcombine.low %v2712_v52, %v2716_v2 }
 0x3f3   :  { %8692 = vmatpush2.bf16.msra.mxu1 %v13658_v3  ;;  %8650 = vmatprep.subr.bf16.mxu0 %v13523_v12  ;;  %v2844_v41 = vld [vmem:[#allocation9 + $0xf20] sm:$0xff]  ;;  %v2262_v49 = vadd.f32 %v2227_v4, %v2146_v11  ;;  %v2308_v12 = vmul.f32 0.2, %v2276_v23 }
 0x3f4   :  { %8693 = vmatprep.subr.bf16.mxu1 %v13651_v7  ;;  %v17126_v29 = vld [vmem:[#allocation58_spill] sm:$0xff]  ;;  %v2144_v32 = vmul.f32 %v2103_v47, %v2028_v43  ;;  %v13635_v37 = vcombine.high %v2840_v61, %v2844_v41  ;;  %v13634_v7 = vcombine.low %v2840_v61, %v2844_v41 }
 0x3f5   :  { %v2046_v30 = vmul.f32 %v16188_v51, %v17126_v29  ;;  %v2704_v55 = vld [vmem:[#allocation9 + $0xac0] sm:$0xff]  ;;  %v2294_v54 = vmul.f32 0.2, %v2262_v49  ;;  %v2340_v47 = vmax.f32 %v2276_v23, %v2308_v12 }
 0x3f6   :  { %8651 = vmatpush2.bf16.msra.mxu0 %v13522_v13  ;;  %v2708_v19 = vld [vmem:[#allocation9 + $0xae0] sm:$0xff]  ;;  %v2260_v59 = vadd.f32 %v2219_v27, %v2144_v32 }
 0x3f7   :  { %8694 = vmatpush2.bf16.msra.mxu1 %v13650_v10  ;;  %v2162_v58 = vmul.f32 %v2111_v40, %v2046_v30  ;;  %8652 = vmatprep.subr.bf16.mxu0 %v13515_v18  ;;  %v2832_v51 = vld [vmem:[#allocation9 + $0xec0] sm:$0xff]  ;;  %v13499_v36 = vcombine.high %v2704_v55, %v2708_v19  ;;  %v13498_v2 = vcombine.low %v2704_v55, %v2708_v19 }
 0x3f8   :  { %8695 = vmatprep.subr.bf16.mxu1 %v13643_v6  ;;  %v2836_v17 = vld [vmem:[#allocation9 + $0xee0] sm:$0xff]  ;;  %v2292_v3 = vmul.f32 0.2, %v2260_v59  ;;  %v2326_v6 = vmax.f32 %v2262_v49, %v2294_v54 }
 0x3f9   :  { %v2278_v9 = vadd.f32 %v2227_v4, %v2162_v58  ;;  %v13627_v5 = vcombine.high %v2832_v51, %v2836_v17  ;;  %v2696_v13 = vld [vmem:[#allocation9 + $0xa80] sm:$0xff]  ;;  %v13626_v43 = vcombine.low %v2832_v51, %v2836_v17 }
 0x3fa   :  { %8653 = vmatpush2.bf16.msra.mxu0 %v13514_v28  ;;  %v2324_v10 = vmax.f32 %v2260_v59, %v2292_v3  ;;  %v2700_v18 = vld [vmem:[#allocation9 + $0xaa0] sm:$0xff] }
 0x3fb   :  { %8696 = vmatpush2.bf16.msra.mxu1 %v13642_v44  ;;  %v2310_v57 = vmul.f32 0.2, %v2278_v9  ;;  %8654 = vmatprep.subr.bf16.mxu0 %v13507_v15  ;;  %v2824_v27 = vld [vmem:[#allocation9 + $0xe80] sm:$0xff]  ;;  %v13491_v35 = vcombine.high %v2696_v13, %v2700_v18  ;;  %v13490_v30 = vcombine.low %v2696_v13, %v2700_v18 }
 0x3fc   :  { %8697 = vmatprep.subr.bf16.mxu1 %v13635_v37  ;;  %v2828_v40 = vld [vmem:[#allocation9 + $0xea0] sm:$0xff]  ;;  %v16427_v52 = vpack.c.bf16 %v2340_v47, %v2324_v10 }
 0x3fd   :  { %v2342_v38 = vmax.f32 %v2278_v9, %v2310_v57  ;;  %v13619_v61 = vcombine.high %v2824_v27, %v2828_v40  ;;  %v2688_v41 = vld [vmem:[#allocation9 + $0xa40] sm:$0xff]  ;;  %v13618_v4 = vcombine.low %v2824_v27, %v2828_v40 }
 0x3fe   :  { %8655 = vmatpush2.bf16.msra.mxu0 %v13506_v60  ;;  %v2692_v14 = vld [vmem:[#allocation9 + $0xa60] sm:$0xff] }
 0x3ff   :  { %8698 = vmatpush2.bf16.msra.mxu1 %v13634_v7  ;;  %v16429_v53 = vpack.c.bf16 %v2342_v38, %v2326_v6  ;;  %8656 = vmatprep.subr.bf16.mxu0 %v13499_v36  ;;  %v2816_v1 = vld [vmem:[#allocation9 + $0xe40] sm:$0xff]  ;;  %v13483_v28 = vcombine.high %v2688_v41, %v2692_v14  ;;  %v13482_v58 = vcombine.low %v2688_v41, %v2692_v14 }
 0x400   :  { %8699 = vmatprep.subr.bf16.mxu1 %v13627_v5  ;;  %v2820_v29 = vld [vmem:[#allocation9 + $0xe60] sm:$0xff] }
 0x401   :  { %v13611_v44 = vcombine.high %v2816_v1, %v2820_v29  ;;  %v2680_v32 = vld [vmem:[#allocation9 + $0xa00] sm:$0xff]  ;;  %v13610_v37 = vcombine.low %v2816_v1, %v2820_v29 }
 0x402   :  { %8657 = vmatpush2.bf16.msra.mxu0 %v13498_v2  ;;  %v2684_v56 = vld [vmem:[#allocation9 + $0xa20] sm:$0xff] }
 0x403   :  { %8700 = vmatpush2.bf16.msra.mxu1 %v13626_v43  ;;  %8658 = vmatprep.subr.bf16.mxu0 %v13491_v35  ;;  %v2808_v15 = vld [vmem:[#allocation9 + $0xe00] sm:$0xff]  ;;  %v13475_v55 = vcombine.high %v2680_v32, %v2684_v56  ;;  %v13474_v49 = vcombine.low %v2680_v32, %v2684_v56 }
 0x404   :  { %8701 = vmatprep.subr.bf16.mxu1 %v13619_v61  ;;  %v2812_v11 = vld [vmem:[#allocation9 + $0xe20] sm:$0xff] }
 0x405   :  { %v13603_v19 = vcombine.high %v2808_v15, %v2812_v11  ;;  %v2928_v59 = vld [vmem:[#allocation9 + $0x11c0] sm:$0xff]  ;;  %v13602_v9 = vcombine.low %v2808_v15, %v2812_v11 }
 0x406   :  { %8659 = vmatpush2.bf16.msra.mxu0 %v13490_v30  ;;  %v2932_v23 = vld [vmem:[#allocation9 + $0x11e0] sm:$0xff] }
 0x407   :  { %8702 = vmatpush2.bf16.msra.mxu1 %v13618_v4  ;;  %8660 = vmatprep.subr.bf16.mxu0 %v13483_v28  ;;  %v3056_v51 = vld [vmem:[#allocation9 + $0x15c0] sm:$0xff]  ;;  %v13723_v60 = vcombine.high %v2928_v59, %v2932_v23  ;;  %v13722_v57 = vcombine.low %v2928_v59, %v2932_v23 }
 0x408   :  { %8703 = vmatprep.subr.bf16.mxu1 %v13611_v44  ;;  %v3060_v17 = vld [vmem:[#allocation9 + $0x15e0] sm:$0xff] }
 0x409   :  { %v13851_v3 = vcombine.high %v3056_v51, %v3060_v17  ;;  %v2920_v12 = vld [vmem:[#allocation9 + $0x1180] sm:$0xff]  ;;  %v13850_v5 = vcombine.low %v3056_v51, %v3060_v17 }
 0x40a   :  { %8661 = vmatpush2.bf16.msra.mxu0 %v13482_v58  ;;  %v2924_v7 = vld [vmem:[#allocation9 + $0x11a0] sm:$0xff] }
 0x40b   :  { %8704 = vmatpush2.bf16.msra.mxu1 %v13610_v37  ;;  %8662 = vmatprep.subr.bf16.mxu0 %v13475_v55  ;;  %v3048_v36 = vld [vmem:[#allocation9 + $0x1580] sm:$0xff]  ;;  %v13715_v13 = vcombine.high %v2920_v12, %v2924_v7  ;;  %v13714_v6 = vcombine.low %v2920_v12, %v2924_v7 }
 0x40c   :  { %8705 = vmatprep.subr.bf16.mxu1 %v13603_v19  ;;  %v3052_v54 = vld [vmem:[#allocation9 + $0x15a0] sm:$0xff] }
 0x40d   :  { %v13843_v10 = vcombine.high %v3048_v36, %v3052_v54  ;;  %v2912_v47 = vld [vmem:[#allocation9 + $0x1140] sm:$0xff]  ;;  %v13842_v38 = vcombine.low %v3048_v36, %v3052_v54 }
 0x40e   :  { %8663 = vmatpush2.bf16.msra.mxu0 %v13474_v49  ;;  %v2916_v18 = vld [vmem:[#allocation9 + $0x1160] sm:$0xff] }
 0x40f   :  { %8706 = vmatpush2.bf16.msra.mxu1 %v13602_v9  ;;  %8718 = vmatprep.subr.bf16.mxu0 %v13723_v60  ;;  %v3040_v27 = vld [vmem:[#allocation9 + $0x1540] sm:$0xff]  ;;  %v13707_v2 = vcombine.high %v2912_v47, %v2916_v18  ;;  %v13706_v1 = vcombine.low %v2912_v47, %v2916_v18 }
 0x410   :  { %8761 = vmatprep.subr.bf16.mxu1 %v13851_v3  ;;  %v3044_v40 = vld [vmem:[#allocation9 + $0x1560] sm:$0xff] }
 0x411   :  { %8665 = vmatmul.mubr.bf16.vlgmr.msra.gmra.mxu0 %v16248_v33  ;;  %v13835_v43 = vcombine.high %v3040_v27, %v3044_v40  ;;  %v2904_v35 = vld [vmem:[#allocation9 + $0x1100] sm:$0xff]  ;;  %v13834_v29 = vcombine.low %v3040_v27, %v3044_v40 }
 0x412   :  { %8708 = vmatmul.mubr.bf16.vlgmr.msra.gmra.mxu1 %v16283_v31  ;;  %8719 = vmatpush1.bf16.msra.mxu0 %v13722_v57  ;;  %v2908_v61 = vld [vmem:[#allocation9 + $0x1120] sm:$0xff] }
 0x413   :  { %8750 = vmatprep.mubr.bf16.mxu0 %v16343_v0  ;;  %8762 = vmatpush1.bf16.msra.mxu1 %v13850_v5  ;;  %v3032_v41 = vld [vmem:[#allocation9 + $0x1500] sm:$0xff]  ;;  %v13699_v30 = vcombine.high %v2904_v35, %v2908_v61  ;;  %v13698_v15 = vcombine.low %v2904_v35, %v2908_v61 }
 0x414   :  { %8793 = vmatprep.mubr.bf16.mxu1 %v16357_v25  ;;  %8720 = vmatprep.subr.bf16.mxu0 %v13715_v13  ;;  %v3036_v14 = vld [vmem:[#allocation9 + $0x1520] sm:$0xff] }
 0x415   :  { %8763 = vmatprep.subr.bf16.mxu1 %v13843_v10  ;;  %v13827_v4 = vcombine.high %v3032_v41, %v3036_v14  ;;  %v2896_v28 = vld [vmem:[#allocation9 + $0x10c0] sm:$0xff]  ;;  %v13826_v11 = vcombine.low %v3032_v41, %v3036_v14 }
 0x416   :  { %8721 = vmatpush1.bf16.msra.mxu0 %v13714_v6  ;;  %v2900_v44 = vld [vmem:[#allocation9 + $0x10e0] sm:$0xff] }
 0x417   :  { %8764 = vmatpush1.bf16.msra.mxu1 %v13842_v38  ;;  %8722 = vmatprep.subr.bf16.mxu0 %v13707_v2  ;;  %v3024_v32 = vld [vmem:[#allocation9 + $0x14c0] sm:$0xff]  ;;  %v13691_v58 = vcombine.high %v2896_v28, %v2900_v44  ;;  %v13690_v51 = vcombine.low %v2896_v28, %v2900_v44 }
 0x418   :  { %8765 = vmatprep.subr.bf16.mxu1 %v13835_v43  ;;  %v3028_v56 = vld [vmem:[#allocation9 + $0x14e0] sm:$0xff] }
 0x419   :  { %v13819_v37 = vcombine.high %v3024_v32, %v3028_v56  ;;  %v2888_v55 = vld [vmem:[#allocation9 + $0x1080] sm:$0xff]  ;;  %v13818_v17 = vcombine.low %v3024_v32, %v3028_v56 }
 0x41a   :  { %8723 = vmatpush1.bf16.msra.mxu0 %v13706_v1  ;;  %v2892_v19 = vld [vmem:[#allocation9 + $0x10a0] sm:$0xff] }
 0x41b   :  { %8766 = vmatpush1.bf16.msra.mxu1 %v13834_v29  ;;  %8724 = vmatprep.subr.bf16.mxu0 %v13699_v30  ;;  %v3016_v59 = vld [vmem:[#allocation9 + $0x1480] sm:$0xff]  ;;  %v13683_v49 = vcombine.high %v2888_v55, %v2892_v19  ;;  %v13682_v36 = vcombine.low %v2888_v55, %v2892_v19 }
 0x41c   :  { %8767 = vmatprep.subr.bf16.mxu1 %v13827_v4  ;;  %v3020_v23 = vld [vmem:[#allocation9 + $0x14a0] sm:$0xff] }
 0x41d   :  { %v13811_v9 = vcombine.high %v3016_v59, %v3020_v23  ;;  %v2880_v60 = vld [vmem:[#allocation9 + $0x1040] sm:$0xff]  ;;  %v13810_v54 = vcombine.low %v3016_v59, %v3020_v23 }
 0x41e   :  { %8725 = vmatpush1.bf16.msra.mxu0 %v13698_v15  ;;  %v2884_v3 = vld [vmem:[#allocation9 + $0x1060] sm:$0xff] }
 0x41f   :  { %8768 = vmatpush1.bf16.msra.mxu1 %v13826_v11  ;;  %8726 = vmatprep.subr.bf16.mxu0 %v13691_v58  ;;  %v3008_v12 = vld [vmem:[#allocation9 + $0x1440] sm:$0xff]  ;;  %v13675_v57 = vcombine.high %v2880_v60, %v2884_v3  ;;  %v13674_v27 = vcombine.low %v2880_v60, %v2884_v3 }
 0x420   :  { %8769 = vmatprep.subr.bf16.mxu1 %v13819_v37  ;;  %v3012_v7 = vld [vmem:[#allocation9 + $0x1460] sm:$0xff] }
 0x421   :  { %v13803_v5 = vcombine.high %v3008_v12, %v3012_v7  ;;  %v2872_v13 = vld [vmem:[#allocation9 + $0x1000] sm:$0xff]  ;;  %v13802_v40 = vcombine.low %v3008_v12, %v3012_v7 }
 0x422   :  { %8727 = vmatpush1.bf16.msra.mxu0 %v13690_v51  ;;  %v2876_v10 = vld [vmem:[#allocation9 + $0x1020] sm:$0xff] }
 0x423   :  { %8770 = vmatpush1.bf16.msra.mxu1 %v13818_v17  ;;  %8728 = vmatprep.subr.bf16.mxu0 %v13683_v49  ;;  %v3000_v47 = vld [vmem:[#allocation9 + $0x1400] sm:$0xff]  ;;  %v13667_v6 = vcombine.high %v2872_v13, %v2876_v10  ;;  %v13666_v41 = vcombine.low %v2872_v13, %v2876_v10 }
 0x424   :  { %8771 = vmatprep.subr.bf16.mxu1 %v13811_v9  ;;  %v3004_v18 = vld [vmem:[#allocation9 + $0x1420] sm:$0xff] }
 0x425   :  { %v13795_v38 = vcombine.high %v3000_v47, %v3004_v18  ;;  %v2992_v2 = vld [vmem:[#allocation9 + $0x13c0] sm:$0xff]  ;;  %v13794_v14 = vcombine.low %v3000_v47, %v3004_v18 }
 0x426   :  { %8729 = vmatpush1.bf16.msra.mxu0 %v13682_v36  ;;  %v2996_v43 = vld [vmem:[#allocation9 + $0x13e0] sm:$0xff] }
 0x427   :  { %8772 = vmatpush1.bf16.msra.mxu1 %v13810_v54  ;;  %8730 = vmatprep.subr.bf16.mxu0 %v13675_v57  ;;  %v3120_v35 = vld [vmem:[#allocation9 + $0x17c0] sm:$0xff]  ;;  %v13787_v1 = vcombine.high %v2992_v2, %v2996_v43  ;;  %v13786_v32 = vcombine.low %v2992_v2, %v2996_v43 }
 0x428   :  { %8773 = vmatprep.subr.bf16.mxu1 %v13803_v5  ;;  %v3124_v61 = vld [vmem:[#allocation9 + $0x17e0] sm:$0xff] }
 0x429   :  { %v13915_v29 = vcombine.high %v3120_v35, %v3124_v61  ;;  %v2984_v30 = vld [vmem:[#allocation9 + $0x1380] sm:$0xff]  ;;  %v13914_v56 = vcombine.low %v3120_v35, %v3124_v61 }
 0x42a   :  { %8731 = vmatpush1.bf16.msra.mxu0 %v13674_v27  ;;  %v2988_v4 = vld [vmem:[#allocation9 + $0x13a0] sm:$0xff] }
 0x42b   :  { %8774 = vmatpush1.bf16.msra.mxu1 %v13802_v40  ;;  %8732 = vmatprep.subr.bf16.mxu0 %v13667_v6  ;;  %v3112_v28 = vld [vmem:[#allocation9 + $0x1780] sm:$0xff]  ;;  %v13779_v15 = vcombine.high %v2984_v30, %v2988_v4  ;;  %v13778_v59 = vcombine.low %v2984_v30, %v2988_v4 }
 0x42c   :  { %8775 = vmatprep.subr.bf16.mxu1 %v13795_v38  ;;  %v3116_v44 = vld [vmem:[#allocation9 + $0x17a0] sm:$0xff] }
 0x42d   :  { %v13907_v11 = vcombine.high %v3112_v28, %v3116_v44  ;;  %v2976_v58 = vld [vmem:[#allocation9 + $0x1340] sm:$0xff]  ;;  %v13906_v23 = vcombine.low %v3112_v28, %v3116_v44 }
 0x42e   :  { %8733 = vmatpush1.bf16.msra.mxu0 %v13666_v41  ;;  %v2980_v37 = vld [vmem:[#allocation9 + $0x1360] sm:$0xff] }
 0x42f   :  { %8776 = vmatpush1.bf16.msra.mxu1 %v13794_v14  ;;  %8734 = vmatprep.subr.bf16.mxu0 %v13787_v1  ;;  %v3104_v55 = vld [vmem:[#allocation9 + $0x1740] sm:$0xff]  ;;  %v13771_v51 = vcombine.high %v2976_v58, %v2980_v37  ;;  %v13770_v12 = vcombine.low %v2976_v58, %v2980_v37 }
 0x430   :  { %8777 = vmatprep.subr.bf16.mxu1 %v13915_v29  ;;  %v3108_v19 = vld [vmem:[#allocation9 + $0x1760] sm:$0xff] }
 0x431   :  { %v13899_v17 = vcombine.high %v3104_v55, %v3108_v19  ;;  %v2968_v49 = vld [vmem:[#allocation9 + $0x1300] sm:$0xff]  ;;  %v13898_v7 = vcombine.low %v3104_v55, %v3108_v19 }
 0x432   :  { %8735 = vmatpush2.bf16.msra.mxu0 %v13786_v32  ;;  %v2972_v9 = vld [vmem:[#allocation9 + $0x1320] sm:$0xff] }
 0x433   :  { %8778 = vmatpush2.bf16.msra.mxu1 %v13914_v56  ;;  %8736 = vmatprep.subr.bf16.mxu0 %v13779_v15  ;;  %v3096_v60 = vld [vmem:[#allocation9 + $0x1700] sm:$0xff]  ;;  %v13763_v36 = vcombine.high %v2968_v49, %v2972_v9  ;;  %v13762_v47 = vcombine.low %v2968_v49, %v2972_v9 }
 0x434   :  { %8779 = vmatprep.subr.bf16.mxu1 %v13907_v11  ;;  %v3100_v3 = vld [vmem:[#allocation9 + $0x1720] sm:$0xff] }
 0x435   :  { %v13891_v54 = vcombine.high %v3096_v60, %v3100_v3  ;;  %v2960_v57 = vld [vmem:[#allocation9 + $0x12c0] sm:$0xff]  ;;  %v13890_v18 = vcombine.low %v3096_v60, %v3100_v3 }
 0x436   :  { %8737 = vmatpush2.bf16.msra.mxu0 %v13778_v59  ;;  %v2964_v5 = vld [vmem:[#allocation9 + $0x12e0] sm:$0xff] }
 0x437   :  { %8780 = vmatpush2.bf16.msra.mxu1 %v13906_v23  ;;  %8738 = vmatprep.subr.bf16.mxu0 %v13771_v51  ;;  %v3088_v13 = vld [vmem:[#allocation9 + $0x16c0] sm:$0xff]  ;;  %v13755_v27 = vcombine.high %v2960_v57, %v2964_v5  ;;  %v13754_v35 = vcombine.low %v2960_v57, %v2964_v5 }
 0x438   :  { %8781 = vmatprep.subr.bf16.mxu1 %v13899_v17  ;;  %v3092_v10 = vld [vmem:[#allocation9 + $0x16e0] sm:$0xff] }
 0x439   :  { %v13883_v40 = vcombine.high %v3088_v13, %v3092_v10  ;;  %v2952_v6 = vld [vmem:[#allocation9 + $0x1280] sm:$0xff]  ;;  %v13882_v61 = vcombine.low %v3088_v13, %v3092_v10 }
 0x43a   :  { %8739 = vmatpush2.bf16.msra.mxu0 %v13770_v12  ;;  %v2956_v38 = vld [vmem:[#allocation9 + $0x12a0] sm:$0xff] }
 0x43b   :  { %8782 = vmatpush2.bf16.msra.mxu1 %v13898_v7  ;;  %8740 = vmatprep.subr.bf16.mxu0 %v13763_v36  ;;  %v3080_v2 = vld [vmem:[#allocation9 + $0x1680] sm:$0xff]  ;;  %v13747_v41 = vcombine.high %v2952_v6, %v2956_v38  ;;  %v13746_v28 = vcombine.low %v2952_v6, %v2956_v38 }
 0x43c   :  { %8783 = vmatprep.subr.bf16.mxu1 %v13891_v54  ;;  %v3084_v43 = vld [vmem:[#allocation9 + $0x16a0] sm:$0xff] }
 0x43d   :  { %v13875_v14 = vcombine.high %v3080_v2, %v3084_v43  ;;  %v2944_v1 = vld [vmem:[#allocation9 + $0x1240] sm:$0xff]  ;;  %v13874_v44 = vcombine.low %v3080_v2, %v3084_v43 }
 0x43e   :  { %8741 = vmatpush2.bf16.msra.mxu0 %v13762_v47  ;;  %v2948_v29 = vld [vmem:[#allocation9 + $0x1260] sm:$0xff] }
 0x43f   :  { %8784 = vmatpush2.bf16.msra.mxu1 %v13890_v18  ;;  %8742 = vmatprep.subr.bf16.mxu0 %v13755_v27  ;;  %v3072_v30 = vld [vmem:[#allocation9 + $0x1640] sm:$0xff]  ;;  %v13739_v32 = vcombine.high %v2944_v1, %v2948_v29  ;;  %v13738_v55 = vcombine.low %v2944_v1, %v2948_v29 }
 0x440   :  { %8785 = vmatprep.subr.bf16.mxu1 %v13883_v40  ;;  %v3076_v4 = vld [vmem:[#allocation9 + $0x1660] sm:$0xff] }
 0x441   :  { %v13867_v56 = vcombine.high %v3072_v30, %v3076_v4  ;;  %v2936_v15 = vld [vmem:[#allocation9 + $0x1200] sm:$0xff]  ;;  %v13866_v19 = vcombine.low %v3072_v30, %v3076_v4 }
 0x442   :  { %8743 = vmatpush2.bf16.msra.mxu0 %v13754_v35  ;;  %v2940_v11 = vld [vmem:[#allocation9 + $0x1220] sm:$0xff] }
 0x443   :  { %8786 = vmatpush2.bf16.msra.mxu1 %v13882_v61  ;;  %8744 = vmatprep.subr.bf16.mxu0 %v13747_v41  ;;  %v3064_v58 = vld [vmem:[#allocation9 + $0x1600] sm:$0xff]  ;;  %v13731_v59 = vcombine.high %v2936_v15, %v2940_v11  ;;  %v13730_v60 = vcombine.low %v2936_v15, %v2940_v11 }
 0x444   :  { %8787 = vmatprep.subr.bf16.mxu1 %v13875_v14  ;;  %v3068_v37 = vld [vmem:[#allocation9 + $0x1620] sm:$0xff] }
 0x445   :  { %v13859_v23 = vcombine.high %v3064_v58, %v3068_v37  ;;  %v3184_v51 = vld [vmem:[#allocation9 + $0x19c0] sm:$0xff]  ;;  %v13858_v3 = vcombine.low %v3064_v58, %v3068_v37 }
 0x446   :  { %8745 = vmatpush2.bf16.msra.mxu0 %v13746_v28  ;;  %v3188_v17 = vld [vmem:[#allocation9 + $0x19e0] sm:$0xff] }
 0x447   :  { %8788 = vmatpush2.bf16.msra.mxu1 %v13874_v44  ;;  %8746 = vmatprep.subr.bf16.mxu0 %v13739_v32  ;;  %v3312_v49 = vld [vmem:[#allocation9 + $0x1dc0] sm:$0xff]  ;;  %v13979_v12 = vcombine.high %v3184_v51, %v3188_v17  ;;  %v13978_v57 = vcombine.low %v3184_v51, %v3188_v17 }
 0x448   :  { %8789 = vmatprep.subr.bf16.mxu1 %v13867_v56  ;;  %v3316_v9 = vld [vmem:[#allocation9 + $0x1de0] sm:$0xff] }
 0x449   :  { %v14107_v7 = vcombine.high %v3312_v49, %v3316_v9  ;;  %v3176_v36 = vld [vmem:[#allocation9 + $0x1980] sm:$0xff]  ;;  %v14106_v10 = vcombine.low %v3312_v49, %v3316_v9 }
 0x44a   :  { %8747 = vmatpush2.bf16.msra.mxu0 %v13738_v55  ;;  %v3180_v54 = vld [vmem:[#allocation9 + $0x19a0] sm:$0xff] }
 0x44b   :  { %8790 = vmatpush2.bf16.msra.mxu1 %v13866_v19  ;;  %8748 = vmatprep.subr.bf16.mxu0 %v13731_v59  ;;  %v3304_v5 = vld [vmem:[#allocation9 + $0x1d80] sm:$0xff]  ;;  %v13971_v47 = vcombine.high %v3176_v36, %v3180_v54  ;;  %v13970_v2 = vcombine.low %v3176_v36, %v3180_v54 }
 0x44c   :  { %8791 = vmatprep.subr.bf16.mxu1 %v13859_v23  ;;  %v3308_v13 = vld [vmem:[#allocation9 + $0x1da0] sm:$0xff] }
 0x44d   :  { %v3168_v18 = vld [vmem:[#allocation9 + $0x1940] sm:$0xff]  ;;  %v14099_v40 = vcombine.high %v3304_v5, %v3308_v13  ;;  %v14098_v43 = vcombine.low %v3304_v5, %v3308_v13 }
 0x44e   :  { %8749 = vmatpush2.bf16.msra.mxu0 %v13730_v60  ;;  %v3172_v27 = vld [vmem:[#allocation9 + $0x1960] sm:$0xff] }
 0x44f   :  { %8792 = vmatpush2.bf16.msra.mxu1 %v13858_v3  ;;  %8804 = vmatprep.subr.bf16.mxu0 %v13979_v12  ;;  %v3296_v6 = vld [vmem:[#allocation9 + $0x1d40] sm:$0xff]  ;;  %v13963_v35 = vcombine.high %v3168_v18, %v3172_v27  ;;  %v13962_v30 = vcombine.low %v3168_v18, %v3172_v27 }
 0x450   :  { %8847 = vmatprep.subr.bf16.mxu1 %v14107_v7  ;;  %v3300_v38 = vld [vmem:[#allocation9 + $0x1d60] sm:$0xff] }
 0x451   :  { %8751 = vmatmul.mubr.bf16.vlgmr.msra.gmra.mxu0 %v16398_v62  ;;  %v14091_v61 = vcombine.high %v3296_v6, %v3300_v38  ;;  %v3160_v41 = vld [vmem:[#allocation9 + $0x1900] sm:$0xff]  ;;  %v14090_v4 = vcombine.low %v3296_v6, %v3300_v38 }
 0x452   :  { %8794 = vmatmul.mubr.bf16.vlgmr.msra.gmra.mxu1 %v16400_v46  ;;  %8805 = vmatpush1.bf16.msra.mxu0 %v13978_v57  ;;  %v3164_v14 = vld [vmem:[#allocation9 + $0x1920] sm:$0xff] }
 0x453   :  { %8836 = vmatprep.mubr.bf16.mxu0 %v16407_v45  ;;  %8848 = vmatpush1.bf16.msra.mxu1 %v14106_v10  ;;  %v3288_v1 = vld [vmem:[#allocation9 + $0x1d00] sm:$0xff]  ;;  %v13955_v28 = vcombine.high %v3160_v41, %v3164_v14  ;;  %v13954_v58 = vcombine.low %v3160_v41, %v3164_v14 }
 0x454   :  { %8879 = vmatprep.mubr.bf16.mxu1 %v16409_v8  ;;  %8806 = vmatprep.subr.bf16.mxu0 %v13971_v47  ;;  %v3292_v29 = vld [vmem:[#allocation9 + $0x1d20] sm:$0xff] }
 0x455   :  { %8849 = vmatprep.subr.bf16.mxu1 %v14099_v40  ;;  %v14083_v44 = vcombine.high %v3288_v1, %v3292_v29  ;;  %v3152_v32 = vld [vmem:[#allocation9 + $0x18c0] sm:$0xff]  ;;  %v14082_v37 = vcombine.low %v3288_v1, %v3292_v29 }
 0x456   :  { %8807 = vmatpush1.bf16.msra.mxu0 %v13970_v2  ;;  %v3156_v56 = vld [vmem:[#allocation9 + $0x18e0] sm:$0xff] }
 0x457   :  { %8850 = vmatpush1.bf16.msra.mxu1 %v14098_v43  ;;  %8808 = vmatprep.subr.bf16.mxu0 %v13963_v35  ;;  %v3280_v15 = vld [vmem:[#allocation9 + $0x1cc0] sm:$0xff]  ;;  %v13947_v55 = vcombine.high %v3152_v32, %v3156_v56  ;;  %v13946_v49 = vcombine.low %v3152_v32, %v3156_v56 }
 0x458   :  { %8851 = vmatprep.subr.bf16.mxu1 %v14091_v61  ;;  %v3284_v11 = vld [vmem:[#allocation9 + $0x1ce0] sm:$0xff] }
 0x459   :  { %v14075_v19 = vcombine.high %v3280_v15, %v3284_v11  ;;  %v3144_v59 = vld [vmem:[#allocation9 + $0x1880] sm:$0xff]  ;;  %v14074_v9 = vcombine.low %v3280_v15, %v3284_v11 }
 0x45a   :  { %8809 = vmatpush1.bf16.msra.mxu0 %v13962_v30  ;;  %v3148_v23 = vld [vmem:[#allocation9 + $0x18a0] sm:$0xff] }
 0x45b   :  { %8852 = vmatpush1.bf16.msra.mxu1 %v14090_v4  ;;  %8810 = vmatprep.subr.bf16.mxu0 %v13955_v28  ;;  %v3272_v51 = vld [vmem:[#allocation9 + $0x1c80] sm:$0xff]  ;;  %v13939_v60 = vcombine.high %v3144_v59, %v3148_v23  ;;  %v13938_v57 = vcombine.low %v3144_v59, %v3148_v23 }
 0x45c   :  { %8853 = vmatprep.subr.bf16.mxu1 %v14083_v44  ;;  %v3276_v17 = vld [vmem:[#allocation9 + $0x1ca0] sm:$0xff] }
 0x45d   :  { %v14067_v3 = vcombine.high %v3272_v51, %v3276_v17  ;;  %v3136_v12 = vld [vmem:[#allocation9 + $0x1840] sm:$0xff]  ;;  %v14066_v5 = vcombine.low %v3272_v51, %v3276_v17 }
 0x45e   :  { %8811 = vmatpush1.bf16.msra.mxu0 %v13954_v58  ;;  %v3140_v7 = vld [vmem:[#allocation9 + $0x1860] sm:$0xff] }
 0x45f   :  { %8854 = vmatpush1.bf16.msra.mxu1 %v14082_v37  ;;  %8812 = vmatprep.subr.bf16.mxu0 %v13947_v55  ;;  %v3264_v36 = vld [vmem:[#allocation9 + $0x1c40] sm:$0xff]  ;;  %v13931_v13 = vcombine.high %v3136_v12, %v3140_v7  ;;  %v13930_v6 = vcombine.low %v3136_v12, %v3140_v7 }
 0x460   :  { %8855 = vmatprep.subr.bf16.mxu1 %v14075_v19  ;;  %v3268_v54 = vld [vmem:[#allocation9 + $0x1c60] sm:$0xff] }
 0x461   :  { %v14059_v10 = vcombine.high %v3264_v36, %v3268_v54  ;;  %v3128_v47 = vld [vmem:[#allocation9 + $0x1800] sm:$0xff]  ;;  %v14058_v38 = vcombine.low %v3264_v36, %v3268_v54 }
 0x462   :  { %8813 = vmatpush1.bf16.msra.mxu0 %v13946_v49  ;;  %v3132_v18 = vld [vmem:[#allocation9 + $0x1820] sm:$0xff] }
 0x463   :  { %8856 = vmatpush1.bf16.msra.mxu1 %v14074_v9  ;;  %8814 = vmatprep.subr.bf16.mxu0 %v13939_v60  ;;  %v3256_v27 = vld [vmem:[#allocation9 + $0x1c00] sm:$0xff]  ;;  %v13923_v2 = vcombine.high %v3128_v47, %v3132_v18  ;;  %v13922_v1 = vcombine.low %v3128_v47, %v3132_v18 }
 0x464   :  { %8857 = vmatprep.subr.bf16.mxu1 %v14067_v3  ;;  %v3260_v40 = vld [vmem:[#allocation9 + $0x1c20] sm:$0xff] }
 0x465   :  { %v14051_v43 = vcombine.high %v3256_v27, %v3260_v40  ;;  %v3248_v35 = vld [vmem:[#allocation9 + $0x1bc0] sm:$0xff]  ;;  %v14050_v29 = vcombine.low %v3256_v27, %v3260_v40 }
 0x466   :  { %8815 = vmatpush1.bf16.msra.mxu0 %v13938_v57  ;;  %v3252_v61 = vld [vmem:[#allocation9 + $0x1be0] sm:$0xff] }
 0x467   :  { %8858 = vmatpush1.bf16.msra.mxu1 %v14066_v5  ;;  %8816 = vmatprep.subr.bf16.mxu0 %v13931_v13  ;;  %v3376_v41 = vld [vmem:[#allocation9 + $0x1fc0] sm:$0xff]  ;;  %v14043_v30 = vcombine.high %v3248_v35, %v3252_v61  ;;  %v14042_v15 = vcombine.low %v3248_v35, %v3252_v61 }
 0x468   :  { %8859 = vmatprep.subr.bf16.mxu1 %v14059_v10  ;;  %v3380_v14 = vld [vmem:[#allocation9 + $0x1fe0] sm:$0xff] }
 0x469   :  { %v14171_v4 = vcombine.high %v3376_v41, %v3380_v14  ;;  %v3240_v28 = vld [vmem:[#allocation9 + $0x1b80] sm:$0xff]  ;;  %v14170_v11 = vcombine.low %v3376_v41, %v3380_v14 }
 0x46a   :  { %8817 = vmatpush1.bf16.msra.mxu0 %v13930_v6  ;;  %v3244_v44 = vld [vmem:[#allocation9 + $0x1ba0] sm:$0xff] }
 0x46b   :  { %8860 = vmatpush1.bf16.msra.mxu1 %v14058_v38  ;;  %8818 = vmatprep.subr.bf16.mxu0 %v13923_v2  ;;  %v3368_v32 = vld [vmem:[#allocation9 + $0x1f80] sm:$0xff]  ;;  %v14035_v58 = vcombine.high %v3240_v28, %v3244_v44  ;;  %v14034_v51 = vcombine.low %v3240_v28, %v3244_v44 }
 0x46c   :  { %8861 = vmatprep.subr.bf16.mxu1 %v14051_v43  ;;  %v3372_v56 = vld [vmem:[#allocation9 + $0x1fa0] sm:$0xff] }
 0x46d   :  { %v14163_v37 = vcombine.high %v3368_v32, %v3372_v56  ;;  %v3232_v55 = vld [vmem:[#allocation9 + $0x1b40] sm:$0xff]  ;;  %v14162_v17 = vcombine.low %v3368_v32, %v3372_v56 }
 0x46e   :  { %8819 = vmatpush1.bf16.msra.mxu0 %v13922_v1  ;;  %v3236_v19 = vld [vmem:[#allocation9 + $0x1b60] sm:$0xff] }
 0x46f   :  { %8862 = vmatpush1.bf16.msra.mxu1 %v14050_v29  ;;  %8820 = vmatprep.subr.bf16.mxu0 %v14043_v30  ;;  %v3360_v59 = vld [vmem:[#allocation9 + $0x1f40] sm:$0xff]  ;;  %v14027_v49 = vcombine.high %v3232_v55, %v3236_v19  ;;  %v14026_v36 = vcombine.low %v3232_v55, %v3236_v19 }
 0x470   :  { %8863 = vmatprep.subr.bf16.mxu1 %v14171_v4  ;;  %v3364_v23 = vld [vmem:[#allocation9 + $0x1f60] sm:$0xff] }
 0x471   :  { %v14155_v9 = vcombine.high %v3360_v59, %v3364_v23  ;;  %v3224_v60 = vld [vmem:[#allocation9 + $0x1b00] sm:$0xff]  ;;  %v14154_v54 = vcombine.low %v3360_v59, %v3364_v23 }
 0x472   :  { %8821 = vmatpush2.bf16.msra.mxu0 %v14042_v15  ;;  %v3228_v3 = vld [vmem:[#allocation9 + $0x1b20] sm:$0xff] }
 0x473   :  { %8864 = vmatpush2.bf16.msra.mxu1 %v14170_v11  ;;  %8822 = vmatprep.subr.bf16.mxu0 %v14035_v58  ;;  %v3352_v12 = vld [vmem:[#allocation9 + $0x1f00] sm:$0xff]  ;;  %v14019_v57 = vcombine.high %v3224_v60, %v3228_v3  ;;  %v14018_v27 = vcombine.low %v3224_v60, %v3228_v3  ;;  %v2545_v60 = vld [vmem:[#allocation9 + $0x5c8] sm:$0xff] }
 0x474   :  { %8865 = vmatprep.subr.bf16.mxu1 %v14163_v37  ;;  %v3356_v7 = vld [vmem:[#allocation9 + $0x1f20] sm:$0xff]  ;;  %v2549_v3 = vld [vmem:[#allocation9 + $0x5e8] sm:$0xff] }
 0x475   :  { %v14147_v5 = vcombine.high %v3352_v12, %v3356_v7  ;;  %v3216_v13 = vld [vmem:[#allocation9 + $0x1ac0] sm:$0xff]  ;;  %v14146_v40 = vcombine.low %v3352_v12, %v3356_v7 }
 0x476   :  { %8823 = vmatpush2.bf16.msra.mxu0 %v14034_v51  ;;  %v3220_v10 = vld [vmem:[#allocation9 + $0x1ae0] sm:$0xff] }
 0x477   :  { %8866 = vmatpush2.bf16.msra.mxu1 %v14162_v17  ;;  %8824 = vmatprep.subr.bf16.mxu0 %v14027_v49  ;;  %v3344_v47 = vld [vmem:[#allocation9 + $0x1ec0] sm:$0xff]  ;;  %v14011_v6 = vcombine.high %v3216_v13, %v3220_v10  ;;  %v14010_v41 = vcombine.low %v3216_v13, %v3220_v10  ;;  %v2417_v49 = vld [vmem:[#allocation9 + $0x1c8] sm:$0xff] }
 0x478   :  { %8867 = vmatprep.subr.bf16.mxu1 %v14155_v9  ;;  %v3348_v18 = vld [vmem:[#allocation9 + $0x1ee0] sm:$0xff]  ;;  %v2421_v9 = vld [vmem:[#allocation9 + $0x1e8] sm:$0xff] }
 0x479   :  { %v14139_v38 = vcombine.high %v3344_v47, %v3348_v18  ;;  %v3208_v2 = vld [vmem:[#allocation9 + $0x1a80] sm:$0xff]  ;;  %v14138_v14 = vcombine.low %v3344_v47, %v3348_v18  ;;  %v2413_v13 = vld [vmem:[#allocation9 + $0x1a8] sm:$0xff]  ;;  %v13212_v10 = vcombine.low %v2417_v49, %v2421_v9 }
 0x47a   :  { %8825 = vmatpush2.bf16.msra.mxu0 %v14026_v36  ;;  %v3212_v43 = vld [vmem:[#allocation9 + $0x1aa0] sm:$0xff]  ;;  %v13213_v36 = vcombine.high %v2417_v49, %v2421_v9  ;;  %v2537_v18 = vld [vmem:[#allocation9 + $0x588] sm:$0xff] }
 0x47b   :  { %8868 = vmatpush2.bf16.msra.mxu1 %v14154_v54  ;;  %8826 = vmatprep.subr.bf16.mxu0 %v14019_v57  ;;  %v3336_v35 = vld [vmem:[#allocation9 + $0x1e80] sm:$0xff]  ;;  %v14003_v1 = vcombine.high %v3208_v2, %v3212_v43  ;;  %v14002_v32 = vcombine.low %v3208_v2, %v3212_v43  ;;  %v13341_v57 = vcombine.high %v2545_v60, %v2549_v3  ;;  %v2401_v43 = vld [vmem:[#allocation9 + $0x148] sm:$0xff] }
 0x47c   :  { %8869 = vmatprep.subr.bf16.mxu1 %v14147_v5  ;;  %v3340_v61 = vld [vmem:[#allocation9 + $0x1ea0] sm:$0xff]  ;;  %v2409_v5 = vld [vmem:[#allocation9 + $0x188] sm:$0xff] }
 0x47d   :  { %v14131_v29 = vcombine.high %v3336_v35, %v3340_v61  ;;  %v3200_v30 = vld [vmem:[#allocation9 + $0x1a40] sm:$0xff]  ;;  %v14130_v56 = vcombine.low %v3336_v35, %v3340_v61  ;;  %v13205_v2 = vcombine.high %v2409_v5, %v2413_v13  ;;  %v2405_v35 = vld [vmem:[#allocation9 + $0x168] sm:$0xff] }
 0x47e   :  { %8827 = vmatpush2.bf16.msra.mxu0 %v14018_v27  ;;  %v3204_v4 = vld [vmem:[#allocation9 + $0x1a60] sm:$0xff]  ;;  %v2541_v27 = vld [vmem:[#allocation9 + $0x5a8] sm:$0xff]  ;;  %v13196_v9 = vcombine.low %v2401_v43, %v2405_v35 }
 0x47f   :  { %8870 = vmatpush2.bf16.msra.mxu1 %v14146_v40  ;;  %8828 = vmatprep.subr.bf16.mxu0 %v14011_v6  ;;  %v3328_v28 = vld [vmem:[#allocation9 + $0x1e40] sm:$0xff]  ;;  %v13995_v15 = vcombine.high %v3200_v30, %v3204_v4  ;;  %v13994_v59 = vcombine.low %v3200_v30, %v3204_v4  ;;  %v13340_v40 = vcombine.low %v2545_v60, %v2549_v3  ;;  %v17127_v6 = vld [vmem:[#allocation41_spill] sm:$0xff] }
 0x480   :  { %8871 = vmatprep.subr.bf16.mxu1 %v14139_v38  ;;  %v3332_v44 = vld [vmem:[#allocation9 + $0x1e60] sm:$0xff]  ;;  %v13204_v4 = vcombine.low %v2409_v5, %v2413_v13  ;;  %v2389_v5 = vld [vmem:[#allocation9 + $0xe8] sm:$0xff] }
 0x481   :  { %v14123_v11 = vcombine.high %v3328_v28, %v3332_v44  ;;  %v3192_v58 = vld [vmem:[#allocation9 + $0x1a00] sm:$0xff]  ;;  %v14122_v23 = vcombine.low %v3328_v28, %v3332_v44 }
 0x482   :  { %8829 = vmatpush2.bf16.msra.mxu0 %v14010_v41  ;;  %v3196_v37 = vld [vmem:[#allocation9 + $0x1a20] sm:$0xff] }
 0x483   :  { %8872 = vmatpush2.bf16.msra.mxu1 %v14138_v14  ;;  %8830 = vmatprep.subr.bf16.mxu0 %v14003_v1  ;;  %v3320_v55 = vld [vmem:[#allocation9 + $0x1e00] sm:$0xff]  ;;  %v13987_v51 = vcombine.high %v3192_v58, %v3196_v37  ;;  %v13986_v12 = vcombine.low %v3192_v58, %v3196_v37  ;;  %v13333_v14 = vcombine.high %v2537_v18, %v2541_v27  ;;  %v2529_v1 = vld [vmem:[#allocation9 + $0x548] sm:$0xff] }
 0x484   :  { %8873 = vmatprep.subr.bf16.mxu1 %v14131_v29  ;;  %v3324_v19 = vld [vmem:[#allocation9 + $0x1e20] sm:$0xff]  ;;  %v2533_v29 = vld [vmem:[#allocation9 + $0x568] sm:$0xff] }
 0x485   :  { %v14115_v17 = vcombine.high %v3320_v55, %v3324_v19  ;;  %v14114_v7 = vcombine.low %v3320_v55, %v3324_v19  ;;  %v3384_v54 = vld [vmem:[#allocation10] sm:$0xff]  ;;  %v13325_v58 = vcombine.high %v2529_v1, %v2533_v29  ;;  %v2393_v37 = vld [vmem:[#allocation9 + $0x108] sm:$0xff]  ;;  %v13324_v3 = vcombine.low %v2529_v1, %v2533_v29 }
 0x486   :  { %8831 = vmatpush2.bf16.msra.mxu0 %v14002_v32  ;;  %v3389_v47 = vrot.slane %v3384_v54, %v17097_v16  ;;  %v3393_v38 = vrot.slane %v3384_v54, %v17127_v6  ;;  %v13332_v32 = vcombine.low %v2537_v18, %v2541_v27  ;;  %v2397_v55 = vld [vmem:[#allocation9 + $0x128] sm:$0xff] }
 0x487   :  { %8874 = vmatpush2.bf16.msra.mxu1 %v14130_v56  ;;  %8832 = vmatprep.subr.bf16.mxu0 %v13995_v15  ;;  %v13197_v56 = vcombine.high %v2401_v43, %v2405_v35  ;;  %v2517_v18 = vld [vmem:[#allocation9 + $0x4e8] sm:$0xff] }
 0x488   :  { %8875 = vmatprep.subr.bf16.mxu1 %v14123_v11  ;;  %v2377_v35 = vld [vmem:[#allocation9 + $0x88] sm:$0xff] }
 0x48a   :  { %8833 = vmatpush2.bf16.msra.mxu0 %v13994_v59 }
 0x48b   :  { %8876 = vmatpush2.bf16.msra.mxu1 %v14122_v23  ;;  %8834 = vmatprep.subr.bf16.mxu0 %v13987_v51  ;;  %v2521_v23 = vld [vmem:[#allocation9 + $0x508] sm:$0xff] }
 0x48c   :  { %8877 = vmatprep.subr.bf16.mxu1 %v14115_v17  ;;  %v2525_v51 = vld [vmem:[#allocation9 + $0x528] sm:$0xff] }
 0x48d   :  { %v13317_v54 = vcombine.high %v2521_v23, %v2525_v51 }
 0x48e   :  { %8835 = vmatpush2.bf16.msra.mxu0 %v13986_v12  ;;  %v8580_v61 = vpop.f32.mrf.mxu0  ;;  %v8623_v41 = vpop.f32.mrf.mxu1  ;;  %v13189_v12 = vcombine.high %v2393_v37, %v2397_v55 }
 0x48f   :  { %8878 = vmatpush2.bf16.msra.mxu1 %v14114_v7  ;;  %8890 = vmatprep.subr.bf16.mxu0 %v13213_v36  ;;  %v8581_v30 = vadd.f32 %v8580_v61, %v3389_v47  ;;  %v2381_v61 = vld [vmem:[#allocation9 + $0xa8] sm:$0xff] }
 0x490   :  { %8933 = vmatprep.subr.bf16.mxu1 %v13341_v57  ;;  %v8582_v28 = vpop.f32.mrf.mxu0  ;;  %v8625_v44 = vpop.f32.mrf.mxu1  ;;  %v2385_v57 = vld [vmem:[#allocation9 + $0xc8] sm:$0xff]  ;;  %v13173_v29 = vcombine.high %v2377_v35, %v2381_v61 }
 0x491   :  { %8837 = vmatmul.mubr.bf16.vlgmr.msra.gmra.mxu0 %v16427_v52  ;;  %v16444_v15 = vadd.f32 %v8623_v41, %v8581_v30  ;;  %v8583_v11 = vadd.f32 %v8582_v28, %v3393_v38  ;;  %v2509_v41 = vld [vmem:[#allocation9 + $0x4a8] sm:$0xff] }
 0x492   :  { %8880 = vmatmul.mubr.bf16.vlgmr.msra.gmra.mxu1 %v16429_v53  ;;  %8891 = vmatpush1.bf16.msra.mxu0 %v13212_v10  ;;  %v8584_v19 = vpop.f32.mrf.mxu0  ;;  %v8627_v59 = vpop.f32.mrf.mxu1  ;;  %v2513_v10 = vld [vmem:[#allocation9 + $0x4c8] sm:$0xff] }
 0x493   :  { %8922 = vmatprep.mubr.bf16.mxu0 %v16226_v22  ;;  %8934 = vmatpush1.bf16.msra.mxu1 %v13340_v40  ;;  %v16447_v17 = vadd.f32 %v8625_v44, %v8583_v11  ;;  %v8585_v49 = vadd.f32 %v8584_v19, %v3389_v47  ;;  %v13188_v47 = vcombine.low %v2393_v37, %v2397_v55  ;;  %v2373_v28 = vld [vmem:[#allocation9 + $0x68] sm:$0xff] }
 0x494   :  { %8965 = vmatprep.mubr.bf16.mxu1 %v16228_v50  ;;  %8892 = vmatprep.subr.bf16.mxu0 %v13205_v2  ;;  %v8586_v60 = vpop.f32.mrf.mxu0  ;;  %v8629_v13 = vpop.f32.mrf.mxu1  ;;  %v13316_v40 = vcombine.low %v2521_v23, %v2525_v51  ;;  %v13181_v2 = vcombine.high %v2385_v57, %v2389_v5  ;;  %v13309_v43 = vcombine.high %v2513_v10, %v2517_v18  ;;  %v2497_v44 = vld [vmem:[#allocation9 + $0x448] sm:$0xff] }
 0x495   :  { %8935 = vmatprep.subr.bf16.mxu1 %v13333_v14  ;;  %v16449_v7 = vadd.f32 %v8627_v59, %v8585_v49  ;;  %v8587_v36 = vadd.f32 %v8586_v60, %v3393_v38  ;;  %v2505_v38 = vld [vmem:[#allocation9 + $0x488] sm:$0xff]  ;;  %v13180_v14 = vcombine.low %v2385_v57, %v2389_v5  ;;  %v13308_v1 = vcombine.low %v2513_v10, %v2517_v18 }
 0x496   :  { %8893 = vmatpush1.bf16.msra.mxu0 %v13204_v4  ;;  %v13301_v30 = vcombine.high %v2505_v38, %v2509_v41  ;;  %v2369_v4 = vld [vmem:[#allocation9 + $0x48] sm:$0xff]  ;;  %v13300_v11 = vcombine.low %v2505_v38, %v2509_v41 }
 0x497   :  { %8936 = vmatpush1.bf16.msra.mxu1 %v13332_v32  ;;  %8894 = vmatprep.subr.bf16.mxu0 %v13197_v56  ;;  %v16451_v27 = vadd.f32 %v8629_v13, %v8587_v36  ;;  %v2501_v32 = vld [vmem:[#allocation9 + $0x468] sm:$0xff]  ;;  %v13172_v56 = vcombine.low %v2377_v35, %v2381_v61  ;;  %v13164_v51 = vcombine.low %v2369_v4, %v2373_v28 }
 0x498   :  { %8937 = vmatprep.subr.bf16.mxu1 %v13325_v58  ;;  %v13165_v58 = vcombine.high %v2369_v4, %v2373_v28  ;;  %v13293_v37 = vcombine.high %v2497_v44, %v2501_v32  ;;  %v2361_v55 = vld [vmem:[#allocation9 + $0x8] sm:$0xff]  ;;  %v13292_v49 = vcombine.low %v2497_v44, %v2501_v32 }
 0x499   :  { %v2365_v19 = vld [vmem:[#allocation9 + $0x28] sm:$0xff] }
 0x49a   :  { %8895 = vmatpush1.bf16.msra.mxu0 %v13196_v9  ;;  %v2489_v59 = vld [vmem:[#allocation9 + $0x408] sm:$0xff]  ;;  %v13157_v9 = vcombine.high %v2361_v55, %v2365_v19  ;;  %v13156_v57 = vcombine.low %v2361_v55, %v2365_v19 }
 0x49b   :  { %8938 = vmatpush1.bf16.msra.mxu1 %v13324_v3  ;;  %8896 = vmatprep.subr.bf16.mxu0 %v13189_v12  ;;  %v2493_v23 = vld [vmem:[#allocation9 + $0x428] sm:$0xff] }
 0x49c   :  { %8939 = vmatprep.subr.bf16.mxu1 %v13317_v54  ;;  %v13285_v60 = vcombine.high %v2489_v59, %v2493_v23  ;;  %v2481_v3 = vld [vmem:[#allocation9 + $0x3c8] sm:$0xff]  ;;  %v13284_v5 = vcombine.low %v2489_v59, %v2493_v23 }
 0x49d   :  { %v2485_v12 = vld [vmem:[#allocation9 + $0x3e8] sm:$0xff] }
 0x49e   :  { %8897 = vmatpush1.bf16.msra.mxu0 %v13188_v47  ;;  %v2609_v36 = vld [vmem:[#allocation9 + $0x7c8] sm:$0xff]  ;;  %v13277_v13 = vcombine.high %v2481_v3, %v2485_v12 }
 0x49f   :  { %8940 = vmatpush1.bf16.msra.mxu1 %v13316_v40  ;;  %8898 = vmatprep.subr.bf16.mxu0 %v13181_v2  ;;  %v2613_v54 = vld [vmem:[#allocation9 + $0x7e8] sm:$0xff] }
 0x4a0   :  { %8941 = vmatprep.subr.bf16.mxu1 %v13309_v43  ;;  %v13405_v10 = vcombine.high %v2609_v36, %v2613_v54  ;;  %v2473_v18 = vld [vmem:[#allocation9 + $0x388] sm:$0xff]  ;;  %v13276_v43 = vcombine.low %v2481_v3, %v2485_v12  ;;  %v13404_v35 = vcombine.low %v2609_v36, %v2613_v54 }
 0x4a1   :  { %v2477_v47 = vld [vmem:[#allocation9 + $0x3a8] sm:$0xff] }
 0x4a2   :  { %8899 = vmatpush1.bf16.msra.mxu0 %v13180_v14  ;;  %v2601_v40 = vld [vmem:[#allocation9 + $0x788] sm:$0xff]  ;;  %v13269_v61 = vcombine.high %v2473_v18, %v2477_v47 }
 0x4a3   :  { %8942 = vmatpush1.bf16.msra.mxu1 %v13308_v1  ;;  %8900 = vmatprep.subr.bf16.mxu0 %v13173_v29  ;;  %v2605_v2 = vld [vmem:[#allocation9 + $0x7a8] sm:$0xff] }
 0x4a4   :  { %8943 = vmatprep.subr.bf16.mxu1 %v13301_v30  ;;  %v13397_v38 = vcombine.high %v2601_v40, %v2605_v2  ;;  %v2465_v41 = vld [vmem:[#allocation9 + $0x348] sm:$0xff]  ;;  %v13268_v30 = vcombine.low %v2473_v18, %v2477_v47  ;;  %v13396_v4 = vcombine.low %v2601_v40, %v2605_v2 }
 0x4a5   :  { %v2469_v14 = vld [vmem:[#allocation9 + $0x368] sm:$0xff] }
 0x4a6   :  { %8901 = vmatpush1.bf16.msra.mxu0 %v13172_v56  ;;  %v2593_v1 = vld [vmem:[#allocation9 + $0x748] sm:$0xff]  ;;  %v13261_v28 = vcombine.high %v2465_v41, %v2469_v14 }
 0x4a7   :  { %8944 = vmatpush1.bf16.msra.mxu1 %v13300_v11  ;;  %8902 = vmatprep.subr.bf16.mxu0 %v13165_v58  ;;  %v2597_v29 = vld [vmem:[#allocation9 + $0x768] sm:$0xff] }
 0x4a8   :  { %8945 = vmatprep.subr.bf16.mxu1 %v13293_v37  ;;  %v13389_v44 = vcombine.high %v2593_v1, %v2597_v29  ;;  %v2457_v32 = vld [vmem:[#allocation9 + $0x308] sm:$0xff]  ;;  %v13260_v37 = vcombine.low %v2465_v41, %v2469_v14  ;;  %v13388_v55 = vcombine.low %v2593_v1, %v2597_v29 }
 0x4a9   :  { %v2461_v56 = vld [vmem:[#allocation9 + $0x328] sm:$0xff] }
 0x4aa   :  { %8903 = vmatpush1.bf16.msra.mxu0 %v13164_v51  ;;  %v2585_v11 = vld [vmem:[#allocation9 + $0x708] sm:$0xff]  ;;  %v13253_v19 = vcombine.high %v2457_v32, %v2461_v56 }
 0x4ab   :  { %8946 = vmatpush1.bf16.msra.mxu1 %v13292_v49  ;;  %8904 = vmatprep.subr.bf16.mxu0 %v13157_v9  ;;  %v2589_v58 = vld [vmem:[#allocation9 + $0x728] sm:$0xff] }
 0x4ac   :  { %8947 = vmatprep.subr.bf16.mxu1 %v13285_v60  ;;  %v13381_v59 = vcombine.high %v2585_v11, %v2589_v58  ;;  %v2449_v23 = vld [vmem:[#allocation9 + $0x2c8] sm:$0xff]  ;;  %v13252_v60 = vcombine.low %v2457_v32, %v2461_v56  ;;  %v13380_v3 = vcombine.low %v2585_v11, %v2589_v58 }
 0x4ad   :  { %v2453_v51 = vld [vmem:[#allocation9 + $0x2e8] sm:$0xff] }
 0x4ae   :  { %8905 = vmatpush1.bf16.msra.mxu0 %v13156_v57  ;;  %v2577_v49 = vld [vmem:[#allocation9 + $0x6c8] sm:$0xff]  ;;  %v13245_v12 = vcombine.high %v2449_v23, %v2453_v51 }
 0x4af   :  { %8948 = vmatpush1.bf16.msra.mxu1 %v13284_v5  ;;  %8906 = vmatprep.subr.bf16.mxu0 %v13277_v13  ;;  %v2581_v9 = vld [vmem:[#allocation9 + $0x6e8] sm:$0xff] }
 0x4b0   :  { %8949 = vmatprep.subr.bf16.mxu1 %v13405_v10  ;;  %v13373_v36 = vcombine.high %v2577_v49, %v2581_v9  ;;  %v2441_v54 = vld [vmem:[#allocation9 + $0x288] sm:$0xff]  ;;  %v13244_v10 = vcombine.low %v2449_v23, %v2453_v51  ;;  %v13372_v18 = vcombine.low %v2577_v49, %v2581_v9 }
 0x4b1   :  { %v2445_v57 = vld [vmem:[#allocation9 + $0x2a8] sm:$0xff] }
 0x4b2   :  { %8907 = vmatpush2.bf16.msra.mxu0 %v13276_v43  ;;  %v2569_v5 = vld [vmem:[#allocation9 + $0x688] sm:$0xff]  ;;  %v13237_v47 = vcombine.high %v2441_v54, %v2445_v57 }
 0x4b3   :  { %8950 = vmatpush2.bf16.msra.mxu1 %v13404_v35  ;;  %8908 = vmatprep.subr.bf16.mxu0 %v13269_v61  ;;  %v2573_v13 = vld [vmem:[#allocation9 + $0x6a8] sm:$0xff] }
 0x4b4   :  { %8951 = vmatprep.subr.bf16.mxu1 %v13397_v38  ;;  %v13365_v40 = vcombine.high %v2569_v5, %v2573_v13  ;;  %v2433_v2 = vld [vmem:[#allocation9 + $0x248] sm:$0xff]  ;;  %v13236_v38 = vcombine.low %v2441_v54, %v2445_v57  ;;  %v13364_v41 = vcombine.low %v2569_v5, %v2573_v13 }
 0x4b5   :  { %v2437_v43 = vld [vmem:[#allocation9 + $0x268] sm:$0xff] }
 0x4b6   :  { %8909 = vmatpush2.bf16.msra.mxu0 %v13268_v30  ;;  %v2561_v35 = vld [vmem:[#allocation9 + $0x648] sm:$0xff]  ;;  %v13229_v14 = vcombine.high %v2433_v2, %v2437_v43 }
 0x4b7   :  { %8952 = vmatpush2.bf16.msra.mxu1 %v13396_v4  ;;  %8910 = vmatprep.subr.bf16.mxu0 %v13261_v28  ;;  %v2565_v61 = vld [vmem:[#allocation9 + $0x668] sm:$0xff] }
 0x4b8   :  { %8953 = vmatprep.subr.bf16.mxu1 %v13389_v44  ;;  %v13357_v1 = vcombine.high %v2561_v35, %v2565_v61  ;;  %v2425_v29 = vld [vmem:[#allocation9 + $0x208] sm:$0xff]  ;;  %v13228_v44 = vcombine.low %v2433_v2, %v2437_v43  ;;  %v13356_v32 = vcombine.low %v2561_v35, %v2565_v61 }
 0x4b9   :  { %v2429_v30 = vld [vmem:[#allocation9 + $0x228] sm:$0xff] }
 0x4ba   :  { %8911 = vmatpush2.bf16.msra.mxu0 %v13260_v37  ;;  %v2553_v4 = vld [vmem:[#allocation9 + $0x608] sm:$0xff]  ;;  %v13221_v56 = vcombine.high %v2425_v29, %v2429_v30 }
 0x4bb   :  { %8954 = vmatpush2.bf16.msra.mxu1 %v13388_v55  ;;  %8912 = vmatprep.subr.bf16.mxu0 %v13253_v19  ;;  %v2557_v28 = vld [vmem:[#allocation9 + $0x628] sm:$0xff] }
 0x4bc   :  { %8955 = vmatprep.subr.bf16.mxu1 %v13381_v59  ;;  %v13349_v11 = vcombine.high %v2553_v4, %v2557_v28  ;;  %v2673_v58 = vld [vmem:[#allocation9 + $0x9c8] sm:$0xff]  ;;  %v13220_v59 = vcombine.low %v2425_v29, %v2429_v30  ;;  %v13348_v23 = vcombine.low %v2553_v4, %v2557_v28 }
 0x4bd   :  { %v2677_v37 = vld [vmem:[#allocation9 + $0x9e8] sm:$0xff] }
 0x4be   :  { %8913 = vmatpush2.bf16.msra.mxu0 %v13252_v60  ;;  %v2801_v55 = vld [vmem:[#allocation9 + $0xdc8] sm:$0xff]  ;;  %v13469_v51 = vcombine.high %v2673_v58, %v2677_v37 }
 0x4bf   :  { %8956 = vmatpush2.bf16.msra.mxu1 %v13380_v3  ;;  %8914 = vmatprep.subr.bf16.mxu0 %v13245_v12  ;;  %v2805_v19 = vld [vmem:[#allocation9 + $0xde8] sm:$0xff]  ;;  %v13468_v3 = vcombine.low %v2673_v58, %v2677_v37 }
 0x4c0   :  { %8957 = vmatprep.subr.bf16.mxu1 %v13373_v36  ;;  %v13597_v49 = vcombine.high %v2801_v55, %v2805_v19  ;;  %v2665_v9 = vld [vmem:[#allocation9 + $0x988] sm:$0xff]  ;;  %v13596_v54 = vcombine.low %v2801_v55, %v2805_v19 }
 0x4c1   :  { %v2669_v60 = vld [vmem:[#allocation9 + $0x9a8] sm:$0xff] }
 0x4c2   :  { %8915 = vmatpush2.bf16.msra.mxu0 %v13244_v10  ;;  %v2793_v12 = vld [vmem:[#allocation9 + $0xd88] sm:$0xff]  ;;  %v13461_v57 = vcombine.high %v2665_v9, %v2669_v60  ;;  %v13460_v35 = vcombine.low %v2665_v9, %v2669_v60 }
 0x4c3   :  { %8958 = vmatpush2.bf16.msra.mxu1 %v13372_v18  ;;  %8916 = vmatprep.subr.bf16.mxu0 %v13237_v47  ;;  %v2797_v36 = vld [vmem:[#allocation9 + $0xda8] sm:$0xff] }
 0x4c4   :  { %8959 = vmatprep.subr.bf16.mxu1 %v13365_v40  ;;  %v2657_v5 = vld [vmem:[#allocation9 + $0x948] sm:$0xff]  ;;  %v13589_v47 = vcombine.high %v2793_v12, %v2797_v36 }
 0x4c5   :  { %v2661_v13 = vld [vmem:[#allocation9 + $0x968] sm:$0xff] }
 0x4c6   :  { %8917 = vmatpush2.bf16.msra.mxu0 %v13236_v38  ;;  %v2785_v40 = vld [vmem:[#allocation9 + $0xd48] sm:$0xff]  ;;  %v13452_v37 = vcombine.low %v2657_v5, %v2661_v13 }
 0x4c7   :  { %8960 = vmatpush2.bf16.msra.mxu1 %v13364_v41  ;;  %8918 = vmatprep.subr.bf16.mxu0 %v13229_v14  ;;  %v2789_v2 = vld [vmem:[#allocation9 + $0xd68] sm:$0xff]  ;;  %v13588_v41 = vcombine.low %v2793_v12, %v2797_v36  ;;  %v13453_v14 = vcombine.high %v2657_v5, %v2661_v13 }
 0x4c8   :  { %8961 = vmatprep.subr.bf16.mxu1 %v13357_v1  ;;  %v13581_v30 = vcombine.high %v2785_v40, %v2789_v2  ;;  %v2653_v4 = vld [vmem:[#allocation9 + $0x928] sm:$0xff]  ;;  %v13580_v19 = vcombine.low %v2785_v40, %v2789_v2 }
 0x4c9   :  { %v2645_v9 = vld [vmem:[#allocation9 + $0x8e8] sm:$0xff] }
 0x4ca   :  { %8919 = vmatpush2.bf16.msra.mxu0 %v13228_v44  ;;  %v2773_v12 = vld [vmem:[#allocation9 + $0xce8] sm:$0xff] }
 0x4cb   :  { %8962 = vmatpush2.bf16.msra.mxu1 %v13356_v32  ;;  %8920 = vmatprep.subr.bf16.mxu0 %v13221_v56  ;;  %v2777_v32 = vld [vmem:[#allocation9 + $0xd08] sm:$0xff] }
 0x4cc   :  { %8963 = vmatprep.subr.bf16.mxu1 %v13349_v11  ;;  %v2781_v56 = vld [vmem:[#allocation9 + $0xd28] sm:$0xff] }
 0x4cd   :  { %v2633_v13 = vld [vmem:[#allocation9 + $0x888] sm:$0xff] }
 0x4ce   :  { %8921 = vmatpush2.bf16.msra.mxu0 %v13220_v59 }
 0x4cf   :  { %8964 = vmatpush2.bf16.msra.mxu1 %v13348_v23  ;;  %8976 = vmatprep.subr.bf16.mxu0 %v13469_v51  ;;  %v13573_v51 = vcombine.high %v2777_v32, %v2781_v56 }
 0x4d0   :  { %9019 = vmatprep.subr.bf16.mxu1 %v13597_v49  ;;  %v2641_v49 = vld [vmem:[#allocation9 + $0x8c8] sm:$0xff] }
 0x4d1   :  { %v8666_v10 = vpop.f32.mrf.mxu0  ;;  %8923 = vmatmul.mubr.bf16.vlgmr.msra.gmra.mxu0 %v16230_v42 }
 0x4d2   :  { %v8709_v18 = vpop.f32.mrf.mxu1  ;;  %v8667_v43 = vadd.f32 %v8666_v10, %v16444_v15  ;;  %8966 = vmatmul.mubr.bf16.vlgmr.msra.gmra.mxu1 %v16233_v21  ;;  %8977 = vmatpush1.bf16.msra.mxu0 %v13468_v3  ;;  %v2649_v15 = vld [vmem:[#allocation9 + $0x908] sm:$0xff] }
 0x4d3   :  { %9008 = vmatprep.mubr.bf16.mxu0 %v16235_v63  ;;  %9020 = vmatpush1.bf16.msra.mxu1 %v13596_v54  ;;  %v8668_v61 = vpop.f32.mrf.mxu0  ;;  %v2769_v3 = vld [vmem:[#allocation9 + $0xcc8] sm:$0xff]  ;;  %v13572_v54 = vcombine.low %v2777_v32, %v2781_v56 }
 0x4d4   :  { %v8711_v38 = vpop.f32.mrf.mxu1  ;;  %v16457_v1 = vadd.f32 %v8709_v18, %v8667_v43  ;;  %9051 = vmatprep.mubr.bf16.mxu1 %v16237_v39  ;;  %v8669_v29 = vadd.f32 %v8668_v61, %v16447_v17  ;;  %8978 = vmatprep.subr.bf16.mxu0 %v13461_v57  ;;  %v13445_v17 = vcombine.high %v2649_v15, %v2653_v4  ;;  %v2637_v10 = vld [vmem:[#allocation9 + $0x8a8] sm:$0xff] }
 0x4d5   :  { %v8670_v28 = vpop.f32.mrf.mxu0  ;;  %9021 = vmatprep.subr.bf16.mxu1 %v13589_v47  ;;  %v13437_v57 = vcombine.high %v2641_v49, %v2645_v9  ;;  %v13565_v5 = vcombine.high %v2769_v3, %v2773_v12  ;;  %v2765_v18 = vld [vmem:[#allocation9 + $0xca8] sm:$0xff]  ;;  %v13436_v47 = vcombine.low %v2641_v49, %v2645_v9  ;;  %v13564_v40 = vcombine.low %v2769_v3, %v2773_v12 }
 0x4d6   :  { %v8713_v44 = vpop.f32.mrf.mxu1  ;;  %v16461_v11 = vadd.f32 %v8711_v38, %v8669_v29  ;;  %v8671_v58 = vadd.f32 %v8670_v28, %v16449_v7  ;;  %8979 = vmatpush1.bf16.msra.mxu0 %v13460_v35  ;;  %v13444_v7 = vcombine.low %v2649_v15, %v2653_v4  ;;  %v13429_v2 = vcombine.high %v2633_v13, %v2637_v10  ;;  %v2625_v35 = vld [vmem:[#allocation9 + $0x848] sm:$0xff] }
 0x4d7   :  { %9022 = vmatpush1.bf16.msra.mxu1 %v13588_v41  ;;  %v8672_v55 = vpop.f32.mrf.mxu0  ;;  %8980 = vmatprep.subr.bf16.mxu0 %v13453_v14  ;;  %v2629_v61 = vld [vmem:[#allocation9 + $0x868] sm:$0xff]  ;;  %v13428_v14 = vcombine.low %v2633_v13, %v2637_v10 }
 0x4d8   :  { %v16464_v59 = vadd.f32 %v8713_v44, %v8671_v58  ;;  %v8673_v23 = vadd.f32 %v8672_v55, %v16451_v27  ;;  %9023 = vmatprep.subr.bf16.mxu1 %v13581_v30  ;;  %v8715_v60 = vpop.f32.mrf.mxu1  ;;  %v2761_v27 = vld [vmem:[#allocation9 + $0xc88] sm:$0xff]  ;;  %v13421_v30 = vcombine.high %v2625_v35, %v2629_v61  ;;  %v13420_v56 = vcombine.low %v2625_v35, %v2629_v61 }
 0x4d9   :  { %v13557_v43 = vcombine.high %v2761_v27, %v2765_v18  ;;  %v2753_v38 = vld [vmem:[#allocation9 + $0xc48] sm:$0xff]  ;;  %v13556_v29 = vcombine.low %v2761_v27, %v2765_v18 }
 0x4da   :  { %v16467_v36 = vadd.f32 %v8715_v60, %v8673_v23  ;;  %8981 = vmatpush1.bf16.msra.mxu0 %v13452_v37  ;;  %v2757_v41 = vld [vmem:[#allocation9 + $0xc68] sm:$0xff] }
 0x4db   :  { %9024 = vmatpush1.bf16.msra.mxu1 %v13580_v19  ;;  %8982 = vmatprep.subr.bf16.mxu0 %v13445_v17  ;;  %v13549_v15 = vcombine.high %v2753_v38, %v2757_v41  ;;  %v2617_v4 = vld [vmem:[#allocation9 + $0x808] sm:$0xff]  ;;  %v13548_v58 = vcombine.low %v2753_v38, %v2757_v41 }
 0x4dc   :  { %9025 = vmatprep.subr.bf16.mxu1 %v13573_v51  ;;  %v2621_v28 = vld [vmem:[#allocation9 + $0x828] sm:$0xff] }
 0x4dd   :  { %v2745_v44 = vld [vmem:[#allocation9 + $0xc08] sm:$0xff]  ;;  %v13413_v37 = vcombine.high %v2617_v4, %v2621_v28  ;;  %v13412_v49 = vcombine.low %v2617_v4, %v2621_v28 }
 0x4de   :  { %8983 = vmatpush1.bf16.msra.mxu0 %v13444_v7  ;;  %v2749_v32 = vld [vmem:[#allocation9 + $0xc28] sm:$0xff] }
 0x4df   :  { %9026 = vmatpush1.bf16.msra.mxu1 %v13572_v54  ;;  %8984 = vmatprep.subr.bf16.mxu0 %v13437_v57  ;;  %v13541_v55 = vcombine.high %v2745_v44, %v2749_v32  ;;  %v2737_v19 = vld [vmem:[#allocation9 + $0xbc8] sm:$0xff]  ;;  %v13540_v9 = vcombine.low %v2745_v44, %v2749_v32 }
 0x4e0   :  { %9027 = vmatprep.subr.bf16.mxu1 %v13565_v5  ;;  %v2741_v17 = vld [vmem:[#allocation9 + $0xbe8] sm:$0xff] }
 0x4e1   :  { %v2865_v23 = vld [vmem:[#allocation9 + $0xfc8] sm:$0xff]  ;;  %v13533_v60 = vcombine.high %v2737_v19, %v2741_v17  ;;  %v13532_v5 = vcombine.low %v2737_v19, %v2741_v17 }
 0x4e2   :  { %8985 = vmatpush1.bf16.msra.mxu0 %v13436_v47  ;;  %v2869_v51 = vld [vmem:[#allocation9 + $0xfe8] sm:$0xff] }
 0x4e3   :  { %9028 = vmatpush1.bf16.msra.mxu1 %v13564_v40  ;;  %8986 = vmatprep.subr.bf16.mxu0 %v13429_v2  ;;  %v13661_v3 = vcombine.high %v2865_v23, %v2869_v51  ;;  %v2729_v12 = vld [vmem:[#allocation9 + $0xb88] sm:$0xff]  ;;  %v13660_v13 = vcombine.low %v2865_v23, %v2869_v51 }
 0x4e4   :  { %9029 = vmatprep.subr.bf16.mxu1 %v13557_v43  ;;  %v2733_v7 = vld [vmem:[#allocation9 + $0xba8] sm:$0xff] }
 0x4e5   :  { %v2857_v54 = vld [vmem:[#allocation9 + $0xf88] sm:$0xff]  ;;  %v13525_v10 = vcombine.high %v2729_v12, %v2733_v7  ;;  %v13524_v43 = vcombine.low %v2729_v12, %v2733_v7 }
 0x4e6   :  { %8987 = vmatpush1.bf16.msra.mxu0 %v13428_v14  ;;  %v2861_v57 = vld [vmem:[#allocation9 + $0xfa8] sm:$0xff] }
 0x4e7   :  { %9030 = vmatpush1.bf16.msra.mxu1 %v13556_v29  ;;  %8988 = vmatprep.subr.bf16.mxu0 %v13421_v30  ;;  %v13653_v27 = vcombine.high %v2857_v54, %v2861_v57  ;;  %v2721_v18 = vld [vmem:[#allocation9 + $0xb48] sm:$0xff]  ;;  %v13652_v35 = vcombine.low %v2857_v54, %v2861_v57 }
 0x4e8   :  { %9031 = vmatprep.subr.bf16.mxu1 %v13549_v15  ;;  %v2725_v47 = vld [vmem:[#allocation9 + $0xb68] sm:$0xff] }
 0x4e9   :  { %v2849_v40 = vld [vmem:[#allocation9 + $0xf48] sm:$0xff]  ;;  %v13517_v61 = vcombine.high %v2721_v18, %v2725_v47  ;;  %v13516_v15 = vcombine.low %v2721_v18, %v2725_v47 }
 0x4ea   :  { %8989 = vmatpush1.bf16.msra.mxu0 %v13420_v56  ;;  %v2853_v2 = vld [vmem:[#allocation9 + $0xf68] sm:$0xff] }
 0x4eb   :  { %9032 = vmatpush1.bf16.msra.mxu1 %v13548_v58  ;;  %8990 = vmatprep.subr.bf16.mxu0 %v13413_v37  ;;  %v13645_v38 = vcombine.high %v2849_v40, %v2853_v2  ;;  %v2713_v41 = vld [vmem:[#allocation9 + $0xb08] sm:$0xff]  ;;  %v13644_v4 = vcombine.low %v2849_v40, %v2853_v2 }
 0x4ec   :  { %9033 = vmatprep.subr.bf16.mxu1 %v13541_v55  ;;  %v2717_v14 = vld [vmem:[#allocation9 + $0xb28] sm:$0xff] }
 0x4ed   :  { %v2841_v29 = vld [vmem:[#allocation9 + $0xf08] sm:$0xff]  ;;  %v13509_v28 = vcombine.high %v2713_v41, %v2717_v14  ;;  %v13508_v55 = vcombine.low %v2713_v41, %v2717_v14 }
 0x4ee   :  { %8991 = vmatpush1.bf16.msra.mxu0 %v13412_v49  ;;  %v2845_v30 = vld [vmem:[#allocation9 + $0xf28] sm:$0xff] }
 0x4ef   :  { %9034 = vmatpush1.bf16.msra.mxu1 %v13540_v9  ;;  %8992 = vmatprep.subr.bf16.mxu0 %v13533_v60  ;;  %v13637_v44 = vcombine.high %v2841_v29, %v2845_v30  ;;  %v2705_v32 = vld [vmem:[#allocation9 + $0xac8] sm:$0xff]  ;;  %v13636_v19 = vcombine.low %v2841_v29, %v2845_v30 }
 0x4f0   :  { %9035 = vmatprep.subr.bf16.mxu1 %v13661_v3  ;;  %v2709_v56 = vld [vmem:[#allocation9 + $0xae8] sm:$0xff] }
 0x4f1   :  { %v2833_v58 = vld [vmem:[#allocation9 + $0xec8] sm:$0xff]  ;;  %v13501_v17 = vcombine.high %v2705_v32, %v2709_v56  ;;  %v13500_v3 = vcombine.low %v2705_v32, %v2709_v56 }
 0x4f2   :  { %8993 = vmatpush2.bf16.msra.mxu0 %v13532_v5  ;;  %v2837_v37 = vld [vmem:[#allocation9 + $0xee8] sm:$0xff] }
 0x4f3   :  { %9036 = vmatpush2.bf16.msra.mxu1 %v13660_v13  ;;  %8994 = vmatprep.subr.bf16.mxu0 %v13525_v10  ;;  %v13629_v23 = vcombine.high %v2833_v58, %v2837_v37  ;;  %v2697_v51 = vld [vmem:[#allocation9 + $0xa88] sm:$0xff]  ;;  %v13628_v12 = vcombine.low %v2833_v58, %v2837_v37 }
 0x4f4   :  { %9037 = vmatprep.subr.bf16.mxu1 %v13653_v27  ;;  %v2701_v49 = vld [vmem:[#allocation9 + $0xaa8] sm:$0xff] }
 0x4f5   :  { %v2825_v9 = vld [vmem:[#allocation9 + $0xe88] sm:$0xff]  ;;  %v13493_v7 = vcombine.high %v2697_v51, %v2701_v49  ;;  %v13492_v27 = vcombine.low %v2697_v51, %v2701_v49 }
 0x4f6   :  { %8995 = vmatpush2.bf16.msra.mxu0 %v13524_v43  ;;  %v2829_v60 = vld [vmem:[#allocation9 + $0xea8] sm:$0xff] }
 0x4f7   :  { %9038 = vmatpush2.bf16.msra.mxu1 %v13652_v35  ;;  %8996 = vmatprep.subr.bf16.mxu0 %v13517_v61  ;;  %v13621_v54 = vcombine.high %v2825_v9, %v2829_v60  ;;  %v2689_v57 = vld [vmem:[#allocation9 + $0xa48] sm:$0xff]  ;;  %v13620_v18 = vcombine.low %v2825_v9, %v2829_v60 }
 0x4f8   :  { %9039 = vmatprep.subr.bf16.mxu1 %v13645_v38  ;;  %v2693_v5 = vld [vmem:[#allocation9 + $0xa68] sm:$0xff] }
 0x4f9   :  { %v2817_v13 = vld [vmem:[#allocation9 + $0xe48] sm:$0xff]  ;;  %v13485_v47 = vcombine.high %v2689_v57, %v2693_v5  ;;  %v13484_v38 = vcombine.low %v2689_v57, %v2693_v5 }
 0x4fa   :  { %8997 = vmatpush2.bf16.msra.mxu0 %v13516_v15  ;;  %v2821_v10 = vld [vmem:[#allocation9 + $0xe68] sm:$0xff] }
 0x4fb   :  { %9040 = vmatpush2.bf16.msra.mxu1 %v13644_v4  ;;  %8998 = vmatprep.subr.bf16.mxu0 %v13509_v28  ;;  %v13613_v40 = vcombine.high %v2817_v13, %v2821_v10  ;;  %v2681_v2 = vld [vmem:[#allocation9 + $0xa08] sm:$0xff]  ;;  %v13612_v41 = vcombine.low %v2817_v13, %v2821_v10 }
 0x4fc   :  { %9041 = vmatprep.subr.bf16.mxu1 %v13637_v44  ;;  %v2685_v43 = vld [vmem:[#allocation9 + $0xa28] sm:$0xff] }
 0x4fd   :  { %v2809_v35 = vld [vmem:[#allocation9 + $0xe08] sm:$0xff]  ;;  %v13477_v14 = vcombine.high %v2681_v2, %v2685_v43  ;;  %v13476_v44 = vcombine.low %v2681_v2, %v2685_v43 }
 0x4fe   :  { %8999 = vmatpush2.bf16.msra.mxu0 %v13508_v55  ;;  %v2813_v61 = vld [vmem:[#allocation9 + $0xe28] sm:$0xff] }
 0x4ff   :  { %9042 = vmatpush2.bf16.msra.mxu1 %v13636_v19  ;;  %9000 = vmatprep.subr.bf16.mxu0 %v13501_v17  ;;  %v13605_v29 = vcombine.high %v2809_v35, %v2813_v61  ;;  %v2929_v30 = vld [vmem:[#allocation9 + $0x11c8] sm:$0xff]  ;;  %v13604_v32 = vcombine.low %v2809_v35, %v2813_v61 }
 0x500   :  { %9043 = vmatprep.subr.bf16.mxu1 %v13629_v23  ;;  %v2933_v15 = vld [vmem:[#allocation9 + $0x11e8] sm:$0xff] }
 0x501   :  { %v3057_v4 = vld [vmem:[#allocation9 + $0x15c8] sm:$0xff]  ;;  %v13725_v56 = vcombine.high %v2929_v30, %v2933_v15  ;;  %v13724_v19 = vcombine.low %v2929_v30, %v2933_v15 }
 0x502   :  { %9001 = vmatpush2.bf16.msra.mxu0 %v13500_v3  ;;  %v3061_v28 = vld [vmem:[#allocation9 + $0x15e8] sm:$0xff] }
 0x503   :  { %9044 = vmatpush2.bf16.msra.mxu1 %v13628_v12  ;;  %9002 = vmatprep.subr.bf16.mxu0 %v13493_v7  ;;  %v13853_v58 = vcombine.high %v3057_v4, %v3061_v28  ;;  %v2921_v37 = vld [vmem:[#allocation9 + $0x1188] sm:$0xff]  ;;  %v13852_v51 = vcombine.low %v3057_v4, %v3061_v28 }
 0x504   :  { %9045 = vmatprep.subr.bf16.mxu1 %v13621_v54  ;;  %v2925_v55 = vld [vmem:[#allocation9 + $0x11a8] sm:$0xff] }
 0x505   :  { %v3049_v17 = vld [vmem:[#allocation9 + $0x1588] sm:$0xff]  ;;  %v13717_v49 = vcombine.high %v2921_v37, %v2925_v55  ;;  %v13716_v13 = vcombine.low %v2921_v37, %v2925_v55 }
 0x506   :  { %9003 = vmatpush2.bf16.msra.mxu0 %v13492_v27  ;;  %v3053_v23 = vld [vmem:[#allocation9 + $0x15a8] sm:$0xff] }
 0x507   :  { %9046 = vmatpush2.bf16.msra.mxu1 %v13620_v18  ;;  %9004 = vmatprep.subr.bf16.mxu0 %v13485_v47  ;;  %v2913_v9 = vld [vmem:[#allocation9 + $0x1148] sm:$0xff]  ;;  %v13845_v12 = vcombine.high %v3049_v17, %v3053_v23  ;;  %v13844_v27 = vcombine.low %v3049_v17, %v3053_v23 }
 0x508   :  { %9047 = vmatprep.subr.bf16.mxu1 %v13613_v40  ;;  %v2917_v60 = vld [vmem:[#allocation9 + $0x1168] sm:$0xff] }
 0x509   :  { %v3041_v7 = vld [vmem:[#allocation9 + $0x1548] sm:$0xff]  ;;  %v13709_v18 = vcombine.high %v2913_v9, %v2917_v60  ;;  %v13708_v15 = vcombine.low %v2913_v9, %v2917_v60 }
 0x50a   :  { %9005 = vmatpush2.bf16.msra.mxu0 %v13484_v38  ;;  %v3045_v54 = vld [vmem:[#allocation9 + $0x1568] sm:$0xff] }
 0x50b   :  { %9048 = vmatpush2.bf16.msra.mxu1 %v13612_v41  ;;  %9006 = vmatprep.subr.bf16.mxu0 %v13477_v14  ;;  %v2905_v43 = vld [vmem:[#allocation9 + $0x1108] sm:$0xff] }
 0x50c   :  { %9049 = vmatprep.subr.bf16.mxu1 %v13605_v29  ;;  %v2909_v35 = vld [vmem:[#allocation9 + $0x1128] sm:$0xff] }
 0x50d   :  { %v3033_v38 = vld [vmem:[#allocation9 + $0x1508] sm:$0xff]  ;;  %v13701_v28 = vcombine.high %v2905_v43, %v2909_v35  ;;  %v13700_v23 = vcombine.low %v2905_v43, %v2909_v35 }
 0x50e   :  { %9007 = vmatpush2.bf16.msra.mxu0 %v13476_v44  ;;  %v3037_v41 = vld [vmem:[#allocation9 + $0x1528] sm:$0xff] }
 0x50f   :  { %9050 = vmatpush2.bf16.msra.mxu1 %v13604_v32  ;;  %9062 = vmatprep.subr.bf16.mxu0 %v13725_v56  ;;  %v13829_v56 = vcombine.high %v3033_v38, %v3037_v41  ;;  %v2901_v37 = vld [vmem:[#allocation9 + $0x10e8] sm:$0xff] }
 0x510   :  { %9105 = vmatprep.subr.bf16.mxu1 %v13853_v58  ;;  %v2897_v58 = vld [vmem:[#allocation9 + $0x10c8] sm:$0xff] }
 0x511   :  { %v8752_v3 = vpop.f32.mrf.mxu0  ;;  %9009 = vmatmul.mubr.bf16.vlgmr.msra.gmra.mxu0 %v16248_v33  ;;  %v3029_v17 = vld [vmem:[#allocation9 + $0x14e8] sm:$0xff] }
 0x512   :  { %v8753_v57 = vadd.f32 %v8752_v3, %v16457_v1  ;;  %v8795_v5 = vpop.f32.mrf.mxu1  ;;  %9052 = vmatmul.mubr.bf16.vlgmr.msra.gmra.mxu1 %v16283_v31  ;;  %9063 = vmatpush1.bf16.msra.mxu0 %v13724_v19  ;;  %v13837_v1 = vcombine.high %v3041_v7, %v3045_v54  ;;  %v3025_v19 = vld [vmem:[#allocation9 + $0x14c8] sm:$0xff] }
 0x513   :  { %9094 = vmatprep.mubr.bf16.mxu0 %v16343_v0  ;;  %9106 = vmatpush1.bf16.msra.mxu1 %v13852_v51  ;;  %v8754_v10 = vpop.f32.mrf.mxu0  ;;  %v13828_v51 = vcombine.low %v3033_v38, %v3037_v41  ;;  %v13821_v9 = vcombine.high %v3025_v19, %v3029_v17  ;;  %v2889_v60 = vld [vmem:[#allocation9 + $0x1088] sm:$0xff] }
 0x514   :  { %v16473_v47 = vadd.f32 %v8795_v5, %v8753_v57  ;;  %9137 = vmatprep.mubr.bf16.mxu1 %v16357_v25  ;;  %v8755_v40 = vadd.f32 %v8754_v10, %v16461_v11  ;;  %v8797_v2 = vpop.f32.mrf.mxu1  ;;  %9064 = vmatprep.subr.bf16.mxu0 %v13717_v49  ;;  %v13836_v11 = vcombine.low %v3041_v7, %v3045_v54  ;;  %v2893_v3 = vld [vmem:[#allocation9 + $0x10a8] sm:$0xff] }
 0x515   :  { %v8756_v61 = vpop.f32.mrf.mxu0  ;;  %9107 = vmatprep.subr.bf16.mxu1 %v13845_v12  ;;  %v13693_v49 = vcombine.high %v2897_v58, %v2901_v37  ;;  %v3021_v12 = vld [vmem:[#allocation9 + $0x14a8] sm:$0xff]  ;;  %v13692_v7 = vcombine.low %v2897_v58, %v2901_v37  ;;  %v13820_v54 = vcombine.low %v3025_v19, %v3029_v17  ;;  %v13685_v57 = vcombine.high %v2889_v60, %v2893_v3 }
 0x516   :  { %v16477_v14 = vadd.f32 %v8797_v2, %v8755_v40  ;;  %v8757_v29 = vadd.f32 %v8756_v61, %v16464_v59  ;;  %v8799_v30 = vpop.f32.mrf.mxu1  ;;  %9065 = vmatpush1.bf16.msra.mxu0 %v13716_v13  ;;  %v2881_v13 = vld [vmem:[#allocation9 + $0x1048] sm:$0xff]  ;;  %v13684_v40 = vcombine.low %v2889_v60, %v2893_v3 }
 0x517   :  { %9108 = vmatpush1.bf16.msra.mxu1 %v13844_v27  ;;  %v8758_v4 = vpop.f32.mrf.mxu0  ;;  %9066 = vmatprep.subr.bf16.mxu0 %v13709_v18  ;;  %v2885_v10 = vld [vmem:[#allocation9 + $0x1068] sm:$0xff] }
 0x518   :  { %v16480_v44 = vadd.f32 %v8799_v30, %v8757_v29  ;;  %v8759_v32 = vadd.f32 %v8758_v4, %v16467_v36  ;;  %9109 = vmatprep.subr.bf16.mxu1 %v13837_v1  ;;  %v8801_v55 = vpop.f32.mrf.mxu1  ;;  %v3017_v36 = vld [vmem:[#allocation9 + $0x1488] sm:$0xff]  ;;  %v13677_v1 = vcombine.high %v2881_v13, %v2885_v10  ;;  %v13676_v29 = vcombine.low %v2881_v13, %v2885_v10 }
 0x519   :  { %v13813_v5 = vcombine.high %v3017_v36, %v3021_v12  ;;  %v3009_v27 = vld [vmem:[#allocation9 + $0x1448] sm:$0xff]  ;;  %v13812_v2 = vcombine.low %v3017_v36, %v3021_v12 }
 0x51a   :  { %v16483_v59 = vadd.f32 %v8801_v55, %v8759_v32  ;;  %9067 = vmatpush1.bf16.msra.mxu0 %v13708_v15  ;;  %v3013_v18 = vld [vmem:[#allocation9 + $0x1468] sm:$0xff] }
 0x51b   :  { %9110 = vmatpush1.bf16.msra.mxu1 %v13836_v11  ;;  %9068 = vmatprep.subr.bf16.mxu0 %v13701_v28  ;;  %v13805_v43 = vcombine.high %v3009_v27, %v3013_v18  ;;  %v2873_v35 = vld [vmem:[#allocation9 + $0x1008] sm:$0xff]  ;;  %v13804_v30 = vcombine.low %v3009_v27, %v3013_v18 }
 0x51c   :  { %9111 = vmatprep.subr.bf16.mxu1 %v13829_v56  ;;  %v2877_v61 = vld [vmem:[#allocation9 + $0x1028] sm:$0xff] }
 0x51d   :  { %v3001_v38 = vld [vmem:[#allocation9 + $0x1408] sm:$0xff]  ;;  %v13669_v15 = vcombine.high %v2873_v35, %v2877_v61  ;;  %v13668_v58 = vcombine.low %v2873_v35, %v2877_v61 }
 0x51e   :  { %9069 = vmatpush1.bf16.msra.mxu0 %v13700_v23  ;;  %v3005_v41 = vld [vmem:[#allocation9 + $0x1428] sm:$0xff] }
 0x51f   :  { %9112 = vmatpush1.bf16.msra.mxu1 %v13828_v51  ;;  %9070 = vmatprep.subr.bf16.mxu0 %v13693_v49  ;;  %v13797_v4 = vcombine.high %v3001_v38, %v3005_v41  ;;  %v2993_v11 = vld [vmem:[#allocation9 + $0x13c8] sm:$0xff]  ;;  %v13796_v37 = vcombine.low %v3001_v38, %v3005_v41 }
 0x520   :  { %9113 = vmatprep.subr.bf16.mxu1 %v13821_v9  ;;  %v2997_v28 = vld [vmem:[#allocation9 + $0x13e8] sm:$0xff] }
 0x521   :  { %v3121_v32 = vld [vmem:[#allocation9 + $0x17c8] sm:$0xff]  ;;  %v13789_v55 = vcombine.high %v2993_v11, %v2997_v28  ;;  %v13788_v9 = vcombine.low %v2993_v11, %v2997_v28 }
 0x522   :  { %9071 = vmatpush1.bf16.msra.mxu0 %v13692_v7  ;;  %v3125_v56 = vld [vmem:[#allocation9 + $0x17e8] sm:$0xff] }
 0x523   :  { %9114 = vmatpush1.bf16.msra.mxu1 %v13820_v54  ;;  %9072 = vmatprep.subr.bf16.mxu0 %v13685_v57  ;;  %v13917_v19 = vcombine.high %v3121_v32, %v3125_v56  ;;  %v2985_v17 = vld [vmem:[#allocation9 + $0x1388] sm:$0xff]  ;;  %v13916_v60 = vcombine.low %v3121_v32, %v3125_v56 }
 0x524   :  { %9115 = vmatprep.subr.bf16.mxu1 %v13813_v5  ;;  %v2989_v23 = vld [vmem:[#allocation9 + $0x13a8] sm:$0xff] }
 0x525   :  { %v3113_v51 = vld [vmem:[#allocation9 + $0x1788] sm:$0xff]  ;;  %v13781_v3 = vcombine.high %v2985_v17, %v2989_v23  ;;  %v13780_v5 = vcombine.low %v2985_v17, %v2989_v23 }
 0x526   :  { %9073 = vmatpush1.bf16.msra.mxu0 %v13684_v40  ;;  %v3117_v49 = vld [vmem:[#allocation9 + $0x17a8] sm:$0xff] }
 0x527   :  { %9116 = vmatpush1.bf16.msra.mxu1 %v13812_v2  ;;  %9074 = vmatprep.subr.bf16.mxu0 %v13677_v1  ;;  %v13909_v36 = vcombine.high %v3113_v51, %v3117_v49  ;;  %v2977_v12 = vld [vmem:[#allocation9 + $0x1348] sm:$0xff]  ;;  %v13908_v13 = vcombine.low %v3113_v51, %v3117_v49 }
 0x528   :  { %9117 = vmatprep.subr.bf16.mxu1 %v13805_v43  ;;  %v2981_v7 = vld [vmem:[#allocation9 + $0x1368] sm:$0xff] }
 0x529   :  { %v3105_v54 = vld [vmem:[#allocation9 + $0x1748] sm:$0xff]  ;;  %v13773_v10 = vcombine.high %v2977_v12, %v2981_v7  ;;  %v13772_v43 = vcombine.low %v2977_v12, %v2981_v7 }
 0x52a   :  { %9075 = vmatpush1.bf16.msra.mxu0 %v13676_v29  ;;  %v3109_v57 = vld [vmem:[#allocation9 + $0x1768] sm:$0xff] }
 0x52b   :  { %9118 = vmatpush1.bf16.msra.mxu1 %v13804_v30  ;;  %9076 = vmatprep.subr.bf16.mxu0 %v13669_v15  ;;  %v13901_v27 = vcombine.high %v3105_v54, %v3109_v57  ;;  %v2969_v18 = vld [vmem:[#allocation9 + $0x1308] sm:$0xff]  ;;  %v13900_v35 = vcombine.low %v3105_v54, %v3109_v57 }
 0x52c   :  { %9119 = vmatprep.subr.bf16.mxu1 %v13797_v4  ;;  %v2973_v40 = vld [vmem:[#allocation9 + $0x1328] sm:$0xff] }
 0x52d   :  { %v3097_v2 = vld [vmem:[#allocation9 + $0x1708] sm:$0xff]  ;;  %v13765_v61 = vcombine.high %v2969_v18, %v2973_v40  ;;  %v13764_v4 = vcombine.low %v2969_v18, %v2973_v40 }
 0x52e   :  { %9077 = vmatpush1.bf16.msra.mxu0 %v13668_v58  ;;  %v3101_v1 = vld [vmem:[#allocation9 + $0x1728] sm:$0xff] }
 0x52f   :  { %9120 = vmatpush1.bf16.msra.mxu1 %v13796_v37  ;;  %9078 = vmatprep.subr.bf16.mxu0 %v13789_v55  ;;  %v13893_v38 = vcombine.high %v3097_v2, %v3101_v1  ;;  %v2961_v41 = vld [vmem:[#allocation9 + $0x12c8] sm:$0xff]  ;;  %v13892_v11 = vcombine.low %v3097_v2, %v3101_v1 }
 0x530   :  { %9121 = vmatprep.subr.bf16.mxu1 %v13917_v19  ;;  %v2965_v29 = vld [vmem:[#allocation9 + $0x12e8] sm:$0xff] }
 0x531   :  { %v3089_v30 = vld [vmem:[#allocation9 + $0x16c8] sm:$0xff]  ;;  %v13757_v28 = vcombine.high %v2961_v41, %v2965_v29  ;;  %v13756_v19 = vcombine.low %v2961_v41, %v2965_v29 }
 0x532   :  { %9079 = vmatpush2.bf16.msra.mxu0 %v13788_v9  ;;  %v3093_v15 = vld [vmem:[#allocation9 + $0x16e8] sm:$0xff] }
 0x533   :  { %9122 = vmatpush2.bf16.msra.mxu1 %v13916_v60  ;;  %9080 = vmatprep.subr.bf16.mxu0 %v13781_v3  ;;  %v13885_v32 = vcombine.high %v3089_v30, %v3093_v15  ;;  %v2953_v56 = vld [vmem:[#allocation9 + $0x1288] sm:$0xff]  ;;  %v13884_v17 = vcombine.low %v3089_v30, %v3093_v15 }
 0x534   :  { %9123 = vmatprep.subr.bf16.mxu1 %v13909_v36  ;;  %v2957_v58 = vld [vmem:[#allocation9 + $0x12a8] sm:$0xff] }
 0x535   :  { %v3081_v37 = vld [vmem:[#allocation9 + $0x1688] sm:$0xff]  ;;  %v13749_v23 = vcombine.high %v2953_v56, %v2957_v58  ;;  %v13748_v36 = vcombine.low %v2953_v56, %v2957_v58 }
 0x536   :  { %9081 = vmatpush2.bf16.msra.mxu0 %v13780_v5  ;;  %v3085_v55 = vld [vmem:[#allocation9 + $0x16a8] sm:$0xff] }
 0x537   :  { %9124 = vmatpush2.bf16.msra.mxu1 %v13908_v13  ;;  %9082 = vmatprep.subr.bf16.mxu0 %v13773_v10  ;;  %v13877_v51 = vcombine.high %v3081_v37, %v3085_v55  ;;  %v2945_v49 = vld [vmem:[#allocation9 + $0x1248] sm:$0xff]  ;;  %v13876_v12 = vcombine.low %v3081_v37, %v3085_v55 }
 0x538   :  { %9125 = vmatprep.subr.bf16.mxu1 %v13901_v27  ;;  %v2949_v9 = vld [vmem:[#allocation9 + $0x1268] sm:$0xff] }
 0x539   :  { %v3073_v60 = vld [vmem:[#allocation9 + $0x1648] sm:$0xff]  ;;  %v13741_v7 = vcombine.high %v2945_v49, %v2949_v9  ;;  %v13740_v27 = vcombine.low %v2945_v49, %v2949_v9 }
 0x53a   :  { %9083 = vmatpush2.bf16.msra.mxu0 %v13772_v43  ;;  %v3077_v3 = vld [vmem:[#allocation9 + $0x1668] sm:$0xff] }
 0x53b   :  { %9126 = vmatpush2.bf16.msra.mxu1 %v13900_v35  ;;  %9084 = vmatprep.subr.bf16.mxu0 %v13765_v61  ;;  %v13869_v54 = vcombine.high %v3073_v60, %v3077_v3  ;;  %v2937_v57 = vld [vmem:[#allocation9 + $0x1208] sm:$0xff]  ;;  %v13868_v18 = vcombine.low %v3073_v60, %v3077_v3 }
 0x53c   :  { %9127 = vmatprep.subr.bf16.mxu1 %v13893_v38  ;;  %v2941_v5 = vld [vmem:[#allocation9 + $0x1228] sm:$0xff] }
 0x53d   :  { %v3065_v13 = vld [vmem:[#allocation9 + $0x1608] sm:$0xff]  ;;  %v13733_v40 = vcombine.high %v2937_v57, %v2941_v5  ;;  %v13732_v38 = vcombine.low %v2937_v57, %v2941_v5 }
 0x53e   :  { %9085 = vmatpush2.bf16.msra.mxu0 %v13764_v4  ;;  %v3069_v10 = vld [vmem:[#allocation9 + $0x1628] sm:$0xff] }
 0x53f   :  { %9128 = vmatpush2.bf16.msra.mxu1 %v13892_v11  ;;  %9086 = vmatprep.subr.bf16.mxu0 %v13757_v28  ;;  %v13861_v2 = vcombine.high %v3065_v13, %v3069_v10  ;;  %v3185_v1 = vld [vmem:[#allocation9 + $0x19c8] sm:$0xff]  ;;  %v13860_v41 = vcombine.low %v3065_v13, %v3069_v10 }
 0x540   :  { %9129 = vmatprep.subr.bf16.mxu1 %v13885_v32  ;;  %v3189_v43 = vld [vmem:[#allocation9 + $0x19e8] sm:$0xff] }
 0x541   :  { %v3313_v35 = vld [vmem:[#allocation9 + $0x1dc8] sm:$0xff]  ;;  %v13981_v29 = vcombine.high %v3185_v1, %v3189_v43  ;;  %v13980_v11 = vcombine.low %v3185_v1, %v3189_v43 }
 0x542   :  { %9087 = vmatpush2.bf16.msra.mxu0 %v13756_v19  ;;  %v3317_v61 = vld [vmem:[#allocation9 + $0x1de8] sm:$0xff] }
 0x543   :  { %9130 = vmatpush2.bf16.msra.mxu1 %v13884_v17  ;;  %9088 = vmatprep.subr.bf16.mxu0 %v13749_v23  ;;  %v14109_v30 = vcombine.high %v3313_v35, %v3317_v61  ;;  %v3177_v15 = vld [vmem:[#allocation9 + $0x1988] sm:$0xff]  ;;  %v14108_v56 = vcombine.low %v3313_v35, %v3317_v61 }
 0x544   :  { %9131 = vmatprep.subr.bf16.mxu1 %v13877_v51  ;;  %v3181_v4 = vld [vmem:[#allocation9 + $0x19a8] sm:$0xff] }
 0x545   :  { %v3305_v28 = vld [vmem:[#allocation9 + $0x1d88] sm:$0xff]  ;;  %v13973_v58 = vcombine.high %v3177_v15, %v3181_v4  ;;  %v13972_v60 = vcombine.low %v3177_v15, %v3181_v4 }
 0x546   :  { %9089 = vmatpush2.bf16.msra.mxu0 %v13748_v36  ;;  %v3309_v32 = vld [vmem:[#allocation9 + $0x1da8] sm:$0xff] }
 0x547   :  { %9132 = vmatpush2.bf16.msra.mxu1 %v13876_v12  ;;  %9090 = vmatprep.subr.bf16.mxu0 %v13741_v7  ;;  %v3169_v37 = vld [vmem:[#allocation9 + $0x1948] sm:$0xff]  ;;  %v14101_v17 = vcombine.high %v3305_v28, %v3309_v32  ;;  %v14100_v36 = vcombine.low %v3305_v28, %v3309_v32 }
 0x548   :  { %9133 = vmatprep.subr.bf16.mxu1 %v13869_v54  ;;  %v3173_v55 = vld [vmem:[#allocation9 + $0x1968] sm:$0xff] }
 0x549   :  { %v3297_v23 = vld [vmem:[#allocation9 + $0x1d48] sm:$0xff]  ;;  %v13965_v12 = vcombine.high %v3169_v37, %v3173_v55  ;;  %v13964_v43 = vcombine.low %v3169_v37, %v3173_v55 }
 0x54a   :  { %9091 = vmatpush2.bf16.msra.mxu0 %v13740_v27  ;;  %v3301_v51 = vld [vmem:[#allocation9 + $0x1d68] sm:$0xff] }
 0x54b   :  { %9134 = vmatpush2.bf16.msra.mxu1 %v13868_v18  ;;  %9092 = vmatprep.subr.bf16.mxu0 %v13733_v40  ;;  %v3161_v5 = vld [vmem:[#allocation9 + $0x1908] sm:$0xff] }
 0x54c   :  { %9135 = vmatprep.subr.bf16.mxu1 %v13861_v2  ;;  %v3165_v13 = vld [vmem:[#allocation9 + $0x1928] sm:$0xff] }
 0x54d   :  { %v3289_v27 = vld [vmem:[#allocation9 + $0x1d08] sm:$0xff]  ;;  %v13957_v61 = vcombine.high %v3161_v5, %v3165_v13  ;;  %v13956_v32 = vcombine.low %v3161_v5, %v3165_v13 }
 0x54e   :  { %9093 = vmatpush2.bf16.msra.mxu0 %v13732_v38  ;;  %v3293_v18 = vld [vmem:[#allocation9 + $0x1d28] sm:$0xff] }
 0x54f   :  { %9136 = vmatpush2.bf16.msra.mxu1 %v13860_v41  ;;  %9148 = vmatprep.subr.bf16.mxu0 %v13981_v29  ;;  %v14085_v29 = vcombine.high %v3289_v27, %v3293_v18  ;;  %v3157_v15 = vld [vmem:[#allocation9 + $0x18e8] sm:$0xff] }
 0x550   :  { %9191 = vmatprep.subr.bf16.mxu1 %v14109_v30  ;;  %v3153_v30 = vld [vmem:[#allocation9 + $0x18c8] sm:$0xff] }
 0x551   :  { %v8838_v19 = vpop.f32.mrf.mxu0  ;;  %9095 = vmatmul.mubr.bf16.vlgmr.msra.gmra.mxu0 %v16398_v62  ;;  %v3285_v28 = vld [vmem:[#allocation9 + $0x1ce8] sm:$0xff] }
 0x552   :  { %v8839_v49 = vadd.f32 %v8838_v19, %v16473_v47  ;;  %v8881_v9 = vpop.f32.mrf.mxu1  ;;  %9138 = vmatmul.mubr.bf16.vlgmr.msra.gmra.mxu1 %v16400_v46  ;;  %9149 = vmatpush1.bf16.msra.mxu0 %v13980_v11  ;;  %v14093_v47 = vcombine.high %v3297_v23, %v3301_v51  ;;  %v3281_v11 = vld [vmem:[#allocation9 + $0x1cc8] sm:$0xff] }
 0x553   :  { %9180 = vmatprep.mubr.bf16.mxu0 %v16407_v45  ;;  %9192 = vmatpush1.bf16.msra.mxu1 %v14108_v56  ;;  %v8840_v3 = vpop.f32.mrf.mxu0  ;;  %v14084_v56 = vcombine.low %v3289_v27, %v3293_v18  ;;  %v14077_v37 = vcombine.high %v3281_v11, %v3285_v28  ;;  %v3145_v55 = vld [vmem:[#allocation9 + $0x1888] sm:$0xff] }
 0x554   :  { %v16489_v7 = vadd.f32 %v8881_v9, %v8839_v49  ;;  %9223 = vmatprep.mubr.bf16.mxu1 %v16409_v8  ;;  %v8841_v54 = vadd.f32 %v8840_v3, %v16477_v14  ;;  %v8883_v57 = vpop.f32.mrf.mxu1  ;;  %9150 = vmatprep.subr.bf16.mxu0 %v13973_v58  ;;  %v14092_v14 = vcombine.low %v3297_v23, %v3301_v51  ;;  %v3149_v19 = vld [vmem:[#allocation9 + $0x18a8] sm:$0xff] }
 0x555   :  { %v8842_v10 = vpop.f32.mrf.mxu0  ;;  %9193 = vmatprep.subr.bf16.mxu1 %v14101_v17  ;;  %v13949_v58 = vcombine.high %v3153_v30, %v3157_v15  ;;  %v3277_v17 = vld [vmem:[#allocation9 + $0x1ca8] sm:$0xff]  ;;  %v13948_v23 = vcombine.low %v3153_v30, %v3157_v15  ;;  %v14076_v51 = vcombine.low %v3281_v11, %v3285_v28  ;;  %v13941_v49 = vcombine.high %v3145_v55, %v3149_v19 }
 0x556   :  { %v16493_v40 = vadd.f32 %v8883_v57, %v8841_v54  ;;  %v8843_v2 = vadd.f32 %v8842_v10, %v16480_v44  ;;  %v8885_v1 = vpop.f32.mrf.mxu1  ;;  %9151 = vmatpush1.bf16.msra.mxu0 %v13972_v60  ;;  %v3137_v60 = vld [vmem:[#allocation9 + $0x1848] sm:$0xff]  ;;  %v13940_v54 = vcombine.low %v3145_v55, %v3149_v19 }
 0x557   :  { %9194 = vmatpush1.bf16.msra.mxu1 %v14100_v36  ;;  %v8844_v35 = vpop.f32.mrf.mxu0  ;;  %9152 = vmatprep.subr.bf16.mxu0 %v13965_v12  ;;  %v3141_v3 = vld [vmem:[#allocation9 + $0x1868] sm:$0xff] }
 0x558   :  { %v16496_v38 = vadd.f32 %v8885_v1, %v8843_v2  ;;  %v8845_v41 = vadd.f32 %v8844_v35, %v16483_v59  ;;  %9195 = vmatprep.subr.bf16.mxu1 %v14093_v47  ;;  %v8887_v4 = vpop.f32.mrf.mxu1  ;;  %v3273_v59 = vld [vmem:[#allocation9 + $0x1c88] sm:$0xff]  ;;  %v13933_v47 = vcombine.high %v3137_v60, %v3141_v3  ;;  %v13932_v2 = vcombine.low %v3137_v60, %v3141_v3 }
 0x559   :  { %v14069_v9 = vcombine.high %v3273_v59, %v3277_v17  ;;  %v3265_v36 = vld [vmem:[#allocation9 + $0x1c48] sm:$0xff]  ;;  %v14068_v57 = vcombine.low %v3273_v59, %v3277_v17 }
 0x55a   :  { %17128 = vst [vmem:[#allocation67_spill] sm:$0xff] %v16496_v38  ;;  %v16499_v44 = vadd.f32 %v8887_v4, %v8845_v41  ;;  %9153 = vmatpush1.bf16.msra.mxu0 %v13964_v43  ;;  %v3269_v12 = vld [vmem:[#allocation9 + $0x1c68] sm:$0xff] }
 0x55b   :  { %9196 = vmatpush1.bf16.msra.mxu1 %v14092_v14  ;;  %9154 = vmatprep.subr.bf16.mxu0 %v13957_v61  ;;  %v14061_v5 = vcombine.high %v3265_v36, %v3269_v12  ;;  %v3129_v13 = vld [vmem:[#allocation9 + $0x1808] sm:$0xff]  ;;  %v14060_v1 = vcombine.low %v3265_v36, %v3269_v12 }
 0x55c   :  { %17129 = vst [vmem:[#allocation66_spill] sm:$0xff] %v16499_v44  ;;  %9197 = vmatprep.subr.bf16.mxu1 %v14085_v29  ;;  %v3133_v10 = vld [vmem:[#allocation9 + $0x1828] sm:$0xff]  ;;  %v15082_v44 = vld [vmem:[#allocation10] sm:$0xff] }
 0x55d   :  { %v3257_v27 = vld [vmem:[#allocation9 + $0x1c08] sm:$0xff]  ;;  %v13925_v43 = vcombine.high %v3129_v13, %v3133_v10  ;;  %v13924_v30 = vcombine.low %v3129_v13, %v3133_v10 }
 0x55e   :  { %9155 = vmatpush1.bf16.msra.mxu0 %v13956_v32  ;;  %v3261_v18 = vld [vmem:[#allocation9 + $0x1c28] sm:$0xff] }
 0x55f   :  { %9198 = vmatpush1.bf16.msra.mxu1 %v14084_v56  ;;  %9156 = vmatprep.subr.bf16.mxu0 %v13949_v58  ;;  %v14053_v35 = vcombine.high %v3257_v27, %v3261_v18  ;;  %v3249_v14 = vld [vmem:[#allocation9 + $0x1bc8] sm:$0xff]  ;;  %v14052_v15 = vcombine.low %v3257_v27, %v3261_v18 }
 0x560   :  { %9199 = vmatprep.subr.bf16.mxu1 %v14077_v37  ;;  %v3253_v61 = vld [vmem:[#allocation9 + $0x1be8] sm:$0xff] }
 0x561   :  { %v3377_v41 = vld [vmem:[#allocation9 + $0x1fc8] sm:$0xff]  ;;  %v14045_v4 = vcombine.high %v3249_v14, %v3253_v61  ;;  %v14044_v37 = vcombine.low %v3249_v14, %v3253_v61 }
 0x562   :  { %9157 = vmatpush1.bf16.msra.mxu0 %v13948_v23  ;;  %v3381_v29 = vld [vmem:[#allocation9 + $0x1fe8] sm:$0xff] }
 0x563   :  { %9200 = vmatpush1.bf16.msra.mxu1 %v14076_v51  ;;  %9158 = vmatprep.subr.bf16.mxu0 %v13941_v49  ;;  %v14173_v11 = vcombine.high %v3377_v41, %v3381_v29  ;;  %v3241_v28 = vld [vmem:[#allocation9 + $0x1b88] sm:$0xff]  ;;  %v14172_v55 = vcombine.low %v3377_v41, %v3381_v29 }
 0x564   :  { %9201 = vmatprep.subr.bf16.mxu1 %v14069_v9  ;;  %v3245_v32 = vld [vmem:[#allocation9 + $0x1ba8] sm:$0xff] }
 0x565   :  { %v3369_v56 = vld [vmem:[#allocation9 + $0x1f88] sm:$0xff]  ;;  %v14037_v19 = vcombine.high %v3241_v28, %v3245_v32  ;;  %v14036_v9 = vcombine.low %v3241_v28, %v3245_v32 }
 0x566   :  { %9159 = vmatpush1.bf16.msra.mxu0 %v13940_v54  ;;  %v3373_v58 = vld [vmem:[#allocation9 + $0x1fa8] sm:$0xff] }
 0x567   :  { %9202 = vmatpush1.bf16.msra.mxu1 %v14068_v57  ;;  %9160 = vmatprep.subr.bf16.mxu0 %v13933_v47  ;;  %v14165_v59 = vcombine.high %v3369_v56, %v3373_v58  ;;  %v3233_v17 = vld [vmem:[#allocation9 + $0x1b48] sm:$0xff]  ;;  %v14164_v60 = vcombine.low %v3369_v56, %v3373_v58 }
 0x568   :  { %9203 = vmatprep.subr.bf16.mxu1 %v14061_v5  ;;  %v3237_v23 = vld [vmem:[#allocation9 + $0x1b68] sm:$0xff] }
 0x569   :  { %v3361_v51 = vld [vmem:[#allocation9 + $0x1f48] sm:$0xff]  ;;  %v14029_v3 = vcombine.high %v3233_v17, %v3237_v23  ;;  %v14028_v5 = vcombine.low %v3233_v17, %v3237_v23 }
 0x56a   :  { %9161 = vmatpush1.bf16.msra.mxu0 %v13932_v2  ;;  %v3365_v49 = vld [vmem:[#allocation9 + $0x1f68] sm:$0xff] }
 0x56b   :  { %9204 = vmatpush1.bf16.msra.mxu1 %v14060_v1  ;;  %9162 = vmatprep.subr.bf16.mxu0 %v13925_v43  ;;  %v14157_v36 = vcombine.high %v3361_v51, %v3365_v49  ;;  %v3225_v12 = vld [vmem:[#allocation9 + $0x1b08] sm:$0xff]  ;;  %v14156_v13 = vcombine.low %v3361_v51, %v3365_v49 }
 0x56c   :  { %9205 = vmatprep.subr.bf16.mxu1 %v14053_v35  ;;  %v3229_v54 = vld [vmem:[#allocation9 + $0x1b28] sm:$0xff] }
 0x56d   :  { %v3353_v57 = vld [vmem:[#allocation9 + $0x1f08] sm:$0xff]  ;;  %v14021_v10 = vcombine.high %v3225_v12, %v3229_v54  ;;  %v14020_v35 = vcombine.low %v3225_v12, %v3229_v54 }
 0x56e   :  { %9163 = vmatpush1.bf16.msra.mxu0 %v13924_v30  ;;  %v3357_v47 = vld [vmem:[#allocation9 + $0x1f28] sm:$0xff] }
 0x56f   :  { %9206 = vmatpush1.bf16.msra.mxu1 %v14052_v15  ;;  %9164 = vmatprep.subr.bf16.mxu0 %v14045_v4  ;;  %v14149_v27 = vcombine.high %v3353_v57, %v3357_v47  ;;  %v3217_v18 = vld [vmem:[#allocation9 + $0x1ac8] sm:$0xff]  ;;  %v14148_v14 = vcombine.low %v3353_v57, %v3357_v47  ;;  %v2418_v47 = vld [vmem:[#allocation9 + $0x1d0] sm:$0xff] }
 0x570   :  { %9207 = vmatprep.subr.bf16.mxu1 %v14173_v11  ;;  %v3221_v2 = vld [vmem:[#allocation9 + $0x1ae8] sm:$0xff] }
 0x571   :  { %v3345_v1 = vld [vmem:[#allocation9 + $0x1ec8] sm:$0xff]  ;;  %v14013_v61 = vcombine.high %v3217_v18, %v3221_v2  ;;  %v14012_v11 = vcombine.low %v3217_v18, %v3221_v2 }
 0x572   :  { %9165 = vmatpush2.bf16.msra.mxu0 %v14044_v37  ;;  %v3349_v43 = vld [vmem:[#allocation9 + $0x1ee8] sm:$0xff] }
 0x573   :  { %9208 = vmatpush2.bf16.msra.mxu1 %v14172_v55  ;;  %9166 = vmatprep.subr.bf16.mxu0 %v14037_v19  ;;  %v14141_v41 = vcombine.high %v3345_v1, %v3349_v43  ;;  %v3209_v29 = vld [vmem:[#allocation9 + $0x1a88] sm:$0xff]  ;;  %v14140_v28 = vcombine.low %v3345_v1, %v3349_v43  ;;  %v2410_v43 = vld [vmem:[#allocation9 + $0x190] sm:$0xff] }
 0x574   :  { %9209 = vmatprep.subr.bf16.mxu1 %v14165_v59  ;;  %v3213_v30 = vld [vmem:[#allocation9 + $0x1aa8] sm:$0xff] }
 0x575   :  { %v3337_v15 = vld [vmem:[#allocation9 + $0x1e88] sm:$0xff]  ;;  %v14005_v32 = vcombine.high %v3209_v29, %v3213_v30  ;;  %v14004_v59 = vcombine.low %v3209_v29, %v3213_v30  ;;  %v2538_v29 = vld [vmem:[#allocation9 + $0x590] sm:$0xff] }
 0x576   :  { %9167 = vmatpush2.bf16.msra.mxu0 %v14036_v9  ;;  %v3341_v4 = vld [vmem:[#allocation9 + $0x1ea8] sm:$0xff]  ;;  %v2542_v30 = vld [vmem:[#allocation9 + $0x5b0] sm:$0xff] }
 0x577   :  { %9210 = vmatpush2.bf16.msra.mxu1 %v14164_v60  ;;  %9168 = vmatprep.subr.bf16.mxu0 %v14029_v3  ;;  %v14133_v56 = vcombine.high %v3337_v15, %v3341_v4  ;;  %v3201_v58 = vld [vmem:[#allocation9 + $0x1a48] sm:$0xff]  ;;  %v14132_v17 = vcombine.low %v3337_v15, %v3341_v4 }
 0x578   :  { %9211 = vmatprep.subr.bf16.mxu1 %v14157_v36  ;;  %v3205_v37 = vld [vmem:[#allocation9 + $0x1a68] sm:$0xff] }
 0x579   :  { %v3329_v55 = vld [vmem:[#allocation9 + $0x1e48] sm:$0xff]  ;;  %v13997_v23 = vcombine.high %v3201_v58, %v3205_v37  ;;  %v13996_v36 = vcombine.low %v3201_v58, %v3205_v37  ;;  %v13335_v37 = vcombine.high %v2538_v29, %v2542_v30 }
 0x57a   :  { %9169 = vmatpush2.bf16.msra.mxu0 %v14028_v5  ;;  %v3333_v19 = vld [vmem:[#allocation9 + $0x1e68] sm:$0xff]  ;;  %v2422_v5 = vld [vmem:[#allocation9 + $0x1f0] sm:$0xff] }
 0x57b   :  { %9212 = vmatpush2.bf16.msra.mxu1 %v14156_v13  ;;  %9170 = vmatprep.subr.bf16.mxu0 %v14021_v10  ;;  %v14125_v51 = vcombine.high %v3329_v55, %v3333_v19  ;;  %v3193_v49 = vld [vmem:[#allocation9 + $0x1a08] sm:$0xff]  ;;  %v14124_v12 = vcombine.low %v3329_v55, %v3333_v19  ;;  %v2546_v13 = vld [vmem:[#allocation9 + $0x5d0] sm:$0xff]  ;;  %v13215_v2 = vcombine.high %v2418_v47, %v2422_v5 }
 0x57c   :  { %9213 = vmatprep.subr.bf16.mxu1 %v14149_v27  ;;  %v3197_v9 = vld [vmem:[#allocation9 + $0x1a28] sm:$0xff]  ;;  %v2550_v10 = vld [vmem:[#allocation9 + $0x5f0] sm:$0xff] }
 0x57d   :  { %v3321_v60 = vld [vmem:[#allocation9 + $0x1e08] sm:$0xff]  ;;  %v13989_v54 = vcombine.high %v3193_v49, %v3197_v9  ;;  %v13988_v27 = vcombine.low %v3193_v49, %v3197_v9  ;;  %v13343_v1 = vcombine.high %v2546_v13, %v2550_v10  ;;  %v13342_v15 = vcombine.low %v2546_v13, %v2550_v10  ;;  %v2530_v55 = vld [vmem:[#allocation9 + $0x550] sm:$0xff] }
 0x57e   :  { %9171 = vmatpush2.bf16.msra.mxu0 %v14020_v35  ;;  %v3325_v3 = vld [vmem:[#allocation9 + $0x1e28] sm:$0xff]  ;;  %v2414_v35 = vld [vmem:[#allocation9 + $0x1b0] sm:$0xff]  ;;  %v13334_v49 = vcombine.low %v2538_v29, %v2542_v30 }
 0x57f   :  { %9214 = vmatpush2.bf16.msra.mxu1 %v14148_v14  ;;  %9172 = vmatprep.subr.bf16.mxu0 %v14013_v61  ;;  %v14117_v57 = vcombine.high %v3321_v60, %v3325_v3  ;;  %v14116_v18 = vcombine.low %v3321_v60, %v3325_v3  ;;  %v15081_v14 = vld [vmem:[#allocation10] sm:$0xff]  ;;  %v2534_v19 = vld [vmem:[#allocation9 + $0x570] sm:$0xff] }
 0x580   :  { %9215 = vmatprep.subr.bf16.mxu1 %v14141_v41  ;;  %v3397_v61 = vrot.slane %v15081_v14, %v17099_v34  ;;  %v13214_v41 = vcombine.low %v2418_v47, %v2422_v5  ;;  %v17130_v4 = vld [vmem:[#allocation43_spill] sm:$0xff]  ;;  %v2522_v5 = vld [vmem:[#allocation9 + $0x510] sm:$0xff] }
 0x581   :  { %v2526_v13 = vld [vmem:[#allocation9 + $0x530] sm:$0xff] }
 0x582   :  { %9173 = vmatpush2.bf16.msra.mxu0 %v14012_v11  ;;  %v3401_v11 = vrot.slane %v15081_v14, %v17130_v4  ;;  %v13319_v29 = vcombine.high %v2522_v5, %v2526_v13  ;;  %v2386_v30 = vld [vmem:[#allocation9 + $0xd0] sm:$0xff] }
 0x583   :  { %9216 = vmatpush2.bf16.msra.mxu1 %v14140_v28  ;;  %9174 = vmatprep.subr.bf16.mxu0 %v14005_v32  ;;  %v13207_v28 = vcombine.high %v2410_v43, %v2414_v35  ;;  %v2402_v32 = vld [vmem:[#allocation9 + $0x150] sm:$0xff] }
 0x584   :  { %9217 = vmatprep.subr.bf16.mxu1 %v14133_v56  ;;  %v2406_v56 = vld [vmem:[#allocation9 + $0x170] sm:$0xff] }
 0x585   :  { %v13199_v9 = vcombine.high %v2402_v32, %v2406_v56 }
 0x586   :  { %9175 = vmatpush2.bf16.msra.mxu0 %v14004_v59 }
 0x587   :  { %9218 = vmatpush2.bf16.msra.mxu1 %v14132_v17  ;;  %9176 = vmatprep.subr.bf16.mxu0 %v13997_v23  ;;  %v13206_v23 = vcombine.low %v2410_v43, %v2414_v35  ;;  %v13326_v43 = vcombine.low %v2530_v55, %v2534_v19 }
 0x588   :  { %9219 = vmatprep.subr.bf16.mxu1 %v14125_v51 }
 0x58a   :  { %9177 = vmatpush2.bf16.msra.mxu0 %v13996_v36 }
 0x58b   :  { %9220 = vmatpush2.bf16.msra.mxu1 %v14124_v12  ;;  %9178 = vmatprep.subr.bf16.mxu0 %v13989_v54  ;;  %v13327_v12 = vcombine.high %v2530_v55, %v2534_v19  ;;  %v2394_v54 = vld [vmem:[#allocation9 + $0x110] sm:$0xff] }
 0x58c   :  { %9221 = vmatprep.subr.bf16.mxu1 %v14117_v57  ;;  %v2398_v57 = vld [vmem:[#allocation9 + $0x130] sm:$0xff] }
 0x58d   :  { %v13191_v35 = vcombine.high %v2394_v54, %v2398_v57  ;;  %v2378_v19 = vld [vmem:[#allocation9 + $0x90] sm:$0xff] }
 0x58e   :  { %9179 = vmatpush2.bf16.msra.mxu0 %v13988_v27 }
 0x58f   :  { %9222 = vmatpush2.bf16.msra.mxu1 %v14116_v18  ;;  %9234 = vmatprep.subr.bf16.mxu0 %v13215_v2  ;;  %v13198_v2 = vcombine.low %v2402_v32, %v2406_v56  ;;  %v13318_v32 = vcombine.low %v2522_v5, %v2526_v13 }
 0x590   :  { %9277 = vmatprep.subr.bf16.mxu1 %v13343_v1 }
 0x591   :  { %v8924_v58 = vpop.f32.mrf.mxu0  ;;  %9181 = vmatmul.mubr.bf16.vlgmr.msra.gmra.mxu0 %v16427_v52 }
 0x592   :  { %v8925_v59 = vadd.f32 %v8924_v58, %v3397_v61  ;;  %v8967_v17 = vpop.f32.mrf.mxu1  ;;  %9224 = vmatmul.mubr.bf16.vlgmr.msra.gmra.mxu1 %v16429_v53  ;;  %9235 = vmatpush1.bf16.msra.mxu0 %v13214_v41  ;;  %v2514_v58 = vld [vmem:[#allocation9 + $0x4d0] sm:$0xff] }
 0x593   :  { %9266 = vmatprep.mubr.bf16.mxu0 %v16226_v22  ;;  %9278 = vmatpush1.bf16.msra.mxu1 %v13342_v15  ;;  %v8926_v51 = vpop.f32.mrf.mxu0  ;;  %v2390_v15 = vld [vmem:[#allocation9 + $0xf0] sm:$0xff] }
 0x594   :  { %v16506_v60 = vadd.f32 %v8967_v17, %v8925_v59  ;;  %9309 = vmatprep.mubr.bf16.mxu1 %v16228_v50  ;;  %v8927_v3 = vadd.f32 %v8926_v51, %v3401_v11  ;;  %v8969_v36 = vpop.f32.mrf.mxu1  ;;  %9236 = vmatprep.subr.bf16.mxu0 %v13207_v28  ;;  %v13183_v56 = vcombine.high %v2386_v30, %v2390_v15  ;;  %v2382_v17 = vld [vmem:[#allocation9 + $0xb0] sm:$0xff] }
 0x595   :  { %v8928_v47 = vpop.f32.mrf.mxu0  ;;  %9279 = vmatprep.subr.bf16.mxu1 %v13335_v37  ;;  %v2518_v37 = vld [vmem:[#allocation9 + $0x4f0] sm:$0xff]  ;;  %v13182_v51 = vcombine.low %v2386_v30, %v2390_v15 }
 0x596   :  { %v16509_v10 = vadd.f32 %v8969_v36, %v8927_v3  ;;  %v8929_v27 = vadd.f32 %v8928_v47, %v3397_v61  ;;  %v8971_v18 = vpop.f32.mrf.mxu1  ;;  %9237 = vmatpush1.bf16.msra.mxu0 %v13206_v23  ;;  %v13190_v61 = vcombine.low %v2394_v54, %v2398_v57  ;;  %v13311_v55 = vcombine.high %v2514_v58, %v2518_v37  ;;  %v2510_v23 = vld [vmem:[#allocation9 + $0x4b0] sm:$0xff] }
 0x597   :  { %9280 = vmatpush1.bf16.msra.mxu1 %v13334_v49  ;;  %v8930_v1 = vpop.f32.mrf.mxu0  ;;  %9238 = vmatprep.subr.bf16.mxu0 %v13199_v9  ;;  %v13310_v49 = vcombine.low %v2514_v58, %v2518_v37  ;;  %v13175_v9 = vcombine.high %v2378_v19, %v2382_v17  ;;  %v2370_v36 = vld [vmem:[#allocation9 + $0x50] sm:$0xff]  ;;  %v13174_v47 = vcombine.low %v2378_v19, %v2382_v17 }
 0x598   :  { %v16511_v14 = vadd.f32 %v8971_v18, %v8929_v27  ;;  %v8931_v41 = vadd.f32 %v8930_v1, %v3401_v11  ;;  %9281 = vmatprep.subr.bf16.mxu1 %v13327_v12  ;;  %v8973_v28 = vpop.f32.mrf.mxu1  ;;  %v2506_v11 = vld [vmem:[#allocation9 + $0x490] sm:$0xff] }
 0x599   :  { %v13303_v3 = vcombine.high %v2506_v11, %v2510_v23  ;;  %v2374_v12 = vld [vmem:[#allocation9 + $0x70] sm:$0xff]  ;;  %v13302_v5 = vcombine.low %v2506_v11, %v2510_v23 }
 0x59a   :  { %v16513_v59 = vadd.f32 %v8973_v28, %v8931_v41  ;;  %9239 = vmatpush1.bf16.msra.mxu0 %v13198_v2  ;;  %v2498_v54 = vld [vmem:[#allocation9 + $0x450] sm:$0xff]  ;;  %v13167_v13 = vcombine.high %v2370_v36, %v2374_v12 }
 0x59b   :  { %9282 = vmatpush1.bf16.msra.mxu1 %v13326_v43  ;;  %9240 = vmatprep.subr.bf16.mxu0 %v13191_v35  ;;  %v2502_v57 = vld [vmem:[#allocation9 + $0x470] sm:$0xff]  ;;  %v13166_v35 = vcombine.low %v2370_v36, %v2374_v12 }
 0x59c   :  { %9283 = vmatprep.subr.bf16.mxu1 %v13319_v29  ;;  %v13295_v27 = vcombine.high %v2498_v54, %v2502_v57  ;;  %v2362_v18 = vld [vmem:[#allocation9 + $0x10] sm:$0xff]  ;;  %v13294_v41 = vcombine.low %v2498_v54, %v2502_v57 }
 0x59d   :  { %v2366_v2 = vld [vmem:[#allocation9 + $0x30] sm:$0xff] }
 0x59e   :  { %9241 = vmatpush1.bf16.msra.mxu0 %v13190_v61  ;;  %v2490_v1 = vld [vmem:[#allocation9 + $0x410] sm:$0xff]  ;;  %v13159_v29 = vcombine.high %v2362_v18, %v2366_v2  ;;  %v13158_v61 = vcombine.low %v2362_v18, %v2366_v2 }
 0x59f   :  { %9284 = vmatpush1.bf16.msra.mxu1 %v13318_v32  ;;  %9242 = vmatprep.subr.bf16.mxu0 %v13183_v56  ;;  %v2494_v43 = vld [vmem:[#allocation9 + $0x430] sm:$0xff] }
 0x5a0   :  { %9285 = vmatprep.subr.bf16.mxu1 %v13311_v55  ;;  %v13287_v30 = vcombine.high %v2490_v1, %v2494_v43  ;;  %v2482_v15 = vld [vmem:[#allocation9 + $0x3d0] sm:$0xff]  ;;  %v13286_v32 = vcombine.low %v2490_v1, %v2494_v43 }
 0x5a1   :  { %v2486_v28 = vld [vmem:[#allocation9 + $0x3f0] sm:$0xff] }
 0x5a2   :  { %9243 = vmatpush1.bf16.msra.mxu0 %v13182_v51  ;;  %v2610_v58 = vld [vmem:[#allocation9 + $0x7d0] sm:$0xff]  ;;  %v13279_v56 = vcombine.high %v2482_v15, %v2486_v28  ;;  %v13278_v51 = vcombine.low %v2482_v15, %v2486_v28 }
 0x5a3   :  { %9286 = vmatpush1.bf16.msra.mxu1 %v13310_v49  ;;  %9244 = vmatprep.subr.bf16.mxu0 %v13175_v9  ;;  %v2614_v37 = vld [vmem:[#allocation9 + $0x7f0] sm:$0xff] }
 0x5a4   :  { %9287 = vmatprep.subr.bf16.mxu1 %v13303_v3  ;;  %v13407_v55 = vcombine.high %v2610_v58, %v2614_v37  ;;  %v2474_v19 = vld [vmem:[#allocation9 + $0x390] sm:$0xff]  ;;  %v13406_v49 = vcombine.low %v2610_v58, %v2614_v37 }
 0x5a5   :  { %v2478_v17 = vld [vmem:[#allocation9 + $0x3b0] sm:$0xff] }
 0x5a6   :  { %9245 = vmatpush1.bf16.msra.mxu0 %v13174_v47  ;;  %v2602_v11 = vld [vmem:[#allocation9 + $0x790] sm:$0xff]  ;;  %v13271_v9 = vcombine.high %v2474_v19, %v2478_v17  ;;  %v13270_v47 = vcombine.low %v2474_v19, %v2478_v17 }
 0x5a7   :  { %9288 = vmatpush1.bf16.msra.mxu1 %v13302_v5  ;;  %9246 = vmatprep.subr.bf16.mxu0 %v13167_v13  ;;  %v2606_v23 = vld [vmem:[#allocation9 + $0x7b0] sm:$0xff] }
 0x5a8   :  { %9289 = vmatprep.subr.bf16.mxu1 %v13295_v27  ;;  %v13399_v3 = vcombine.high %v2602_v11, %v2606_v23  ;;  %v2466_v36 = vld [vmem:[#allocation9 + $0x350] sm:$0xff]  ;;  %v13398_v5 = vcombine.low %v2602_v11, %v2606_v23 }
 0x5a9   :  { %v2470_v12 = vld [vmem:[#allocation9 + $0x370] sm:$0xff] }
 0x5aa   :  { %9247 = vmatpush1.bf16.msra.mxu0 %v13166_v35  ;;  %v2594_v54 = vld [vmem:[#allocation9 + $0x750] sm:$0xff]  ;;  %v13263_v13 = vcombine.high %v2466_v36, %v2470_v12  ;;  %v13262_v35 = vcombine.low %v2466_v36, %v2470_v12 }
 0x5ab   :  { %9290 = vmatpush1.bf16.msra.mxu1 %v13294_v41  ;;  %9248 = vmatprep.subr.bf16.mxu0 %v13159_v29  ;;  %v2598_v57 = vld [vmem:[#allocation9 + $0x770] sm:$0xff] }
 0x5ac   :  { %9291 = vmatprep.subr.bf16.mxu1 %v13287_v30  ;;  %v13391_v27 = vcombine.high %v2594_v54, %v2598_v57  ;;  %v2458_v18 = vld [vmem:[#allocation9 + $0x310] sm:$0xff]  ;;  %v13390_v41 = vcombine.low %v2594_v54, %v2598_v57 }
 0x5ad   :  { %v2462_v2 = vld [vmem:[#allocation9 + $0x330] sm:$0xff] }
 0x5ae   :  { %9249 = vmatpush1.bf16.msra.mxu0 %v13158_v61  ;;  %v2586_v1 = vld [vmem:[#allocation9 + $0x710] sm:$0xff]  ;;  %v13255_v29 = vcombine.high %v2458_v18, %v2462_v2  ;;  %v13254_v61 = vcombine.low %v2458_v18, %v2462_v2 }
 0x5af   :  { %9292 = vmatpush1.bf16.msra.mxu1 %v13286_v32  ;;  %9250 = vmatprep.subr.bf16.mxu0 %v13279_v56  ;;  %v2590_v43 = vld [vmem:[#allocation9 + $0x730] sm:$0xff] }
 0x5b0   :  { %9293 = vmatprep.subr.bf16.mxu1 %v13407_v55  ;;  %v13383_v30 = vcombine.high %v2586_v1, %v2590_v43  ;;  %v2450_v15 = vld [vmem:[#allocation9 + $0x2d0] sm:$0xff]  ;;  %v13382_v32 = vcombine.low %v2586_v1, %v2590_v43 }
 0x5b1   :  { %v2454_v28 = vld [vmem:[#allocation9 + $0x2f0] sm:$0xff] }
 0x5b2   :  { %9251 = vmatpush2.bf16.msra.mxu0 %v13278_v51  ;;  %v2578_v58 = vld [vmem:[#allocation9 + $0x6d0] sm:$0xff]  ;;  %v13247_v56 = vcombine.high %v2450_v15, %v2454_v28  ;;  %v13246_v51 = vcombine.low %v2450_v15, %v2454_v28 }
 0x5b3   :  { %9294 = vmatpush2.bf16.msra.mxu1 %v13406_v49  ;;  %9252 = vmatprep.subr.bf16.mxu0 %v13271_v9  ;;  %v2582_v37 = vld [vmem:[#allocation9 + $0x6f0] sm:$0xff] }
 0x5b4   :  { %9295 = vmatprep.subr.bf16.mxu1 %v13399_v3  ;;  %v13375_v55 = vcombine.high %v2578_v58, %v2582_v37  ;;  %v2442_v19 = vld [vmem:[#allocation9 + $0x290] sm:$0xff]  ;;  %v13374_v49 = vcombine.low %v2578_v58, %v2582_v37 }
 0x5b5   :  { %v2446_v17 = vld [vmem:[#allocation9 + $0x2b0] sm:$0xff] }
 0x5b6   :  { %9253 = vmatpush2.bf16.msra.mxu0 %v13270_v47  ;;  %v2570_v11 = vld [vmem:[#allocation9 + $0x690] sm:$0xff]  ;;  %v13239_v9 = vcombine.high %v2442_v19, %v2446_v17  ;;  %v13238_v47 = vcombine.low %v2442_v19, %v2446_v17 }
 0x5b7   :  { %9296 = vmatpush2.bf16.msra.mxu1 %v13398_v5  ;;  %9254 = vmatprep.subr.bf16.mxu0 %v13263_v13  ;;  %v2574_v23 = vld [vmem:[#allocation9 + $0x6b0] sm:$0xff] }
 0x5b8   :  { %9297 = vmatprep.subr.bf16.mxu1 %v13391_v27  ;;  %v13367_v3 = vcombine.high %v2570_v11, %v2574_v23  ;;  %v2434_v36 = vld [vmem:[#allocation9 + $0x250] sm:$0xff]  ;;  %v13366_v5 = vcombine.low %v2570_v11, %v2574_v23 }
 0x5b9   :  { %v2438_v12 = vld [vmem:[#allocation9 + $0x270] sm:$0xff] }
 0x5ba   :  { %9255 = vmatpush2.bf16.msra.mxu0 %v13262_v35  ;;  %v2562_v54 = vld [vmem:[#allocation9 + $0x650] sm:$0xff]  ;;  %v13231_v13 = vcombine.high %v2434_v36, %v2438_v12  ;;  %v13230_v35 = vcombine.low %v2434_v36, %v2438_v12 }
 0x5bb   :  { %9298 = vmatpush2.bf16.msra.mxu1 %v13390_v41  ;;  %9256 = vmatprep.subr.bf16.mxu0 %v13255_v29  ;;  %v2566_v57 = vld [vmem:[#allocation9 + $0x670] sm:$0xff] }
 0x5bc   :  { %9299 = vmatprep.subr.bf16.mxu1 %v13383_v30  ;;  %v13359_v27 = vcombine.high %v2562_v54, %v2566_v57  ;;  %v2426_v18 = vld [vmem:[#allocation9 + $0x210] sm:$0xff]  ;;  %v13358_v41 = vcombine.low %v2562_v54, %v2566_v57 }
 0x5bd   :  { %v2430_v2 = vld [vmem:[#allocation9 + $0x230] sm:$0xff] }
 0x5be   :  { %9257 = vmatpush2.bf16.msra.mxu0 %v13254_v61  ;;  %v2554_v1 = vld [vmem:[#allocation9 + $0x610] sm:$0xff]  ;;  %v13223_v29 = vcombine.high %v2426_v18, %v2430_v2  ;;  %v13222_v61 = vcombine.low %v2426_v18, %v2430_v2 }
 0x5bf   :  { %9300 = vmatpush2.bf16.msra.mxu1 %v13382_v32  ;;  %9258 = vmatprep.subr.bf16.mxu0 %v13247_v56  ;;  %v2558_v43 = vld [vmem:[#allocation9 + $0x630] sm:$0xff] }
 0x5c0   :  { %9301 = vmatprep.subr.bf16.mxu1 %v13375_v55  ;;  %v13351_v30 = vcombine.high %v2554_v1, %v2558_v43  ;;  %v2674_v15 = vld [vmem:[#allocation9 + $0x9d0] sm:$0xff]  ;;  %v13350_v32 = vcombine.low %v2554_v1, %v2558_v43 }
 0x5c1   :  { %v2678_v28 = vld [vmem:[#allocation9 + $0x9f0] sm:$0xff] }
 0x5c2   :  { %9259 = vmatpush2.bf16.msra.mxu0 %v13246_v51  ;;  %v2802_v58 = vld [vmem:[#allocation9 + $0xdd0] sm:$0xff]  ;;  %v13471_v56 = vcombine.high %v2674_v15, %v2678_v28  ;;  %v13470_v11 = vcombine.low %v2674_v15, %v2678_v28 }
 0x5c3   :  { %9302 = vmatpush2.bf16.msra.mxu1 %v13374_v49  ;;  %9260 = vmatprep.subr.bf16.mxu0 %v13239_v9  ;;  %v2806_v37 = vld [vmem:[#allocation9 + $0xdf0] sm:$0xff] }
 0x5c4   :  { %9303 = vmatprep.subr.bf16.mxu1 %v13367_v3  ;;  %v13599_v55 = vcombine.high %v2802_v58, %v2806_v37  ;;  %v2666_v19 = vld [vmem:[#allocation9 + $0x990] sm:$0xff]  ;;  %v13598_v49 = vcombine.low %v2802_v58, %v2806_v37 }
 0x5c5   :  { %v2670_v17 = vld [vmem:[#allocation9 + $0x9b0] sm:$0xff] }
 0x5c6   :  { %9261 = vmatpush2.bf16.msra.mxu0 %v13238_v47  ;;  %v2794_v23 = vld [vmem:[#allocation9 + $0xd90] sm:$0xff]  ;;  %v13463_v9 = vcombine.high %v2666_v19, %v2670_v17 }
 0x5c7   :  { %9304 = vmatpush2.bf16.msra.mxu1 %v13366_v5  ;;  %9262 = vmatprep.subr.bf16.mxu0 %v13231_v13  ;;  %v2798_v51 = vld [vmem:[#allocation9 + $0xdb0] sm:$0xff] }
 0x5c8   :  { %9305 = vmatprep.subr.bf16.mxu1 %v13359_v27  ;;  %v2658_v3 = vld [vmem:[#allocation9 + $0x950] sm:$0xff]  ;;  %v13591_v54 = vcombine.high %v2794_v23, %v2798_v51  ;;  %v13462_v27 = vcombine.low %v2666_v19, %v2670_v17  ;;  %v13590_v2 = vcombine.low %v2794_v23, %v2798_v51 }
 0x5c9   :  { %v2662_v36 = vld [vmem:[#allocation9 + $0x970] sm:$0xff] }
 0x5ca   :  { %9263 = vmatpush2.bf16.msra.mxu0 %v13230_v35  ;;  %v2786_v57 = vld [vmem:[#allocation9 + $0xd50] sm:$0xff]  ;;  %v13455_v1 = vcombine.high %v2658_v3, %v2662_v36 }
 0x5cb   :  { %9306 = vmatpush2.bf16.msra.mxu1 %v13358_v41  ;;  %9264 = vmatprep.subr.bf16.mxu0 %v13223_v29  ;;  %v2790_v47 = vld [vmem:[#allocation9 + $0xd70] sm:$0xff] }
 0x5cc   :  { %9307 = vmatprep.subr.bf16.mxu1 %v13351_v30  ;;  %v2650_v29 = vld [vmem:[#allocation9 + $0x910] sm:$0xff] }
 0x5cd   :  { %v2654_v30 = vld [vmem:[#allocation9 + $0x930] sm:$0xff] }
 0x5ce   :  { %9265 = vmatpush2.bf16.msra.mxu0 %v13222_v61  ;;  %v2778_v28 = vld [vmem:[#allocation9 + $0xd10] sm:$0xff]  ;;  %v13447_v19 = vcombine.high %v2650_v29, %v2654_v30 }
 0x5cf   :  { %9308 = vmatpush2.bf16.msra.mxu1 %v13350_v32  ;;  %9320 = vmatprep.subr.bf16.mxu0 %v13471_v56  ;;  %v2782_v58 = vld [vmem:[#allocation9 + $0xd30] sm:$0xff]  ;;  %v13454_v56 = vcombine.low %v2658_v3, %v2662_v36  ;;  %v13446_v3 = vcombine.low %v2650_v29, %v2654_v30 }
 0x5d0   :  { %9363 = vmatprep.subr.bf16.mxu1 %v13599_v55  ;;  %v13575_v23 = vcombine.high %v2778_v28, %v2782_v58  ;;  %v2642_v51 = vld [vmem:[#allocation9 + $0x8d0] sm:$0xff]  ;;  %v13574_v36 = vcombine.low %v2778_v28, %v2782_v58 }
 0x5d1   :  { %v9010_v12 = vpop.f32.mrf.mxu0  ;;  %9267 = vmatmul.mubr.bf16.vlgmr.msra.gmra.mxu0 %v16230_v42  ;;  %v2754_v29 = vld [vmem:[#allocation9 + $0xc50] sm:$0xff] }
 0x5d2   :  { %v9011_v5 = vadd.f32 %v9010_v12, %v16506_v60  ;;  %v9053_v13 = vpop.f32.mrf.mxu1  ;;  %9310 = vmatmul.mubr.bf16.vlgmr.msra.gmra.mxu1 %v16233_v21  ;;  %9321 = vmatpush1.bf16.msra.mxu0 %v13470_v11  ;;  %v13583_v60 = vcombine.high %v2786_v57, %v2790_v47  ;;  %v2770_v12 = vld [vmem:[#allocation9 + $0xcd0] sm:$0xff] }
 0x5d3   :  { %9352 = vmatprep.mubr.bf16.mxu0 %v16235_v63  ;;  %9364 = vmatpush1.bf16.msra.mxu1 %v13598_v49  ;;  %v9012_v18 = vpop.f32.mrf.mxu0  ;;  %v2646_v49 = vld [vmem:[#allocation9 + $0x8f0] sm:$0xff] }
 0x5d4   :  { %v16519_v43 = vadd.f32 %v9053_v13, %v9011_v5  ;;  %9395 = vmatprep.mubr.bf16.mxu1 %v16237_v39  ;;  %v9013_v35 = vadd.f32 %v9012_v18, %v16509_v10  ;;  %v9055_v41 = vpop.f32.mrf.mxu1  ;;  %9322 = vmatprep.subr.bf16.mxu0 %v13463_v9  ;;  %v13582_v10 = vcombine.low %v2786_v57, %v2790_v47  ;;  %v2634_v5 = vld [vmem:[#allocation9 + $0x890] sm:$0xff] }
 0x5d5   :  { %v9014_v15 = vpop.f32.mrf.mxu0  ;;  %9365 = vmatprep.subr.bf16.mxu1 %v13591_v54  ;;  %v2774_v54 = vld [vmem:[#allocation9 + $0xcf0] sm:$0xff]  ;;  %v13439_v57 = vcombine.high %v2642_v51, %v2646_v49  ;;  %v13438_v18 = vcombine.low %v2642_v51, %v2646_v49 }
 0x5d6   :  { %v16523_v37 = vadd.f32 %v9055_v41, %v9013_v35  ;;  %v9015_v61 = vadd.f32 %v9014_v15, %v16511_v14  ;;  %v9057_v32 = vpop.f32.mrf.mxu1  ;;  %9323 = vmatpush1.bf16.msra.mxu0 %v13462_v27  ;;  %v13567_v47 = vcombine.high %v2770_v12, %v2774_v54  ;;  %v2638_v13 = vld [vmem:[#allocation9 + $0x8b0] sm:$0xff] }
 0x5d7   :  { %9366 = vmatpush1.bf16.msra.mxu1 %v13590_v2  ;;  %v9016_v55 = vpop.f32.mrf.mxu0  ;;  %9324 = vmatprep.subr.bf16.mxu0 %v13455_v1  ;;  %v2766_v27 = vld [vmem:[#allocation9 + $0xcb0] sm:$0xff]  ;;  %v13566_v2 = vcombine.low %v2770_v12, %v2774_v54  ;;  %v13431_v1 = vcombine.high %v2634_v5, %v2638_v13  ;;  %v13430_v15 = vcombine.low %v2634_v5, %v2638_v13 }
 0x5d8   :  { %v16526_v17 = vadd.f32 %v9057_v32, %v9015_v61  ;;  %v9017_v11 = vadd.f32 %v9016_v55, %v16513_v59  ;;  %9367 = vmatprep.subr.bf16.mxu1 %v13583_v60  ;;  %v9059_v9 = vpop.f32.mrf.mxu1  ;;  %v2762_v59 = vld [vmem:[#allocation9 + $0xc90] sm:$0xff] }
 0x5d9   :  { %v13559_v35 = vcombine.high %v2762_v59, %v2766_v27  ;;  %v2626_v41 = vld [vmem:[#allocation9 + $0x850] sm:$0xff]  ;;  %v13558_v28 = vcombine.low %v2762_v59, %v2766_v27 }
 0x5da   :  { %v16529_v14 = vadd.f32 %v9059_v9, %v9017_v11  ;;  %9325 = vmatpush1.bf16.msra.mxu0 %v13454_v56  ;;  %v2630_v60 = vld [vmem:[#allocation9 + $0x870] sm:$0xff] }
 0x5db   :  { %9368 = vmatpush1.bf16.msra.mxu1 %v13582_v10  ;;  %9326 = vmatprep.subr.bf16.mxu0 %v13447_v19  ;;  %v2758_v30 = vld [vmem:[#allocation9 + $0xc70] sm:$0xff]  ;;  %v13423_v58 = vcombine.high %v2626_v41, %v2630_v60  ;;  %v13422_v19 = vcombine.low %v2626_v41, %v2630_v60 }
 0x5dc   :  { %9369 = vmatprep.subr.bf16.mxu1 %v13575_v23  ;;  %v13551_v61 = vcombine.high %v2754_v29, %v2758_v30  ;;  %v2618_v32 = vld [vmem:[#allocation9 + $0x810] sm:$0xff]  ;;  %v13550_v11 = vcombine.low %v2754_v29, %v2758_v30 }
 0x5dd   :  { %v2622_v56 = vld [vmem:[#allocation9 + $0x830] sm:$0xff] }
 0x5de   :  { %9327 = vmatpush1.bf16.msra.mxu0 %v13446_v3  ;;  %v2746_v55 = vld [vmem:[#allocation9 + $0xc10] sm:$0xff]  ;;  %v13415_v23 = vcombine.high %v2618_v32, %v2622_v56  ;;  %v13414_v3 = vcombine.low %v2618_v32, %v2622_v56 }
 0x5df   :  { %9370 = vmatpush1.bf16.msra.mxu1 %v13574_v36  ;;  %9328 = vmatprep.subr.bf16.mxu0 %v13439_v57  ;;  %v2750_v10 = vld [vmem:[#allocation9 + $0xc30] sm:$0xff] }
 0x5e0   :  { %9371 = vmatprep.subr.bf16.mxu1 %v13567_v47  ;;  %v13543_v51 = vcombine.high %v2746_v55, %v2750_v10  ;;  %v2738_v49 = vld [vmem:[#allocation9 + $0xbd0] sm:$0xff]  ;;  %v13542_v36 = vcombine.low %v2746_v55, %v2750_v10 }
 0x5e1   :  { %v2742_v9 = vld [vmem:[#allocation9 + $0xbf0] sm:$0xff] }
 0x5e2   :  { %9329 = vmatpush1.bf16.msra.mxu0 %v13438_v18  ;;  %v2866_v12 = vld [vmem:[#allocation9 + $0xfd0] sm:$0xff]  ;;  %v13535_v57 = vcombine.high %v2738_v49, %v2742_v9  ;;  %v13534_v18 = vcombine.low %v2738_v49, %v2742_v9 }
 0x5e3   :  { %9372 = vmatpush1.bf16.msra.mxu1 %v13566_v2  ;;  %9330 = vmatprep.subr.bf16.mxu0 %v13431_v1  ;;  %v2870_v54 = vld [vmem:[#allocation9 + $0xff0] sm:$0xff] }
 0x5e4   :  { %9373 = vmatprep.subr.bf16.mxu1 %v13559_v35  ;;  %v13663_v47 = vcombine.high %v2866_v12, %v2870_v54  ;;  %v2730_v5 = vld [vmem:[#allocation9 + $0xb90] sm:$0xff]  ;;  %v13662_v2 = vcombine.low %v2866_v12, %v2870_v54 }
 0x5e5   :  { %v2734_v13 = vld [vmem:[#allocation9 + $0xbb0] sm:$0xff] }
 0x5e6   :  { %9331 = vmatpush1.bf16.msra.mxu0 %v13430_v15  ;;  %v2858_v59 = vld [vmem:[#allocation9 + $0xf90] sm:$0xff]  ;;  %v13527_v1 = vcombine.high %v2730_v5, %v2734_v13  ;;  %v13526_v15 = vcombine.low %v2730_v5, %v2734_v13 }
 0x5e7   :  { %9374 = vmatpush1.bf16.msra.mxu1 %v13558_v28  ;;  %9332 = vmatprep.subr.bf16.mxu0 %v13423_v58  ;;  %v2862_v27 = vld [vmem:[#allocation9 + $0xfb0] sm:$0xff] }
 0x5e8   :  { %9375 = vmatprep.subr.bf16.mxu1 %v13551_v61  ;;  %v13655_v35 = vcombine.high %v2858_v59, %v2862_v27  ;;  %v2722_v41 = vld [vmem:[#allocation9 + $0xb50] sm:$0xff]  ;;  %v13654_v28 = vcombine.low %v2858_v59, %v2862_v27 }
 0x5e9   :  { %v2726_v60 = vld [vmem:[#allocation9 + $0xb70] sm:$0xff] }
 0x5ea   :  { %9333 = vmatpush1.bf16.msra.mxu0 %v13422_v19  ;;  %v2850_v29 = vld [vmem:[#allocation9 + $0xf50] sm:$0xff]  ;;  %v13519_v58 = vcombine.high %v2722_v41, %v2726_v60  ;;  %v13518_v19 = vcombine.low %v2722_v41, %v2726_v60 }
 0x5eb   :  { %9376 = vmatpush1.bf16.msra.mxu1 %v13550_v11  ;;  %9334 = vmatprep.subr.bf16.mxu0 %v13415_v23  ;;  %v2854_v30 = vld [vmem:[#allocation9 + $0xf70] sm:$0xff] }
 0x5ec   :  { %9377 = vmatprep.subr.bf16.mxu1 %v13543_v51  ;;  %v13647_v61 = vcombine.high %v2850_v29, %v2854_v30  ;;  %v2714_v32 = vld [vmem:[#allocation9 + $0xb10] sm:$0xff]  ;;  %v13646_v11 = vcombine.low %v2850_v29, %v2854_v30 }
 0x5ed   :  { %v2718_v56 = vld [vmem:[#allocation9 + $0xb30] sm:$0xff] }
 0x5ee   :  { %9335 = vmatpush1.bf16.msra.mxu0 %v13414_v3  ;;  %v2842_v55 = vld [vmem:[#allocation9 + $0xf10] sm:$0xff]  ;;  %v13511_v23 = vcombine.high %v2714_v32, %v2718_v56  ;;  %v13510_v3 = vcombine.low %v2714_v32, %v2718_v56 }
 0x5ef   :  { %9378 = vmatpush1.bf16.msra.mxu1 %v13542_v36  ;;  %9336 = vmatprep.subr.bf16.mxu0 %v13535_v57  ;;  %v2846_v10 = vld [vmem:[#allocation9 + $0xf30] sm:$0xff] }
 0x5f0   :  { %9379 = vmatprep.subr.bf16.mxu1 %v13663_v47  ;;  %v13639_v51 = vcombine.high %v2842_v55, %v2846_v10  ;;  %v2706_v49 = vld [vmem:[#allocation9 + $0xad0] sm:$0xff]  ;;  %v13638_v36 = vcombine.low %v2842_v55, %v2846_v10 }
 0x5f1   :  { %v2710_v9 = vld [vmem:[#allocation9 + $0xaf0] sm:$0xff] }
 0x5f2   :  { %9337 = vmatpush2.bf16.msra.mxu0 %v13534_v18  ;;  %v2834_v12 = vld [vmem:[#allocation9 + $0xed0] sm:$0xff]  ;;  %v13503_v57 = vcombine.high %v2706_v49, %v2710_v9  ;;  %v13502_v18 = vcombine.low %v2706_v49, %v2710_v9 }
 0x5f3   :  { %9380 = vmatpush2.bf16.msra.mxu1 %v13662_v2  ;;  %9338 = vmatprep.subr.bf16.mxu0 %v13527_v1  ;;  %v2838_v54 = vld [vmem:[#allocation9 + $0xef0] sm:$0xff] }
 0x5f4   :  { %9381 = vmatprep.subr.bf16.mxu1 %v13655_v35  ;;  %v13631_v47 = vcombine.high %v2834_v12, %v2838_v54  ;;  %v2698_v5 = vld [vmem:[#allocation9 + $0xa90] sm:$0xff]  ;;  %v13630_v2 = vcombine.low %v2834_v12, %v2838_v54 }
 0x5f5   :  { %v2702_v13 = vld [vmem:[#allocation9 + $0xab0] sm:$0xff] }
 0x5f6   :  { %9339 = vmatpush2.bf16.msra.mxu0 %v13526_v15  ;;  %v2826_v59 = vld [vmem:[#allocation9 + $0xe90] sm:$0xff]  ;;  %v13495_v1 = vcombine.high %v2698_v5, %v2702_v13  ;;  %v13494_v15 = vcombine.low %v2698_v5, %v2702_v13 }
 0x5f7   :  { %9382 = vmatpush2.bf16.msra.mxu1 %v13654_v28  ;;  %9340 = vmatprep.subr.bf16.mxu0 %v13519_v58  ;;  %v2830_v27 = vld [vmem:[#allocation9 + $0xeb0] sm:$0xff] }
 0x5f8   :  { %9383 = vmatprep.subr.bf16.mxu1 %v13647_v61  ;;  %v13623_v35 = vcombine.high %v2826_v59, %v2830_v27  ;;  %v2690_v41 = vld [vmem:[#allocation9 + $0xa50] sm:$0xff]  ;;  %v13622_v28 = vcombine.low %v2826_v59, %v2830_v27 }
 0x5f9   :  { %v2694_v60 = vld [vmem:[#allocation9 + $0xa70] sm:$0xff] }
 0x5fa   :  { %9341 = vmatpush2.bf16.msra.mxu0 %v13518_v19  ;;  %v2818_v29 = vld [vmem:[#allocation9 + $0xe50] sm:$0xff]  ;;  %v13487_v58 = vcombine.high %v2690_v41, %v2694_v60  ;;  %v13486_v19 = vcombine.low %v2690_v41, %v2694_v60 }
 0x5fb   :  { %9384 = vmatpush2.bf16.msra.mxu1 %v13646_v11  ;;  %9342 = vmatprep.subr.bf16.mxu0 %v13511_v23  ;;  %v2822_v30 = vld [vmem:[#allocation9 + $0xe70] sm:$0xff] }
 0x5fc   :  { %9385 = vmatprep.subr.bf16.mxu1 %v13639_v51  ;;  %v13615_v61 = vcombine.high %v2818_v29, %v2822_v30  ;;  %v2682_v32 = vld [vmem:[#allocation9 + $0xa10] sm:$0xff]  ;;  %v13614_v11 = vcombine.low %v2818_v29, %v2822_v30 }
 0x5fd   :  { %v2686_v56 = vld [vmem:[#allocation9 + $0xa30] sm:$0xff] }
 0x5fe   :  { %9343 = vmatpush2.bf16.msra.mxu0 %v13510_v3  ;;  %v2810_v55 = vld [vmem:[#allocation9 + $0xe10] sm:$0xff]  ;;  %v13479_v23 = vcombine.high %v2682_v32, %v2686_v56  ;;  %v13478_v3 = vcombine.low %v2682_v32, %v2686_v56 }
 0x5ff   :  { %9386 = vmatpush2.bf16.msra.mxu1 %v13638_v36  ;;  %9344 = vmatprep.subr.bf16.mxu0 %v13503_v57  ;;  %v2814_v10 = vld [vmem:[#allocation9 + $0xe30] sm:$0xff] }
 0x600   :  { %9387 = vmatprep.subr.bf16.mxu1 %v13631_v47  ;;  %v13607_v51 = vcombine.high %v2810_v55, %v2814_v10  ;;  %v2930_v49 = vld [vmem:[#allocation9 + $0x11d0] sm:$0xff]  ;;  %v13606_v36 = vcombine.low %v2810_v55, %v2814_v10 }
 0x601   :  { %v2934_v9 = vld [vmem:[#allocation9 + $0x11f0] sm:$0xff] }
 0x602   :  { %9345 = vmatpush2.bf16.msra.mxu0 %v13502_v18  ;;  %v3058_v12 = vld [vmem:[#allocation9 + $0x15d0] sm:$0xff]  ;;  %v13727_v57 = vcombine.high %v2930_v49, %v2934_v9  ;;  %v13726_v59 = vcombine.low %v2930_v49, %v2934_v9 }
 0x603   :  { %9388 = vmatpush2.bf16.msra.mxu1 %v13630_v2  ;;  %9346 = vmatprep.subr.bf16.mxu0 %v13495_v1  ;;  %v3062_v54 = vld [vmem:[#allocation9 + $0x15f0] sm:$0xff] }
 0x604   :  { %9389 = vmatprep.subr.bf16.mxu1 %v13623_v35  ;;  %v13855_v47 = vcombine.high %v3058_v12, %v3062_v54  ;;  %v2922_v5 = vld [vmem:[#allocation9 + $0x1190] sm:$0xff]  ;;  %v13854_v2 = vcombine.low %v3058_v12, %v3062_v54 }
 0x605   :  { %v2926_v13 = vld [vmem:[#allocation9 + $0x11b0] sm:$0xff] }
 0x606   :  { %9347 = vmatpush2.bf16.msra.mxu0 %v13494_v15  ;;  %v3050_v27 = vld [vmem:[#allocation9 + $0x1590] sm:$0xff]  ;;  %v13719_v1 = vcombine.high %v2922_v5, %v2926_v13  ;;  %v13718_v15 = vcombine.low %v2922_v5, %v2926_v13 }
 0x607   :  { %9390 = vmatpush2.bf16.msra.mxu1 %v13622_v28  ;;  %9348 = vmatprep.subr.bf16.mxu0 %v13487_v58  ;;  %v3054_v18 = vld [vmem:[#allocation9 + $0x15b0] sm:$0xff] }
 0x608   :  { %9391 = vmatprep.subr.bf16.mxu1 %v13615_v61  ;;  %v2914_v35 = vld [vmem:[#allocation9 + $0x1150] sm:$0xff]  ;;  %v13847_v60 = vcombine.high %v3050_v27, %v3054_v18  ;;  %v13846_v28 = vcombine.low %v3050_v27, %v3054_v18 }
 0x609   :  { %v2918_v41 = vld [vmem:[#allocation9 + $0x1170] sm:$0xff] }
 0x60a   :  { %9349 = vmatpush2.bf16.msra.mxu0 %v13486_v19  ;;  %v3042_v29 = vld [vmem:[#allocation9 + $0x1550] sm:$0xff]  ;;  %v13711_v58 = vcombine.high %v2914_v35, %v2918_v41  ;;  %v13710_v19 = vcombine.low %v2914_v35, %v2918_v41 }
 0x60b   :  { %9392 = vmatpush2.bf16.msra.mxu1 %v13614_v11  ;;  %9350 = vmatprep.subr.bf16.mxu0 %v13479_v23  ;;  %v3046_v30 = vld [vmem:[#allocation9 + $0x1570] sm:$0xff] }
 0x60c   :  { %9393 = vmatprep.subr.bf16.mxu1 %v13607_v51  ;;  %v13839_v61 = vcombine.high %v3042_v29, %v3046_v30  ;;  %v2906_v32 = vld [vmem:[#allocation9 + $0x1110] sm:$0xff]  ;;  %v13838_v11 = vcombine.low %v3042_v29, %v3046_v30 }
 0x60d   :  { %v2910_v56 = vld [vmem:[#allocation9 + $0x1130] sm:$0xff] }
 0x60e   :  { %9351 = vmatpush2.bf16.msra.mxu0 %v13478_v3  ;;  %v3034_v55 = vld [vmem:[#allocation9 + $0x1510] sm:$0xff]  ;;  %v13703_v23 = vcombine.high %v2906_v32, %v2910_v56  ;;  %v13702_v3 = vcombine.low %v2906_v32, %v2910_v56 }
 0x60f   :  { %9394 = vmatpush2.bf16.msra.mxu1 %v13606_v36  ;;  %9406 = vmatprep.subr.bf16.mxu0 %v13727_v57  ;;  %v3038_v10 = vld [vmem:[#allocation9 + $0x1530] sm:$0xff] }
 0x610   :  { %9449 = vmatprep.subr.bf16.mxu1 %v13855_v47  ;;  %v13831_v51 = vcombine.high %v3034_v55, %v3038_v10  ;;  %v2898_v49 = vld [vmem:[#allocation9 + $0x10d0] sm:$0xff]  ;;  %v13830_v36 = vcombine.low %v3034_v55, %v3038_v10 }
 0x611   :  { %9353 = vmatmul.mubr.bf16.vlgmr.msra.gmra.mxu0 %v16248_v33  ;;  %v2902_v9 = vld [vmem:[#allocation9 + $0x10f0] sm:$0xff] }
 0x612   :  { %9396 = vmatmul.mubr.bf16.vlgmr.msra.gmra.mxu1 %v16283_v31  ;;  %9407 = vmatpush1.bf16.msra.mxu0 %v13726_v59  ;;  %v3026_v12 = vld [vmem:[#allocation9 + $0x14d0] sm:$0xff]  ;;  %v13695_v57 = vcombine.high %v2898_v49, %v2902_v9  ;;  %v13694_v18 = vcombine.low %v2898_v49, %v2902_v9 }
 0x613   :  { %9438 = vmatprep.mubr.bf16.mxu0 %v16343_v0  ;;  %9450 = vmatpush1.bf16.msra.mxu1 %v13854_v2  ;;  %v3030_v54 = vld [vmem:[#allocation9 + $0x14f0] sm:$0xff] }
 0x614   :  { %9481 = vmatprep.mubr.bf16.mxu1 %v16357_v25  ;;  %9408 = vmatprep.subr.bf16.mxu0 %v13719_v1  ;;  %v13823_v47 = vcombine.high %v3026_v12, %v3030_v54  ;;  %v2890_v5 = vld [vmem:[#allocation9 + $0x1090] sm:$0xff]  ;;  %v13822_v2 = vcombine.low %v3026_v12, %v3030_v54 }
 0x615   :  { %9451 = vmatprep.subr.bf16.mxu1 %v13847_v60  ;;  %v2894_v13 = vld [vmem:[#allocation9 + $0x10b0] sm:$0xff] }
 0x616   :  { %9409 = vmatpush1.bf16.msra.mxu0 %v13718_v15  ;;  %v3018_v59 = vld [vmem:[#allocation9 + $0x1490] sm:$0xff]  ;;  %v13687_v1 = vcombine.high %v2890_v5, %v2894_v13  ;;  %v13686_v15 = vcombine.low %v2890_v5, %v2894_v13 }
 0x617   :  { %9452 = vmatpush1.bf16.msra.mxu1 %v13846_v28  ;;  %9410 = vmatprep.subr.bf16.mxu0 %v13711_v58  ;;  %v3022_v27 = vld [vmem:[#allocation9 + $0x14b0] sm:$0xff] }
 0x618   :  { %9453 = vmatprep.subr.bf16.mxu1 %v13839_v61  ;;  %v13815_v35 = vcombine.high %v3018_v59, %v3022_v27  ;;  %v2882_v41 = vld [vmem:[#allocation9 + $0x1050] sm:$0xff]  ;;  %v13814_v28 = vcombine.low %v3018_v59, %v3022_v27 }
 0x619   :  { %v2886_v60 = vld [vmem:[#allocation9 + $0x1070] sm:$0xff] }
 0x61a   :  { %9411 = vmatpush1.bf16.msra.mxu0 %v13710_v19  ;;  %v3010_v29 = vld [vmem:[#allocation9 + $0x1450] sm:$0xff]  ;;  %v13679_v58 = vcombine.high %v2882_v41, %v2886_v60  ;;  %v13678_v19 = vcombine.low %v2882_v41, %v2886_v60 }
 0x61b   :  { %9454 = vmatpush1.bf16.msra.mxu1 %v13838_v11  ;;  %9412 = vmatprep.subr.bf16.mxu0 %v13703_v23  ;;  %v3014_v30 = vld [vmem:[#allocation9 + $0x1470] sm:$0xff] }
 0x61c   :  { %9455 = vmatprep.subr.bf16.mxu1 %v13831_v51  ;;  %v13807_v61 = vcombine.high %v3010_v29, %v3014_v30  ;;  %v2874_v32 = vld [vmem:[#allocation9 + $0x1010] sm:$0xff]  ;;  %v13806_v11 = vcombine.low %v3010_v29, %v3014_v30 }
 0x61d   :  { %v2878_v56 = vld [vmem:[#allocation9 + $0x1030] sm:$0xff] }
 0x61e   :  { %9413 = vmatpush1.bf16.msra.mxu0 %v13702_v3  ;;  %v3002_v55 = vld [vmem:[#allocation9 + $0x1410] sm:$0xff]  ;;  %v13671_v23 = vcombine.high %v2874_v32, %v2878_v56  ;;  %v13670_v3 = vcombine.low %v2874_v32, %v2878_v56 }
 0x61f   :  { %9456 = vmatpush1.bf16.msra.mxu1 %v13830_v36  ;;  %9414 = vmatprep.subr.bf16.mxu0 %v13695_v57  ;;  %v3006_v10 = vld [vmem:[#allocation9 + $0x1430] sm:$0xff] }
 0x620   :  { %9457 = vmatprep.subr.bf16.mxu1 %v13823_v47  ;;  %v13799_v51 = vcombine.high %v3002_v55, %v3006_v10  ;;  %v2994_v49 = vld [vmem:[#allocation9 + $0x13d0] sm:$0xff]  ;;  %v13798_v36 = vcombine.low %v3002_v55, %v3006_v10 }
 0x621   :  { %v2998_v9 = vld [vmem:[#allocation9 + $0x13f0] sm:$0xff] }
 0x622   :  { %9415 = vmatpush1.bf16.msra.mxu0 %v13694_v18  ;;  %v3122_v12 = vld [vmem:[#allocation9 + $0x17d0] sm:$0xff]  ;;  %v13791_v57 = vcombine.high %v2994_v49, %v2998_v9  ;;  %v13790_v18 = vcombine.low %v2994_v49, %v2998_v9 }
 0x623   :  { %9458 = vmatpush1.bf16.msra.mxu1 %v13822_v2  ;;  %9416 = vmatprep.subr.bf16.mxu0 %v13687_v1  ;;  %v3126_v54 = vld [vmem:[#allocation9 + $0x17f0] sm:$0xff] }
 0x624   :  { %9459 = vmatprep.subr.bf16.mxu1 %v13815_v35  ;;  %v13919_v47 = vcombine.high %v3122_v12, %v3126_v54  ;;  %v2986_v5 = vld [vmem:[#allocation9 + $0x1390] sm:$0xff]  ;;  %v13918_v2 = vcombine.low %v3122_v12, %v3126_v54 }
 0x625   :  { %v2990_v13 = vld [vmem:[#allocation9 + $0x13b0] sm:$0xff] }
 0x626   :  { %9417 = vmatpush1.bf16.msra.mxu0 %v13686_v15  ;;  %v3114_v59 = vld [vmem:[#allocation9 + $0x1790] sm:$0xff]  ;;  %v13783_v1 = vcombine.high %v2986_v5, %v2990_v13  ;;  %v13782_v15 = vcombine.low %v2986_v5, %v2990_v13 }
 0x627   :  { %9460 = vmatpush1.bf16.msra.mxu1 %v13814_v28  ;;  %9418 = vmatprep.subr.bf16.mxu0 %v13679_v58  ;;  %v3118_v27 = vld [vmem:[#allocation9 + $0x17b0] sm:$0xff] }
 0x628   :  { %9461 = vmatprep.subr.bf16.mxu1 %v13807_v61  ;;  %v13911_v35 = vcombine.high %v3114_v59, %v3118_v27  ;;  %v2978_v41 = vld [vmem:[#allocation9 + $0x1350] sm:$0xff]  ;;  %v13910_v28 = vcombine.low %v3114_v59, %v3118_v27 }
 0x629   :  { %v2982_v60 = vld [vmem:[#allocation9 + $0x1370] sm:$0xff] }
 0x62a   :  { %9419 = vmatpush1.bf16.msra.mxu0 %v13678_v19  ;;  %v3106_v29 = vld [vmem:[#allocation9 + $0x1750] sm:$0xff]  ;;  %v13775_v58 = vcombine.high %v2978_v41, %v2982_v60  ;;  %v13774_v19 = vcombine.low %v2978_v41, %v2982_v60 }
 0x62b   :  { %9462 = vmatpush1.bf16.msra.mxu1 %v13806_v11  ;;  %9420 = vmatprep.subr.bf16.mxu0 %v13671_v23  ;;  %v3110_v30 = vld [vmem:[#allocation9 + $0x1770] sm:$0xff] }
 0x62c   :  { %9463 = vmatprep.subr.bf16.mxu1 %v13799_v51  ;;  %v13903_v61 = vcombine.high %v3106_v29, %v3110_v30  ;;  %v2970_v32 = vld [vmem:[#allocation9 + $0x1310] sm:$0xff]  ;;  %v13902_v11 = vcombine.low %v3106_v29, %v3110_v30 }
 0x62d   :  { %v2974_v56 = vld [vmem:[#allocation9 + $0x1330] sm:$0xff] }
 0x62e   :  { %9421 = vmatpush1.bf16.msra.mxu0 %v13670_v3  ;;  %v3098_v55 = vld [vmem:[#allocation9 + $0x1710] sm:$0xff]  ;;  %v13767_v23 = vcombine.high %v2970_v32, %v2974_v56  ;;  %v13766_v3 = vcombine.low %v2970_v32, %v2974_v56 }
 0x62f   :  { %9464 = vmatpush1.bf16.msra.mxu1 %v13798_v36  ;;  %9422 = vmatprep.subr.bf16.mxu0 %v13791_v57  ;;  %v3102_v10 = vld [vmem:[#allocation9 + $0x1730] sm:$0xff] }
 0x630   :  { %9465 = vmatprep.subr.bf16.mxu1 %v13919_v47  ;;  %v13895_v51 = vcombine.high %v3098_v55, %v3102_v10  ;;  %v2962_v49 = vld [vmem:[#allocation9 + $0x12d0] sm:$0xff]  ;;  %v13894_v36 = vcombine.low %v3098_v55, %v3102_v10 }
 0x631   :  { %v2966_v9 = vld [vmem:[#allocation9 + $0x12f0] sm:$0xff] }
 0x632   :  { %9423 = vmatpush2.bf16.msra.mxu0 %v13790_v18  ;;  %v3090_v12 = vld [vmem:[#allocation9 + $0x16d0] sm:$0xff]  ;;  %v13759_v57 = vcombine.high %v2962_v49, %v2966_v9  ;;  %v13758_v18 = vcombine.low %v2962_v49, %v2966_v9 }
 0x633   :  { %9466 = vmatpush2.bf16.msra.mxu1 %v13918_v2  ;;  %9424 = vmatprep.subr.bf16.mxu0 %v13783_v1  ;;  %v3094_v54 = vld [vmem:[#allocation9 + $0x16f0] sm:$0xff] }
 0x634   :  { %9467 = vmatprep.subr.bf16.mxu1 %v13911_v35  ;;  %v13887_v47 = vcombine.high %v3090_v12, %v3094_v54  ;;  %v2954_v5 = vld [vmem:[#allocation9 + $0x1290] sm:$0xff]  ;;  %v13886_v2 = vcombine.low %v3090_v12, %v3094_v54 }
 0x635   :  { %v2958_v13 = vld [vmem:[#allocation9 + $0x12b0] sm:$0xff] }
 0x636   :  { %9425 = vmatpush2.bf16.msra.mxu0 %v13782_v15  ;;  %v3082_v59 = vld [vmem:[#allocation9 + $0x1690] sm:$0xff]  ;;  %v13751_v1 = vcombine.high %v2954_v5, %v2958_v13  ;;  %v13750_v15 = vcombine.low %v2954_v5, %v2958_v13 }
 0x637   :  { %9468 = vmatpush2.bf16.msra.mxu1 %v13910_v28  ;;  %9426 = vmatprep.subr.bf16.mxu0 %v13775_v58  ;;  %v3086_v27 = vld [vmem:[#allocation9 + $0x16b0] sm:$0xff] }
 0x638   :  { %9469 = vmatprep.subr.bf16.mxu1 %v13903_v61  ;;  %v13879_v35 = vcombine.high %v3082_v59, %v3086_v27  ;;  %v2946_v41 = vld [vmem:[#allocation9 + $0x1250] sm:$0xff]  ;;  %v13878_v28 = vcombine.low %v3082_v59, %v3086_v27 }
 0x639   :  { %v2950_v60 = vld [vmem:[#allocation9 + $0x1270] sm:$0xff] }
 0x63a   :  { %9427 = vmatpush2.bf16.msra.mxu0 %v13774_v19  ;;  %v3074_v29 = vld [vmem:[#allocation9 + $0x1650] sm:$0xff]  ;;  %v13743_v58 = vcombine.high %v2946_v41, %v2950_v60  ;;  %v13742_v19 = vcombine.low %v2946_v41, %v2950_v60 }
 0x63b   :  { %9470 = vmatpush2.bf16.msra.mxu1 %v13902_v11  ;;  %9428 = vmatprep.subr.bf16.mxu0 %v13767_v23  ;;  %v3078_v30 = vld [vmem:[#allocation9 + $0x1670] sm:$0xff] }
 0x63c   :  { %9471 = vmatprep.subr.bf16.mxu1 %v13895_v51  ;;  %v13871_v61 = vcombine.high %v3074_v29, %v3078_v30  ;;  %v2938_v32 = vld [vmem:[#allocation9 + $0x1210] sm:$0xff]  ;;  %v13870_v11 = vcombine.low %v3074_v29, %v3078_v30 }
 0x63d   :  { %v2942_v56 = vld [vmem:[#allocation9 + $0x1230] sm:$0xff] }
 0x63e   :  { %9429 = vmatpush2.bf16.msra.mxu0 %v13766_v3  ;;  %v3066_v55 = vld [vmem:[#allocation9 + $0x1610] sm:$0xff]  ;;  %v13735_v23 = vcombine.high %v2938_v32, %v2942_v56  ;;  %v13734_v3 = vcombine.low %v2938_v32, %v2942_v56 }
 0x63f   :  { %9472 = vmatpush2.bf16.msra.mxu1 %v13894_v36  ;;  %9430 = vmatprep.subr.bf16.mxu0 %v13759_v57  ;;  %v3070_v10 = vld [vmem:[#allocation9 + $0x1630] sm:$0xff] }
 0x640   :  { %9473 = vmatprep.subr.bf16.mxu1 %v13887_v47  ;;  %v13863_v51 = vcombine.high %v3066_v55, %v3070_v10  ;;  %v3186_v49 = vld [vmem:[#allocation9 + $0x19d0] sm:$0xff]  ;;  %v13862_v36 = vcombine.low %v3066_v55, %v3070_v10 }
 0x641   :  { %v3190_v9 = vld [vmem:[#allocation9 + $0x19f0] sm:$0xff] }
 0x642   :  { %9431 = vmatpush2.bf16.msra.mxu0 %v13758_v18  ;;  %v3314_v12 = vld [vmem:[#allocation9 + $0x1dd0] sm:$0xff]  ;;  %v13983_v57 = vcombine.high %v3186_v49, %v3190_v9  ;;  %v13982_v59 = vcombine.low %v3186_v49, %v3190_v9 }
 0x643   :  { %9474 = vmatpush2.bf16.msra.mxu1 %v13886_v2  ;;  %9432 = vmatprep.subr.bf16.mxu0 %v13751_v1  ;;  %v3318_v54 = vld [vmem:[#allocation9 + $0x1df0] sm:$0xff] }
 0x644   :  { %9475 = vmatprep.subr.bf16.mxu1 %v13879_v35  ;;  %v14111_v47 = vcombine.high %v3314_v12, %v3318_v54  ;;  %v3178_v5 = vld [vmem:[#allocation9 + $0x1990] sm:$0xff]  ;;  %v14110_v2 = vcombine.low %v3314_v12, %v3318_v54 }
 0x645   :  { %v3182_v13 = vld [vmem:[#allocation9 + $0x19b0] sm:$0xff] }
 0x646   :  { %9433 = vmatpush2.bf16.msra.mxu0 %v13750_v15  ;;  %v3306_v27 = vld [vmem:[#allocation9 + $0x1d90] sm:$0xff]  ;;  %v13975_v1 = vcombine.high %v3178_v5, %v3182_v13  ;;  %v13974_v15 = vcombine.low %v3178_v5, %v3182_v13 }
 0x647   :  { %9476 = vmatpush2.bf16.msra.mxu1 %v13878_v28  ;;  %9434 = vmatprep.subr.bf16.mxu0 %v13743_v58  ;;  %v3310_v18 = vld [vmem:[#allocation9 + $0x1db0] sm:$0xff] }
 0x648   :  { %9477 = vmatprep.subr.bf16.mxu1 %v13871_v61  ;;  %v3170_v35 = vld [vmem:[#allocation9 + $0x1950] sm:$0xff]  ;;  %v14103_v60 = vcombine.high %v3306_v27, %v3310_v18  ;;  %v14102_v28 = vcombine.low %v3306_v27, %v3310_v18 }
 0x649   :  { %v3174_v41 = vld [vmem:[#allocation9 + $0x1970] sm:$0xff] }
 0x64a   :  { %9435 = vmatpush2.bf16.msra.mxu0 %v13742_v19  ;;  %v3298_v29 = vld [vmem:[#allocation9 + $0x1d50] sm:$0xff]  ;;  %v13967_v58 = vcombine.high %v3170_v35, %v3174_v41  ;;  %v13966_v19 = vcombine.low %v3170_v35, %v3174_v41 }
 0x64b   :  { %9478 = vmatpush2.bf16.msra.mxu1 %v13870_v11  ;;  %9436 = vmatprep.subr.bf16.mxu0 %v13735_v23  ;;  %v3302_v30 = vld [vmem:[#allocation9 + $0x1d70] sm:$0xff] }
 0x64c   :  { %9479 = vmatprep.subr.bf16.mxu1 %v13863_v51  ;;  %v14095_v61 = vcombine.high %v3298_v29, %v3302_v30  ;;  %v3162_v32 = vld [vmem:[#allocation9 + $0x1910] sm:$0xff]  ;;  %v14094_v11 = vcombine.low %v3298_v29, %v3302_v30 }
 0x64d   :  { %v3166_v56 = vld [vmem:[#allocation9 + $0x1930] sm:$0xff] }
 0x64e   :  { %9437 = vmatpush2.bf16.msra.mxu0 %v13734_v3  ;;  %v3290_v55 = vld [vmem:[#allocation9 + $0x1d10] sm:$0xff]  ;;  %v13959_v23 = vcombine.high %v3162_v32, %v3166_v56  ;;  %v13958_v3 = vcombine.low %v3162_v32, %v3166_v56 }
 0x64f   :  { %9480 = vmatpush2.bf16.msra.mxu1 %v13862_v36  ;;  %9492 = vmatprep.subr.bf16.mxu0 %v13983_v57  ;;  %v3294_v10 = vld [vmem:[#allocation9 + $0x1d30] sm:$0xff] }
 0x650   :  { %9535 = vmatprep.subr.bf16.mxu1 %v14111_v47  ;;  %v14087_v51 = vcombine.high %v3290_v55, %v3294_v10  ;;  %v3154_v49 = vld [vmem:[#allocation9 + $0x18d0] sm:$0xff]  ;;  %v14086_v36 = vcombine.low %v3290_v55, %v3294_v10 }
 0x651   :  { %9439 = vmatmul.mubr.bf16.vlgmr.msra.gmra.mxu0 %v16398_v62  ;;  %v3158_v9 = vld [vmem:[#allocation9 + $0x18f0] sm:$0xff] }
 0x652   :  { %9482 = vmatmul.mubr.bf16.vlgmr.msra.gmra.mxu1 %v16400_v46  ;;  %9493 = vmatpush1.bf16.msra.mxu0 %v13982_v59  ;;  %v3282_v12 = vld [vmem:[#allocation9 + $0x1cd0] sm:$0xff]  ;;  %v13951_v57 = vcombine.high %v3154_v49, %v3158_v9  ;;  %v13950_v18 = vcombine.low %v3154_v49, %v3158_v9 }
 0x653   :  { %9524 = vmatprep.mubr.bf16.mxu0 %v16407_v45  ;;  %9536 = vmatpush1.bf16.msra.mxu1 %v14110_v2  ;;  %v3286_v54 = vld [vmem:[#allocation9 + $0x1cf0] sm:$0xff] }
 0x654   :  { %9567 = vmatprep.mubr.bf16.mxu1 %v16409_v8  ;;  %9494 = vmatprep.subr.bf16.mxu0 %v13975_v1  ;;  %v14079_v47 = vcombine.high %v3282_v12, %v3286_v54  ;;  %v3146_v5 = vld [vmem:[#allocation9 + $0x1890] sm:$0xff]  ;;  %v14078_v2 = vcombine.low %v3282_v12, %v3286_v54 }
 0x655   :  { %9537 = vmatprep.subr.bf16.mxu1 %v14103_v60  ;;  %v3150_v13 = vld [vmem:[#allocation9 + $0x18b0] sm:$0xff] }
 0x656   :  { %9495 = vmatpush1.bf16.msra.mxu0 %v13974_v15  ;;  %v3274_v59 = vld [vmem:[#allocation9 + $0x1c90] sm:$0xff]  ;;  %v13943_v1 = vcombine.high %v3146_v5, %v3150_v13  ;;  %v13942_v15 = vcombine.low %v3146_v5, %v3150_v13 }
 0x657   :  { %9538 = vmatpush1.bf16.msra.mxu1 %v14102_v28  ;;  %9496 = vmatprep.subr.bf16.mxu0 %v13967_v58  ;;  %v3278_v27 = vld [vmem:[#allocation9 + $0x1cb0] sm:$0xff] }
 0x658   :  { %9539 = vmatprep.subr.bf16.mxu1 %v14095_v61  ;;  %v14071_v35 = vcombine.high %v3274_v59, %v3278_v27  ;;  %v3138_v41 = vld [vmem:[#allocation9 + $0x1850] sm:$0xff]  ;;  %v14070_v28 = vcombine.low %v3274_v59, %v3278_v27 }
 0x659   :  { %v3142_v60 = vld [vmem:[#allocation9 + $0x1870] sm:$0xff] }
 0x65a   :  { %9497 = vmatpush1.bf16.msra.mxu0 %v13966_v19  ;;  %v3266_v29 = vld [vmem:[#allocation9 + $0x1c50] sm:$0xff]  ;;  %v13935_v58 = vcombine.high %v3138_v41, %v3142_v60  ;;  %v13934_v19 = vcombine.low %v3138_v41, %v3142_v60 }
 0x65b   :  { %9540 = vmatpush1.bf16.msra.mxu1 %v14094_v11  ;;  %9498 = vmatprep.subr.bf16.mxu0 %v13959_v23  ;;  %v3270_v30 = vld [vmem:[#allocation9 + $0x1c70] sm:$0xff] }
 0x65c   :  { %9541 = vmatprep.subr.bf16.mxu1 %v14087_v51  ;;  %v14063_v61 = vcombine.high %v3266_v29, %v3270_v30  ;;  %v3130_v32 = vld [vmem:[#allocation9 + $0x1810] sm:$0xff]  ;;  %v14062_v11 = vcombine.low %v3266_v29, %v3270_v30 }
 0x65d   :  { %v3134_v56 = vld [vmem:[#allocation9 + $0x1830] sm:$0xff] }
 0x65e   :  { %9499 = vmatpush1.bf16.msra.mxu0 %v13958_v3  ;;  %v3258_v55 = vld [vmem:[#allocation9 + $0x1c10] sm:$0xff]  ;;  %v13927_v23 = vcombine.high %v3130_v32, %v3134_v56  ;;  %v13926_v3 = vcombine.low %v3130_v32, %v3134_v56 }
 0x65f   :  { %9542 = vmatpush1.bf16.msra.mxu1 %v14086_v36  ;;  %9500 = vmatprep.subr.bf16.mxu0 %v13951_v57  ;;  %v3262_v10 = vld [vmem:[#allocation9 + $0x1c30] sm:$0xff] }
 0x660   :  { %9543 = vmatprep.subr.bf16.mxu1 %v14079_v47  ;;  %v14055_v51 = vcombine.high %v3258_v55, %v3262_v10  ;;  %v3250_v49 = vld [vmem:[#allocation9 + $0x1bd0] sm:$0xff]  ;;  %v14054_v36 = vcombine.low %v3258_v55, %v3262_v10 }
 0x661   :  { %v3254_v9 = vld [vmem:[#allocation9 + $0x1bf0] sm:$0xff] }
 0x662   :  { %9501 = vmatpush1.bf16.msra.mxu0 %v13950_v18  ;;  %v3378_v12 = vld [vmem:[#allocation9 + $0x1fd0] sm:$0xff]  ;;  %v14047_v57 = vcombine.high %v3250_v49, %v3254_v9  ;;  %v14046_v18 = vcombine.low %v3250_v49, %v3254_v9 }
 0x663   :  { %9544 = vmatpush1.bf16.msra.mxu1 %v14078_v2  ;;  %9502 = vmatprep.subr.bf16.mxu0 %v13943_v1  ;;  %v3382_v54 = vld [vmem:[#allocation9 + $0x1ff0] sm:$0xff] }
 0x664   :  { %9545 = vmatprep.subr.bf16.mxu1 %v14071_v35  ;;  %v14175_v47 = vcombine.high %v3378_v12, %v3382_v54  ;;  %v3242_v5 = vld [vmem:[#allocation9 + $0x1b90] sm:$0xff]  ;;  %v14174_v2 = vcombine.low %v3378_v12, %v3382_v54 }
 0x665   :  { %v3246_v13 = vld [vmem:[#allocation9 + $0x1bb0] sm:$0xff] }
 0x666   :  { %9503 = vmatpush1.bf16.msra.mxu0 %v13942_v15  ;;  %v3370_v59 = vld [vmem:[#allocation9 + $0x1f90] sm:$0xff]  ;;  %v14039_v1 = vcombine.high %v3242_v5, %v3246_v13  ;;  %v14038_v15 = vcombine.low %v3242_v5, %v3246_v13 }
 0x667   :  { %9546 = vmatpush1.bf16.msra.mxu1 %v14070_v28  ;;  %9504 = vmatprep.subr.bf16.mxu0 %v13935_v58  ;;  %v3374_v27 = vld [vmem:[#allocation9 + $0x1fb0] sm:$0xff] }
 0x668   :  { %9547 = vmatprep.subr.bf16.mxu1 %v14063_v61  ;;  %v14167_v35 = vcombine.high %v3370_v59, %v3374_v27  ;;  %v3234_v41 = vld [vmem:[#allocation9 + $0x1b50] sm:$0xff]  ;;  %v14166_v28 = vcombine.low %v3370_v59, %v3374_v27 }
 0x669   :  { %v3238_v60 = vld [vmem:[#allocation9 + $0x1b70] sm:$0xff] }
 0x66a   :  { %9505 = vmatpush1.bf16.msra.mxu0 %v13934_v19  ;;  %v3362_v29 = vld [vmem:[#allocation9 + $0x1f50] sm:$0xff]  ;;  %v14031_v58 = vcombine.high %v3234_v41, %v3238_v60  ;;  %v14030_v19 = vcombine.low %v3234_v41, %v3238_v60 }
 0x66b   :  { %9548 = vmatpush1.bf16.msra.mxu1 %v14062_v11  ;;  %9506 = vmatprep.subr.bf16.mxu0 %v13927_v23  ;;  %v3366_v30 = vld [vmem:[#allocation9 + $0x1f70] sm:$0xff] }
 0x66c   :  { %9549 = vmatprep.subr.bf16.mxu1 %v14055_v51  ;;  %v14159_v61 = vcombine.high %v3362_v29, %v3366_v30  ;;  %v3226_v32 = vld [vmem:[#allocation9 + $0x1b10] sm:$0xff]  ;;  %v14158_v11 = vcombine.low %v3362_v29, %v3366_v30 }
 0x66d   :  { %v3230_v56 = vld [vmem:[#allocation9 + $0x1b30] sm:$0xff] }
 0x66e   :  { %9507 = vmatpush1.bf16.msra.mxu0 %v13926_v3  ;;  %v3354_v55 = vld [vmem:[#allocation9 + $0x1f10] sm:$0xff]  ;;  %v14023_v23 = vcombine.high %v3226_v32, %v3230_v56  ;;  %v14022_v3 = vcombine.low %v3226_v32, %v3230_v56 }
 0x66f   :  { %9550 = vmatpush1.bf16.msra.mxu1 %v14054_v36  ;;  %9508 = vmatprep.subr.bf16.mxu0 %v14047_v57  ;;  %v3358_v10 = vld [vmem:[#allocation9 + $0x1f30] sm:$0xff] }
 0x670   :  { %9551 = vmatprep.subr.bf16.mxu1 %v14175_v47  ;;  %v14151_v51 = vcombine.high %v3354_v55, %v3358_v10  ;;  %v3218_v49 = vld [vmem:[#allocation9 + $0x1ad0] sm:$0xff]  ;;  %v14150_v36 = vcombine.low %v3354_v55, %v3358_v10 }
 0x671   :  { %v3222_v9 = vld [vmem:[#allocation9 + $0x1af0] sm:$0xff] }
 0x672   :  { %9509 = vmatpush2.bf16.msra.mxu0 %v14046_v18  ;;  %v3346_v12 = vld [vmem:[#allocation9 + $0x1ed0] sm:$0xff]  ;;  %v14015_v57 = vcombine.high %v3218_v49, %v3222_v9  ;;  %v14014_v18 = vcombine.low %v3218_v49, %v3222_v9  ;;  %v2419_v49 = vld [vmem:[#allocation9 + $0x1d8] sm:$0xff] }
 0x673   :  { %9552 = vmatpush2.bf16.msra.mxu1 %v14174_v2  ;;  %9510 = vmatprep.subr.bf16.mxu0 %v14039_v1  ;;  %v3350_v54 = vld [vmem:[#allocation9 + $0x1ef0] sm:$0xff]  ;;  %v2423_v9 = vld [vmem:[#allocation9 + $0x1f8] sm:$0xff] }
 0x674   :  { %9553 = vmatprep.subr.bf16.mxu1 %v14167_v35  ;;  %v14143_v47 = vcombine.high %v3346_v12, %v3350_v54  ;;  %v3210_v5 = vld [vmem:[#allocation9 + $0x1a90] sm:$0xff]  ;;  %v14142_v2 = vcombine.low %v3346_v12, %v3350_v54  ;;  %v2547_v12 = vld [vmem:[#allocation9 + $0x5d8] sm:$0xff] }
 0x675   :  { %v3214_v13 = vld [vmem:[#allocation9 + $0x1ab0] sm:$0xff]  ;;  %v2551_v54 = vld [vmem:[#allocation9 + $0x5f8] sm:$0xff] }
 0x676   :  { %9511 = vmatpush2.bf16.msra.mxu0 %v14038_v15  ;;  %v3338_v59 = vld [vmem:[#allocation9 + $0x1e90] sm:$0xff]  ;;  %v14007_v1 = vcombine.high %v3210_v5, %v3214_v13  ;;  %v14006_v15 = vcombine.low %v3210_v5, %v3214_v13  ;;  %v2411_v5 = vld [vmem:[#allocation9 + $0x198] sm:$0xff] }
 0x677   :  { %9554 = vmatpush2.bf16.msra.mxu1 %v14166_v28  ;;  %9512 = vmatprep.subr.bf16.mxu0 %v14031_v58  ;;  %v3342_v27 = vld [vmem:[#allocation9 + $0x1eb0] sm:$0xff]  ;;  %v2415_v13 = vld [vmem:[#allocation9 + $0x1b8] sm:$0xff] }
 0x678   :  { %9555 = vmatprep.subr.bf16.mxu1 %v14159_v61  ;;  %v14135_v35 = vcombine.high %v3338_v59, %v3342_v27  ;;  %v3202_v41 = vld [vmem:[#allocation9 + $0x1a50] sm:$0xff]  ;;  %v14134_v28 = vcombine.low %v3338_v59, %v3342_v27  ;;  %v13216_v59 = vcombine.low %v2419_v49, %v2423_v9  ;;  %v2539_v27 = vld [vmem:[#allocation9 + $0x598] sm:$0xff] }
 0x679   :  { %v3206_v60 = vld [vmem:[#allocation9 + $0x1a70] sm:$0xff] }
 0x67a   :  { %9513 = vmatpush2.bf16.msra.mxu0 %v14030_v19  ;;  %v3330_v29 = vld [vmem:[#allocation9 + $0x1e50] sm:$0xff]  ;;  %v13999_v58 = vcombine.high %v3202_v41, %v3206_v60  ;;  %v13998_v19 = vcombine.low %v3202_v41, %v3206_v60  ;;  %v2407_v41 = vld [vmem:[#allocation9 + $0x178] sm:$0xff] }
 0x67b   :  { %9556 = vmatpush2.bf16.msra.mxu1 %v14158_v11  ;;  %9514 = vmatprep.subr.bf16.mxu0 %v14023_v23  ;;  %v3334_v30 = vld [vmem:[#allocation9 + $0x1e70] sm:$0xff] }
 0x67c   :  { %9557 = vmatprep.subr.bf16.mxu1 %v14151_v51  ;;  %v14127_v61 = vcombine.high %v3330_v29, %v3334_v30  ;;  %v3194_v32 = vld [vmem:[#allocation9 + $0x1a10] sm:$0xff]  ;;  %v14126_v11 = vcombine.low %v3330_v29, %v3334_v30  ;;  %v2531_v29 = vld [vmem:[#allocation9 + $0x558] sm:$0xff] }
 0x67d   :  { %v3198_v56 = vld [vmem:[#allocation9 + $0x1a30] sm:$0xff]  ;;  %v2535_v30 = vld [vmem:[#allocation9 + $0x578] sm:$0xff] }
 0x67e   :  { %9515 = vmatpush2.bf16.msra.mxu0 %v14022_v3  ;;  %v3322_v55 = vld [vmem:[#allocation9 + $0x1e10] sm:$0xff]  ;;  %v13991_v23 = vcombine.high %v3194_v32, %v3198_v56  ;;  %v13990_v3 = vcombine.low %v3194_v32, %v3198_v56  ;;  %v2395_v32 = vld [vmem:[#allocation9 + $0x118] sm:$0xff] }
 0x67f   :  { %9558 = vmatpush2.bf16.msra.mxu1 %v14150_v36  ;;  %9516 = vmatprep.subr.bf16.mxu0 %v14015_v57  ;;  %v3326_v10 = vld [vmem:[#allocation9 + $0x1e30] sm:$0xff]  ;;  %v13217_v57 = vcombine.high %v2419_v49, %v2423_v9  ;;  %v2399_v56 = vld [vmem:[#allocation9 + $0x138] sm:$0xff] }
 0x680   :  { %9559 = vmatprep.subr.bf16.mxu1 %v14143_v47  ;;  %v14119_v51 = vcombine.high %v3322_v55, %v3326_v10  ;;  %v14118_v36 = vcombine.low %v3322_v55, %v3326_v10  ;;  %v13345_v47 = vcombine.high %v2547_v12, %v2551_v54  ;;  %v2523_v55 = vld [vmem:[#allocation9 + $0x518] sm:$0xff] }
 0x681   :  { %v2527_v10 = vld [vmem:[#allocation9 + $0x538] sm:$0xff] }
 0x682   :  { %9517 = vmatpush2.bf16.msra.mxu0 %v14014_v18  ;;  %v2543_v18 = vld [vmem:[#allocation9 + $0x5b8] sm:$0xff] }
 0x683   :  { %9560 = vmatpush2.bf16.msra.mxu1 %v14142_v2  ;;  %9518 = vmatprep.subr.bf16.mxu0 %v14007_v1  ;;  %v13344_v2 = vcombine.low %v2547_v12, %v2551_v54  ;;  %v13209_v1 = vcombine.high %v2411_v5, %v2415_v13  ;;  %v13337_v60 = vcombine.high %v2539_v27, %v2543_v18  ;;  %v2391_v49 = vld [vmem:[#allocation9 + $0xf8] sm:$0xff] }
 0x684   :  { %9561 = vmatprep.subr.bf16.mxu1 %v14135_v35  ;;  %v2403_v35 = vld [vmem:[#allocation9 + $0x158] sm:$0xff]  ;;  %v13320_v54 = vcombine.low %v2523_v55, %v2527_v10 }
 0x685   :  { %v2515_v9 = vld [vmem:[#allocation9 + $0x4d8] sm:$0xff] }
 0x686   :  { %9519 = vmatpush2.bf16.msra.mxu0 %v14006_v15  ;;  %v13208_v15 = vcombine.low %v2411_v5, %v2415_v13  ;;  %v2519_v12 = vld [vmem:[#allocation9 + $0x4f8] sm:$0xff] }
 0x687   :  { %9562 = vmatpush2.bf16.msra.mxu1 %v14134_v28  ;;  %9520 = vmatprep.subr.bf16.mxu0 %v13999_v58  ;;  %v13336_v28 = vcombine.low %v2539_v27, %v2543_v18  ;;  %v13201_v58 = vcombine.high %v2403_v35, %v2407_v41  ;;  %v2507_v5 = vld [vmem:[#allocation9 + $0x498] sm:$0xff]  ;;  %v13312_v27 = vcombine.low %v2515_v9, %v2519_v12 }
 0x688   :  { %9563 = vmatprep.subr.bf16.mxu1 %v14127_v61  ;;  %v13329_v61 = vcombine.high %v2531_v29, %v2535_v30  ;;  %v2511_v13 = vld [vmem:[#allocation9 + $0x4b8] sm:$0xff] }
 0x68a   :  { %9521 = vmatpush2.bf16.msra.mxu0 %v13998_v19  ;;  %v13200_v19 = vcombine.low %v2403_v35, %v2407_v41  ;;  %v2375_v35 = vld [vmem:[#allocation9 + $0x78] sm:$0xff] }
 0x68b   :  { %9564 = vmatpush2.bf16.msra.mxu1 %v14126_v11  ;;  %9522 = vmatprep.subr.bf16.mxu0 %v13991_v23  ;;  %v13328_v11 = vcombine.low %v2531_v29, %v2535_v30  ;;  %v13193_v23 = vcombine.high %v2395_v32, %v2399_v56  ;;  %v2499_v41 = vld [vmem:[#allocation9 + $0x458] sm:$0xff]  ;;  %v13304_v30 = vcombine.low %v2507_v5, %v2511_v13 }
 0x68c   :  { %9565 = vmatprep.subr.bf16.mxu1 %v14119_v51  ;;  %v2387_v51 = vld [vmem:[#allocation9 + $0xd8] sm:$0xff] }
 0x68e   :  { %9523 = vmatpush2.bf16.msra.mxu0 %v13990_v3  ;;  %v13185_v3 = vcombine.high %v2387_v51, %v2391_v49 }
 0x68f   :  { %9566 = vmatpush2.bf16.msra.mxu1 %v14118_v36  ;;  %9578 = vmatprep.subr.bf16.mxu0 %v13217_v57  ;;  %v13313_v36 = vcombine.high %v2515_v9, %v2519_v12  ;;  %v2379_v57 = vld [vmem:[#allocation9 + $0x98] sm:$0xff] }
 0x690   :  { %9621 = vmatprep.subr.bf16.mxu1 %v13345_v47  ;;  %v2383_v47 = vld [vmem:[#allocation9 + $0xb8] sm:$0xff] }
 0x691   :  { %9525 = vmatmul.mubr.bf16.vlgmr.msra.gmra.mxu0 %v16427_v52  ;;  %v13177_v18 = vcombine.high %v2379_v57, %v2383_v47  ;;  %v13176_v29 = vcombine.low %v2379_v57, %v2383_v47  ;;  %v2603_v57 = vld [vmem:[#allocation9 + $0x798] sm:$0xff] }
 0x692   :  { %9568 = vmatmul.mubr.bf16.vlgmr.msra.gmra.mxu1 %v16429_v53  ;;  %9579 = vmatpush1.bf16.msra.mxu0 %v13216_v59  ;;  %v13184_v59 = vcombine.low %v2387_v51, %v2391_v49  ;;  %v2611_v51 = vld [vmem:[#allocation9 + $0x7d8] sm:$0xff] }
 0x693   :  { %9610 = vmatprep.mubr.bf16.mxu0 %v16226_v22  ;;  %9622 = vmatpush1.bf16.msra.mxu1 %v13344_v2  ;;  %v13321_v22 = vcombine.high %v2523_v55, %v2527_v10  ;;  %v13305_v2 = vcombine.high %v2507_v5, %v2511_v13  ;;  %v2615_v49 = vld [vmem:[#allocation9 + $0x7f8] sm:$0xff] }
 0x694   :  { %9653 = vmatprep.mubr.bf16.mxu1 %v16228_v50  ;;  %9580 = vmatprep.subr.bf16.mxu0 %v13209_v1  ;;  %v13192_v50 = vcombine.low %v2395_v32, %v2399_v56  ;;  %v2371_v1 = vld [vmem:[#allocation9 + $0x58] sm:$0xff]  ;;  %v13408_v13 = vcombine.low %v2611_v51, %v2615_v49 }
 0x695   :  { %9623 = vmatprep.subr.bf16.mxu1 %v13337_v60  ;;  %v2503_v60 = vld [vmem:[#allocation9 + $0x478] sm:$0xff]  ;;  %v13168_v55 = vcombine.low %v2371_v1, %v2375_v35 }
 0x696   :  { %9581 = vmatpush1.bf16.msra.mxu0 %v13208_v15  ;;  %v13169_v15 = vcombine.high %v2371_v1, %v2375_v35  ;;  %v2491_v32 = vld [vmem:[#allocation9 + $0x418] sm:$0xff]  ;;  %v13296_v10 = vcombine.low %v2499_v41, %v2503_v60 }
 0x697   :  { %9624 = vmatpush1.bf16.msra.mxu1 %v13336_v28  ;;  %9582 = vmatprep.subr.bf16.mxu0 %v13201_v58  ;;  %v13297_v28 = vcombine.high %v2499_v41, %v2503_v60  ;;  %v2363_v58 = vld [vmem:[#allocation9 + $0x18] sm:$0xff] }
 0x698   :  { %9625 = vmatprep.subr.bf16.mxu1 %v13329_v61  ;;  %v2367_v61 = vld [vmem:[#allocation9 + $0x38] sm:$0xff] }
 0x699   :  { %v2495_v56 = vld [vmem:[#allocation9 + $0x438] sm:$0xff]  ;;  %v13160_v9 = vcombine.low %v2363_v58, %v2367_v61 }
 0x69a   :  { %9583 = vmatpush1.bf16.msra.mxu0 %v13200_v19  ;;  %v13161_v19 = vcombine.high %v2363_v58, %v2367_v61  ;;  %v13288_v12 = vcombine.low %v2491_v32, %v2495_v56  ;;  %v2607_v47 = vld [vmem:[#allocation9 + $0x7b8] sm:$0xff] }
 0x69b   :  { %9626 = vmatpush1.bf16.msra.mxu1 %v13328_v11  ;;  %9584 = vmatprep.subr.bf16.mxu0 %v13193_v23  ;;  %v13289_v11 = vcombine.high %v2491_v32, %v2495_v56  ;;  %v2483_v23 = vld [vmem:[#allocation9 + $0x3d8] sm:$0xff]  ;;  %v13400_v60 = vcombine.low %v2603_v57, %v2607_v47 }
 0x69c   :  { %9627 = vmatprep.subr.bf16.mxu1 %v13321_v22  ;;  %v2487_v22 = vld [vmem:[#allocation9 + $0x3f8] sm:$0xff] }
 0x69d   :  { %v13280_v5 = vcombine.low %v2483_v23, %v2487_v22  ;;  %v2595_v1 = vld [vmem:[#allocation9 + $0x758] sm:$0xff] }
 0x69e   :  { %9585 = vmatpush1.bf16.msra.mxu0 %v13192_v50  ;;  %v13281_v50 = vcombine.high %v2483_v23, %v2487_v22  ;;  %v2599_v35 = vld [vmem:[#allocation9 + $0x778] sm:$0xff] }
 0x69f   :  { %9628 = vmatpush1.bf16.msra.mxu1 %v13320_v54  ;;  %9586 = vmatprep.subr.bf16.mxu0 %v13185_v3  ;;  %v13409_v54 = vcombine.high %v2611_v51, %v2615_v49  ;;  %v2475_v3 = vld [vmem:[#allocation9 + $0x398] sm:$0xff]  ;;  %v13392_v56 = vcombine.low %v2595_v1, %v2599_v35 }
 0x6a0   :  { %9629 = vmatprep.subr.bf16.mxu1 %v13313_v36  ;;  %v2479_v36 = vld [vmem:[#allocation9 + $0x3b8] sm:$0xff] }
 0x6a1   :  { %v13272_v41 = vcombine.low %v2475_v3, %v2479_v36  ;;  %v2587_v58 = vld [vmem:[#allocation9 + $0x718] sm:$0xff] }
 0x6a2   :  { %9587 = vmatpush1.bf16.msra.mxu0 %v13184_v59  ;;  %v13273_v59 = vcombine.high %v2475_v3, %v2479_v36  ;;  %v2591_v61 = vld [vmem:[#allocation9 + $0x738] sm:$0xff] }
 0x6a3   :  { %9630 = vmatpush1.bf16.msra.mxu1 %v13312_v27  ;;  %9588 = vmatprep.subr.bf16.mxu0 %v13177_v18  ;;  %v13401_v27 = vcombine.high %v2603_v57, %v2607_v47  ;;  %v2467_v18 = vld [vmem:[#allocation9 + $0x358] sm:$0xff]  ;;  %v13384_v49 = vcombine.low %v2587_v58, %v2591_v61 }
 0x6a4   :  { %9631 = vmatprep.subr.bf16.mxu1 %v13305_v2  ;;  %v2471_v2 = vld [vmem:[#allocation9 + $0x378] sm:$0xff] }
 0x6a5   :  { %v13264_v32 = vcombine.low %v2467_v18, %v2471_v2  ;;  %v2579_v23 = vld [vmem:[#allocation9 + $0x6d8] sm:$0xff] }
 0x6a6   :  { %9589 = vmatpush1.bf16.msra.mxu0 %v13176_v29  ;;  %v13265_v29 = vcombine.high %v2467_v18, %v2471_v2  ;;  %v2583_v22 = vld [vmem:[#allocation9 + $0x6f8] sm:$0xff] }
 0x6a7   :  { %9632 = vmatpush1.bf16.msra.mxu1 %v13304_v30  ;;  %9590 = vmatprep.subr.bf16.mxu0 %v13169_v15  ;;  %v13393_v30 = vcombine.high %v2595_v1, %v2599_v35  ;;  %v2459_v15 = vld [vmem:[#allocation9 + $0x318] sm:$0xff]  ;;  %v13376_v47 = vcombine.low %v2579_v23, %v2583_v22 }
 0x6a8   :  { %9633 = vmatprep.subr.bf16.mxu1 %v13297_v28  ;;  %v2463_v28 = vld [vmem:[#allocation9 + $0x338] sm:$0xff] }
 0x6a9   :  { %v13256_v51 = vcombine.low %v2459_v15, %v2463_v28  ;;  %v2571_v3 = vld [vmem:[#allocation9 + $0x698] sm:$0xff] }
 0x6aa   :  { %9591 = vmatpush1.bf16.msra.mxu0 %v13168_v55  ;;  %v13257_v55 = vcombine.high %v2459_v15, %v2463_v28  ;;  %v2575_v36 = vld [vmem:[#allocation9 + $0x6b8] sm:$0xff] }
 0x6ab   :  { %9634 = vmatpush1.bf16.msra.mxu1 %v13296_v10  ;;  %9592 = vmatprep.subr.bf16.mxu0 %v13161_v19  ;;  %v13385_v10 = vcombine.high %v2587_v58, %v2591_v61  ;;  %v2451_v19 = vld [vmem:[#allocation9 + $0x2d8] sm:$0xff]  ;;  %v13368_v35 = vcombine.low %v2571_v3, %v2575_v36 }
 0x6ac   :  { %9635 = vmatprep.subr.bf16.mxu1 %v13289_v11  ;;  %v2455_v11 = vld [vmem:[#allocation9 + $0x2f8] sm:$0xff] }
 0x6ad   :  { %v13248_v57 = vcombine.low %v2451_v19, %v2455_v11  ;;  %v2563_v18 = vld [vmem:[#allocation9 + $0x658] sm:$0xff] }
 0x6ae   :  { %9593 = vmatpush1.bf16.msra.mxu0 %v13160_v9  ;;  %v13249_v9 = vcombine.high %v2451_v19, %v2455_v11  ;;  %v2567_v2 = vld [vmem:[#allocation9 + $0x678] sm:$0xff] }
 0x6af   :  { %9636 = vmatpush1.bf16.msra.mxu1 %v13288_v12  ;;  %9594 = vmatprep.subr.bf16.mxu0 %v13281_v50  ;;  %v13377_v12 = vcombine.high %v2579_v23, %v2583_v22  ;;  %v2443_v50 = vld [vmem:[#allocation9 + $0x298] sm:$0xff]  ;;  %v13360_v61 = vcombine.low %v2563_v18, %v2567_v2 }
 0x6b0   :  { %9637 = vmatprep.subr.bf16.mxu1 %v13409_v54  ;;  %v2447_v54 = vld [vmem:[#allocation9 + $0x2b8] sm:$0xff] }
 0x6b1   :  { %v13240_v1 = vcombine.low %v2443_v50, %v2447_v54  ;;  %v2555_v15 = vld [vmem:[#allocation9 + $0x618] sm:$0xff] }
 0x6b2   :  { %9595 = vmatpush2.bf16.msra.mxu0 %v13280_v5  ;;  %v13241_v5 = vcombine.high %v2443_v50, %v2447_v54  ;;  %v2559_v28 = vld [vmem:[#allocation9 + $0x638] sm:$0xff] }
 0x6b3   :  { %9638 = vmatpush2.bf16.msra.mxu1 %v13408_v13  ;;  %9596 = vmatprep.subr.bf16.mxu0 %v13273_v59  ;;  %v13369_v13 = vcombine.high %v2571_v3, %v2575_v36  ;;  %v2435_v59 = vld [vmem:[#allocation9 + $0x258] sm:$0xff]  ;;  %v13352_v22 = vcombine.low %v2555_v15, %v2559_v28 }
 0x6b4   :  { %9639 = vmatprep.subr.bf16.mxu1 %v13401_v27  ;;  %v2439_v27 = vld [vmem:[#allocation9 + $0x278] sm:$0xff] }
 0x6b5   :  { %v13232_v58 = vcombine.low %v2435_v59, %v2439_v27  ;;  %v2803_v19 = vld [vmem:[#allocation9 + $0xdd8] sm:$0xff] }
 0x6b6   :  { %9597 = vmatpush2.bf16.msra.mxu0 %v13272_v41  ;;  %v13233_v41 = vcombine.high %v2435_v59, %v2439_v27  ;;  %v2807_v11 = vld [vmem:[#allocation9 + $0xdf8] sm:$0xff] }
 0x6b7   :  { %9640 = vmatpush2.bf16.msra.mxu1 %v13400_v60  ;;  %9598 = vmatprep.subr.bf16.mxu0 %v13265_v29  ;;  %v13361_v60 = vcombine.high %v2563_v18, %v2567_v2  ;;  %v2427_v29 = vld [vmem:[#allocation9 + $0x218] sm:$0xff]  ;;  %v13600_v36 = vcombine.low %v2803_v19, %v2807_v11 }
 0x6b8   :  { %9641 = vmatprep.subr.bf16.mxu1 %v13393_v30  ;;  %v2431_v30 = vld [vmem:[#allocation9 + $0x238] sm:$0xff] }
 0x6b9   :  { %v13224_v23 = vcombine.low %v2427_v29, %v2431_v30  ;;  %v2795_v54 = vld [vmem:[#allocation9 + $0xd98] sm:$0xff] }
 0x6ba   :  { %9599 = vmatpush2.bf16.msra.mxu0 %v13264_v32  ;;  %v13225_v32 = vcombine.high %v2427_v29, %v2431_v30  ;;  %v2799_v3 = vld [vmem:[#allocation9 + $0xdb8] sm:$0xff] }
 0x6bb   :  { %9642 = vmatpush2.bf16.msra.mxu1 %v13392_v56  ;;  %9600 = vmatprep.subr.bf16.mxu0 %v13257_v55  ;;  %v13353_v56 = vcombine.high %v2555_v15, %v2559_v28  ;;  %v2675_v55 = vld [vmem:[#allocation9 + $0x9d8] sm:$0xff]  ;;  %v13592_v2 = vcombine.low %v2795_v54, %v2799_v3 }
 0x6bc   :  { %9643 = vmatprep.subr.bf16.mxu1 %v13385_v10  ;;  %v2679_v10 = vld [vmem:[#allocation9 + $0x9f8] sm:$0xff] }
 0x6bd   :  { %v13472_v50 = vcombine.low %v2675_v55, %v2679_v10  ;;  %v2787_v59 = vld [vmem:[#allocation9 + $0xd58] sm:$0xff] }
 0x6be   :  { %9601 = vmatpush2.bf16.msra.mxu0 %v13256_v51  ;;  %v13473_v51 = vcombine.high %v2675_v55, %v2679_v10  ;;  %v2791_v27 = vld [vmem:[#allocation9 + $0xd78] sm:$0xff] }
 0x6bf   :  { %9644 = vmatpush2.bf16.msra.mxu1 %v13384_v49  ;;  %9602 = vmatprep.subr.bf16.mxu0 %v13249_v9  ;;  %v13601_v49 = vcombine.high %v2803_v19, %v2807_v11  ;;  %v2667_v9 = vld [vmem:[#allocation9 + $0x998] sm:$0xff] }
 0x6c0   :  { %9645 = vmatprep.subr.bf16.mxu1 %v13377_v12  ;;  %v2671_v12 = vld [vmem:[#allocation9 + $0x9b8] sm:$0xff] }
 0x6c1   :  { %v13464_v18 = vcombine.low %v2667_v9, %v2671_v12  ;;  %v2783_v29 = vld [vmem:[#allocation9 + $0xd38] sm:$0xff] }
 0x6c2   :  { %9603 = vmatpush2.bf16.msra.mxu0 %v13248_v57  ;;  %v13465_v57 = vcombine.high %v2667_v9, %v2671_v12  ;;  %v2643_v28 = vld [vmem:[#allocation9 + $0x8d8] sm:$0xff] }
 0x6c3   :  { %9646 = vmatpush2.bf16.msra.mxu1 %v13376_v47  ;;  %9604 = vmatprep.subr.bf16.mxu0 %v13241_v5  ;;  %v2659_v47 = vld [vmem:[#allocation9 + $0x958] sm:$0xff] }
 0x6c4   :  { %9647 = vmatprep.subr.bf16.mxu1 %v13369_v13  ;;  %v2663_v5 = vld [vmem:[#allocation9 + $0x978] sm:$0xff]  ;;  %v13593_v13 = vcombine.high %v2795_v54, %v2799_v3 }
 0x6c5   :  { %v13456_v30 = vcombine.low %v2659_v47, %v2663_v5  ;;  %v2635_v19 = vld [vmem:[#allocation9 + $0x898] sm:$0xff] }
 0x6c6   :  { %9605 = vmatpush2.bf16.msra.mxu0 %v13240_v1  ;;  %v13457_v1 = vcombine.high %v2659_v47, %v2663_v5  ;;  %v2639_v11 = vld [vmem:[#allocation9 + $0x8b8] sm:$0xff] }
 0x6c7   :  { %9648 = vmatpush2.bf16.msra.mxu1 %v13368_v35  ;;  %9606 = vmatprep.subr.bf16.mxu0 %v13233_v41  ;;  %v13585_v35 = vcombine.high %v2787_v59, %v2791_v27  ;;  %v2651_v41 = vld [vmem:[#allocation9 + $0x918] sm:$0xff]  ;;  %v13433_v9 = vcombine.high %v2635_v19, %v2639_v11 }
 0x6c8   :  { %9649 = vmatprep.subr.bf16.mxu1 %v13361_v60  ;;  %v2655_v60 = vld [vmem:[#allocation9 + $0x938] sm:$0xff] }
 0x6c9   :  { %v13449_v15 = vcombine.high %v2651_v41, %v2655_v60  ;;  %v2631_v54 = vld [vmem:[#allocation9 + $0x878] sm:$0xff] }
 0x6ca   :  { %9607 = vmatpush2.bf16.msra.mxu0 %v13232_v58  ;;  %v2647_v58 = vld [vmem:[#allocation9 + $0x8f8] sm:$0xff] }
 0x6cb   :  { %9650 = vmatpush2.bf16.msra.mxu1 %v13360_v61  ;;  %9608 = vmatprep.subr.bf16.mxu0 %v13225_v32  ;;  %v2771_v61 = vld [vmem:[#allocation9 + $0xcd8] sm:$0xff]  ;;  %v13441_v55 = vcombine.high %v2643_v28, %v2647_v58 }
 0x6cc   :  { %9651 = vmatprep.subr.bf16.mxu1 %v13353_v56  ;;  %v2775_v32 = vld [vmem:[#allocation9 + $0xcf8] sm:$0xff] }
 0x6cd   :  { %v13569_v10 = vcombine.high %v2771_v61, %v2775_v32  ;;  %v2755_v3 = vld [vmem:[#allocation9 + $0xc58] sm:$0xff] }
 0x6ce   :  { %9609 = vmatpush2.bf16.msra.mxu0 %v13224_v23  ;;  %v2763_v23 = vld [vmem:[#allocation9 + $0xc98] sm:$0xff] }
 0x6cf   :  { %9652 = vmatpush2.bf16.msra.mxu1 %v13352_v22  ;;  %9664 = vmatprep.subr.bf16.mxu0 %v13473_v51  ;;  %v2767_v22 = vld [vmem:[#allocation9 + $0xcb8] sm:$0xff]  ;;  %v13440_v51 = vcombine.low %v2643_v28, %v2647_v58 }
 0x6d0   :  { %9707 = vmatprep.subr.bf16.mxu1 %v13601_v49  ;;  %v13568_v49 = vcombine.low %v2771_v61, %v2775_v32  ;;  %v13561_v12 = vcombine.high %v2763_v23, %v2767_v22  ;;  %v13560_v47 = vcombine.low %v2763_v23, %v2767_v22  ;;  %v2731_v61 = vld [vmem:[#allocation9 + $0xb98] sm:$0xff] }
 0x6d1   :  { %9611 = vmatmul.mubr.bf16.vlgmr.msra.gmra.mxu0 %v16230_v42  ;;  %v2779_v42 = vld [vmem:[#allocation9 + $0xd18] sm:$0xff] }
 0x6d2   :  { %9654 = vmatmul.mubr.bf16.vlgmr.msra.gmra.mxu1 %v16233_v21  ;;  %9665 = vmatpush1.bf16.msra.mxu0 %v13472_v50  ;;  %v13584_v21 = vcombine.low %v2787_v59, %v2791_v27  ;;  %v13576_v56 = vcombine.low %v2779_v42, %v2783_v29  ;;  %v2627_v50 = vld [vmem:[#allocation9 + $0x858] sm:$0xff] }
 0x6d3   :  { %9696 = vmatprep.mubr.bf16.mxu0 %v16235_v63  ;;  %9708 = vmatpush1.bf16.msra.mxu1 %v13600_v36  ;;  %v13577_v63 = vcombine.high %v2779_v42, %v2783_v29  ;;  %v2759_v36 = vld [vmem:[#allocation9 + $0xc78] sm:$0xff]  ;;  %v13425_v5 = vcombine.high %v2627_v50, %v2631_v54 }
 0x6d4   :  { %9739 = vmatprep.mubr.bf16.mxu1 %v16237_v39  ;;  %9666 = vmatprep.subr.bf16.mxu0 %v13465_v57  ;;  %v13448_v39 = vcombine.low %v2651_v41, %v2655_v60  ;;  %v13432_v57 = vcombine.low %v2635_v19, %v2639_v11  ;;  %v2619_v59 = vld [vmem:[#allocation9 + $0x818] sm:$0xff] }
 0x6d5   :  { %9709 = vmatprep.subr.bf16.mxu1 %v13593_v13  ;;  %v13553_v13 = vcombine.high %v2755_v3, %v2759_v36  ;;  %v2623_v27 = vld [vmem:[#allocation9 + $0x838] sm:$0xff] }
 0x6d6   :  { %9667 = vmatpush1.bf16.msra.mxu0 %v13464_v18  ;;  %v2747_v18 = vld [vmem:[#allocation9 + $0xc18] sm:$0xff]  ;;  %v13417_v41 = vcombine.high %v2619_v59, %v2623_v27 }
 0x6d7   :  { %9710 = vmatpush1.bf16.msra.mxu1 %v13592_v2  ;;  %9668 = vmatprep.subr.bf16.mxu0 %v13457_v1  ;;  %v2751_v2 = vld [vmem:[#allocation9 + $0xc38] sm:$0xff]  ;;  %v13424_v1 = vcombine.low %v2627_v50, %v2631_v54 }
 0x6d8   :  { %9711 = vmatprep.subr.bf16.mxu1 %v13585_v35  ;;  %v13552_v35 = vcombine.low %v2755_v3, %v2759_v36  ;;  %v13545_v60 = vcombine.high %v2747_v18, %v2751_v2  ;;  %v2739_v42 = vld [vmem:[#allocation9 + $0xbd8] sm:$0xff] }
 0x6d9   :  { %v2743_v29 = vld [vmem:[#allocation9 + $0xbf8] sm:$0xff] }
 0x6da   :  { %9669 = vmatpush1.bf16.msra.mxu0 %v13456_v30  ;;  %v2867_v30 = vld [vmem:[#allocation9 + $0xfd8] sm:$0xff]  ;;  %v13537_v28 = vcombine.high %v2739_v42, %v2743_v29 }
 0x6db   :  { %9712 = vmatpush1.bf16.msra.mxu1 %v13584_v21  ;;  %9670 = vmatprep.subr.bf16.mxu0 %v13449_v15  ;;  %v2871_v21 = vld [vmem:[#allocation9 + $0xff8] sm:$0xff]  ;;  %v13416_v15 = vcombine.low %v2619_v59, %v2623_v27 }
 0x6dc   :  { %9713 = vmatprep.subr.bf16.mxu1 %v13577_v63  ;;  %v13544_v63 = vcombine.low %v2747_v18, %v2751_v2  ;;  %v13665_v58 = vcombine.high %v2867_v30, %v2871_v21  ;;  %v2735_v32 = vld [vmem:[#allocation9 + $0xbb8] sm:$0xff] }
 0x6dd   :  { %v13529_v19 = vcombine.high %v2731_v61, %v2735_v32  ;;  %v2723_v23 = vld [vmem:[#allocation9 + $0xb58] sm:$0xff] }
 0x6de   :  { %9671 = vmatpush1.bf16.msra.mxu0 %v13448_v39  ;;  %v2859_v39 = vld [vmem:[#allocation9 + $0xf98] sm:$0xff] }
 0x6df   :  { %9714 = vmatpush1.bf16.msra.mxu1 %v13576_v56  ;;  %9672 = vmatprep.subr.bf16.mxu0 %v13441_v55  ;;  %v2863_v56 = vld [vmem:[#allocation9 + $0xfb8] sm:$0xff]  ;;  %v13536_v55 = vcombine.low %v2739_v42, %v2743_v29 }
 0x6e0   :  { %9715 = vmatprep.subr.bf16.mxu1 %v13569_v10  ;;  %v13664_v10 = vcombine.low %v2867_v30, %v2871_v21  ;;  %v13657_v11 = vcombine.high %v2859_v39, %v2863_v56  ;;  %v2727_v22 = vld [vmem:[#allocation9 + $0xb78] sm:$0xff] }
 0x6e1   :  { %v13521_v50 = vcombine.high %v2723_v23, %v2727_v22  ;;  %v2715_v3 = vld [vmem:[#allocation9 + $0xb18] sm:$0xff] }
 0x6e2   :  { %9673 = vmatpush1.bf16.msra.mxu0 %v13440_v51  ;;  %v2851_v51 = vld [vmem:[#allocation9 + $0xf58] sm:$0xff] }
 0x6e3   :  { %9716 = vmatpush1.bf16.msra.mxu1 %v13568_v49  ;;  %9674 = vmatprep.subr.bf16.mxu0 %v13433_v9  ;;  %v2855_v49 = vld [vmem:[#allocation9 + $0xf78] sm:$0xff]  ;;  %v13528_v9 = vcombine.low %v2731_v61, %v2735_v32 }
 0x6e4   :  { %9717 = vmatprep.subr.bf16.mxu1 %v13561_v12  ;;  %v13656_v12 = vcombine.low %v2859_v39, %v2863_v56  ;;  %v13649_v54 = vcombine.high %v2851_v51, %v2855_v49  ;;  %v2719_v36 = vld [vmem:[#allocation9 + $0xb38] sm:$0xff] }
 0x6e5   :  { %v13513_v59 = vcombine.high %v2715_v3, %v2719_v36  ;;  %v2707_v18 = vld [vmem:[#allocation9 + $0xad8] sm:$0xff] }
 0x6e6   :  { %9675 = vmatpush1.bf16.msra.mxu0 %v13432_v57  ;;  %v2843_v57 = vld [vmem:[#allocation9 + $0xf18] sm:$0xff] }
 0x6e7   :  { %9718 = vmatpush1.bf16.msra.mxu1 %v13560_v47  ;;  %9676 = vmatprep.subr.bf16.mxu0 %v13425_v5  ;;  %v2847_v47 = vld [vmem:[#allocation9 + $0xf38] sm:$0xff]  ;;  %v13520_v5 = vcombine.low %v2723_v23, %v2727_v22 }
 0x6e8   :  { %9719 = vmatprep.subr.bf16.mxu1 %v13553_v13  ;;  %v13648_v13 = vcombine.low %v2851_v51, %v2855_v49  ;;  %v13641_v27 = vcombine.high %v2843_v57, %v2847_v47  ;;  %v2711_v2 = vld [vmem:[#allocation9 + $0xaf8] sm:$0xff] }
 0x6e9   :  { %v13505_v42 = vcombine.high %v2707_v18, %v2711_v2  ;;  %v2699_v30 = vld [vmem:[#allocation9 + $0xa98] sm:$0xff] }
 0x6ea   :  { %9677 = vmatpush1.bf16.msra.mxu0 %v13424_v1  ;;  %v2835_v1 = vld [vmem:[#allocation9 + $0xed8] sm:$0xff] }
 0x6eb   :  { %9720 = vmatpush1.bf16.msra.mxu1 %v13552_v35  ;;  %9678 = vmatprep.subr.bf16.mxu0 %v13417_v41  ;;  %v2839_v35 = vld [vmem:[#allocation9 + $0xef8] sm:$0xff]  ;;  %v13512_v41 = vcombine.low %v2715_v3, %v2719_v36 }
 0x6ec   :  { %9721 = vmatprep.subr.bf16.mxu1 %v13545_v60  ;;  %v13640_v60 = vcombine.low %v2843_v57, %v2847_v47  ;;  %v13633_v29 = vcombine.high %v2835_v1, %v2839_v35  ;;  %v2703_v21 = vld [vmem:[#allocation9 + $0xab8] sm:$0xff] }
 0x6ed   :  { %v13497_v61 = vcombine.high %v2699_v30, %v2703_v21  ;;  %v2691_v39 = vld [vmem:[#allocation9 + $0xa58] sm:$0xff] }
 0x6ee   :  { %9679 = vmatpush1.bf16.msra.mxu0 %v13416_v15  ;;  %v2827_v15 = vld [vmem:[#allocation9 + $0xe98] sm:$0xff] }
 0x6ef   :  { %9722 = vmatpush1.bf16.msra.mxu1 %v13544_v63  ;;  %9680 = vmatprep.subr.bf16.mxu0 %v13537_v28  ;;  %v2831_v63 = vld [vmem:[#allocation9 + $0xeb8] sm:$0xff]  ;;  %v13504_v28 = vcombine.low %v2707_v18, %v2711_v2 }
 0x6f0   :  { %9723 = vmatprep.subr.bf16.mxu1 %v13665_v58  ;;  %v13632_v58 = vcombine.low %v2835_v1, %v2839_v35  ;;  %v13625_v32 = vcombine.high %v2827_v15, %v2831_v63  ;;  %v2695_v56 = vld [vmem:[#allocation9 + $0xa78] sm:$0xff] }
 0x6f1   :  { %v13489_v23 = vcombine.high %v2691_v39, %v2695_v56  ;;  %v2683_v51 = vld [vmem:[#allocation9 + $0xa18] sm:$0xff] }
 0x6f2   :  { %9681 = vmatpush2.bf16.msra.mxu0 %v13536_v55  ;;  %v2819_v55 = vld [vmem:[#allocation9 + $0xe58] sm:$0xff] }
 0x6f3   :  { %9724 = vmatpush2.bf16.msra.mxu1 %v13664_v10  ;;  %9682 = vmatprep.subr.bf16.mxu0 %v13529_v19  ;;  %v2823_v10 = vld [vmem:[#allocation9 + $0xe78] sm:$0xff]  ;;  %v13496_v19 = vcombine.low %v2699_v30, %v2703_v21 }
 0x6f4   :  { %9725 = vmatprep.subr.bf16.mxu1 %v13657_v11  ;;  %v13624_v11 = vcombine.low %v2827_v15, %v2831_v63  ;;  %v13617_v22 = vcombine.high %v2819_v55, %v2823_v10  ;;  %v2687_v49 = vld [vmem:[#allocation9 + $0xa38] sm:$0xff] }
 0x6f5   :  { %v13481_v3 = vcombine.high %v2683_v51, %v2687_v49  ;;  %v2931_v57 = vld [vmem:[#allocation9 + $0x11d8] sm:$0xff] }
 0x6f6   :  { %9683 = vmatpush2.bf16.msra.mxu0 %v13528_v9  ;;  %v2811_v9 = vld [vmem:[#allocation9 + $0xe18] sm:$0xff] }
 0x6f7   :  { %9726 = vmatpush2.bf16.msra.mxu1 %v13656_v12  ;;  %9684 = vmatprep.subr.bf16.mxu0 %v13521_v50  ;;  %v2815_v12 = vld [vmem:[#allocation9 + $0xe38] sm:$0xff]  ;;  %v13488_v50 = vcombine.low %v2691_v39, %v2695_v56 }
 0x6f8   :  { %9727 = vmatprep.subr.bf16.mxu1 %v13649_v54  ;;  %v13616_v54 = vcombine.low %v2819_v55, %v2823_v10  ;;  %v13609_v36 = vcombine.high %v2811_v9, %v2815_v12  ;;  %v2935_v47 = vld [vmem:[#allocation9 + $0x11f8] sm:$0xff] }
 0x6f9   :  { %v13729_v18 = vcombine.high %v2931_v57, %v2935_v47  ;;  %v2923_v1 = vld [vmem:[#allocation9 + $0x1198] sm:$0xff] }
 0x6fa   :  { %9685 = vmatpush2.bf16.msra.mxu0 %v13520_v5  ;;  %v3059_v5 = vld [vmem:[#allocation9 + $0x15d8] sm:$0xff] }
 0x6fb   :  { %9728 = vmatpush2.bf16.msra.mxu1 %v13648_v13  ;;  %9686 = vmatprep.subr.bf16.mxu0 %v13513_v59  ;;  %v3063_v13 = vld [vmem:[#allocation9 + $0x15f8] sm:$0xff]  ;;  %v13480_v59 = vcombine.low %v2683_v51, %v2687_v49 }
 0x6fc   :  { %9729 = vmatprep.subr.bf16.mxu1 %v13641_v27  ;;  %v13608_v27 = vcombine.low %v2811_v9, %v2815_v12  ;;  %v13857_v2 = vcombine.high %v3059_v5, %v3063_v13  ;;  %v2927_v35 = vld [vmem:[#allocation9 + $0x11b8] sm:$0xff] }
 0x6fd   :  { %v13721_v30 = vcombine.high %v2923_v1, %v2927_v35  ;;  %v2915_v21 = vld [vmem:[#allocation9 + $0x1158] sm:$0xff] }
 0x6fe   :  { %9687 = vmatpush2.bf16.msra.mxu0 %v13512_v41  ;;  %v13728_v41 = vcombine.low %v2931_v57, %v2935_v47  ;;  %v2919_v15 = vld [vmem:[#allocation9 + $0x1178] sm:$0xff] }
 0x6ff   :  { %9730 = vmatpush2.bf16.msra.mxu1 %v13640_v60  ;;  %9688 = vmatprep.subr.bf16.mxu0 %v13505_v42  ;;  %v3051_v60 = vld [vmem:[#allocation9 + $0x1598] sm:$0xff]  ;;  %v13713_v39 = vcombine.high %v2915_v21, %v2919_v15 }
 0x700   :  { %9731 = vmatprep.subr.bf16.mxu1 %v13633_v29  ;;  %v3055_v42 = vld [vmem:[#allocation9 + $0x15b8] sm:$0xff]  ;;  %v13856_v29 = vcombine.low %v3059_v5, %v3063_v13 }
 0x701   :  { %v13849_v63 = vcombine.high %v3051_v60, %v3055_v42  ;;  %v2907_v55 = vld [vmem:[#allocation9 + $0x1118] sm:$0xff] }
 0x702   :  { %9689 = vmatpush2.bf16.msra.mxu0 %v13504_v28  ;;  %v3043_v28 = vld [vmem:[#allocation9 + $0x1558] sm:$0xff] }
 0x703   :  { %9732 = vmatpush2.bf16.msra.mxu1 %v13632_v58  ;;  %9690 = vmatprep.subr.bf16.mxu0 %v13497_v61  ;;  %v3047_v58 = vld [vmem:[#allocation9 + $0x1578] sm:$0xff]  ;;  %v13720_v61 = vcombine.low %v2923_v1, %v2927_v35 }
 0x704   :  { %9733 = vmatprep.subr.bf16.mxu1 %v13625_v32  ;;  %v13848_v32 = vcombine.low %v3051_v60, %v3055_v42  ;;  %v13841_v56 = vcombine.high %v3043_v28, %v3047_v58  ;;  %v2911_v10 = vld [vmem:[#allocation9 + $0x1138] sm:$0xff] }
 0x705   :  { %v2903_v51 = vld [vmem:[#allocation9 + $0x10f8] sm:$0xff] }
 0x706   :  { %9691 = vmatpush2.bf16.msra.mxu0 %v13496_v19  ;;  %v3039_v19 = vld [vmem:[#allocation9 + $0x1538] sm:$0xff] }
 0x707   :  { %9734 = vmatpush2.bf16.msra.mxu1 %v13624_v11  ;;  %9692 = vmatprep.subr.bf16.mxu0 %v13489_v23  ;;  %v13712_v11 = vcombine.low %v2915_v21, %v2919_v15  ;;  %v13705_v23 = vcombine.high %v2907_v55, %v2911_v10  ;;  %v3027_v49 = vld [vmem:[#allocation9 + $0x14d8] sm:$0xff] }
 0x708   :  { %9735 = vmatprep.subr.bf16.mxu1 %v13617_v22  ;;  %v2899_v22 = vld [vmem:[#allocation9 + $0x10d8] sm:$0xff] }
 0x709   :  { %v3031_v9 = vld [vmem:[#allocation9 + $0x14f8] sm:$0xff]  ;;  %v13696_v5 = vcombine.low %v2899_v22, %v2903_v51 }
 0x70a   :  { %9693 = vmatpush2.bf16.msra.mxu0 %v13488_v50  ;;  %v13697_v50 = vcombine.high %v2899_v22, %v2903_v51  ;;  %v3019_v57 = vld [vmem:[#allocation9 + $0x1498] sm:$0xff]  ;;  %v13824_v13 = vcombine.low %v3027_v49, %v3031_v9 }
 0x70b   :  { %9736 = vmatpush2.bf16.msra.mxu1 %v13616_v54  ;;  %9694 = vmatprep.subr.bf16.mxu0 %v13481_v3  ;;  %v13825_v54 = vcombine.high %v3027_v49, %v3031_v9  ;;  %v2891_v3 = vld [vmem:[#allocation9 + $0x1098] sm:$0xff] }
 0x70c   :  { %9737 = vmatprep.subr.bf16.mxu1 %v13609_v36  ;;  %v2895_v36 = vld [vmem:[#allocation9 + $0x10b8] sm:$0xff] }
 0x70d   :  { %v3023_v47 = vld [vmem:[#allocation9 + $0x14b8] sm:$0xff] }
 0x70e   :  { %9695 = vmatpush2.bf16.msra.mxu0 %v13480_v59  ;;  %v13689_v59 = vcombine.high %v2891_v3, %v2895_v36  ;;  %v3011_v1 = vld [vmem:[#allocation9 + $0x1458] sm:$0xff]  ;;  %v13816_v60 = vcombine.low %v3019_v57, %v3023_v47 }
 0x70f   :  { %9738 = vmatpush2.bf16.msra.mxu1 %v13608_v27  ;;  %9750 = vmatprep.subr.bf16.mxu0 %v13729_v18  ;;  %v13817_v27 = vcombine.high %v3019_v57, %v3023_v47  ;;  %v2883_v18 = vld [vmem:[#allocation9 + $0x1058] sm:$0xff] }
 0x710   :  { %9793 = vmatprep.subr.bf16.mxu1 %v13857_v2  ;;  %v2887_v2 = vld [vmem:[#allocation9 + $0x1078] sm:$0xff] }
 0x711   :  { %9697 = vmatmul.mubr.bf16.vlgmr.msra.gmra.mxu0 %v16248_v33  ;;  %v3035_v33 = vld [vmem:[#allocation9 + $0x1518] sm:$0xff]  ;;  %v13681_v42 = vcombine.high %v2883_v18, %v2887_v2 }
 0x712   :  { %9740 = vmatmul.mubr.bf16.vlgmr.msra.gmra.mxu1 %v16283_v31  ;;  %9751 = vmatpush1.bf16.msra.mxu0 %v13728_v41  ;;  %v13840_v31 = vcombine.low %v3043_v28, %v3047_v58  ;;  %v13832_v12 = vcombine.low %v3035_v33, %v3039_v19  ;;  %v3015_v35 = vld [vmem:[#allocation9 + $0x1478] sm:$0xff]  ;;  %v13688_v41 = vcombine.low %v2891_v3, %v2895_v36 }
 0x713   :  { %9782 = vmatprep.mubr.bf16.mxu0 %v16343_v0  ;;  %9794 = vmatpush1.bf16.msra.mxu1 %v13856_v29  ;;  %v13833_v0 = vcombine.high %v3035_v33, %v3039_v19  ;;  %v13809_v29 = vcombine.high %v3011_v1, %v3015_v35  ;;  %v2879_v21 = vld [vmem:[#allocation9 + $0x1038] sm:$0xff]  ;;  %v13680_v28 = vcombine.low %v2883_v18, %v2887_v2 }
 0x714   :  { %9825 = vmatprep.mubr.bf16.mxu1 %v16357_v25  ;;  %9752 = vmatprep.subr.bf16.mxu0 %v13721_v30  ;;  %v13704_v25 = vcombine.low %v2907_v55, %v2911_v10  ;;  %v2875_v30 = vld [vmem:[#allocation9 + $0x1018] sm:$0xff]  ;;  %v13808_v58 = vcombine.low %v3011_v1, %v3015_v35 }
 0x715   :  { %9795 = vmatprep.subr.bf16.mxu1 %v13849_v63  ;;  %v3003_v15 = vld [vmem:[#allocation9 + $0x1418] sm:$0xff]  ;;  %v13672_v33 = vcombine.low %v2875_v30, %v2879_v21 }
 0x716   :  { %9753 = vmatpush1.bf16.msra.mxu0 %v13720_v61  ;;  %v3007_v63 = vld [vmem:[#allocation9 + $0x1438] sm:$0xff]  ;;  %v13673_v61 = vcombine.high %v2875_v30, %v2879_v21 }
 0x717   :  { %9796 = vmatpush1.bf16.msra.mxu1 %v13848_v32  ;;  %9754 = vmatprep.subr.bf16.mxu0 %v13713_v39  ;;  %v13801_v32 = vcombine.high %v3003_v15, %v3007_v63  ;;  %v2995_v39 = vld [vmem:[#allocation9 + $0x13d8] sm:$0xff]  ;;  %v13800_v19 = vcombine.low %v3003_v15, %v3007_v63 }
 0x718   :  { %9797 = vmatprep.subr.bf16.mxu1 %v13841_v56  ;;  %v2999_v56 = vld [vmem:[#allocation9 + $0x13f8] sm:$0xff] }
 0x719   :  { %v3123_v55 = vld [vmem:[#allocation9 + $0x17d8] sm:$0xff]  ;;  %v13792_v49 = vcombine.low %v2995_v39, %v2999_v56 }
 0x71a   :  { %9755 = vmatpush1.bf16.msra.mxu0 %v13712_v11  ;;  %v3127_v10 = vld [vmem:[#allocation9 + $0x17f8] sm:$0xff]  ;;  %v13793_v11 = vcombine.high %v2995_v39, %v2999_v56 }
 0x71b   :  { %9798 = vmatpush1.bf16.msra.mxu1 %v13840_v31  ;;  %9756 = vmatprep.subr.bf16.mxu0 %v13705_v23  ;;  %v13921_v31 = vcombine.high %v3123_v55, %v3127_v10  ;;  %v2987_v23 = vld [vmem:[#allocation9 + $0x1398] sm:$0xff]  ;;  %v13920_v9 = vcombine.low %v3123_v55, %v3127_v10 }
 0x71c   :  { %9799 = vmatprep.subr.bf16.mxu1 %v13833_v0  ;;  %v2991_v0 = vld [vmem:[#allocation9 + $0x13b8] sm:$0xff] }
 0x71d   :  { %v3115_v22 = vld [vmem:[#allocation9 + $0x1798] sm:$0xff]  ;;  %v13784_v57 = vcombine.low %v2987_v23, %v2991_v0 }
 0x71e   :  { %9757 = vmatpush1.bf16.msra.mxu0 %v13704_v25  ;;  %v3119_v51 = vld [vmem:[#allocation9 + $0x17b8] sm:$0xff]  ;;  %v13785_v25 = vcombine.high %v2987_v23, %v2991_v0 }
 0x71f   :  { %9800 = vmatpush1.bf16.msra.mxu1 %v13832_v12  ;;  %9758 = vmatprep.subr.bf16.mxu0 %v13697_v50  ;;  %v13913_v12 = vcombine.high %v3115_v22, %v3119_v51  ;;  %v2979_v50 = vld [vmem:[#allocation9 + $0x1358] sm:$0xff]  ;;  %v13912_v47 = vcombine.low %v3115_v22, %v3119_v51 }
 0x720   :  { %9801 = vmatprep.subr.bf16.mxu1 %v13825_v54  ;;  %v2983_v54 = vld [vmem:[#allocation9 + $0x1378] sm:$0xff] }
 0x721   :  { %v3107_v3 = vld [vmem:[#allocation9 + $0x1758] sm:$0xff]  ;;  %v13776_v1 = vcombine.low %v2979_v50, %v2983_v54 }
 0x722   :  { %9759 = vmatpush1.bf16.msra.mxu0 %v13696_v5  ;;  %v3111_v36 = vld [vmem:[#allocation9 + $0x1778] sm:$0xff]  ;;  %v13777_v5 = vcombine.high %v2979_v50, %v2983_v54 }
 0x723   :  { %9802 = vmatpush1.bf16.msra.mxu1 %v13824_v13  ;;  %9760 = vmatprep.subr.bf16.mxu0 %v13689_v59  ;;  %v13905_v13 = vcombine.high %v3107_v3, %v3111_v36  ;;  %v2971_v59 = vld [vmem:[#allocation9 + $0x1318] sm:$0xff]  ;;  %v13904_v35 = vcombine.low %v3107_v3, %v3111_v36 }
 0x724   :  { %9803 = vmatprep.subr.bf16.mxu1 %v13817_v27  ;;  %v2975_v27 = vld [vmem:[#allocation9 + $0x1338] sm:$0xff] }
 0x725   :  { %v3099_v18 = vld [vmem:[#allocation9 + $0x1718] sm:$0xff]  ;;  %v13768_v15 = vcombine.low %v2971_v59, %v2975_v27 }
 0x726   :  { %9761 = vmatpush1.bf16.msra.mxu0 %v13688_v41  ;;  %v3103_v2 = vld [vmem:[#allocation9 + $0x1738] sm:$0xff]  ;;  %v13769_v41 = vcombine.high %v2971_v59, %v2975_v27 }
 0x727   :  { %9804 = vmatpush1.bf16.msra.mxu1 %v13816_v60  ;;  %9762 = vmatprep.subr.bf16.mxu0 %v13681_v42  ;;  %v13897_v60 = vcombine.high %v3099_v18, %v3103_v2  ;;  %v2963_v42 = vld [vmem:[#allocation9 + $0x12d8] sm:$0xff]  ;;  %v13896_v63 = vcombine.low %v3099_v18, %v3103_v2 }
 0x728   :  { %9805 = vmatprep.subr.bf16.mxu1 %v13809_v29  ;;  %v2967_v29 = vld [vmem:[#allocation9 + $0x12f8] sm:$0xff] }
 0x729   :  { %v3091_v30 = vld [vmem:[#allocation9 + $0x16d8] sm:$0xff]  ;;  %v13760_v55 = vcombine.low %v2963_v42, %v2967_v29 }
 0x72a   :  { %9763 = vmatpush1.bf16.msra.mxu0 %v13680_v28  ;;  %v3095_v21 = vld [vmem:[#allocation9 + $0x16f8] sm:$0xff]  ;;  %v13761_v28 = vcombine.high %v2963_v42, %v2967_v29 }
 0x72b   :  { %9806 = vmatpush1.bf16.msra.mxu1 %v13808_v58  ;;  %9764 = vmatprep.subr.bf16.mxu0 %v13673_v61  ;;  %v13889_v58 = vcombine.high %v3091_v30, %v3095_v21  ;;  %v2955_v61 = vld [vmem:[#allocation9 + $0x1298] sm:$0xff]  ;;  %v13888_v10 = vcombine.low %v3091_v30, %v3095_v21 }
 0x72c   :  { %9807 = vmatprep.subr.bf16.mxu1 %v13801_v32  ;;  %v2959_v32 = vld [vmem:[#allocation9 + $0x12b8] sm:$0xff] }
 0x72d   :  { %v3083_v39 = vld [vmem:[#allocation9 + $0x1698] sm:$0xff]  ;;  %v13752_v22 = vcombine.low %v2955_v61, %v2959_v32 }
 0x72e   :  { %9765 = vmatpush1.bf16.msra.mxu0 %v13672_v33  ;;  %v3087_v56 = vld [vmem:[#allocation9 + $0x16b8] sm:$0xff]  ;;  %v13753_v33 = vcombine.high %v2955_v61, %v2959_v32 }
 0x72f   :  { %9808 = vmatpush1.bf16.msra.mxu1 %v13800_v19  ;;  %9766 = vmatprep.subr.bf16.mxu0 %v13793_v11  ;;  %v13881_v19 = vcombine.high %v3083_v39, %v3087_v56  ;;  %v2947_v11 = vld [vmem:[#allocation9 + $0x1258] sm:$0xff]  ;;  %v13880_v51 = vcombine.low %v3083_v39, %v3087_v56 }
 0x730   :  { %9809 = vmatprep.subr.bf16.mxu1 %v13921_v31  ;;  %v2951_v31 = vld [vmem:[#allocation9 + $0x1278] sm:$0xff] }
 0x731   :  { %v3075_v23 = vld [vmem:[#allocation9 + $0x1658] sm:$0xff]  ;;  %v13744_v3 = vcombine.low %v2947_v11, %v2951_v31 }
 0x732   :  { %9767 = vmatpush2.bf16.msra.mxu0 %v13792_v49  ;;  %v3079_v0 = vld [vmem:[#allocation9 + $0x1678] sm:$0xff]  ;;  %v13745_v49 = vcombine.high %v2947_v11, %v2951_v31 }
 0x733   :  { %9810 = vmatpush2.bf16.msra.mxu1 %v13920_v9  ;;  %9768 = vmatprep.subr.bf16.mxu0 %v13785_v25  ;;  %v13873_v9 = vcombine.high %v3075_v23, %v3079_v0  ;;  %v2939_v25 = vld [vmem:[#allocation9 + $0x1218] sm:$0xff]  ;;  %v13872_v36 = vcombine.low %v3075_v23, %v3079_v0 }
 0x734   :  { %9811 = vmatprep.subr.bf16.mxu1 %v13913_v12  ;;  %v2943_v12 = vld [vmem:[#allocation9 + $0x1238] sm:$0xff] }
 0x735   :  { %v3067_v50 = vld [vmem:[#allocation9 + $0x1618] sm:$0xff]  ;;  %v13736_v18 = vcombine.low %v2939_v25, %v2943_v12 }
 0x736   :  { %9769 = vmatpush2.bf16.msra.mxu0 %v13784_v57  ;;  %v3071_v54 = vld [vmem:[#allocation9 + $0x1638] sm:$0xff]  ;;  %v13737_v57 = vcombine.high %v2939_v25, %v2943_v12 }
 0x737   :  { %9812 = vmatpush2.bf16.msra.mxu1 %v13912_v47  ;;  %9770 = vmatprep.subr.bf16.mxu0 %v13777_v5  ;;  %v13865_v47 = vcombine.high %v3067_v50, %v3071_v54  ;;  %v3187_v5 = vld [vmem:[#allocation9 + $0x19d8] sm:$0xff]  ;;  %v13864_v2 = vcombine.low %v3067_v50, %v3071_v54 }
 0x738   :  { %9813 = vmatprep.subr.bf16.mxu1 %v13905_v13  ;;  %v3191_v13 = vld [vmem:[#allocation9 + $0x19f8] sm:$0xff] }
 0x739   :  { %v3315_v59 = vld [vmem:[#allocation9 + $0x1dd8] sm:$0xff]  ;;  %v13984_v42 = vcombine.low %v3187_v5, %v3191_v13 }
 0x73a   :  { %9771 = vmatpush2.bf16.msra.mxu0 %v13776_v1  ;;  %v3319_v27 = vld [vmem:[#allocation9 + $0x1df8] sm:$0xff]  ;;  %v13985_v1 = vcombine.high %v3187_v5, %v3191_v13 }
 0x73b   :  { %9814 = vmatpush2.bf16.msra.mxu1 %v13904_v35  ;;  %9772 = vmatprep.subr.bf16.mxu0 %v13769_v41  ;;  %v14113_v35 = vcombine.high %v3315_v59, %v3319_v27  ;;  %v3179_v41 = vld [vmem:[#allocation9 + $0x1998] sm:$0xff]  ;;  %v14112_v21 = vcombine.low %v3315_v59, %v3319_v27 }
 0x73c   :  { %9815 = vmatprep.subr.bf16.mxu1 %v13897_v60  ;;  %v3183_v60 = vld [vmem:[#allocation9 + $0x19b8] sm:$0xff] }
 0x73d   :  { %v3307_v29 = vld [vmem:[#allocation9 + $0x1d98] sm:$0xff]  ;;  %v13976_v39 = vcombine.low %v3179_v41, %v3183_v60 }
 0x73e   :  { %9773 = vmatpush2.bf16.msra.mxu0 %v13768_v15  ;;  %v3311_v30 = vld [vmem:[#allocation9 + $0x1db8] sm:$0xff]  ;;  %v13977_v15 = vcombine.high %v3179_v41, %v3183_v60 }
 0x73f   :  { %9816 = vmatpush2.bf16.msra.mxu1 %v13896_v63  ;;  %9774 = vmatprep.subr.bf16.mxu0 %v13761_v28  ;;  %v3171_v63 = vld [vmem:[#allocation9 + $0x1958] sm:$0xff]  ;;  %v14104_v56 = vcombine.low %v3307_v29, %v3311_v30 }
 0x740   :  { %9817 = vmatprep.subr.bf16.mxu1 %v13889_v58  ;;  %v3175_v28 = vld [vmem:[#allocation9 + $0x1978] sm:$0xff]  ;;  %v14105_v58 = vcombine.high %v3307_v29, %v3311_v30 }
 0x741   :  { %v3299_v61 = vld [vmem:[#allocation9 + $0x1d58] sm:$0xff]  ;;  %v13968_v31 = vcombine.low %v3171_v63, %v3175_v28 }
 0x742   :  { %9775 = vmatpush2.bf16.msra.mxu0 %v13760_v55  ;;  %v3303_v32 = vld [vmem:[#allocation9 + $0x1d78] sm:$0xff]  ;;  %v13969_v55 = vcombine.high %v3171_v63, %v3175_v28 }
 0x743   :  { %9818 = vmatpush2.bf16.msra.mxu1 %v13888_v10  ;;  %9776 = vmatprep.subr.bf16.mxu0 %v13753_v33  ;;  %v14097_v10 = vcombine.high %v3299_v61, %v3303_v32  ;;  %v3163_v33 = vld [vmem:[#allocation9 + $0x1918] sm:$0xff] }
 0x744   :  { %9819 = vmatprep.subr.bf16.mxu1 %v13881_v19  ;;  %v3167_v19 = vld [vmem:[#allocation9 + $0x1938] sm:$0xff] }
 0x745   :  { %v3295_v11 = vld [vmem:[#allocation9 + $0x1d38] sm:$0xff]  ;;  %v13961_v23 = vcombine.high %v3163_v33, %v3167_v19 }
 0x746   :  { %9777 = vmatpush2.bf16.msra.mxu0 %v13752_v22  ;;  %v3155_v0 = vld [vmem:[#allocation9 + $0x18d8] sm:$0xff] }
 0x747   :  { %9820 = vmatpush2.bf16.msra.mxu1 %v13880_v51  ;;  %9778 = vmatprep.subr.bf16.mxu0 %v13745_v49  ;;  %v3159_v22 = vld [vmem:[#allocation9 + $0x18f8] sm:$0xff] }
 0x748   :  { %9821 = vmatprep.subr.bf16.mxu1 %v13873_v9  ;;  %v3283_v51 = vld [vmem:[#allocation9 + $0x1cd8] sm:$0xff]  ;;  %v13953_v25 = vcombine.high %v3155_v0, %v3159_v22 }
 0x749   :  { %v3287_v49 = vld [vmem:[#allocation9 + $0x1cf8] sm:$0xff] }
 0x74a   :  { %9779 = vmatpush2.bf16.msra.mxu0 %v13744_v3  ;;  %v14081_v12 = vcombine.high %v3283_v51, %v3287_v49  ;;  %v3147_v50 = vld [vmem:[#allocation9 + $0x1898] sm:$0xff] }
 0x74b   :  { %9822 = vmatpush2.bf16.msra.mxu1 %v13872_v36  ;;  %9780 = vmatprep.subr.bf16.mxu0 %v13737_v57  ;;  %v3151_v54 = vld [vmem:[#allocation9 + $0x18b8] sm:$0xff]  ;;  %v13952_v57 = vcombine.low %v3155_v0, %v3159_v22 }
 0x74c   :  { %9823 = vmatprep.subr.bf16.mxu1 %v13865_v47  ;;  %v3275_v3 = vld [vmem:[#allocation9 + $0x1c98] sm:$0xff]  ;;  %v14080_v47 = vcombine.low %v3283_v51, %v3287_v49  ;;  %v13945_v5 = vcombine.high %v3147_v50, %v3151_v54 }
 0x74d   :  { %v3279_v36 = vld [vmem:[#allocation9 + $0x1cb8] sm:$0xff] }
 0x74e   :  { %9781 = vmatpush2.bf16.msra.mxu0 %v13736_v18  ;;  %v14073_v13 = vcombine.high %v3275_v3, %v3279_v36  ;;  %v3139_v59 = vld [vmem:[#allocation9 + $0x1858] sm:$0xff] }
 0x74f   :  { %9824 = vmatpush2.bf16.msra.mxu1 %v13864_v2  ;;  %9836 = vmatprep.subr.bf16.mxu0 %v13985_v1  ;;  %v3143_v27 = vld [vmem:[#allocation9 + $0x1878] sm:$0xff]  ;;  %v13944_v1 = vcombine.low %v3147_v50, %v3151_v54 }
 0x750   :  { %9879 = vmatprep.subr.bf16.mxu1 %v14113_v35  ;;  %v3267_v18 = vld [vmem:[#allocation9 + $0x1c58] sm:$0xff]  ;;  %v14072_v35 = vcombine.low %v3275_v3, %v3279_v36  ;;  %v13937_v41 = vcombine.high %v3139_v59, %v3143_v27 }
 0x751   :  { %9783 = vmatmul.mubr.bf16.vlgmr.msra.gmra.mxu0 %v16398_v62  ;;  %v3291_v62 = vld [vmem:[#allocation9 + $0x1d18] sm:$0xff] }
 0x752   :  { %9826 = vmatmul.mubr.bf16.vlgmr.msra.gmra.mxu1 %v16400_v46  ;;  %9837 = vmatpush1.bf16.msra.mxu0 %v13984_v42  ;;  %v14096_v46 = vcombine.low %v3299_v61, %v3303_v32  ;;  %v14088_v9 = vcombine.low %v3291_v62, %v3295_v11  ;;  %v3271_v2 = vld [vmem:[#allocation9 + $0x1c78] sm:$0xff] }
 0x753   :  { %9868 = vmatprep.mubr.bf16.mxu0 %v16407_v45  ;;  %9880 = vmatpush1.bf16.msra.mxu1 %v14112_v21  ;;  %v14089_v45 = vcombine.high %v3291_v62, %v3295_v11  ;;  %v14065_v60 = vcombine.high %v3267_v18, %v3271_v2  ;;  %v3131_v42 = vld [vmem:[#allocation9 + $0x1818] sm:$0xff]  ;;  %v14064_v63 = vcombine.low %v3267_v18, %v3271_v2 }
 0x754   :  { %9911 = vmatprep.mubr.bf16.mxu1 %v16409_v8  ;;  %9838 = vmatprep.subr.bf16.mxu0 %v13977_v15  ;;  %v13960_v8 = vcombine.low %v3163_v33, %v3167_v19  ;;  %v3135_v29 = vld [vmem:[#allocation9 + $0x1838] sm:$0xff]  ;;  %v13936_v15 = vcombine.low %v3139_v59, %v3143_v27 }
 0x755   :  { %9881 = vmatprep.subr.bf16.mxu1 %v14105_v58  ;;  %v3259_v30 = vld [vmem:[#allocation9 + $0x1c18] sm:$0xff]  ;;  %v13929_v28 = vcombine.high %v3131_v42, %v3135_v29 }
 0x756   :  { %9839 = vmatpush1.bf16.msra.mxu0 %v13976_v39  ;;  %v3263_v21 = vld [vmem:[#allocation9 + $0x1c38] sm:$0xff] }
 0x757   :  { %9882 = vmatpush1.bf16.msra.mxu1 %v14104_v56  ;;  %9840 = vmatprep.subr.bf16.mxu0 %v13969_v55  ;;  %v14057_v58 = vcombine.high %v3259_v30, %v3263_v21  ;;  %v3251_v61 = vld [vmem:[#allocation9 + $0x1bd8] sm:$0xff]  ;;  %v13928_v55 = vcombine.low %v3131_v42, %v3135_v29 }
 0x758   :  { %9883 = vmatprep.subr.bf16.mxu1 %v14097_v10  ;;  %v3255_v32 = vld [vmem:[#allocation9 + $0x1bf8] sm:$0xff]  ;;  %v14056_v10 = vcombine.low %v3259_v30, %v3263_v21 }
 0x759   :  { %v3379_v39 = vld [vmem:[#allocation9 + $0x1fd8] sm:$0xff]  ;;  %v14049_v33 = vcombine.high %v3251_v61, %v3255_v32 }
 0x75a   :  { %9841 = vmatpush1.bf16.msra.mxu0 %v13968_v31  ;;  %v3383_v56 = vld [vmem:[#allocation9 + $0x1ff8] sm:$0xff] }
 0x75b   :  { %9884 = vmatpush1.bf16.msra.mxu1 %v14096_v46  ;;  %9842 = vmatprep.subr.bf16.mxu0 %v13961_v23  ;;  %v14177_v19 = vcombine.high %v3379_v39, %v3383_v56  ;;  %v3243_v62 = vld [vmem:[#allocation9 + $0x1b98] sm:$0xff]  ;;  %v14048_v23 = vcombine.low %v3251_v61, %v3255_v32 }
 0x75c   :  { %9885 = vmatprep.subr.bf16.mxu1 %v14089_v45  ;;  %v3247_v11 = vld [vmem:[#allocation9 + $0x1bb8] sm:$0xff]  ;;  %v14176_v45 = vcombine.low %v3379_v39, %v3383_v56 }
 0x75d   :  { %v3371_v31 = vld [vmem:[#allocation9 + $0x1f98] sm:$0xff]  ;;  %v14041_v0 = vcombine.high %v3243_v62, %v3247_v11 }
 0x75e   :  { %9843 = vmatpush1.bf16.msra.mxu0 %v13960_v8  ;;  %v3375_v46 = vld [vmem:[#allocation9 + $0x1fb8] sm:$0xff] }
 0x75f   :  { %9886 = vmatpush1.bf16.msra.mxu1 %v14088_v9  ;;  %9844 = vmatprep.subr.bf16.mxu0 %v13953_v25  ;;  %v14169_v22 = vcombine.high %v3371_v31, %v3375_v46  ;;  %v3235_v51 = vld [vmem:[#allocation9 + $0x1b58] sm:$0xff]  ;;  %v14040_v25 = vcombine.low %v3243_v62, %v3247_v11 }
 0x760   :  { %9887 = vmatprep.subr.bf16.mxu1 %v14081_v12  ;;  %v3239_v49 = vld [vmem:[#allocation9 + $0x1b78] sm:$0xff]  ;;  %v14168_v12 = vcombine.low %v3371_v31, %v3375_v46 }
 0x761   :  { %v3363_v8 = vld [vmem:[#allocation9 + $0x1f58] sm:$0xff]  ;;  %v14033_v50 = vcombine.high %v3235_v51, %v3239_v49 }
 0x762   :  { %9845 = vmatpush1.bf16.msra.mxu0 %v13952_v57  ;;  %v3367_v9 = vld [vmem:[#allocation9 + $0x1f78] sm:$0xff] }
 0x763   :  { %9888 = vmatpush1.bf16.msra.mxu1 %v14080_v47  ;;  %9846 = vmatprep.subr.bf16.mxu0 %v13945_v5  ;;  %v14161_v54 = vcombine.high %v3363_v8, %v3367_v9  ;;  %v3227_v3 = vld [vmem:[#allocation9 + $0x1b18] sm:$0xff]  ;;  %v14032_v5 = vcombine.low %v3235_v51, %v3239_v49 }
 0x764   :  { %9889 = vmatprep.subr.bf16.mxu1 %v14073_v13  ;;  %v3231_v36 = vld [vmem:[#allocation9 + $0x1b38] sm:$0xff]  ;;  %v14160_v13 = vcombine.low %v3363_v8, %v3367_v9 }
 0x765   :  { %v3355_v57 = vld [vmem:[#allocation9 + $0x1f18] sm:$0xff]  ;;  %v14025_v59 = vcombine.high %v3227_v3, %v3231_v36 }
 0x766   :  { %9847 = vmatpush1.bf16.msra.mxu0 %v13944_v1  ;;  %v3359_v47 = vld [vmem:[#allocation9 + $0x1f38] sm:$0xff] }
 0x767   :  { %9890 = vmatpush1.bf16.msra.mxu1 %v14072_v35  ;;  %9848 = vmatprep.subr.bf16.mxu0 %v13937_v41  ;;  %v14153_v27 = vcombine.high %v3355_v57, %v3359_v47  ;;  %v3219_v18 = vld [vmem:[#allocation9 + $0x1ad8] sm:$0xff]  ;;  %v14024_v41 = vcombine.low %v3227_v3, %v3231_v36 }
 0x768   :  { %9891 = vmatprep.subr.bf16.mxu1 %v14065_v60  ;;  %v3223_v2 = vld [vmem:[#allocation9 + $0x1af8] sm:$0xff]  ;;  %v14152_v60 = vcombine.low %v3355_v57, %v3359_v47 }
 0x769   :  { %v3347_v1 = vld [vmem:[#allocation9 + $0x1ed8] sm:$0xff]  ;;  %v14017_v42 = vcombine.high %v3219_v18, %v3223_v2 }
 0x76a   :  { %9849 = vmatpush1.bf16.msra.mxu0 %v13936_v15  ;;  %v3351_v35 = vld [vmem:[#allocation9 + $0x1ef8] sm:$0xff] }
 0x76b   :  { %9892 = vmatpush1.bf16.msra.mxu1 %v14064_v63  ;;  %9850 = vmatprep.subr.bf16.mxu0 %v13929_v28  ;;  %v14145_v29 = vcombine.high %v3347_v1, %v3351_v35  ;;  %v3211_v30 = vld [vmem:[#allocation9 + $0x1a98] sm:$0xff]  ;;  %v14016_v28 = vcombine.low %v3219_v18, %v3223_v2 }
 0x76c   :  { %9893 = vmatprep.subr.bf16.mxu1 %v14057_v58  ;;  %v3215_v21 = vld [vmem:[#allocation9 + $0x1ab8] sm:$0xff]  ;;  %v14144_v58 = vcombine.low %v3347_v1, %v3351_v35 }
 0x76d   :  { %v3339_v15 = vld [vmem:[#allocation9 + $0x1e98] sm:$0xff]  ;;  %v14009_v61 = vcombine.high %v3211_v30, %v3215_v21 }
 0x76e   :  { %9851 = vmatpush1.bf16.msra.mxu0 %v13928_v55  ;;  %v3343_v63 = vld [vmem:[#allocation9 + $0x1eb8] sm:$0xff] }
 0x76f   :  { %9894 = vmatpush1.bf16.msra.mxu1 %v14056_v10  ;;  %9852 = vmatprep.subr.bf16.mxu0 %v14049_v33  ;;  %v14137_v32 = vcombine.high %v3339_v15, %v3343_v63  ;;  %v3203_v39 = vld [vmem:[#allocation9 + $0x1a58] sm:$0xff]  ;;  %v14008_v33 = vcombine.low %v3211_v30, %v3215_v21 }
 0x770   :  { %9895 = vmatprep.subr.bf16.mxu1 %v14177_v19  ;;  %v3207_v56 = vld [vmem:[#allocation9 + $0x1a78] sm:$0xff]  ;;  %v14136_v19 = vcombine.low %v3339_v15, %v3343_v63 }
 0x771   :  { %v3331_v55 = vld [vmem:[#allocation9 + $0x1e58] sm:$0xff]  ;;  %v14001_v62 = vcombine.high %v3203_v39, %v3207_v56 }
 0x772   :  { %9853 = vmatpush2.bf16.msra.mxu0 %v14048_v23  ;;  %v3335_v10 = vld [vmem:[#allocation9 + $0x1e78] sm:$0xff] }
 0x773   :  { %9896 = vmatpush2.bf16.msra.mxu1 %v14176_v45  ;;  %9854 = vmatprep.subr.bf16.mxu0 %v14041_v0  ;;  %v14129_v11 = vcombine.high %v3331_v55, %v3335_v10  ;;  %v3195_v31 = vld [vmem:[#allocation9 + $0x1a18] sm:$0xff]  ;;  %v14000_v0 = vcombine.low %v3203_v39, %v3207_v56 }
 0x774   :  { %9897 = vmatprep.subr.bf16.mxu1 %v14169_v22  ;;  %v3199_v46 = vld [vmem:[#allocation9 + $0x1a38] sm:$0xff]  ;;  %v14128_v22 = vcombine.low %v3331_v55, %v3335_v10 }
 0x775   :  { %v3323_v23 = vld [vmem:[#allocation9 + $0x1e18] sm:$0xff]  ;;  %v13993_v51 = vcombine.high %v3195_v31, %v3199_v46  ;;  %v13992_v8 = vcombine.low %v3195_v31, %v3199_v46 }
 0x776   :  { %9855 = vmatpush2.bf16.msra.mxu0 %v14040_v25  ;;  %v3327_v45 = vld [vmem:[#allocation9 + $0x1e38] sm:$0xff]  ;;  %v9096_v25 = vpop.f32.mrf.mxu0 }
 0x777   :  { %9898 = vmatpush2.bf16.msra.mxu1 %v14168_v12  ;;  %9856 = vmatprep.subr.bf16.mxu0 %v14033_v50  ;;  %v14121_v49 = vcombine.high %v3323_v23, %v3327_v45  ;;  %v14120_v9 = vcombine.low %v3323_v23, %v3327_v45  ;;  %v16557_v12 = vpop.f32.mrf.mxu1 }
 0x778   :  { %9899 = vmatprep.subr.bf16.mxu1 %v14161_v54  ;;  %v16559_v50 = vpop.f32.mrf.mxu0 }
 0x779   :  { %v16561_v54 = vpop.f32.mrf.mxu1 }
 0x77a   :  { %9857 = vmatpush2.bf16.msra.mxu0 %v14032_v5  ;;  %v16563_v3 = vpop.f32.mrf.mxu0 }
 0x77b   :  { %9900 = vmatpush2.bf16.msra.mxu1 %v14160_v13  ;;  %9858 = vmatprep.subr.bf16.mxu0 %v14025_v59  ;;  %v16565_v36 = vpop.f32.mrf.mxu1 }
 0x77c   :  { %9901 = vmatprep.subr.bf16.mxu1 %v14153_v27  ;;  %v16567_v57 = vpop.f32.mrf.mxu0 }
 0x77d   :  { %v16569_v47 = vpop.f32.mrf.mxu1 }
 0x77e   :  { %9859 = vmatpush2.bf16.msra.mxu0 %v14024_v41  ;;  %v16571_v5 = vpop.f32.mrf.mxu0 }
 0x77f   :  { %9902 = vmatpush2.bf16.msra.mxu1 %v14152_v60  ;;  %9860 = vmatprep.subr.bf16.mxu0 %v14017_v42 }
 0x780   :  { %9903 = vmatprep.subr.bf16.mxu1 %v14145_v29 }
 0x782   :  { %9861 = vmatpush2.bf16.msra.mxu0 %v14016_v28 }
 0x783   :  { %9904 = vmatpush2.bf16.msra.mxu1 %v14144_v58  ;;  %9862 = vmatprep.subr.bf16.mxu0 %v14009_v61 }
 0x784   :  { %9905 = vmatprep.subr.bf16.mxu1 %v14137_v32 }
 0x786   :  { %9863 = vmatpush2.bf16.msra.mxu0 %v14008_v33 }
 0x787   :  { %9906 = vmatpush2.bf16.msra.mxu1 %v14136_v19  ;;  %9864 = vmatprep.subr.bf16.mxu0 %v14001_v62 }
 0x788   :  { %9907 = vmatprep.subr.bf16.mxu1 %v14129_v11 }
 0x78a   :  { %9865 = vmatpush2.bf16.msra.mxu0 %v14000_v0 }
 0x78b   :  { %9908 = vmatpush2.bf16.msra.mxu1 %v14128_v22  ;;  %9866 = vmatprep.subr.bf16.mxu0 %v13993_v51 }
 0x78c   :  { %9909 = vmatprep.subr.bf16.mxu1 %v14121_v49 }
 0x78e   :  { %9867 = vmatpush2.bf16.msra.mxu0 %v13992_v8 }
 0x78f   :  { %9910 = vmatpush2.bf16.msra.mxu1 %v14120_v9 }
 0x791   :  { %9869 = vmatmul.mubr.bf16.vlgmr.msra.gmra.mxu0 %v16427_v52  ;;  %v16573_v52 = vpop.f32.mrf.mxu1 }
 0x792   :  { %9912 = vmatmul.mubr.bf16.vlgmr.msra.gmra.mxu1 %v16429_v53  ;;  %v16575_v53 = vpop.f32.mrf.mxu0 }
 0x793   :  { %v16577_v13 = vpop.f32.mrf.mxu1 }
 0x794   :  { %17131 = vst [vmem:[#allocation60_spill] sm:$0xff] %v16577_v13  ;;  %v16579_v59 = vpop.f32.mrf.mxu0 }
 0x795   :  { %v16581_v27 = vpop.f32.mrf.mxu1 }
 0x796   :  { %17132 = vst [vmem:[#allocation62_spill] sm:$0xff] %v16581_v27  ;;  %v16583_v18 = vpop.f32.mrf.mxu0 }
 0x797   :  { %17133 = vst [vmem:[#allocation63_spill] sm:$0xff] %v16583_v18  ;;  %v16585_v2 = vpop.f32.mrf.mxu1 }
 0x798   :  { %17134 = vst [vmem:[#allocation64_spill] sm:$0xff] %v16585_v2  ;;  %v9268_v1 = vpop.f32.mrf.mxu0 }
 0x799   :  { %v9311_v35 = vpop.f32.mrf.mxu1 }
 0x79a   :  { %v9270_v41 = vpop.f32.mrf.mxu0 }
 0x79b   :  { %v9313_v60 = vpop.f32.mrf.mxu1 }
 0x79c   :  { %v9272_v42 = vpop.f32.mrf.mxu0 }
 0x79d   :  { %v9315_v29 = vpop.f32.mrf.mxu1 }
 0x79e   :  { %v9274_v30 = vpop.f32.mrf.mxu0 }
 0x79f   :  { %v16587_v21 = vpop.f32.mrf.mxu1 }
 0x7a0   :  { %v9354_v15 = vpop.f32.mrf.mxu0 }
 0x7a1   :  { %v9397_v63 = vpop.f32.mrf.mxu1 }
 0x7a2   :  { %v9356_v28 = vpop.f32.mrf.mxu0 }
 0x7a3   :  { %v16589_v58 = vpop.f32.mrf.mxu1 }
 0x7a4   :  { %v9358_v61 = vpop.f32.mrf.mxu0 }
 0x7a5   :  { %v16591_v32 = vpop.f32.mrf.mxu1 }
 0x7a6   :  { %v16593_v39 = vpop.f32.mrf.mxu0 }
 0x7a7   :  { %v16595_v56 = vpop.f32.mrf.mxu1 }
 0x7a8   :  { %17135 = vst [vmem:[#allocation65_spill] sm:$0xff] %v16595_v56  ;;  %v9440_v55 = vpop.f32.mrf.mxu0 }
 0x7a9   :  { %v16597_v10 = vpop.f32.mrf.mxu1 }
 0x7aa   :  { %v16599_v33 = vpop.f32.mrf.mxu0 }
 0x7ab   :  { %v16601_v19 = vpop.f32.mrf.mxu1 }
 0x7ac   :  { %17136 = vst [vmem:[#allocation61_spill] sm:$0xff] %v16601_v19  ;;  %v16603_v62 = vpop.f32.mrf.mxu0 }
 0x7ad   :  { %v16605_v11 = vpop.f32.mrf.mxu1 }
 0x7ae   :  { %17137 = vst [vmem:[#allocation47_spill] sm:$0xff] %v16605_v11  ;;  %v16607_v31 = vpop.f32.mrf.mxu0 }
 0x7af   :  { %17138 = vst [vmem:[#allocation48_spill] sm:$0xff] %v16607_v31  ;;  %v16609_v46 = vpop.f32.mrf.mxu1 }
 0x7b0   :  { %17139 = vst [vmem:[#allocation68_spill] sm:$0xff] %v16609_v46  ;;  %v16611_v23 = vpop.f32.mrf.mxu0 }
 0x7b1   :  { %17140 = vst [vmem:[#allocation51_spill] sm:$0xff] %v16611_v23  ;;  %v16613_v45 = vpop.f32.mrf.mxu1 }
 0x7b2   :  { %17141 = vst [vmem:[#allocation49_spill] sm:$0xff] %v16613_v45  ;;  %v16615_v0 = vpop.f32.mrf.mxu0  ;;  %v3405_v45 = vrot.slane %v15082_v44, %v17121_v24  ;;  %v3413_v24 = vrot.slane %v15082_v44, %v17122_v48 }
 0x7b3   :  { %17142 = vst [vmem:[#allocation54_spill] sm:$0xff] %v16615_v0  ;;  %v16617_v22 = vpop.f32.mrf.mxu1 }
 0x7b4   :  { %17143 = vst [vmem:[#allocation52_spill] sm:$0xff] %v16617_v22  ;;  %v16619_v51 = vpop.f32.mrf.mxu0  ;;  %v9269_v22 = vadd.f32 %v9268_v1, %v3405_v45  ;;  %v9273_v19 = vadd.f32 %v9272_v42, %v3405_v45 }
 0x7b5   :  { %17144 = vst [vmem:[#allocation57_spill] sm:$0xff] %v16619_v51  ;;  %v16621_v49 = vpop.f32.mrf.mxu1  ;;  %v3409_v51 = vrot.slane %v15082_v44, %v17107_v20  ;;  %v9099_v20 = vadd.f32 %v16559_v50, %v16523_v37 }
 0x7b6   :  { %17145 = vst [vmem:[#allocation55_spill] sm:$0xff] %v16621_v49  ;;  %v16623_v8 = vpop.f32.mrf.mxu0  ;;  %v9316_v1 = vadd.f32 %v9315_v29, %v9273_v19 }
 0x7b7   :  { %17146 = vst [vmem:[#allocation59_spill] sm:$0xff] %v16623_v8  ;;  %v16625_v9 = vpop.f32.mrf.mxu1  ;;  %v9312_v8 = vadd.f32 %v9311_v35, %v9269_v22  ;;  %v9271_v11 = vadd.f32 %v9270_v41, %v3409_v51  ;;  %v3417_v35 = vrot.slane %v15082_v44, %v17110_v26  ;;  %v9142_v37 = vadd.f32 %v16561_v54, %v9099_v20 }
 0x7b8   :  { %17147 = vst [vmem:[#allocation46_spill] sm:$0xff] %v16625_v9  ;;  %v9612_v34 = vpop.f32.mrf.mxu0  ;;  %v9097_v9 = vadd.f32 %v9096_v25, %v16519_v43  ;;  %v9101_v43 = vadd.f32 %v16563_v3, %v16526_v17  ;;  %v9275_v25 = vadd.f32 %v9274_v30, %v3409_v51  ;;  %v9359_v22 = vadd.f32 %v9358_v61, %v9316_v1  ;;  %v17154_v51 = vld [vmem:[#allocation61_spill] sm:$0xff]  ;;  %v17156_v1 = vld [vmem:[#allocation48_spill] sm:$0xff] }
 0x7b9   :  { %v9655_v16 = vpop.f32.mrf.mxu1  ;;  %v9355_v56 = vadd.f32 %v9354_v15, %v9312_v8  ;;  %v9613_v8 = vadd.f32 %v9612_v34, %v3413_v24 }
 0x7ba   :  { %v9614_v4 = vpop.f32.mrf.mxu0  ;;  %v9140_v13 = vadd.f32 %v16557_v12, %v9097_v9  ;;  %v9922_v12 = vadd.f32 %v16493_v40, %v16489_v7  ;;  %v9144_v50 = vadd.f32 %v16565_v36, %v9101_v43  ;;  %v9318_v17 = vadd.f32 %v16587_v21, %v9275_v25 }
 0x7bb   :  { %v9657_v6 = vpop.f32.mrf.mxu1  ;;  %v9398_v15 = vadd.f32 %v9397_v63, %v9355_v56  ;;  %v9615_v3 = vadd.f32 %v9614_v4, %v3417_v35  ;;  %v9185_v63 = vadd.f32 %v16575_v53, %v9142_v37  ;;  %v9656_v54 = vadd.f32 %v9655_v16, %v9613_v8  ;;  %v17149_v56 = vld [vmem:[#allocation51_spill] sm:$0xff] }
 0x7bc   :  { %v9616_v46 = vpop.f32.mrf.mxu0  ;;  %v9183_v42 = vadd.f32 %v16571_v5, %v9140_v13  ;;  %v9103_v5 = vadd.f32 %v16567_v57, %v16529_v14  ;;  %v9402_v13 = vadd.f32 %v16591_v32, %v9359_v22  ;;  %v9361_v20 = vadd.f32 %v16593_v39, %v9318_v17  ;;  %v17160_v22 = vld [vmem:[#allocation49_spill] sm:$0xff] }
 0x7bd   :  { %v9659_v2 = vpop.f32.mrf.mxu1  ;;  %v9617_v36 = vadd.f32 %v9616_v46, %v3413_v24  ;;  %v9187_v4 = vadd.f32 %v16579_v59, %v9144_v50  ;;  %v17150_v24 = vld [vmem:[#allocation60_spill] sm:$0xff]  ;;  %v17151_v59 = vld [vmem:[#allocation65_spill] sm:$0xff]  ;;  %v17152_v46 = vld [vmem:[#allocation62_spill] sm:$0xff] }
 0x7be   :  { %v9618_v0 = vpop.f32.mrf.mxu0  ;;  %v9445_v57 = vadd.f32 %v16603_v62, %v9402_v13  ;;  %v9146_v32 = vadd.f32 %v16569_v47, %v9103_v5  ;;  %v9404_v19 = vadd.f32 %v17151_v59, %v9361_v20  ;;  %v17162_v37 = vld [vmem:[#allocation57_spill] sm:$0xff] }
 0x7bf   :  { %v16628_v38 = vpop.f32.mrf.mxu1  ;;  %v16670_v62 = vadd.f32 %v17152_v46, %v9187_v4 }
 0x7c0   :  { %17148 = vst [vmem:[#allocation50_spill] sm:$0xff] %v16628_v38  ;;  %v9314_v38 = vadd.f32 %v9313_v60, %v9271_v11  ;;  %v9441_v60 = vadd.f32 %v9440_v55, %v9398_v15  ;;  %v16666_v55 = vadd.f32 %v17150_v24, %v9185_v63  ;;  %v9447_v43 = vadd.f32 %v17156_v1, %v9404_v19 }
 0x7c2   :  { %v9357_v45 = vadd.f32 %v9356_v28, %v9314_v38  ;;  %v16652_v38 = vadd.f32 %v16573_v52, %v9183_v42  ;;  %v9484_v28 = vadd.f32 %v16597_v10, %v9441_v60  ;;  %v9658_v52 = vadd.f32 %v9657_v6, %v9615_v3  ;;  %v17153_v6 = vld [vmem:[#allocation63_spill] sm:$0xff] }
 0x7c3   :  { %v9660_v10 = vadd.f32 %v9659_v2, %v9617_v36  ;;  %v17159_v2 = vld [vmem:[#allocation66_spill] sm:$0xff] }
 0x7c4   :  { %v9400_v34 = vadd.f32 %v16589_v58, %v9357_v45  ;;  %v9619_v58 = vadd.f32 %v9618_v0, %v3417_v35  ;;  %v9923_v53 = vadd.f32 %v9922_v12, %v16652_v38  ;;  %v9527_v39 = vadd.f32 %v17149_v56, %v9484_v28  ;;  %v17158_v45 = vld [vmem:[#allocation67_spill] sm:$0xff]  ;;  %v17161_v12 = vld [vmem:[#allocation54_spill] sm:$0xff] }
 0x7c5   :  { %v9189_v0 = vadd.f32 %v17153_v6, %v9146_v32 }
 0x7c6   :  { %v9443_v14 = vadd.f32 %v16599_v33, %v9400_v34  ;;  %v16681_v8 = vadd.f32 %v17160_v22, %v9527_v39  ;;  %v9924_v63 = vadd.f32 %v9923_v53, %v16666_v55 }
 0x7c7   :  { %v17157_v25 = vld [vmem:[#allocation50_spill] sm:$0xff] }
 0x7c8   :  { %v9486_v47 = vadd.f32 %v17154_v51, %v9443_v14  ;;  %v9662_v35 = vadd.f32 %v17157_v25, %v9619_v58  ;;  %v9925_v14 = vadd.f32 %v9924_v63, %v16681_v8  ;;  %v17167_v58 = vld [vmem:[#allocation59_spill] sm:$0xff]  ;;  %v14575_v63 = vld [vmem:[#allocation15 + $0xc4] ss:$16 sps:$4 sm:$0xff]  }
 0x7ca   :  { %v9529_v60 = vadd.f32 %v17161_v12, %v9486_v47 }
 0x7d1   :  { %v9698_v49 = vpop.f32.mrf.mxu0 }
 0x7d2   :  { %v16631_v31 = vpop.f32.mrf.mxu1  ;;  %v9699_v61 = vadd.f32 %v9698_v49, %v9656_v54  ;;  %v17155_v49 = vld [vmem:[#allocation47_spill] sm:$0xff]  ;;  %v17164_v54 = vld [vmem:[#allocation68_spill] sm:$0xff] }
 0x7d3   :  { %v9700_v18 = vpop.f32.mrf.mxu0  ;;  %v9488_v9 = vadd.f32 %v17155_v49, %v9445_v57  ;;  %v9490_v36 = vadd.f32 %v17164_v54, %v9447_v43  ;;  %v17165_v57 = vld [vmem:[#allocation52_spill] sm:$0xff]  ;;  %v14576_v54 = vld [vmem:[#allocation15 + $0x2c0] ss:$16 sps:$4 sm:$0xff]  }
 0x7d4   :  { %v16634_v27 = vpop.f32.mrf.mxu1  ;;  %v9701_v11 = vadd.f32 %v9700_v18, %v9658_v52  ;;  %v9742_v42 = vadd.f32 %v16631_v31, %v9699_v61  ;;  %v9931_v18 = vadd.f32 %v17159_v2, %v17158_v45  ;;  %v16694_v52 = vadd.f32 %v17165_v57, %v9529_v60  ;;  %v14587_v57 = vld [vmem:[#allocation15 + $0x84] ss:$16 sps:$4 sm:$0xff]  }
 0x7d5   :  { %v9702_v23 = vpop.f32.mrf.mxu0  ;;  %v9531_v50 = vadd.f32 %v17162_v37, %v9488_v9  ;;  %v9533_v61 = vadd.f32 %v17167_v58, %v9490_v36  ;;  %v14581_v36 = vld [vmem:[#allocation15 + $0xa4] ss:$16 sps:$4 sm:$0xff]   ;;  %v14588_v58 = vld [vmem:[#allocation15 + $0x280] ss:$16 sps:$4 sm:$0xff]  }
 0x7d6   :  { %v9745_v41 = vpop.f32.mrf.mxu1  ;;  %v9703_v15 = vadd.f32 %v9702_v23, %v9660_v10  ;;  %v9744_v3 = vadd.f32 %v16634_v27, %v9701_v11  ;;  %v9932_v31 = vadd.f32 %v9931_v18, %v16670_v62  ;;  %v17163_v23 = vld [vmem:[#allocation64_spill] sm:$0xff]  ;;  %v17166_v27 = vld [vmem:[#allocation55_spill] sm:$0xff]  ;;  %v9926_v11 = vadd.f32 %v9925_v14, %v16694_v52 }
 0x7d7   :  { %v9704_v29 = vpop.f32.mrf.mxu0  ;;  %v16689_v20 = vadd.f32 %v17163_v23, %v9189_v0  ;;  %v17168_v0 = vld [vmem:[#allocation46_spill] sm:$0xff]  ;;  %v14573_v23 = vld [vmem:[#allocation15 + $0xc0] ss:$16 sps:$4 sm:$0xff]  }
 0x7d8   :  { %v9747_v44 = vpop.f32.mrf.mxu1  ;;  %v9705_v5 = vadd.f32 %v9704_v29, %v9662_v35  ;;  %v9746_v4 = vadd.f32 %v9745_v41, %v9703_v15  ;;  %v16697_v29 = vadd.f32 %v17166_v27, %v9531_v50  ;;  %v16704_v51 = vadd.f32 %v17168_v0, %v9533_v61  ;;  %v14582_v14 = vld [vmem:[#allocation15 + $0x2a0] ss:$16 sps:$4 sm:$0xff]   ;;  %v14590_v27 = vld [vmem:[#allocation15 + $0x284] ss:$16 sps:$4 sm:$0xff]  }
 0x7d9   :  { %v9933_v24 = vadd.f32 %v9932_v31, %v16689_v20  ;;  %v14578_v31 = vld [vmem:[#allocation15 + $0x2c4] ss:$16 sps:$4 sm:$0xff]   ;;  %v14609_v0 = vld [vmem:[#allocation15] ss:$16 sps:$4 sm:$0xff]  }
 0x7da   :  { %v9748_v32 = vadd.f32 %v9747_v44, %v9705_v5  ;;  %v14569_v5 = vld [vmem:[#allocation15 + $0xe4] ss:$16 sps:$4 sm:$0xff]  }
 0x7db   :  { %v9934_v46 = vadd.f32 %v9933_v24, %v16697_v29  ;;  %11728 = vmatprep.subr.bf16.mxu0 %v14569_v5  ;;  %v14593_v61 = vld [vmem:[#allocation15 + $0x64] ss:$16 sps:$4 sm:$0xff]  }
 0x7dc   :  { %v14602_v24 = vld [vmem:[#allocation15 + $0x244] ss:$16 sps:$4 sm:$0xff]  }
 0x7dd   :  { %v9935_v15 = vadd.f32 %v9934_v46, %v16704_v51  ;;  %v14611_v46 = vld [vmem:[#allocation15 + $0x4] ss:$16 sps:$4 sm:$0xff]  }
 0x811   :  { %v9784_v30 = vpop.f32.mrf.mxu0 }
 0x812   :  { %v9827_v21 = vpop.f32.mrf.mxu1  ;;  %v9785_v34 = vadd.f32 %v9784_v30, %v9742_v42 }
 0x813   :  { %v9786_v16 = vpop.f32.mrf.mxu0 }
 0x814   :  { %v9829_v33 = vpop.f32.mrf.mxu1  ;;  %v9787_v28 = vadd.f32 %v9786_v16, %v9744_v3  ;;  %v9828_v53 = vadd.f32 %v9827_v21, %v9785_v34  ;;  %v14567_v3 = vld [vmem:[#allocation15 + $0xe0] ss:$16 sps:$4 sm:$0xff]  }
 0x815   :  { %v9788_v17 = vpop.f32.mrf.mxu0  ;;  %v14570_v34 = vld [vmem:[#allocation15 + $0x2e0] ss:$16 sps:$4 sm:$0xff]   ;;  %11729 = vmatpush1.bf16.msra.mxu0 %v14567_v3 }
 0x816   :  { %v9831_v13 = vpop.f32.mrf.mxu1  ;;  %v9789_v56 = vadd.f32 %v9788_v17, %v9746_v4  ;;  %v9830_v41 = vadd.f32 %v9829_v33, %v9787_v28  ;;  %11730 = vmatprep.subr.bf16.mxu0 %v14575_v63  ;;  %v14584_v4 = vld [vmem:[#allocation15 + $0x2a4] ss:$16 sps:$4 sm:$0xff]   ;;  %v14579_v28 = vld [vmem:[#allocation15 + $0xa0] ss:$16 sps:$4 sm:$0xff]  }
 0x817   :  { %v9790_v30 = vpop.f32.mrf.mxu0 }
 0x818   :  { %v9833_v39 = vpop.f32.mrf.mxu1  ;;  %v9791_v16 = vadd.f32 %v9790_v30, %v9748_v32  ;;  %v9832_v47 = vadd.f32 %v9831_v13, %v9789_v56  ;;  %v14572_v13 = vld [vmem:[#allocation15 + $0x2e4] ss:$16 sps:$4 sm:$0xff]   ;;  %v14585_v30 = vld [vmem:[#allocation15 + $0x80] ss:$16 sps:$4 sm:$0xff]  }
 0x819   :  { %11771 = vmatprep.subr.bf16.mxu1 %v14572_v13  ;;  %11731 = vmatpush1.bf16.msra.mxu0 %v14573_v23  ;;  %v14596_v32 = vld [vmem:[#allocation15 + $0x264] ss:$16 sps:$4 sm:$0xff]   ;;  %v14594_v56 = vld [vmem:[#allocation15 + $0x260] ss:$16 sps:$4 sm:$0xff]  }
 0x81a   :  { %v9834_v1 = vadd.f32 %v9833_v39, %v9791_v16  ;;  %11772 = vmatpush1.bf16.msra.mxu1 %v14570_v34  ;;  %11732 = vmatprep.subr.bf16.mxu0 %v14581_v36  ;;  %v14599_v39 = vld [vmem:[#allocation15 + $0x44] ss:$16 sps:$4 sm:$0xff]  }
 0x81b   :  { %11773 = vmatprep.subr.bf16.mxu1 %v14578_v31  ;;  %v14605_v16 = vld [vmem:[#allocation15 + $0x24] ss:$16 sps:$4 sm:$0xff]  }
 0x81d   :  { %11733 = vmatpush1.bf16.msra.mxu0 %v14579_v28 }
 0x81e   :  { %11774 = vmatpush1.bf16.msra.mxu1 %v14576_v54  ;;  %11734 = vmatprep.subr.bf16.mxu0 %v14587_v57 }
 0x81f   :  { %11775 = vmatprep.subr.bf16.mxu1 %v14584_v4 }
 0x821   :  { %11735 = vmatpush1.bf16.msra.mxu0 %v14585_v30 }
 0x822   :  { %11776 = vmatpush1.bf16.msra.mxu1 %v14582_v14  ;;  %11736 = vmatprep.subr.bf16.mxu0 %v14593_v61 }
 0x823   :  { %11777 = vmatprep.subr.bf16.mxu1 %v14590_v27 }
 0x826   :  { %11778 = vmatpush1.bf16.msra.mxu1 %v14588_v58 }
 0x827   :  { %11779 = vmatprep.subr.bf16.mxu1 %v14596_v32 }
 0x82a   :  { %11780 = vmatpush1.bf16.msra.mxu1 %v14594_v56 }
 0x82b   :  { %11781 = vmatprep.subr.bf16.mxu1 %v14602_v24  ;;  %v14615_v24 = vld [vmem:[#allocation15 + $0x1e0] ss:$16 sps:$4 sm:$0xff]  }
 0x851   :  { %v9870_v59 = vpop.f32.mrf.mxu0 }
 0x852   :  { %v9871_v19 = vadd.f32 %v9870_v59, %v9828_v53  ;;  %v9913_v10 = vpop.f32.mrf.mxu1  ;;  %v14591_v53 = vld [vmem:[#allocation15 + $0x60] ss:$16 sps:$4 sm:$0xff]  }
 0x853   :  { %v9872_v6 = vpop.f32.mrf.mxu0  ;;  %11737 = vmatpush1.bf16.msra.mxu0 %v14591_v53  ;;  %v14597_v59 = vld [vmem:[#allocation15 + $0x40] ss:$16 sps:$4 sm:$0xff]  }
 0x854   :  { %v16706_v44 = vadd.f32 %v9913_v10, %v9871_v19  ;;  %v9873_v21 = vadd.f32 %v9872_v6, %v9830_v41  ;;  %v9915_v49 = vpop.f32.mrf.mxu1  ;;  %11738 = vmatprep.subr.bf16.mxu0 %v14599_v39  ;;  %v14600_v41 = vld [vmem:[#allocation15 + $0x240] ss:$16 sps:$4 sm:$0xff]   ;;  %v14608_v19 = vld [vmem:[#allocation15 + $0x224] ss:$16 sps:$4 sm:$0xff]  }
 0x855   :  { %v9874_v9 = vpop.f32.mrf.mxu0  ;;  %v14603_v10 = vld [vmem:[#allocation15 + $0x20] ss:$16 sps:$4 sm:$0xff]   ;;  %11782 = vmatpush1.bf16.msra.mxu1 %v14600_v41  ;;  %v14614_v6 = vld [vmem:[#allocation15 + $0x204] ss:$16 sps:$4 sm:$0xff]  }
 0x856   :  { %v9927_v33 = vadd.f32 %v9926_v11, %v16706_v44  ;;  %v16709_v43 = vadd.f32 %v9915_v49, %v9873_v21  ;;  %v9875_v25 = vadd.f32 %v9874_v9, %v9832_v47  ;;  %v9917_v35 = vpop.f32.mrf.mxu1  ;;  %v14606_v11 = vld [vmem:[#allocation15 + $0x220] ss:$16 sps:$4 sm:$0xff]   ;;  %11783 = vmatprep.subr.bf16.mxu1 %v14608_v19  ;;  %v14620_v41 = vld [vmem:[#allocation15 + $0x3e4] ss:$16 sps:$4 sm:$0xff]  }
 0x857   :  { %v9876_v42 = vpop.f32.mrf.mxu0  ;;  %11739 = vmatpush1.bf16.msra.mxu0 %v14597_v59  ;;  %v14612_v47 = vld [vmem:[#allocation15 + $0x200] ss:$16 sps:$4 sm:$0xff]   ;;  %v14617_v59 = vld [vmem:[#allocation15 + $0x1e4] ss:$16 sps:$4 sm:$0xff]  }
 0x858   :  { %v16712_v18 = vadd.f32 %v9917_v35, %v9875_v25  ;;  %v9877_v22 = vadd.f32 %v9876_v42, %v9834_v1  ;;  %v9928_v12 = vadd.f32 %v9927_v33, %v16709_v43  ;;  %v9919_v60 = vpop.f32.mrf.mxu1  ;;  %11740 = vmatprep.subr.bf16.mxu0 %v14605_v16  ;;  %v14621_v16 = vld [vmem:[#allocation15 + $0x1c0] ss:$16 sps:$4 sm:$0xff]   ;;  %v14623_v19 = vld [vmem:[#allocation15 + $0x1c4] ss:$16 sps:$4 sm:$0xff]  }
 0x859   :  { %11784 = vmatpush1.bf16.msra.mxu1 %v14606_v11  ;;  %v14626_v11 = vld [vmem:[#allocation15 + $0x3c4] ss:$16 sps:$4 sm:$0xff]  }
 0x85a   :  { %v9936_v37 = vadd.f32 %v9935_v15, %v16712_v18  ;;  %v16716_v50 = vadd.f32 %v9919_v60, %v9877_v22  ;;  %9929 = vadd.xlane.f32.xlu0 %v9928_v12  ;;  %11785 = vmatprep.subr.bf16.mxu1 %v14614_v6  ;;  %v14632_v6 = vld [vmem:[#allocation15 + $0x3a4] ss:$16 sps:$4 sm:$0xff]  }
 0x85b   :  { %11741 = vmatpush1.bf16.msra.mxu0 %v14603_v10  ;;  %v14624_v10 = vld [vmem:[#allocation15 + $0x3c0] ss:$16 sps:$4 sm:$0xff]  }
 0x85c   :  { %v9937_v17 = vadd.f32 %v9936_v37, %v16716_v50  ;;  %11742 = vmatprep.subr.bf16.mxu0 %v14611_v46  ;;  %v14629_v46 = vld [vmem:[#allocation15 + $0x1a4] ss:$16 sps:$4 sm:$0xff]  }
 0x85d   :  { %11786 = vmatpush1.bf16.msra.mxu1 %v14612_v47  ;;  %v14630_v47 = vld [vmem:[#allocation15 + $0x3a0] ss:$16 sps:$4 sm:$0xff]  }
 0x85e   :  { %9938 = vadd.xlane.f32.xlu1 %v9937_v17  ;;  %11787 = vmatprep.subr.bf16.mxu1 %v14620_v41 }
 0x85f   :  { %11743 = vmatpush1.bf16.msra.mxu0 %v14609_v0  ;;  %v14627_v0 = vld [vmem:[#allocation15 + $0x1a0] ss:$16 sps:$4 sm:$0xff]  }
 0x860   :  { %11744 = vmatprep.subr.bf16.mxu0 %v14617_v59 }
 0x863   :  { %11745 = vmatpush2.bf16.msra.mxu0 %v14615_v24 }
 0x864   :  { %11746 = vmatprep.subr.bf16.mxu0 %v14623_v19  ;;  %v17172_v19 = vld [vmem:[#allocation42_spill] sm:$0xff] }
 0x867   :  { %11747 = vmatpush2.bf16.msra.mxu0 %v14621_v16 }
 0x868   :  { %11748 = vmatprep.subr.bf16.mxu0 %v14629_v46  ;;  %v17173_v46 = vld [vmem:[#allocation45_spill] sm:$0xff] }
 0x86b   :  { %11749 = vmatpush2.bf16.msra.mxu0 %v14627_v0 }
 0x8e3   :  { %v9930_v21 = vpop.xlane.xlu0 %9929 }
 0x8e4   :  { %v9940_v49 = vmul.f32 0.0009765625, %v9930_v21  ;;  %v14635_v21 = vld [vmem:[#allocation15 + $0x184] ss:$16 sps:$4 sm:$0xff]  }
 0x8e5   :  { %11750 = vmatprep.subr.bf16.mxu0 %v14635_v21 }
 0x8e6   :  { %v16720_v9 = vsub.f32 %v16489_v7, %v9940_v49  ;;  %v16723_v1 = vsub.f32 %v16493_v40, %v9940_v49  ;;  %v16726_v33 = vsub.f32 %v16652_v38, %v9940_v49  ;;  %v16729_v42 = vsub.f32 %v16666_v55, %v9940_v49 }
 0x8e7   :  { %v9939_v25 = vpop.xlane.xlu1 %9938  ;;  %v16736_v7 = vsub.f32 %v16681_v8, %v9940_v49  ;;  %v16750_v37 = vsub.f32 %v16694_v52, %v9940_v49 }
 0x8e8   :  { %v9941_v35 = vmul.f32 0.0009765625, %v9939_v25  ;;  %v9958_v15 = vmul.f32 %v16720_v9, %v16720_v9  ;;  %v9959_v22 = vmul.f32 %v16723_v1, %v16723_v1  ;;  %v9960_v40 = vmul.f32 %v16726_v33, %v16726_v33  ;;  %v14633_v25 = vld [vmem:[#allocation15 + $0x180] ss:$16 sps:$4 sm:$0xff]  }
 0x8e9   :  { %v9961_v8 = vmul.f32 %v16729_v42, %v16729_v42  ;;  %v9963_v31 = vmul.f32 %v16750_v37, %v16750_v37  ;;  %11751 = vmatpush2.bf16.msra.mxu0 %v14633_v25  ;;  %v17174_v25 = vld [vmem:[#allocation44_spill] sm:$0xff] }
 0x8ea   :  { %v9974_v12 = vadd.f32 %v9959_v22, %v9958_v15  ;;  %v16741_v38 = vsub.f32 %v17158_v45, %v9941_v35  ;;  %v16744_v60 = vsub.f32 %v17159_v2, %v9941_v35  ;;  %v16747_v55 = vsub.f32 %v16670_v62, %v9941_v35  ;;  %v14641_v15 = vld [vmem:[#allocation15 + $0x164] ss:$16 sps:$4 sm:$0xff]  }
 0x8eb   :  { %v16757_v5 = vsub.f32 %v16689_v20, %v9941_v35  ;;  %v16762_v2 = vsub.f32 %v16706_v44, %v9940_v49  ;;  %v9962_v62 = vmul.f32 %v16736_v7, %v16736_v7  ;;  %v16767_v34 = vsub.f32 %v16697_v29, %v9941_v35  ;;  %v14644_v22 = vld [vmem:[#allocation15 + $0x364] ss:$16 sps:$4 sm:$0xff]   ;;  %11752 = vmatprep.subr.bf16.mxu0 %v14641_v15 }
 0x8ec   :  { %v9975_v17 = vadd.f32 %v9974_v12, %v9960_v40  ;;  %v9966_v3 = vmul.f32 %v16741_v38, %v16741_v38  ;;  %v9967_v45 = vmul.f32 %v16744_v60, %v16744_v60  ;;  %v9968_v13 = vmul.f32 %v16747_v55, %v16747_v55  ;;  %v14639_v40 = vld [vmem:[#allocation15 + $0x160] ss:$16 sps:$4 sm:$0xff]  }
 0x8ed   :  { %v16772_v20 = vsub.f32 %v16709_v43, %v9940_v49  ;;  %v16777_v44 = vsub.f32 %v16704_v51, %v9941_v35  ;;  %v9969_v54 = vmul.f32 %v16757_v5, %v16757_v5  ;;  %v9964_v29 = vmul.f32 %v16762_v2, %v16762_v2  ;;  %v14638_v49 = vld [vmem:[#allocation15 + $0x384] ss:$16 sps:$4 sm:$0xff]   ;;  %v14642_v12 = vld [vmem:[#allocation15 + $0x360] ss:$16 sps:$4 sm:$0xff]   ;;  %11753 = vmatpush2.bf16.msra.mxu0 %v14639_v40 }
 0x8ee   :  { %v9976_v52 = vadd.f32 %v9975_v17, %v9961_v8  ;;  %v9983_v63 = vadd.f32 %v9967_v45, %v9966_v3  ;;  %v16784_v28 = vsub.f32 %v16712_v18, %v9941_v35  ;;  %v9970_v43 = vmul.f32 %v16767_v34, %v16767_v34  ;;  %v14647_v8 = vld [vmem:[#allocation15 + $0x144] ss:$16 sps:$4 sm:$0xff]   ;;  %v14645_v3 = vld [vmem:[#allocation15 + $0x140] ss:$16 sps:$4 sm:$0xff]  }
 0x8ef   :  { %v9965_v57 = vmul.f32 %v16772_v20, %v16772_v20  ;;  %v16791_v27 = vsub.f32 %v16716_v50, %v9941_v35  ;;  %v9971_v30 = vmul.f32 %v16777_v44, %v16777_v44  ;;  %v14618_v50 = vld [vmem:[#allocation15 + $0x3e0] ss:$16 sps:$4 sm:$0xff]   ;;  %v14650_v17 = vld [vmem:[#allocation15 + $0x344] ss:$16 sps:$4 sm:$0xff]   ;;  %11754 = vmatprep.subr.bf16.mxu0 %v14647_v8 }
 0x8f0   :  { %v9977_v23 = vadd.f32 %v9976_v52, %v9962_v62  ;;  %v9984_v36 = vadd.f32 %v9983_v63, %v9968_v13  ;;  %v9972_v18 = vmul.f32 %v16784_v28, %v16784_v28  ;;  %11788 = vmatpush2.bf16.msra.mxu1 %v14618_v50  ;;  %v14636_v35 = vld [vmem:[#allocation15 + $0x380] ss:$16 sps:$4 sm:$0xff]   ;;  %v14653_v62 = vld [vmem:[#allocation15 + $0x124] ss:$16 sps:$4 sm:$0xff]  }
 0x8f1   :  { %v9973_v53 = vmul.f32 %v16791_v27, %v16791_v27  ;;  %11789 = vmatprep.subr.bf16.mxu1 %v14626_v11  ;;  %v14648_v45 = vld [vmem:[#allocation15 + $0x340] ss:$16 sps:$4 sm:$0xff]   ;;  %v14656_v52 = vld [vmem:[#allocation15 + $0x324] ss:$16 sps:$4 sm:$0xff]   ;;  %11755 = vmatpush2.bf16.msra.mxu0 %v14645_v3 }
 0x8f2   :  { %v9978_v4 = vadd.f32 %v9977_v23, %v9963_v31  ;;  %v9985_v14 = vadd.f32 %v9984_v36, %v9969_v54  ;;  %v14651_v13 = vld [vmem:[#allocation15 + $0x120] ss:$16 sps:$4 sm:$0xff]   ;;  %11756 = vmatprep.subr.bf16.mxu0 %v14653_v62  ;;  %v14659_v31 = vld [vmem:[#allocation15 + $0x104] ss:$16 sps:$4 sm:$0xff]  }
 0x8f3   :  { %v14654_v63 = vld [vmem:[#allocation15 + $0x320] ss:$16 sps:$4 sm:$0xff]   ;;  %v14662_v23 = vld [vmem:[#allocation15 + $0x304] ss:$16 sps:$4 sm:$0xff]  }
 0x8f4   :  { %v9979_v51 = vadd.f32 %v9978_v4, %v9964_v29  ;;  %v9986_v58 = vadd.f32 %v9985_v14, %v9970_v43  ;;  %11790 = vmatpush2.bf16.msra.mxu1 %v14624_v10  ;;  %v14657_v54 = vld [vmem:[#allocation15 + $0x100] ss:$16 sps:$4 sm:$0xff]   ;;  %v14665_v29 = vld [vmem:[#allocation15 + $0x4e4] ss:$16 sps:$4 sm:$0xff]  }
 0x8f5   :  { %11791 = vmatprep.subr.bf16.mxu1 %v14632_v6  ;;  %11757 = vmatpush2.bf16.msra.mxu0 %v14651_v13  ;;  %v14660_v36 = vld [vmem:[#allocation15 + $0x300] ss:$16 sps:$4 sm:$0xff]   ;;  %v14668_v4 = vld [vmem:[#allocation15 + $0x6e4] ss:$16 sps:$4 sm:$0xff]  }
 0x8f6   :  { %v9980_v61 = vadd.f32 %v9979_v51, %v9965_v57  ;;  %v9987_v32 = vadd.f32 %v9986_v58, %v9971_v30  ;;  %11758 = vmatprep.subr.bf16.mxu0 %v14659_v31  ;;  %v17171_v50 = vld [vmem:[#allocation40_spill] sm:$0xff] }
 0x8f8   :  { %9981 = vadd.xlane.f32.xlu0 %v9980_v61  ;;  %v9988_v56 = vadd.f32 %v9987_v32, %v9972_v18  ;;  %11792 = vmatpush2.bf16.msra.mxu1 %v14630_v47  ;;  %v10014_v61 = vld [vmem:[#allocation12] sm:$0xff]  ;;  %v10072_v18 = vld [vmem:[#allocation13] sm:$0xff] }
 0x8f9   :  { %11793 = vmatprep.subr.bf16.mxu1 %v14638_v49  ;;  %11759 = vmatpush2.bf16.msra.mxu0 %v14657_v54  ;;  %v17169_v32 = vld [vmem:[#allocation41_spill] sm:$0xff]  ;;  %v10019_v41 = vrot.slane %v10014_v61, %v17171_v50  ;;  %v10077_v16 = vrot.slane %v10072_v18, %v17171_v50  ;;  %v10027_v10 = vrot.slane %v10014_v61, %v17172_v19 }
 0x8fa   :  { %v9989_v39 = vadd.f32 %v9988_v56, %v9973_v53  ;;  %11814 = vmatprep.subr.bf16.mxu0 %v14665_v29  ;;  %v10023_v53 = vrot.slane %v10014_v61, %v17169_v32  ;;  %v10081_v56 = vrot.slane %v10072_v18, %v17169_v32  ;;  %v10085_v11 = vrot.slane %v10072_v18, %v17172_v19 }
 0x8fb   :  { %v10039_v6 = vrot.slane %v10014_v61, %v17173_v46  ;;  %v10097_v0 = vrot.slane %v10072_v18, %v17173_v46  ;;  %v10047_v47 = vrot.slane %v10014_v61, %v17110_v26  ;;  %v16811_v21 = vrot.slane %v10072_v18, %v17110_v26 }
 0x8fc   :  { %9990 = vadd.xlane.f32.xlu1 %v9989_v39  ;;  %11794 = vmatpush2.bf16.msra.mxu1 %v14636_v35  ;;  %v17170_v39 = vld [vmem:[#allocation43_spill] sm:$0xff]  ;;  %v16814_v35 = vrot.slane %v10014_v61, %v17174_v25  ;;  %v16817_v15 = vrot.slane %v10072_v18, %v17174_v25  ;;  %v16823_v40 = vrot.slane %v10072_v18, %v17122_v48 }
 0x8fd   :  { %11795 = vmatprep.subr.bf16.mxu1 %v14644_v22  ;;  %v10031_v24 = vrot.slane %v10014_v61, %v17170_v39  ;;  %v10089_v59 = vrot.slane %v10072_v18, %v17170_v39  ;;  %v16820_v22 = vrot.slane %v10014_v61, %v17122_v48 }
 0x900   :  { %11796 = vmatpush2.bf16.msra.mxu1 %v14642_v12 }
 0x901   :  { %11797 = vmatprep.subr.bf16.mxu1 %v14650_v17 }
 0x904   :  { %11798 = vmatpush2.bf16.msra.mxu1 %v14648_v45 }
 0x905   :  { %11799 = vmatprep.subr.bf16.mxu1 %v14656_v52 }
 0x908   :  { %11800 = vmatpush2.bf16.msra.mxu1 %v14654_v63 }
 0x909   :  { %11801 = vmatprep.subr.bf16.mxu1 %v14662_v23 }
 0x90c   :  { %11802 = vmatpush2.bf16.msra.mxu1 %v14660_v36 }
 0x90d   :  { %11857 = vmatprep.subr.bf16.mxu1 %v14668_v4 }
 0x981   :  { %v9982_v43 = vpop.xlane.xlu0 %9981 }
 0x982   :  { %v9992_v14 = vmul.f32 0.0009765625, %v9982_v43 }
 0x984   :  { %v9994_v57 = vadd.f32 1e-05, %v9992_v14 }
 0x985   :  { %v9991_v51 = vpop.xlane.xlu1 %9990 }
 0x986   :  { %15067 = vrsqrt.f32 %v9994_v57  ;;  %v9993_v30 = vmul.f32 0.0009765625, %v9991_v51 }
 0x988   :  { %v9995_v58 = vadd.f32 1e-05, %v9993_v30 }
 0x98a   :  { %15069 = vrsqrt.f32 %v9995_v58 }
 0x993   :  { %v15068_v49 = vpop.eup %15067 }
 0x994   :  { %v9999_v12 = vmul.f32 %v15068_v49, %v16723_v1  ;;  %v10001_v8 = vmul.f32 %v15068_v49, %v16729_v42  ;;  %v9998_v26 = vmul.f32 %v15068_v49, %v16720_v9  ;;  %v10000_v17 = vmul.f32 %v15068_v49, %v16726_v33 }
 0x995   :  { %v10003_v3 = vmul.f32 %v15068_v49, %v16750_v37  ;;  %v10005_v45 = vmul.f32 %v15068_v49, %v16772_v20  ;;  %v10002_v62 = vmul.f32 %v15068_v49, %v16736_v7  ;;  %v10004_v52 = vmul.f32 %v15068_v49, %v16762_v2 }
 0x996   :  { %v10057_v13 = vmul.f32 %v10023_v53, %v9999_v12  ;;  %v10059_v63 = vmul.f32 %v10031_v24, %v10001_v8  ;;  %v10056_v48 = vmul.f32 %v10019_v41, %v9998_v26  ;;  %v10058_v31 = vmul.f32 %v10027_v10, %v10000_v17 }
 0x997   :  { %v10061_v23 = vmul.f32 %v10039_v6, %v10003_v3  ;;  %v10063_v1 = vmul.f32 %v10047_v47, %v10005_v45  ;;  %v10060_v42 = vmul.f32 %v16814_v35, %v10002_v62  ;;  %v10062_v9 = vmul.f32 %v16820_v22, %v10004_v52  ;;  %v15070_v54 = vpop.eup %15069 }
 0x998   :  { %v10115_v33 = vadd.f32 %v10081_v56, %v10057_v13  ;;  %v10117_v36 = vadd.f32 %v10089_v59, %v10059_v63  ;;  %v10114_v37 = vadd.f32 %v10077_v16, %v10056_v48  ;;  %v10116_v29 = vadd.f32 %v10085_v11, %v10058_v31 }
 0x999   :  { %v10007_v20 = vmul.f32 %v15070_v54, %v16744_v60  ;;  %v10009_v7 = vmul.f32 %v15070_v54, %v16757_v5  ;;  %v10006_v2 = vmul.f32 %v15070_v54, %v16741_v38  ;;  %v10008_v4 = vmul.f32 %v15070_v54, %v16747_v55 }
 0x99a   :  { %v10131_v43 = vmul.f32 0.2, %v10115_v33  ;;  %v10133_v14 = vmul.f32 0.2, %v10117_v36  ;;  %v10130_v57 = vmul.f32 0.2, %v10114_v37  ;;  %v10011_v51 = vmul.f32 %v15070_v54, %v16777_v44 }
 0x99b   :  { %v10065_v30 = vmul.f32 %v10023_v53, %v10007_v20  ;;  %v10067_v58 = vmul.f32 %v10031_v24, %v10009_v7  ;;  %v10064_v61 = vmul.f32 %v10019_v41, %v10006_v2  ;;  %v10066_v18 = vmul.f32 %v10027_v10, %v10008_v4 }
 0x99c   :  { %v10147_v46 = vmax.f32 %v10115_v33, %v10131_v43  ;;  %v10149_v49 = vmax.f32 %v10117_v36, %v10133_v14  ;;  %v10146_v25 = vmax.f32 %v10114_v37, %v10130_v57  ;;  %v10132_v12 = vmul.f32 0.2, %v10116_v29  ;;  %v14666_v33 = vld [vmem:[#allocation15 + $0x6e0] ss:$16 sps:$4 sm:$0xff]  }
 0x99d   :  { %v10123_v60 = vadd.f32 %v10081_v56, %v10065_v30  ;;  %v10125_v8 = vadd.f32 %v10089_v59, %v10067_v58  ;;  %v10122_v5 = vadd.f32 %v10077_v16, %v10064_v61  ;;  %v10124_v26 = vadd.f32 %v10085_v11, %v10066_v18  ;;  %v14669_v57 = vld [vmem:[#allocation15 + $0x4c0] ss:$16 sps:$4 sm:$0xff]  }
 0x99e   :  { %v10148_v38 = vmax.f32 %v10116_v29, %v10132_v12  ;;  %v10069_v17 = vmul.f32 %v10039_v6, %v10011_v51  ;;  %v10119_v55 = vadd.f32 %v10097_v0, %v10061_v23  ;;  %v10013_v3 = vmul.f32 %v15070_v54, %v16791_v27  ;;  %v14663_v23 = vld [vmem:[#allocation15 + $0x4e0] ss:$16 sps:$4 sm:$0xff]   ;;  %v14671_v29 = vld [vmem:[#allocation15 + $0x4c4] ss:$16 sps:$4 sm:$0xff]  }
 0x99f   :  { %v10139_v45 = vmul.f32 0.2, %v10123_v60  ;;  %v10141_v62 = vmul.f32 0.2, %v10125_v8  ;;  %v10138_v44 = vmul.f32 0.2, %v10122_v5  ;;  %v10121_v53 = vadd.f32 %v16811_v21, %v10063_v1 }
 0x9a0   :  { %v10140_v24 = vmul.f32 0.2, %v10124_v26  ;;  %v10127_v41 = vadd.f32 %v10097_v0, %v10069_v17  ;;  %v10135_v10 = vmul.f32 0.2, %v10119_v55  ;;  %v10071_v52 = vmul.f32 %v10047_v47, %v10013_v3  ;;  %v14672_v51 = vld [vmem:[#allocation15 + $0x6c0] ss:$16 sps:$4 sm:$0xff]  }
 0x9a1   :  { %v10155_v13 = vmax.f32 %v10123_v60, %v10139_v45  ;;  %v10157_v63 = vmax.f32 %v10125_v8, %v10141_v62  ;;  %v10154_v56 = vmax.f32 %v10122_v5, %v10138_v44  ;;  %v10137_v59 = vmul.f32 0.2, %v10121_v53  ;;  %v14686_v12 = vld [vmem:[#allocation15 + $0x684] ss:$16 sps:$4 sm:$0xff]   ;;  %v14687_v45 = vld [vmem:[#allocation15 + $0x460] ss:$16 sps:$4 sm:$0xff]  }
 0x9a2   :  { %v10156_v16 = vmax.f32 %v10124_v26, %v10140_v24  ;;  %v10143_v11 = vmul.f32 0.2, %v10127_v41  ;;  %v10151_v48 = vmax.f32 %v10119_v55, %v10135_v10  ;;  %v10129_v6 = vadd.f32 %v16811_v21, %v10071_v52  ;;  %v14674_v21 = vld [vmem:[#allocation15 + $0x6c4] ss:$16 sps:$4 sm:$0xff]   ;;  %v14690_v62 = vld [vmem:[#allocation15 + $0x660] ss:$16 sps:$4 sm:$0xff]  }
 0x9a3   :  { %v16843_v31 = vpack.c.bf16 %v10155_v13, %v10147_v46  ;;  %v16845_v27 = vpack.c.bf16 %v10157_v63, %v10149_v49  ;;  %v16847_v1 = vpack.c.bf16 %v10154_v56, %v10146_v25  ;;  %v10153_v0 = vmax.f32 %v10121_v53, %v10137_v59  ;;  %v14678_v46 = vld [vmem:[#allocation15 + $0x6a0] ss:$16 sps:$4 sm:$0xff]   ;;  %v14683_v25 = vld [vmem:[#allocation15 + $0x484] ss:$16 sps:$4 sm:$0xff]  }
 0x9a4   :  { %v16849_v36 = vpack.c.bf16 %v10156_v16, %v10148_v38  ;;  %v10159_v47 = vmax.f32 %v10127_v41, %v10143_v11  ;;  %v10145_v37 = vmul.f32 0.2, %v10129_v6  ;;  %v10010_v20 = vmul.f32 %v15070_v54, %v16767_v34  ;;  %v14684_v38 = vld [vmem:[#allocation15 + $0x680] ss:$16 sps:$4 sm:$0xff]   ;;  %v14689_v55 = vld [vmem:[#allocation15 + $0x464] ss:$16 sps:$4 sm:$0xff]  }
 0x9a5   :  { %11760 = vmatprep.mubr.bf16.mxu0 %v16843_v31  ;;  %11803 = vmatprep.mubr.bf16.mxu1 %v16845_v27  ;;  %v10118_v7 = vadd.f32 %v16817_v15, %v10060_v42  ;;  %v10012_v2 = vmul.f32 %v15070_v54, %v16784_v28  ;;  %v10120_v4 = vadd.f32 %v16823_v40, %v10062_v9  ;;  %v14677_v42 = vld [vmem:[#allocation15 + $0x4a4] ss:$16 sps:$4 sm:$0xff]   ;;  %v14693_v24 = vld [vmem:[#allocation15 + $0x440] ss:$16 sps:$4 sm:$0xff]  }
 0x9a6   :  { %11761 = vmatmul.mubr.bf16.vlgmr.msra.gmra.mxu0 %v16847_v1  ;;  %11804 = vmatmul.mubr.bf16.vlgmr.msra.gmra.mxu1 %v16849_v36  ;;  %v16859_v43 = vpack.c.bf16 %v10159_v47, %v10151_v48  ;;  %v10161_v14 = vmax.f32 %v10129_v6, %v10145_v37  ;;  %v10068_v34 = vmul.f32 %v16814_v35, %v10010_v20  ;;  %v14680_v9 = vld [vmem:[#allocation15 + $0x6a4] ss:$16 sps:$4 sm:$0xff]   ;;  %v14696_v41 = vld [vmem:[#allocation15 + $0x640] ss:$16 sps:$4 sm:$0xff]  }
 0x9a7   :  { %11815 = vmatpush1.bf16.msra.mxu0 %v14663_v23  ;;  %11858 = vmatpush1.bf16.msra.mxu1 %v14666_v33  ;;  %v10070_v30 = vmul.f32 %v16820_v22, %v10012_v2  ;;  %v10134_v58 = vmul.f32 0.2, %v10118_v7  ;;  %v10136_v35 = vmul.f32 0.2, %v10120_v4  ;;  %v14675_v22 = vld [vmem:[#allocation15 + $0x4a0] ss:$16 sps:$4 sm:$0xff]  }
 0x9a8   :  { %11846 = vmatprep.mubr.bf16.mxu0 %v16859_v43  ;;  %v16864_v28 = vpack.c.bf16 %v10161_v14, %v10153_v0  ;;  %11816 = vmatprep.subr.bf16.mxu0 %v14671_v29  ;;  %v10126_v54 = vadd.f32 %v16817_v15, %v10068_v34  ;;  %v14692_v3 = vld [vmem:[#allocation15 + $0x664] ss:$16 sps:$4 sm:$0xff]   ;;  %v14699_v13 = vld [vmem:[#allocation15 + $0x420] ss:$16 sps:$4 sm:$0xff]  }
 0x9a9   :  { %11859 = vmatprep.subr.bf16.mxu1 %v14674_v21  ;;  %v10128_v61 = vadd.f32 %v16823_v40, %v10070_v30  ;;  %v10150_v60 = vmax.f32 %v10118_v7, %v10134_v58  ;;  %v10152_v15 = vmax.f32 %v10120_v4, %v10136_v35  ;;  %v14681_v40 = vld [vmem:[#allocation15 + $0x480] ss:$16 sps:$4 sm:$0xff]   ;;  %v14695_v44 = vld [vmem:[#allocation15 + $0x444] ss:$16 sps:$4 sm:$0xff]  }
 0x9aa   :  { %11889 = vmatprep.mubr.bf16.mxu1 %v16864_v28  ;;  %v10142_v18 = vmul.f32 0.2, %v10126_v54  ;;  %v14698_v53 = vld [vmem:[#allocation15 + $0x644] ss:$16 sps:$4 sm:$0xff]   ;;  %v14702_v63 = vld [vmem:[#allocation15 + $0x620] ss:$16 sps:$4 sm:$0xff]  }
 0x9ab   :  { %11817 = vmatpush1.bf16.msra.mxu0 %v14669_v57  ;;  %11860 = vmatpush1.bf16.msra.mxu1 %v14672_v51  ;;  %v10144_v49 = vmul.f32 0.2, %v10128_v61  ;;  %v14701_v10 = vld [vmem:[#allocation15 + $0x424] ss:$16 sps:$4 sm:$0xff]   ;;  %v14705_v16 = vld [vmem:[#allocation15 + $0x400] ss:$16 sps:$4 sm:$0xff]  }
 0x9ac   :  { %11818 = vmatprep.subr.bf16.mxu0 %v14677_v42  ;;  %11861 = vmatprep.subr.bf16.mxu1 %v14680_v9  ;;  %v10158_v8 = vmax.f32 %v10126_v54, %v10142_v18  ;;  %v14704_v52 = vld [vmem:[#allocation15 + $0x624] ss:$16 sps:$4 sm:$0xff]   ;;  %v14708_v11 = vld [vmem:[#allocation15 + $0x600] ss:$16 sps:$4 sm:$0xff]  }
 0x9ad   :  { %v10160_v5 = vmax.f32 %v10128_v61, %v10144_v49  ;;  %v14707_v56 = vld [vmem:[#allocation15 + $0x404] ss:$16 sps:$4 sm:$0xff]   ;;  %v14711_v23 = vld [vmem:[#allocation15 + $0x5e0] ss:$16 sps:$4 sm:$0xff]  }
 0x9ae   :  { %v16869_v26 = vpack.c.bf16 %v10158_v8, %v10150_v60  ;;  %v14710_v59 = vld [vmem:[#allocation15 + $0x604] ss:$16 sps:$4 sm:$0xff]   ;;  %v14714_v33 = vld [vmem:[#allocation15 + $0x7e0] ss:$16 sps:$4 sm:$0xff]  }
 0x9af   :  { %11819 = vmatpush1.bf16.msra.mxu0 %v14675_v22  ;;  %11862 = vmatpush1.bf16.msra.mxu1 %v14678_v46  ;;  %v16871_v17 = vpack.c.bf16 %v10160_v5, %v10152_v15  ;;  %v14713_v48 = vld [vmem:[#allocation15 + $0x5e4] ss:$16 sps:$4 sm:$0xff]   ;;  %v14717_v37 = vld [vmem:[#allocation15 + $0x5c0] ss:$16 sps:$4 sm:$0xff]   ;;  %v14761_v15 = vld [vmem:[#allocation15 + $0xec] ss:$16 sps:$4 sm:$0xff]  }
 0x9b0   :  { %11820 = vmatprep.subr.bf16.mxu0 %v14683_v25  ;;  %11863 = vmatprep.subr.bf16.mxu1 %v14686_v12  ;;  %v14716_v6 = vld [vmem:[#allocation15 + $0x7e4] ss:$16 sps:$4 sm:$0xff]   ;;  %v14720_v29 = vld [vmem:[#allocation15 + $0x7c0] ss:$16 sps:$4 sm:$0xff]   ;;  %v14764_v5 = vld [vmem:[#allocation15 + $0x2ec] ss:$16 sps:$4 sm:$0xff]  }
 0x9b1   :  { %v14719_v0 = vld [vmem:[#allocation15 + $0x5c4] ss:$16 sps:$4 sm:$0xff]   ;;  %v14723_v7 = vld [vmem:[#allocation15 + $0x5a0] ss:$16 sps:$4 sm:$0xff]  }
 0x9b2   :  { %v14722_v47 = vld [vmem:[#allocation15 + $0x7c4] ss:$16 sps:$4 sm:$0xff]   ;;  %v14726_v2 = vld [vmem:[#allocation15 + $0x7a0] ss:$16 sps:$4 sm:$0xff]  }
 0x9b3   :  { %11821 = vmatpush1.bf16.msra.mxu0 %v14681_v40  ;;  %11864 = vmatpush1.bf16.msra.mxu1 %v14684_v38  ;;  %v14725_v20 = vld [vmem:[#allocation15 + $0x5a4] ss:$16 sps:$4 sm:$0xff]   ;;  %v14729_v34 = vld [vmem:[#allocation15 + $0x580] ss:$16 sps:$4 sm:$0xff]   ;;  %v14759_v40 = vld [vmem:[#allocation15 + $0xe8] ss:$16 sps:$4 sm:$0xff]  }
 0x9b4   :  { %11822 = vmatprep.subr.bf16.mxu0 %v14689_v55  ;;  %11865 = vmatprep.subr.bf16.mxu1 %v14692_v3  ;;  %v14728_v21 = vld [vmem:[#allocation15 + $0x7a4] ss:$16 sps:$4 sm:$0xff]   ;;  %v14732_v57 = vld [vmem:[#allocation15 + $0x780] ss:$16 sps:$4 sm:$0xff]   ;;  %v14762_v38 = vld [vmem:[#allocation15 + $0x2e8] ss:$16 sps:$4 sm:$0xff]  }
 0x9b5   :  { %v14731_v4 = vld [vmem:[#allocation15 + $0x584] ss:$16 sps:$4 sm:$0xff]   ;;  %v14735_v42 = vld [vmem:[#allocation15 + $0x560] ss:$16 sps:$4 sm:$0xff]   ;;  %v14767_v55 = vld [vmem:[#allocation15 + $0xcc] ss:$16 sps:$4 sm:$0xff]  }
 0x9b6   :  { %v14734_v14 = vld [vmem:[#allocation15 + $0x784] ss:$16 sps:$4 sm:$0xff]   ;;  %v14738_v9 = vld [vmem:[#allocation15 + $0x760] ss:$16 sps:$4 sm:$0xff]   ;;  %v14770_v3 = vld [vmem:[#allocation15 + $0x2cc] ss:$16 sps:$4 sm:$0xff]  }
 0x9b7   :  { %11823 = vmatpush1.bf16.msra.mxu0 %v14687_v45  ;;  %11866 = vmatpush1.bf16.msra.mxu1 %v14690_v62  ;;  %v14737_v51 = vld [vmem:[#allocation15 + $0x564] ss:$16 sps:$4 sm:$0xff]   ;;  %v14741_v61 = vld [vmem:[#allocation15 + $0x540] ss:$16 sps:$4 sm:$0xff]   ;;  %v14765_v45 = vld [vmem:[#allocation15 + $0xc8] ss:$16 sps:$4 sm:$0xff]  }
 0x9b8   :  { %11824 = vmatprep.subr.bf16.mxu0 %v14695_v44  ;;  %11867 = vmatprep.subr.bf16.mxu1 %v14698_v53  ;;  %v14740_v30 = vld [vmem:[#allocation15 + $0x764] ss:$16 sps:$4 sm:$0xff]   ;;  %v14744_v35 = vld [vmem:[#allocation15 + $0x740] ss:$16 sps:$4 sm:$0xff]   ;;  %v14768_v62 = vld [vmem:[#allocation15 + $0x2c8] ss:$16 sps:$4 sm:$0xff]  }
 0x9b9   :  { %v14743_v54 = vld [vmem:[#allocation15 + $0x544] ss:$16 sps:$4 sm:$0xff]   ;;  %v14747_v46 = vld [vmem:[#allocation15 + $0x520] ss:$16 sps:$4 sm:$0xff]   ;;  %v14773_v44 = vld [vmem:[#allocation15 + $0xac] ss:$16 sps:$4 sm:$0xff]  }
 0x9ba   :  { %v14746_v58 = vld [vmem:[#allocation15 + $0x744] ss:$16 sps:$4 sm:$0xff]   ;;  %v14750_v49 = vld [vmem:[#allocation15 + $0x720] ss:$16 sps:$4 sm:$0xff]   ;;  %v14776_v53 = vld [vmem:[#allocation15 + $0x2ac] ss:$16 sps:$4 sm:$0xff]  }
 0x9bb   :  { %11825 = vmatpush1.bf16.msra.mxu0 %v14693_v24  ;;  %11868 = vmatpush1.bf16.msra.mxu1 %v14696_v41  ;;  %v14749_v18 = vld [vmem:[#allocation15 + $0x524] ss:$16 sps:$4 sm:$0xff]   ;;  %v14753_v60 = vld [vmem:[#allocation15 + $0x500] ss:$16 sps:$4 sm:$0xff]   ;;  %v14771_v24 = vld [vmem:[#allocation15 + $0xa8] ss:$16 sps:$4 sm:$0xff]  }
 0x9bc   :  { %11826 = vmatprep.subr.bf16.mxu0 %v14701_v10  ;;  %11869 = vmatprep.subr.bf16.mxu1 %v14704_v52  ;;  %v14752_v22 = vld [vmem:[#allocation15 + $0x724] ss:$16 sps:$4 sm:$0xff]   ;;  %v14756_v8 = vld [vmem:[#allocation15 + $0x700] ss:$16 sps:$4 sm:$0xff]   ;;  %v14774_v41 = vld [vmem:[#allocation15 + $0x2a8] ss:$16 sps:$4 sm:$0xff]  }
 0x9bd   :  { %v14755_v25 = vld [vmem:[#allocation15 + $0x504] ss:$16 sps:$4 sm:$0xff]   ;;  %v14779_v10 = vld [vmem:[#allocation15 + $0x8c] ss:$16 sps:$4 sm:$0xff]  }
 0x9be   :  { %v14758_v12 = vld [vmem:[#allocation15 + $0x704] ss:$16 sps:$4 sm:$0xff]   ;;  %v14782_v52 = vld [vmem:[#allocation15 + $0x28c] ss:$16 sps:$4 sm:$0xff]  }
 0x9bf   :  { %11827 = vmatpush1.bf16.msra.mxu0 %v14699_v13  ;;  %11870 = vmatpush1.bf16.msra.mxu1 %v14702_v63  ;;  %v14777_v13 = vld [vmem:[#allocation15 + $0x88] ss:$16 sps:$4 sm:$0xff]   ;;  %v14785_v63 = vld [vmem:[#allocation15 + $0x6c] ss:$16 sps:$4 sm:$0xff]  }
 0x9c0   :  { %11828 = vmatprep.subr.bf16.mxu0 %v14707_v56  ;;  %11871 = vmatprep.subr.bf16.mxu1 %v14710_v59  ;;  %v14783_v56 = vld [vmem:[#allocation15 + $0x68] ss:$16 sps:$4 sm:$0xff]  }
 0x9c1   :  { %v14786_v59 = vld [vmem:[#allocation15 + $0x268] ss:$16 sps:$4 sm:$0xff]  }
 0x9c3   :  { %11829 = vmatpush1.bf16.msra.mxu0 %v14705_v16  ;;  %11872 = vmatpush1.bf16.msra.mxu1 %v14708_v11  ;;  %v14791_v16 = vld [vmem:[#allocation15 + $0x4c] ss:$16 sps:$4 sm:$0xff]  }
 0x9c4   :  { %11830 = vmatprep.subr.bf16.mxu0 %v14713_v48  ;;  %11873 = vmatprep.subr.bf16.mxu1 %v14716_v6  ;;  %v14794_v11 = vld [vmem:[#allocation15 + $0x24c] ss:$16 sps:$4 sm:$0xff]   ;;  %v14789_v48 = vld [vmem:[#allocation15 + $0x48] ss:$16 sps:$4 sm:$0xff]  }
 0x9c5   :  { %v14792_v6 = vld [vmem:[#allocation15 + $0x248] ss:$16 sps:$4 sm:$0xff]  }
 0x9c7   :  { %11831 = vmatpush2.bf16.msra.mxu0 %v14711_v23  ;;  %11874 = vmatpush2.bf16.msra.mxu1 %v14714_v33  ;;  %v14797_v23 = vld [vmem:[#allocation15 + $0x2c] ss:$16 sps:$4 sm:$0xff]  }
 0x9c8   :  { %11832 = vmatprep.subr.bf16.mxu0 %v14719_v0  ;;  %11875 = vmatprep.subr.bf16.mxu1 %v14722_v47  ;;  %v14800_v33 = vld [vmem:[#allocation15 + $0x22c] ss:$16 sps:$4 sm:$0xff]   ;;  %v14795_v0 = vld [vmem:[#allocation15 + $0x28] ss:$16 sps:$4 sm:$0xff]  }
 0x9c9   :  { %v14798_v47 = vld [vmem:[#allocation15 + $0x228] ss:$16 sps:$4 sm:$0xff]  }
 0x9cb   :  { %11833 = vmatpush2.bf16.msra.mxu0 %v14717_v37  ;;  %11876 = vmatpush2.bf16.msra.mxu1 %v14720_v29  ;;  %v14803_v37 = vld [vmem:[#allocation15 + $0xc] ss:$16 sps:$4 sm:$0xff]  }
 0x9cc   :  { %11834 = vmatprep.subr.bf16.mxu0 %v14725_v20  ;;  %11877 = vmatprep.subr.bf16.mxu1 %v14728_v21  ;;  %v14806_v29 = vld [vmem:[#allocation15 + $0x20c] ss:$16 sps:$4 sm:$0xff]   ;;  %v14801_v20 = vld [vmem:[#allocation15 + $0x8] ss:$16 sps:$4 sm:$0xff]  }
 0x9cd   :  { %v14804_v21 = vld [vmem:[#allocation15 + $0x208] ss:$16 sps:$4 sm:$0xff]  }
 0x9cf   :  { %11835 = vmatpush2.bf16.msra.mxu0 %v14723_v7  ;;  %11878 = vmatpush2.bf16.msra.mxu1 %v14726_v2  ;;  %v14809_v7 = vld [vmem:[#allocation15 + $0x1ec] ss:$16 sps:$4 sm:$0xff]  }
 0x9d0   :  { %11836 = vmatprep.subr.bf16.mxu0 %v14731_v4  ;;  %11879 = vmatprep.subr.bf16.mxu1 %v14734_v14  ;;  %v14812_v2 = vld [vmem:[#allocation15 + $0x3ec] ss:$16 sps:$4 sm:$0xff]   ;;  %v14807_v4 = vld [vmem:[#allocation15 + $0x1e8] ss:$16 sps:$4 sm:$0xff]  }
 0x9d1   :  { %v14810_v14 = vld [vmem:[#allocation15 + $0x3e8] ss:$16 sps:$4 sm:$0xff]  }
 0x9d3   :  { %11837 = vmatpush2.bf16.msra.mxu0 %v14729_v34  ;;  %11880 = vmatpush2.bf16.msra.mxu1 %v14732_v57  ;;  %v14815_v34 = vld [vmem:[#allocation15 + $0x1cc] ss:$16 sps:$4 sm:$0xff]  }
 0x9d4   :  { %11838 = vmatprep.subr.bf16.mxu0 %v14737_v51  ;;  %11881 = vmatprep.subr.bf16.mxu1 %v14740_v30  ;;  %v14818_v57 = vld [vmem:[#allocation15 + $0x3cc] ss:$16 sps:$4 sm:$0xff]   ;;  %v14813_v51 = vld [vmem:[#allocation15 + $0x1c8] ss:$16 sps:$4 sm:$0xff]  }
 0x9d5   :  { %v14816_v30 = vld [vmem:[#allocation15 + $0x3c8] ss:$16 sps:$4 sm:$0xff]  }
 0x9d7   :  { %11839 = vmatpush2.bf16.msra.mxu0 %v14735_v42  ;;  %11882 = vmatpush2.bf16.msra.mxu1 %v14738_v9  ;;  %v14821_v42 = vld [vmem:[#allocation15 + $0x1ac] ss:$16 sps:$4 sm:$0xff]  }
 0x9d8   :  { %11840 = vmatprep.subr.bf16.mxu0 %v14743_v54  ;;  %11883 = vmatprep.subr.bf16.mxu1 %v14746_v58  ;;  %v14824_v9 = vld [vmem:[#allocation15 + $0x3ac] ss:$16 sps:$4 sm:$0xff]   ;;  %v14819_v54 = vld [vmem:[#allocation15 + $0x1a8] ss:$16 sps:$4 sm:$0xff]  }
 0x9d9   :  { %v14822_v58 = vld [vmem:[#allocation15 + $0x3a8] ss:$16 sps:$4 sm:$0xff]  }
 0x9db   :  { %11841 = vmatpush2.bf16.msra.mxu0 %v14741_v61  ;;  %11884 = vmatpush2.bf16.msra.mxu1 %v14744_v35  ;;  %v14827_v61 = vld [vmem:[#allocation15 + $0x18c] ss:$16 sps:$4 sm:$0xff]  }
 0x9dc   :  { %11842 = vmatprep.subr.bf16.mxu0 %v14749_v18  ;;  %11885 = vmatprep.subr.bf16.mxu1 %v14752_v22  ;;  %v14830_v35 = vld [vmem:[#allocation15 + $0x38c] ss:$16 sps:$4 sm:$0xff]   ;;  %v14825_v18 = vld [vmem:[#allocation15 + $0x188] ss:$16 sps:$4 sm:$0xff]  }
 0x9dd   :  { %v14828_v22 = vld [vmem:[#allocation15 + $0x388] ss:$16 sps:$4 sm:$0xff]  }
 0x9df   :  { %11843 = vmatpush2.bf16.msra.mxu0 %v14747_v46  ;;  %11886 = vmatpush2.bf16.msra.mxu1 %v14750_v49  ;;  %v14833_v46 = vld [vmem:[#allocation15 + $0x16c] ss:$16 sps:$4 sm:$0xff]  }
 0x9e0   :  { %11844 = vmatprep.subr.bf16.mxu0 %v14755_v25  ;;  %11887 = vmatprep.subr.bf16.mxu1 %v14758_v12  ;;  %v14836_v49 = vld [vmem:[#allocation15 + $0x36c] ss:$16 sps:$4 sm:$0xff]   ;;  %v14831_v25 = vld [vmem:[#allocation15 + $0x168] ss:$16 sps:$4 sm:$0xff]  }
 0x9e1   :  { %v14834_v12 = vld [vmem:[#allocation15 + $0x368] ss:$16 sps:$4 sm:$0xff]  }
 0x9e3   :  { %11845 = vmatpush2.bf16.msra.mxu0 %v14753_v60  ;;  %11888 = vmatpush2.bf16.msra.mxu1 %v14756_v8  ;;  %v14839_v60 = vld [vmem:[#allocation15 + $0x14c] ss:$16 sps:$4 sm:$0xff]  }
 0x9e4   :  { %11900 = vmatprep.subr.bf16.mxu0 %v14761_v15  ;;  %11943 = vmatprep.subr.bf16.mxu1 %v14764_v5  ;;  %v14842_v8 = vld [vmem:[#allocation15 + $0x34c] ss:$16 sps:$4 sm:$0xff]   ;;  %v14837_v15 = vld [vmem:[#allocation15 + $0x148] ss:$16 sps:$4 sm:$0xff]  }
 0x9e5   :  { %v14840_v5 = vld [vmem:[#allocation15 + $0x348] ss:$16 sps:$4 sm:$0xff]  }
 0x9e6   :  { %11847 = vmatmul.mubr.bf16.vlgmr.msra.gmra.mxu0 %v16869_v26  ;;  %11890 = vmatmul.mubr.bf16.vlgmr.msra.gmra.mxu1 %v16871_v17 }
 0x9e7   :  { %11901 = vmatpush1.bf16.msra.mxu0 %v14759_v40  ;;  %11932 = vmatprep.mubr.bf16.mxu0 %v16843_v31  ;;  %v14780_v31 = vld [vmem:[#allocation15 + $0x288] ss:$16 sps:$4 sm:$0xff]   ;;  %v14845_v40 = vld [vmem:[#allocation15 + $0x12c] ss:$16 sps:$4 sm:$0xff]  }
 0x9e8   :  { %11944 = vmatpush1.bf16.msra.mxu1 %v14762_v38  ;;  %11975 = vmatprep.mubr.bf16.mxu1 %v16845_v27  ;;  %v14788_v27 = vld [vmem:[#allocation15 + $0x26c] ss:$16 sps:$4 sm:$0xff]  }
 0x9e9   :  { %11902 = vmatprep.subr.bf16.mxu0 %v14767_v55  ;;  %11945 = vmatprep.subr.bf16.mxu1 %v14770_v3  ;;  %v14848_v38 = vld [vmem:[#allocation15 + $0x32c] ss:$16 sps:$4 sm:$0xff]   ;;  %v14843_v55 = vld [vmem:[#allocation15 + $0x128] ss:$16 sps:$4 sm:$0xff]  }
 0x9ea   :  { %v14846_v3 = vld [vmem:[#allocation15 + $0x328] ss:$16 sps:$4 sm:$0xff]  }
 0x9eb   :  { %11903 = vmatpush1.bf16.msra.mxu0 %v14765_v45  ;;  %v14851_v45 = vld [vmem:[#allocation15 + $0x10c] ss:$16 sps:$4 sm:$0xff]  }
 0x9ec   :  { %11946 = vmatpush1.bf16.msra.mxu1 %v14768_v62  ;;  %11904 = vmatprep.subr.bf16.mxu0 %v14773_v44  ;;  %v14854_v62 = vld [vmem:[#allocation15 + $0x30c] ss:$16 sps:$4 sm:$0xff]   ;;  %v14849_v44 = vld [vmem:[#allocation15 + $0x108] ss:$16 sps:$4 sm:$0xff]  }
 0x9ed   :  { %11947 = vmatprep.subr.bf16.mxu1 %v14776_v53  ;;  %v14852_v53 = vld [vmem:[#allocation15 + $0x308] ss:$16 sps:$4 sm:$0xff]  }
 0x9ef   :  { %11905 = vmatpush1.bf16.msra.mxu0 %v14771_v24  ;;  %v14857_v24 = vld [vmem:[#allocation15 + $0x4ec] ss:$16 sps:$4 sm:$0xff]  }
 0x9f0   :  { %11948 = vmatpush1.bf16.msra.mxu1 %v14774_v41  ;;  %11906 = vmatprep.subr.bf16.mxu0 %v14779_v10  ;;  %v14860_v41 = vld [vmem:[#allocation15 + $0x6ec] ss:$16 sps:$4 sm:$0xff]   ;;  %v14855_v10 = vld [vmem:[#allocation15 + $0x4e8] ss:$16 sps:$4 sm:$0xff]  }
 0x9f1   :  { %11949 = vmatprep.subr.bf16.mxu1 %v14782_v52  ;;  %v14858_v52 = vld [vmem:[#allocation15 + $0x6e8] ss:$16 sps:$4 sm:$0xff]  }
 0x9f3   :  { %11907 = vmatpush1.bf16.msra.mxu0 %v14777_v13  ;;  %v14863_v13 = vld [vmem:[#allocation15 + $0x4cc] ss:$16 sps:$4 sm:$0xff]  }
 0x9f4   :  { %11950 = vmatpush1.bf16.msra.mxu1 %v14780_v31  ;;  %11908 = vmatprep.subr.bf16.mxu0 %v14785_v63  ;;  %v14866_v31 = vld [vmem:[#allocation15 + $0x6cc] ss:$16 sps:$4 sm:$0xff]   ;;  %v14861_v63 = vld [vmem:[#allocation15 + $0x4c8] ss:$16 sps:$4 sm:$0xff]  }
 0x9f5   :  { %11951 = vmatprep.subr.bf16.mxu1 %v14788_v27  ;;  %v14864_v27 = vld [vmem:[#allocation15 + $0x6c8] ss:$16 sps:$4 sm:$0xff]  }
 0x9f7   :  { %11909 = vmatpush1.bf16.msra.mxu0 %v14783_v56  ;;  %v14869_v56 = vld [vmem:[#allocation15 + $0x4ac] ss:$16 sps:$4 sm:$0xff]  }
 0x9f8   :  { %11952 = vmatpush1.bf16.msra.mxu1 %v14786_v59  ;;  %11910 = vmatprep.subr.bf16.mxu0 %v14791_v16  ;;  %v14872_v59 = vld [vmem:[#allocation15 + $0x6ac] ss:$16 sps:$4 sm:$0xff]   ;;  %v14867_v16 = vld [vmem:[#allocation15 + $0x4a8] ss:$16 sps:$4 sm:$0xff]  }
 0x9f9   :  { %11953 = vmatprep.subr.bf16.mxu1 %v14794_v11  ;;  %v14875_v11 = vld [vmem:[#allocation15 + $0x48c] ss:$16 sps:$4 sm:$0xff]  }
 0x9fb   :  { %11911 = vmatpush1.bf16.msra.mxu0 %v14789_v48  ;;  %v14873_v48 = vld [vmem:[#allocation15 + $0x488] ss:$16 sps:$4 sm:$0xff]  }
 0x9fc   :  { %11954 = vmatpush1.bf16.msra.mxu1 %v14792_v6  ;;  %11912 = vmatprep.subr.bf16.mxu0 %v14797_v23  ;;  %v14881_v6 = vld [vmem:[#allocation15 + $0x46c] ss:$16 sps:$4 sm:$0xff]  }
 0x9fd   :  { %11955 = vmatprep.subr.bf16.mxu1 %v14800_v33  ;;  %v14884_v23 = vld [vmem:[#allocation15 + $0x66c] ss:$16 sps:$4 sm:$0xff]   ;;  %v14882_v33 = vld [vmem:[#allocation15 + $0x668] ss:$16 sps:$4 sm:$0xff]  }
 0x9ff   :  { %11913 = vmatpush1.bf16.msra.mxu0 %v14795_v0  ;;  %v14887_v0 = vld [vmem:[#allocation15 + $0x44c] ss:$16 sps:$4 sm:$0xff]  }
 0xa00   :  { %11956 = vmatpush1.bf16.msra.mxu1 %v14798_v47  ;;  %11914 = vmatprep.subr.bf16.mxu0 %v14803_v37  ;;  %v14890_v47 = vld [vmem:[#allocation15 + $0x64c] ss:$16 sps:$4 sm:$0xff]   ;;  %v14885_v37 = vld [vmem:[#allocation15 + $0x448] ss:$16 sps:$4 sm:$0xff]  }
 0xa01   :  { %11957 = vmatprep.subr.bf16.mxu1 %v14806_v29  ;;  %v14888_v29 = vld [vmem:[#allocation15 + $0x648] ss:$16 sps:$4 sm:$0xff]  }
 0xa03   :  { %11915 = vmatpush1.bf16.msra.mxu0 %v14801_v20  ;;  %v14893_v20 = vld [vmem:[#allocation15 + $0x42c] ss:$16 sps:$4 sm:$0xff]  }
 0xa04   :  { %11958 = vmatpush1.bf16.msra.mxu1 %v14804_v21  ;;  %11916 = vmatprep.subr.bf16.mxu0 %v14809_v7  ;;  %v14896_v21 = vld [vmem:[#allocation15 + $0x62c] ss:$16 sps:$4 sm:$0xff]   ;;  %v14891_v7 = vld [vmem:[#allocation15 + $0x428] ss:$16 sps:$4 sm:$0xff]  }
 0xa05   :  { %11959 = vmatprep.subr.bf16.mxu1 %v14812_v2  ;;  %v14894_v2 = vld [vmem:[#allocation15 + $0x628] ss:$16 sps:$4 sm:$0xff]  }
 0xa07   :  { %11917 = vmatpush2.bf16.msra.mxu0 %v14807_v4  ;;  %v14899_v4 = vld [vmem:[#allocation15 + $0x40c] ss:$16 sps:$4 sm:$0xff]  }
 0xa08   :  { %11960 = vmatpush2.bf16.msra.mxu1 %v14810_v14  ;;  %11918 = vmatprep.subr.bf16.mxu0 %v14815_v34  ;;  %v14902_v14 = vld [vmem:[#allocation15 + $0x60c] ss:$16 sps:$4 sm:$0xff]   ;;  %v14897_v34 = vld [vmem:[#allocation15 + $0x408] ss:$16 sps:$4 sm:$0xff]  }
 0xa09   :  { %11961 = vmatprep.subr.bf16.mxu1 %v14818_v57  ;;  %v14900_v57 = vld [vmem:[#allocation15 + $0x608] ss:$16 sps:$4 sm:$0xff]  }
 0xa0b   :  { %11919 = vmatpush2.bf16.msra.mxu0 %v14813_v51  ;;  %v14905_v51 = vld [vmem:[#allocation15 + $0x5ec] ss:$16 sps:$4 sm:$0xff]  }
 0xa0c   :  { %11962 = vmatpush2.bf16.msra.mxu1 %v14816_v30  ;;  %11920 = vmatprep.subr.bf16.mxu0 %v14821_v42  ;;  %v14908_v30 = vld [vmem:[#allocation15 + $0x7ec] ss:$16 sps:$4 sm:$0xff]   ;;  %v14903_v42 = vld [vmem:[#allocation15 + $0x5e8] ss:$16 sps:$4 sm:$0xff]  }
 0xa0d   :  { %11963 = vmatprep.subr.bf16.mxu1 %v14824_v9  ;;  %v14906_v9 = vld [vmem:[#allocation15 + $0x7e8] ss:$16 sps:$4 sm:$0xff]  }
 0xa0f   :  { %11921 = vmatpush2.bf16.msra.mxu0 %v14819_v54  ;;  %v14911_v54 = vld [vmem:[#allocation15 + $0x5cc] ss:$16 sps:$4 sm:$0xff]  }
 0xa10   :  { %11964 = vmatpush2.bf16.msra.mxu1 %v14822_v58  ;;  %11922 = vmatprep.subr.bf16.mxu0 %v14827_v61  ;;  %v14914_v58 = vld [vmem:[#allocation15 + $0x7cc] ss:$16 sps:$4 sm:$0xff]   ;;  %v14909_v61 = vld [vmem:[#allocation15 + $0x5c8] ss:$16 sps:$4 sm:$0xff]  }
 0xa11   :  { %11965 = vmatprep.subr.bf16.mxu1 %v14830_v35  ;;  %v14912_v35 = vld [vmem:[#allocation15 + $0x7c8] ss:$16 sps:$4 sm:$0xff]  }
 0xa13   :  { %11923 = vmatpush2.bf16.msra.mxu0 %v14825_v18  ;;  %v14917_v18 = vld [vmem:[#allocation15 + $0x5ac] ss:$16 sps:$4 sm:$0xff]  }
 0xa14   :  { %11966 = vmatpush2.bf16.msra.mxu1 %v14828_v22  ;;  %11924 = vmatprep.subr.bf16.mxu0 %v14833_v46  ;;  %v14920_v22 = vld [vmem:[#allocation15 + $0x7ac] ss:$16 sps:$4 sm:$0xff]   ;;  %v14915_v46 = vld [vmem:[#allocation15 + $0x5a8] ss:$16 sps:$4 sm:$0xff]  }
 0xa15   :  { %11967 = vmatprep.subr.bf16.mxu1 %v14836_v49  ;;  %v14918_v49 = vld [vmem:[#allocation15 + $0x7a8] ss:$16 sps:$4 sm:$0xff]  }
 0xa17   :  { %11925 = vmatpush2.bf16.msra.mxu0 %v14831_v25  ;;  %v14923_v25 = vld [vmem:[#allocation15 + $0x58c] ss:$16 sps:$4 sm:$0xff]  }
 0xa18   :  { %11968 = vmatpush2.bf16.msra.mxu1 %v14834_v12  ;;  %11926 = vmatprep.subr.bf16.mxu0 %v14839_v60  ;;  %v14926_v12 = vld [vmem:[#allocation15 + $0x78c] ss:$16 sps:$4 sm:$0xff]   ;;  %v14921_v60 = vld [vmem:[#allocation15 + $0x588] ss:$16 sps:$4 sm:$0xff]  }
 0xa19   :  { %11969 = vmatprep.subr.bf16.mxu1 %v14842_v8  ;;  %v14924_v8 = vld [vmem:[#allocation15 + $0x788] ss:$16 sps:$4 sm:$0xff]  }
 0xa1b   :  { %11927 = vmatpush2.bf16.msra.mxu0 %v14837_v15  ;;  %v14929_v15 = vld [vmem:[#allocation15 + $0x56c] ss:$16 sps:$4 sm:$0xff]  }
 0xa1c   :  { %11970 = vmatpush2.bf16.msra.mxu1 %v14840_v5  ;;  %11928 = vmatprep.subr.bf16.mxu0 %v14845_v40  ;;  %v14932_v5 = vld [vmem:[#allocation15 + $0x76c] ss:$16 sps:$4 sm:$0xff]   ;;  %v14927_v40 = vld [vmem:[#allocation15 + $0x568] ss:$16 sps:$4 sm:$0xff]  }
 0xa1d   :  { %11971 = vmatprep.subr.bf16.mxu1 %v14848_v38  ;;  %v14930_v38 = vld [vmem:[#allocation15 + $0x768] ss:$16 sps:$4 sm:$0xff]  }
 0xa1f   :  { %11929 = vmatpush2.bf16.msra.mxu0 %v14843_v55  ;;  %v14935_v55 = vld [vmem:[#allocation15 + $0x54c] ss:$16 sps:$4 sm:$0xff]  }
 0xa20   :  { %11972 = vmatpush2.bf16.msra.mxu1 %v14846_v3  ;;  %11930 = vmatprep.subr.bf16.mxu0 %v14851_v45  ;;  %v14938_v3 = vld [vmem:[#allocation15 + $0x74c] ss:$16 sps:$4 sm:$0xff]   ;;  %v14933_v45 = vld [vmem:[#allocation15 + $0x548] ss:$16 sps:$4 sm:$0xff]  }
 0xa21   :  { %11973 = vmatprep.subr.bf16.mxu1 %v14854_v62  ;;  %v14936_v62 = vld [vmem:[#allocation15 + $0x748] ss:$16 sps:$4 sm:$0xff]  }
 0xa23   :  { %11931 = vmatpush2.bf16.msra.mxu0 %v14849_v44  ;;  %v14941_v44 = vld [vmem:[#allocation15 + $0x52c] ss:$16 sps:$4 sm:$0xff]  }
 0xa24   :  { %11974 = vmatpush2.bf16.msra.mxu1 %v14852_v53  ;;  %11986 = vmatprep.subr.bf16.mxu0 %v14857_v24  ;;  %v14944_v53 = vld [vmem:[#allocation15 + $0x72c] ss:$16 sps:$4 sm:$0xff]   ;;  %v14939_v24 = vld [vmem:[#allocation15 + $0x528] ss:$16 sps:$4 sm:$0xff]  }
 0xa25   :  { %12029 = vmatprep.subr.bf16.mxu1 %v14860_v41  ;;  %v14942_v41 = vld [vmem:[#allocation15 + $0x728] ss:$16 sps:$4 sm:$0xff]  }
 0xa26   :  { %11933 = vmatmul.mubr.bf16.vlgmr.msra.gmra.mxu0 %v16847_v1  ;;  %v14870_v1 = vld [vmem:[#allocation15 + $0x6a8] ss:$16 sps:$4 sm:$0xff]  }
 0xa27   :  { %11976 = vmatmul.mubr.bf16.vlgmr.msra.gmra.mxu1 %v16849_v36  ;;  %11987 = vmatpush1.bf16.msra.mxu0 %v14855_v10  ;;  %v14878_v36 = vld [vmem:[#allocation15 + $0x68c] ss:$16 sps:$4 sm:$0xff]  }
 0xa28   :  { %12018 = vmatprep.mubr.bf16.mxu0 %v16859_v43  ;;  %12030 = vmatpush1.bf16.msra.mxu1 %v14858_v52  ;;  %v14876_v43 = vld [vmem:[#allocation15 + $0x688] ss:$16 sps:$4 sm:$0xff]   ;;  %v14947_v10 = vld [vmem:[#allocation15 + $0x50c] ss:$16 sps:$4 sm:$0xff]  }
 0xa29   :  { %12061 = vmatprep.mubr.bf16.mxu1 %v16864_v28  ;;  %11988 = vmatprep.subr.bf16.mxu0 %v14863_v13  ;;  %v14879_v28 = vld [vmem:[#allocation15 + $0x468] ss:$16 sps:$4 sm:$0xff]   ;;  %v14950_v52 = vld [vmem:[#allocation15 + $0x70c] ss:$16 sps:$4 sm:$0xff]  }
 0xa2a   :  { %12031 = vmatprep.subr.bf16.mxu1 %v14866_v31  ;;  %v14945_v13 = vld [vmem:[#allocation15 + $0x508] ss:$16 sps:$4 sm:$0xff]  }
 0xa2b   :  { %11989 = vmatpush1.bf16.msra.mxu0 %v14861_v63  ;;  %v14948_v31 = vld [vmem:[#allocation15 + $0x708] ss:$16 sps:$4 sm:$0xff]  }
 0xa2c   :  { %12032 = vmatpush1.bf16.msra.mxu1 %v14864_v27  ;;  %11990 = vmatprep.subr.bf16.mxu0 %v14869_v56 }
 0xa2d   :  { %12033 = vmatprep.subr.bf16.mxu1 %v14872_v59 }
 0xa2f   :  { %11991 = vmatpush1.bf16.msra.mxu0 %v14867_v16 }
 0xa30   :  { %12034 = vmatpush1.bf16.msra.mxu1 %v14870_v1  ;;  %11992 = vmatprep.subr.bf16.mxu0 %v14875_v11 }
 0xa31   :  { %12035 = vmatprep.subr.bf16.mxu1 %v14878_v36 }
 0xa33   :  { %11993 = vmatpush1.bf16.msra.mxu0 %v14873_v48 }
 0xa34   :  { %12036 = vmatpush1.bf16.msra.mxu1 %v14876_v43  ;;  %11994 = vmatprep.subr.bf16.mxu0 %v14881_v6 }
 0xa35   :  { %12037 = vmatprep.subr.bf16.mxu1 %v14884_v23 }
 0xa37   :  { %11995 = vmatpush1.bf16.msra.mxu0 %v14879_v28 }
 0xa38   :  { %12038 = vmatpush1.bf16.msra.mxu1 %v14882_v33  ;;  %11996 = vmatprep.subr.bf16.mxu0 %v14887_v0  ;;  %v10426_v0 = vld [vmem:[#allocation16] sm:$0xf] }
 0xa39   :  { %12039 = vmatprep.subr.bf16.mxu1 %v14890_v47  ;;  %v10435_v47 = vrot.slane %v10426_v0, %v17169_v32 }
 0xa3b   :  { %11997 = vmatpush1.bf16.msra.mxu0 %v14885_v37 }
 0xa3c   :  { %12040 = vmatpush1.bf16.msra.mxu1 %v14888_v29  ;;  %11998 = vmatprep.subr.bf16.mxu0 %v14893_v20 }
 0xa3d   :  { %12041 = vmatprep.subr.bf16.mxu1 %v14896_v21 }
 0xa3f   :  { %11999 = vmatpush1.bf16.msra.mxu0 %v14891_v7 }
 0xa40   :  { %12042 = vmatpush1.bf16.msra.mxu1 %v14894_v2  ;;  %12000 = vmatprep.subr.bf16.mxu0 %v14899_v4  ;;  %v10439_v4 = vrot.slane %v10426_v0, %v17172_v19 }
 0xa41   :  { %12043 = vmatprep.subr.bf16.mxu1 %v14902_v14 }
 0xa43   :  { %12001 = vmatpush1.bf16.msra.mxu0 %v14897_v34 }
 0xa44   :  { %12044 = vmatpush1.bf16.msra.mxu1 %v14900_v57  ;;  %12002 = vmatprep.subr.bf16.mxu0 %v14905_v51  ;;  %v10443_v51 = vrot.slane %v10426_v0, %v17170_v39 }
 0xa45   :  { %12045 = vmatprep.subr.bf16.mxu1 %v14908_v30 }
 0xa47   :  { %12003 = vmatpush2.bf16.msra.mxu0 %v14903_v42 }
 0xa48   :  { %12046 = vmatpush2.bf16.msra.mxu1 %v14906_v9  ;;  %12004 = vmatprep.subr.bf16.mxu0 %v14911_v54 }
 0xa49   :  { %12047 = vmatprep.subr.bf16.mxu1 %v14914_v58 }
 0xa4b   :  { %12005 = vmatpush2.bf16.msra.mxu0 %v14909_v61 }
 0xa4c   :  { %12048 = vmatpush2.bf16.msra.mxu1 %v14912_v35  ;;  %12006 = vmatprep.subr.bf16.mxu0 %v14917_v18 }
 0xa4d   :  { %12049 = vmatprep.subr.bf16.mxu1 %v14920_v22 }
 0xa4f   :  { %12007 = vmatpush2.bf16.msra.mxu0 %v14915_v46 }
 0xa50   :  { %12050 = vmatpush2.bf16.msra.mxu1 %v14918_v49  ;;  %12008 = vmatprep.subr.bf16.mxu0 %v14923_v25 }
 0xa51   :  { %12051 = vmatprep.subr.bf16.mxu1 %v14926_v12 }
 0xa53   :  { %12009 = vmatpush2.bf16.msra.mxu0 %v14921_v60 }
 0xa54   :  { %12052 = vmatpush2.bf16.msra.mxu1 %v14924_v8  ;;  %12010 = vmatprep.subr.bf16.mxu0 %v14929_v15 }
 0xa55   :  { %12053 = vmatprep.subr.bf16.mxu1 %v14932_v5 }
 0xa57   :  { %12011 = vmatpush2.bf16.msra.mxu0 %v14927_v40 }
 0xa58   :  { %12054 = vmatpush2.bf16.msra.mxu1 %v14930_v38  ;;  %12012 = vmatprep.subr.bf16.mxu0 %v14935_v55 }
 0xa59   :  { %12055 = vmatprep.subr.bf16.mxu1 %v14938_v3 }
 0xa5b   :  { %12013 = vmatpush2.bf16.msra.mxu0 %v14933_v45 }
 0xa5c   :  { %12056 = vmatpush2.bf16.msra.mxu1 %v14936_v62  ;;  %12014 = vmatprep.subr.bf16.mxu0 %v14941_v44 }
 0xa5d   :  { %12057 = vmatprep.subr.bf16.mxu1 %v14944_v53 }
 0xa5f   :  { %12015 = vmatpush2.bf16.msra.mxu0 %v14939_v24 }
 0xa60   :  { %12058 = vmatpush2.bf16.msra.mxu1 %v14942_v41  ;;  %12016 = vmatprep.subr.bf16.mxu0 %v14947_v10 }
 0xa61   :  { %12059 = vmatprep.subr.bf16.mxu1 %v14950_v52 }
 0xa63   :  { %12017 = vmatpush2.bf16.msra.mxu0 %v14945_v13 }
 0xa64   :  { %12060 = vmatpush2.bf16.msra.mxu1 %v14948_v31 }
 0xa66   :  { %12019 = vmatmul.mubr.bf16.vlgmr.msra.gmra.mxu0 %v16869_v26  ;;  %v11762_v63 = vpop.f32.mrf.mxu0  ;;  %v11805_v27 = vpop.f32.mrf.mxu1 }
 0xa67   :  { %12062 = vmatmul.mubr.bf16.vlgmr.msra.gmra.mxu1 %v16871_v17  ;;  %v10431_v17 = vrot.slane %v10426_v0, %v17171_v50 }
 0xa68   :  { %v11764_v56 = vpop.f32.mrf.mxu0  ;;  %v11807_v59 = vpop.f32.mrf.mxu1 }
 0xa69   :  { %v11765_v21 = vadd.f32 %v11764_v56, %v10435_v47  ;;  %v11763_v7 = vadd.f32 %v11762_v63, %v10431_v17 }
 0xa6a   :  { %v11766_v16 = vpop.f32.mrf.mxu0  ;;  %v11809_v1 = vpop.f32.mrf.mxu1 }
 0xa6b   :  { %v11808_v34 = vadd.f32 %v11807_v59, %v11765_v21  ;;  %v11806_v30 = vadd.f32 %v11805_v27, %v11763_v7  ;;  %v11767_v42 = vadd.f32 %v11766_v16, %v10431_v17  ;;  %v14956_v17 = vld [vmem:[#allocation21 + $0x174] ss:$8 sps:$4 sm:$0xff]   ;;  %v14957_v21 = vld [vmem:[#allocation21 + $0x60] ss:$8 sps:$4 sm:$0xff]  }
 0xa6c   :  { %v11768_v11 = vpop.f32.mrf.mxu0  ;;  %v11811_v36 = vpop.f32.mrf.mxu1  ;;  %12643 = vmatprep.subr.bf16.mxu1 %v14956_v17  ;;  %v14960_v7 = vld [vmem:[#allocation21 + $0x160] ss:$8 sps:$4 sm:$0xff]   ;;  %v15007_v17 = vld [vmem:[#allocation21 + $0xe4] ss:$8 sps:$4 sm:$0xff]  }
 0xa6d   :  { %v11769_v57 = vadd.f32 %v11768_v11, %v10435_v47  ;;  %v11810_v46 = vadd.f32 %v11809_v1, %v11767_v42  ;;  %v14951_v47 = vld [vmem:[#allocation21 + $0x70] ss:$8 sps:$4 sm:$0xff]   ;;  %v14972_v42 = vld [vmem:[#allocation21 + $0x140] ss:$8 sps:$4 sm:$0xff]  }
 0xa6f   :  { %v11812_v18 = vadd.f32 %v11811_v36, %v11769_v57  ;;  %v14971_v57 = vld [vmem:[#allocation21 + $0x44] ss:$8 sps:$4 sm:$0xff]  }
 0xaa6   :  { %v11848_v48 = vpop.f32.mrf.mxu0  ;;  %v11891_v43 = vpop.f32.mrf.mxu1 }
 0xaa7   :  { %v11849_v35 = vadd.f32 %v11848_v48, %v11806_v30  ;;  %v14969_v30 = vld [vmem:[#allocation21 + $0x40] ss:$8 sps:$4 sm:$0xff]  }
 0xaa8   :  { %v11850_v6 = vpop.f32.mrf.mxu0  ;;  %v11893_v23 = vpop.f32.mrf.mxu1 }
 0xaa9   :  { %v11851_v9 = vadd.f32 %v11850_v6, %v11808_v34  ;;  %v16889_v5 = vadd.f32 %v11891_v43, %v11849_v35  ;;  %v14966_v34 = vld [vmem:[#allocation21 + $0x150] ss:$8 sps:$4 sm:$0xff]   ;;  %v14983_v35 = vld [vmem:[#allocation21 + $0x24] ss:$8 sps:$4 sm:$0xff]  }
 0xaaa   :  { %v11852_v28 = vpop.f32.mrf.mxu0  ;;  %v11895_v33 = vpop.f32.mrf.mxu1 }
 0xaab   :  { %v16887_v49 = vadd.f32 %v11893_v23, %v11851_v9  ;;  %v11853_v40 = vadd.f32 %v11852_v28, %v11810_v46  ;;  %v14977_v9 = vld [vmem:[#allocation21 + $0x34] ss:$8 sps:$4 sm:$0xff]   ;;  %v14984_v46 = vld [vmem:[#allocation21 + $0x120] ss:$8 sps:$4 sm:$0xff]  }
 0xaac   :  { %v11854_v26 = vpop.f32.mrf.mxu0  ;;  %v11897_v37 = vpop.f32.mrf.mxu1 }
 0xaad   :  { %v11855_v12 = vadd.f32 %v11854_v26, %v11812_v18  ;;  %v12072_v44 = vadd.f32 %v16887_v49, %v16889_v5  ;;  %v16897_v31 = vadd.f32 %v11895_v33, %v11853_v40  ;;  %v14953_v26 = vld [vmem:[#allocation21 + $0x74] ss:$8 sps:$4 sm:$0xff]   ;;  %v14986_v18 = vld [vmem:[#allocation21 + $0x124] ss:$8 sps:$4 sm:$0xff]  }
 0xaae   :  { %12600 = vmatprep.subr.bf16.mxu0 %v14953_v26  ;;  %v14998_v40 = vld [vmem:[#allocation21 + $0x104] ss:$8 sps:$4 sm:$0xff]   ;;  %v15004_v26 = vld [vmem:[#allocation21 + $0x1f4] ss:$8 sps:$4 sm:$0xff]  }
 0xaaf   :  { %v16893_v24 = vadd.f32 %v11897_v37, %v11855_v12  ;;  %v14954_v37 = vld [vmem:[#allocation21 + $0x170] ss:$8 sps:$4 sm:$0xff]   ;;  %12601 = vmatpush1.bf16.msra.mxu0 %v14951_v47  ;;  %v14992_v12 = vld [vmem:[#allocation21 + $0x114] ss:$8 sps:$4 sm:$0xff]  }
 0xab0   :  { %12644 = vmatpush1.bf16.msra.mxu1 %v14954_v37  ;;  %v15002_v47 = vld [vmem:[#allocation21 + $0x1f0] ss:$8 sps:$4 sm:$0xff]   ;;  %v15005_v37 = vld [vmem:[#allocation21 + $0xe0] ss:$8 sps:$4 sm:$0xff]  }
 0xab1   :  { %v12077_v36 = vadd.f32 %v16893_v24, %v16897_v31 }
 0xae6   :  { %v11934_v29 = vpop.f32.mrf.mxu0 }
 0xae7   :  { %v11977_v20 = vpop.f32.mrf.mxu1  ;;  %v11935_v58 = vadd.f32 %v11934_v29, %v10439_v4  ;;  %v14959_v29 = vld [vmem:[#allocation21 + $0x64] ss:$8 sps:$4 sm:$0xff]  }
 0xae8   :  { %v11936_v2 = vpop.f32.mrf.mxu0  ;;  %12602 = vmatprep.subr.bf16.mxu0 %v14959_v29  ;;  %v15008_v29 = vld [vmem:[#allocation21 + $0x1e0] ss:$8 sps:$4 sm:$0xff]  }
 0xae9   :  { %v11979_v14 = vpop.f32.mrf.mxu1  ;;  %v11937_v22 = vadd.f32 %v11936_v2, %v10443_v51  ;;  %v11978_v60 = vadd.f32 %v11977_v20, %v11935_v58  ;;  %v14962_v20 = vld [vmem:[#allocation21 + $0x164] ss:$8 sps:$4 sm:$0xff]   ;;  %v14965_v2 = vld [vmem:[#allocation21 + $0x54] ss:$8 sps:$4 sm:$0xff]   ;;  %12603 = vmatpush1.bf16.msra.mxu0 %v14957_v21  ;;  %v14975_v58 = vld [vmem:[#allocation21 + $0x30] ss:$8 sps:$4 sm:$0xff]  }
 0xaea   :  { %v11938_v54 = vpop.f32.mrf.mxu0  ;;  %12645 = vmatprep.subr.bf16.mxu1 %v14962_v20  ;;  %12604 = vmatprep.subr.bf16.mxu0 %v14965_v2  ;;  %v15010_v20 = vld [vmem:[#allocation21 + $0x1e4] ss:$8 sps:$4 sm:$0xff]   ;;  %v15013_v21 = vld [vmem:[#allocation21 + $0xd4] ss:$8 sps:$4 sm:$0xff]   ;;  %v15011_v2 = vld [vmem:[#allocation21 + $0xd0] ss:$8 sps:$4 sm:$0xff]  }
 0xaeb   :  { %v11981_v61 = vpop.f32.mrf.mxu1  ;;  %v11939_v8 = vadd.f32 %v11938_v54, %v10439_v4  ;;  %v11980_v55 = vadd.f32 %v11979_v14, %v11937_v22  ;;  %v14968_v4 = vld [vmem:[#allocation21 + $0x154] ss:$8 sps:$4 sm:$0xff]   ;;  %v14963_v14 = vld [vmem:[#allocation21 + $0x50] ss:$8 sps:$4 sm:$0xff]   ;;  %12646 = vmatpush1.bf16.msra.mxu1 %v14960_v7  ;;  %v14981_v22 = vld [vmem:[#allocation21 + $0x20] ss:$8 sps:$4 sm:$0xff]  }
 0xaec   :  { %v11940_v25 = vpop.f32.mrf.mxu0  ;;  %12647 = vmatprep.subr.bf16.mxu1 %v14968_v4  ;;  %v14980_v54 = vld [vmem:[#allocation21 + $0x134] ss:$8 sps:$4 sm:$0xff]   ;;  %v15014_v4 = vld [vmem:[#allocation21 + $0x1d0] ss:$8 sps:$4 sm:$0xff]  }
 0xaed   :  { %v11983_v15 = vpop.f32.mrf.mxu1  ;;  %v11941_v3 = vadd.f32 %v11940_v25, %v10443_v51  ;;  %v11982_v41 = vadd.f32 %v11981_v61, %v11939_v8  ;;  %v14974_v51 = vld [vmem:[#allocation21 + $0x144] ss:$8 sps:$4 sm:$0xff]   ;;  %12605 = vmatpush1.bf16.msra.mxu0 %v14963_v14  ;;  %v14978_v61 = vld [vmem:[#allocation21 + $0x130] ss:$8 sps:$4 sm:$0xff]   ;;  %v14989_v25 = vld [vmem:[#allocation21 + $0x14] ss:$8 sps:$4 sm:$0xff]  }
 0xaee   :  { %12606 = vmatprep.subr.bf16.mxu0 %v14971_v57  ;;  %v14990_v8 = vld [vmem:[#allocation21 + $0x110] ss:$8 sps:$4 sm:$0xff]   ;;  %v15016_v7 = vld [vmem:[#allocation21 + $0x1d4] ss:$8 sps:$4 sm:$0xff]   ;;  %v15019_v14 = vld [vmem:[#allocation21 + $0xc4] ss:$8 sps:$4 sm:$0xff]  }
 0xaef   :  { %v11984_v27 = vadd.f32 %v11983_v15, %v11941_v3  ;;  %12648 = vmatpush1.bf16.msra.mxu1 %v14966_v34  ;;  %v14995_v15 = vld [vmem:[#allocation21 + $0x4] ss:$8 sps:$4 sm:$0xff]   ;;  %v15017_v57 = vld [vmem:[#allocation21 + $0xc0] ss:$8 sps:$4 sm:$0xff]  }
 0xaf0   :  { %12649 = vmatprep.subr.bf16.mxu1 %v14974_v51  ;;  %v15022_v34 = vld [vmem:[#allocation21 + $0x1c4] ss:$8 sps:$4 sm:$0xff]   ;;  %v15020_v51 = vld [vmem:[#allocation21 + $0x1c0] ss:$8 sps:$4 sm:$0xff]  }
 0xaf1   :  { %12607 = vmatpush1.bf16.msra.mxu0 %v14969_v30  ;;  %v15025_v30 = vld [vmem:[#allocation21 + $0xb4] ss:$8 sps:$4 sm:$0xff]  }
 0xaf2   :  { %12608 = vmatprep.subr.bf16.mxu0 %v14977_v9  ;;  %v15023_v9 = vld [vmem:[#allocation21 + $0xb0] ss:$8 sps:$4 sm:$0xff]  }
 0xaf3   :  { %12650 = vmatpush1.bf16.msra.mxu1 %v14972_v42  ;;  %v15028_v42 = vld [vmem:[#allocation21 + $0x1b4] ss:$8 sps:$4 sm:$0xff]  }
 0xaf4   :  { %12651 = vmatprep.subr.bf16.mxu1 %v14980_v54  ;;  %v15026_v54 = vld [vmem:[#allocation21 + $0x1b0] ss:$8 sps:$4 sm:$0xff]  }
 0xaf5   :  { %12609 = vmatpush1.bf16.msra.mxu0 %v14975_v58  ;;  %v15031_v58 = vld [vmem:[#allocation21 + $0xa4] ss:$8 sps:$4 sm:$0xff]  }
 0xaf6   :  { %12610 = vmatprep.subr.bf16.mxu0 %v14983_v35  ;;  %v15029_v35 = vld [vmem:[#allocation21 + $0xa0] ss:$8 sps:$4 sm:$0xff]  }
 0xaf7   :  { %12652 = vmatpush1.bf16.msra.mxu1 %v14978_v61  ;;  %v15034_v61 = vld [vmem:[#allocation21 + $0x1a4] ss:$8 sps:$4 sm:$0xff]  }
 0xaf8   :  { %12653 = vmatprep.subr.bf16.mxu1 %v14986_v18  ;;  %v15032_v18 = vld [vmem:[#allocation21 + $0x1a0] ss:$8 sps:$4 sm:$0xff]  }
 0xaf9   :  { %12611 = vmatpush1.bf16.msra.mxu0 %v14981_v22  ;;  %v15037_v22 = vld [vmem:[#allocation21 + $0x94] ss:$8 sps:$4 sm:$0xff]  }
 0xafa   :  { %12612 = vmatprep.subr.bf16.mxu0 %v14989_v25  ;;  %v15035_v25 = vld [vmem:[#allocation21 + $0x90] ss:$8 sps:$4 sm:$0xff]  }
 0xafb   :  { %12654 = vmatpush1.bf16.msra.mxu1 %v14984_v46  ;;  %v15040_v46 = vld [vmem:[#allocation21 + $0x194] ss:$8 sps:$4 sm:$0xff]  }
 0xafc   :  { %12655 = vmatprep.subr.bf16.mxu1 %v14992_v12  ;;  %v15038_v12 = vld [vmem:[#allocation21 + $0x190] ss:$8 sps:$4 sm:$0xff]  }
 0xaff   :  { %12656 = vmatpush1.bf16.msra.mxu1 %v14990_v8  ;;  %v15046_v8 = vld [vmem:[#allocation21 + $0x184] ss:$8 sps:$4 sm:$0xff]  }
 0xb00   :  { %12657 = vmatprep.subr.bf16.mxu1 %v14998_v40  ;;  %v15044_v40 = vld [vmem:[#allocation21 + $0x180] ss:$8 sps:$4 sm:$0xff]  }
 0xb26   :  { %v12020_v38 = vpop.f32.mrf.mxu0 }
 0xb27   :  { %v12021_v45 = vadd.f32 %v12020_v38, %v11978_v60  ;;  %v12063_v62 = vpop.f32.mrf.mxu1  ;;  %v14987_v60 = vld [vmem:[#allocation21 + $0x10] ss:$8 sps:$4 sm:$0xff]   ;;  %v14993_v38 = vld [vmem:[#allocation21] ss:$8 sps:$4 sm:$0xff]  }
 0xb28   :  { %v12022_v53 = vpop.f32.mrf.mxu0  ;;  %12613 = vmatpush1.bf16.msra.mxu0 %v14987_v60  ;;  %v15043_v60 = vld [vmem:[#allocation21 + $0x84] ss:$8 sps:$4 sm:$0xff]  }
 0xb29   :  { %v16895_v10 = vadd.f32 %v12063_v62, %v12021_v45  ;;  %v12023_v52 = vadd.f32 %v12022_v53, %v11980_v55  ;;  %v12065_v13 = vpop.f32.mrf.mxu1  ;;  %12614 = vmatprep.subr.bf16.mxu0 %v14995_v15  ;;  %v14996_v55 = vld [vmem:[#allocation21 + $0x100] ss:$8 sps:$4 sm:$0xff]  }
 0xb2a   :  { %v12024_v63 = vpop.f32.mrf.mxu0  ;;  %12658 = vmatpush1.bf16.msra.mxu1 %v14996_v55  ;;  %v15041_v15 = vld [vmem:[#allocation21 + $0x80] ss:$8 sps:$4 sm:$0xff]  }
 0xb2b   :  { %v12073_v56 = vadd.f32 %v12072_v44, %v16895_v10  ;;  %v16900_v59 = vadd.f32 %v12065_v13, %v12023_v52  ;;  %v12025_v16 = vadd.f32 %v12024_v63, %v11982_v41  ;;  %v12067_v1 = vpop.f32.mrf.mxu1  ;;  %12659 = vmatprep.subr.bf16.mxu1 %v15004_v26 }
 0xb2c   :  { %v12026_v11 = vpop.f32.mrf.mxu0  ;;  %12615 = vmatpush1.bf16.msra.mxu0 %v14993_v38 }
 0xb2d   :  { %v16904_v48 = vadd.f32 %v12067_v1, %v12025_v16  ;;  %v12027_v43 = vadd.f32 %v12026_v11, %v11984_v27  ;;  %v12074_v6 = vadd.f32 %v12073_v56, %v16900_v59  ;;  %v12069_v23 = vpop.f32.mrf.mxu1 }
 0xb2e   :  { %12660 = vmatpush2.bf16.msra.mxu1 %v15002_v47 }
 0xb2f   :  { %v12078_v28 = vadd.f32 %v12077_v36, %v16904_v48  ;;  %v16908_v33 = vadd.f32 %v12069_v23, %v12027_v43  ;;  %12075 = vadd.xlane.f32.xlu0 %v12074_v6  ;;  %12661 = vmatprep.subr.bf16.mxu1 %v15010_v20 }
 0xb31   :  { %v12079_v0 = vadd.f32 %v12078_v28, %v16908_v33 }
 0xb32   :  { %12662 = vmatpush2.bf16.msra.mxu1 %v15008_v29 }
 0xb33   :  { %12080 = vadd.xlane.f32.xlu1 %v12079_v0  ;;  %v15001_v0 = vld [vmem:[#allocation21 + $0xf4] ss:$8 sps:$4 sm:$0xff]   ;;  %12663 = vmatprep.subr.bf16.mxu1 %v15016_v7 }
 0xb34   :  { %12616 = vmatprep.subr.bf16.mxu0 %v15001_v0 }
 0xb36   :  { %12664 = vmatpush2.bf16.msra.mxu1 %v15014_v4 }
 0xb37   :  { %12665 = vmatprep.subr.bf16.mxu1 %v15022_v34 }
 0xb3a   :  { %12666 = vmatpush2.bf16.msra.mxu1 %v15020_v51 }
 0xb3b   :  { %12667 = vmatprep.subr.bf16.mxu1 %v15028_v42 }
 0xb3e   :  { %12668 = vmatpush2.bf16.msra.mxu1 %v15026_v54 }
 0xb3f   :  { %12669 = vmatprep.subr.bf16.mxu1 %v15034_v61 }
 0xb42   :  { %12670 = vmatpush2.bf16.msra.mxu1 %v15032_v18 }
 0xb43   :  { %12671 = vmatprep.subr.bf16.mxu1 %v15040_v46 }
 0xb46   :  { %12672 = vmatpush2.bf16.msra.mxu1 %v15038_v12 }
 0xb47   :  { %12673 = vmatprep.subr.bf16.mxu1 %v15046_v8 }
 0xb4a   :  { %12674 = vmatpush2.bf16.msra.mxu1 %v15044_v40 }
 0xbb8   :  { %v12076_v3 = vpop.xlane.xlu0 %12075 }
 0xbb9   :  { %v12082_v45 = vmul.f32 0.001953125, %v12076_v3 }
 0xbbb   :  { %v16912_v62 = vsub.f32 %v16889_v5, %v12082_v45  ;;  %v16915_v44 = vsub.f32 %v16887_v49, %v12082_v45  ;;  %v16918_v53 = vsub.f32 %v16895_v10, %v12082_v45  ;;  %v16921_v52 = vsub.f32 %v16900_v59, %v12082_v45 }
 0xbbc   :  { %v12081_v41 = vpop.xlane.xlu1 %12080 }
 0xbbd   :  { %v12083_v13 = vmul.f32 0.001953125, %v12081_v41  ;;  %v12092_v63 = vmul.f32 %v16912_v62, %v16912_v62  ;;  %v12093_v27 = vmul.f32 %v16915_v44, %v16915_v44  ;;  %v12094_v5 = vmul.f32 %v16918_v53, %v16918_v53 }
 0xbbe   :  { %v12095_v16 = vmul.f32 %v16921_v52, %v16921_v52 }
 0xbbf   :  { %v16930_v49 = vsub.f32 %v16897_v31, %v12083_v13  ;;  %v16933_v10 = vsub.f32 %v16893_v24, %v12083_v13  ;;  %v12100_v56 = vadd.f32 %v12093_v27, %v12092_v63  ;;  %v16936_v59 = vsub.f32 %v16904_v48, %v12083_v13  ;;  %v12124_v63 = vld [vmem:[#allocation18] sm:$0xf]  ;;  %v12154_v27 = vld [vmem:[#allocation19] sm:$0xf] }
 0xbc0   :  { %v16941_v11 = vsub.f32 %v16908_v33, %v12083_v13  ;;  %v14999_v33 = vld [vmem:[#allocation21 + $0xf0] ss:$8 sps:$4 sm:$0xff]  }
 0xbc1   :  { %v12101_v1 = vadd.f32 %v12100_v56, %v12094_v5  ;;  %v12096_v36 = vmul.f32 %v16930_v49, %v16930_v49  ;;  %v12097_v31 = vmul.f32 %v16933_v10, %v16933_v10  ;;  %v12098_v24 = vmul.f32 %v16936_v59, %v16936_v59  ;;  %12617 = vmatpush2.bf16.msra.mxu0 %v14999_v33 }
 0xbc2   :  { %v12099_v48 = vmul.f32 %v16941_v11, %v16941_v11  ;;  %12618 = vmatprep.subr.bf16.mxu0 %v15007_v17  ;;  %v12133_v5 = vrot.slane %v12124_v63, %v17169_v32  ;;  %v12141_v56 = vrot.slane %v12124_v63, %v17170_v39  ;;  %v12167_v33 = vrot.slane %v12154_v27, %v17172_v19 }
 0xbc3   :  { %v12102_v43 = vadd.f32 %v12101_v1, %v12095_v16  ;;  %v12105_v6 = vadd.f32 %v12097_v31, %v12096_v36  ;;  %v12129_v16 = vrot.slane %v12124_v63, %v17171_v50  ;;  %v12137_v1 = vrot.slane %v12124_v63, %v17172_v19 }
 0xbc4   :  { %v12163_v31 = vrot.slane %v12154_v27, %v17169_v32 }
 0xbc5   :  { %12103 = vadd.xlane.f32.xlu0 %v12102_v43  ;;  %v12106_v23 = vadd.f32 %v12105_v6, %v12098_v24  ;;  %12619 = vmatpush2.bf16.msra.mxu0 %v15005_v37  ;;  %v12171_v43 = vrot.slane %v12154_v27, %v17170_v39 }
 0xbc6   :  { %12620 = vmatprep.subr.bf16.mxu0 %v15013_v21 }
 0xbc7   :  { %v12107_v28 = vadd.f32 %v12106_v23, %v12099_v48 }
 0xbc9   :  { %12108 = vadd.xlane.f32.xlu1 %v12107_v28  ;;  %12621 = vmatpush2.bf16.msra.mxu0 %v15011_v2  ;;  %v12159_v28 = vrot.slane %v12154_v27, %v17171_v50 }
 0xbca   :  { %12622 = vmatprep.subr.bf16.mxu0 %v15019_v14 }
 0xbcd   :  { %12623 = vmatpush2.bf16.msra.mxu0 %v15017_v57 }
 0xbce   :  { %12624 = vmatprep.subr.bf16.mxu0 %v15025_v30 }
 0xbd1   :  { %12625 = vmatpush2.bf16.msra.mxu0 %v15023_v9 }
 0xbd2   :  { %12626 = vmatprep.subr.bf16.mxu0 %v15031_v58 }
 0xbd5   :  { %12627 = vmatpush2.bf16.msra.mxu0 %v15029_v35 }
 0xbd6   :  { %12628 = vmatprep.subr.bf16.mxu0 %v15037_v22 }
 0xbd9   :  { %12629 = vmatpush2.bf16.msra.mxu0 %v15035_v25 }
 0xbda   :  { %12630 = vmatprep.subr.bf16.mxu0 %v15043_v60 }
 0xbdd   :  { %12631 = vmatpush2.bf16.msra.mxu0 %v15041_v15 }
 0xc4e   :  { %v12104_v38 = vpop.xlane.xlu0 %12103 }
 0xc4f   :  { %v12110_v55 = vmul.f32 0.001953125, %v12104_v38  ;;  %v12268_v38 = vld [vmem:[#allocation22] sm:$0x3] }
 0xc51   :  { %v12112_v3 = vadd.f32 1e-05, %v12110_v55  ;;  %v12273_v55 = vrot.slane %v12268_v38, %v17171_v50 }
 0xc52   :  { %v12109_v45 = vpop.xlane.xlu1 %12108 }
 0xc53   :  { %15071 = vrsqrt.f32 %v12112_v3  ;;  %v12111_v41 = vmul.f32 0.001953125, %v12109_v45  ;;  %v12277_v3 = vrot.slane %v12268_v38, %v17169_v32 }
 0xc55   :  { %v12113_v13 = vadd.f32 1e-05, %v12111_v41 }
 0xc57   :  { %15073 = vrsqrt.f32 %v12113_v13 }
 0xc60   :  { %v15072_v36 = vpop.eup %15071 }
 0xc61   :  { %v12117_v24 = vmul.f32 %v15072_v36, %v16915_v44  ;;  %v12119_v6 = vmul.f32 %v15072_v36, %v16921_v52  ;;  %v12116_v48 = vmul.f32 %v15072_v36, %v16912_v62  ;;  %v12118_v23 = vmul.f32 %v15072_v36, %v16918_v53 }
 0xc63   :  { %v12147_v0 = vmul.f32 %v12133_v5, %v12117_v24  ;;  %v12149_v47 = vmul.f32 %v12141_v56, %v12119_v6  ;;  %v12146_v26 = vmul.f32 %v12129_v16, %v12116_v48  ;;  %v12148_v37 = vmul.f32 %v12137_v1, %v12118_v23 }
 0xc64   :  { %v15074_v17 = vpop.eup %15073 }
 0xc65   :  { %v12121_v29 = vmul.f32 %v15074_v17, %v16933_v10  ;;  %v12177_v39 = vadd.f32 %v12163_v31, %v12147_v0  ;;  %v12123_v44 = vmul.f32 %v15074_v17, %v16941_v11  ;;  %v12179_v20 = vadd.f32 %v12171_v43, %v12149_v47 }
 0xc66   :  { %v12120_v52 = vmul.f32 %v15074_v17, %v16930_v49  ;;  %v12176_v62 = vadd.f32 %v12159_v28, %v12146_v26  ;;  %v12122_v53 = vmul.f32 %v15074_v17, %v16936_v59  ;;  %v12178_v21 = vadd.f32 %v12167_v33, %v12148_v37 }
 0xc67   :  { %v12151_v7 = vmul.f32 %v12133_v5, %v12121_v29  ;;  %v12153_v2 = vmul.f32 %v12141_v56, %v12123_v44  ;;  %v12185_v34 = vmul.f32 0.2, %v12177_v39  ;;  %v12187_v51 = vmul.f32 0.2, %v12179_v20 }
 0xc68   :  { %v12150_v19 = vmul.f32 %v12129_v16, %v12120_v52  ;;  %v12152_v4 = vmul.f32 %v12137_v1, %v12122_v53  ;;  %v12184_v10 = vmul.f32 0.2, %v12176_v62  ;;  %v12186_v9 = vmul.f32 0.2, %v12178_v21 }
 0xc69   :  { %v12181_v14 = vadd.f32 %v12163_v31, %v12151_v7  ;;  %v12183_v57 = vadd.f32 %v12171_v43, %v12153_v2  ;;  %v12193_v61 = vmax.f32 %v12177_v39, %v12185_v34  ;;  %v12195_v59 = vmax.f32 %v12179_v20, %v12187_v51  ;;  %v15047_v2 = vld [vmem:[#allocation27 + $0x78] sm:$0xff]   ;;  %v15051_v34 = vld [vmem:[#allocation27 + $0x68] sm:$0xff]   ;;  %v15053_v51 = vld [vmem:[#allocation27 + $0x60] sm:$0xff]  }
 0xc6a   :  { %v12180_v30 = vadd.f32 %v12159_v28, %v12150_v19  ;;  %v12182_v42 = vadd.f32 %v12167_v33, %v12152_v4  ;;  %v12192_v22 = vmax.f32 %v12176_v62, %v12184_v10  ;;  %v12194_v25 = vmax.f32 %v12178_v21, %v12186_v9  ;;  %14515 = vmatprep.subr.bf16.mxu0 %v15047_v2  ;;  %v15048_v19 = vld [vmem:[#allocation27 + $0x38] sm:$0xff]   ;;  %v15049_v4 = vld [vmem:[#allocation27 + $0x70] sm:$0xff]  }
 0xc6b   :  { %v12189_v11 = vmul.f32 0.2, %v12181_v14  ;;  %v12191_v54 = vmul.f32 0.2, %v12183_v57  ;;  %v15055_v10 = vld [vmem:[#allocation27 + $0x58] sm:$0xff]   ;;  %v15057_v9 = vld [vmem:[#allocation27 + $0x50] sm:$0xff]  }
 0xc6c   :  { %v12188_v58 = vmul.f32 0.2, %v12180_v30  ;;  %v12190_v49 = vmul.f32 0.2, %v12182_v42 }
 0xc6d   :  { %v12197_v35 = vmax.f32 %v12181_v14, %v12189_v11  ;;  %v12199_v18 = vmax.f32 %v12183_v57, %v12191_v54  ;;  %v15050_v14 = vld [vmem:[#allocation27 + $0x30] sm:$0xff]   ;;  %v15052_v57 = vld [vmem:[#allocation27 + $0x28] sm:$0xff]  }
 0xc6e   :  { %v12196_v46 = vmax.f32 %v12180_v30, %v12188_v58  ;;  %v12198_v12 = vmax.f32 %v12182_v42, %v12190_v49  ;;  %v15054_v30 = vld [vmem:[#allocation27 + $0x20] sm:$0xff]   ;;  %v15056_v42 = vld [vmem:[#allocation27 + $0x18] sm:$0xff]   ;;  %v15058_v11 = vld [vmem:[#allocation27 + $0x10] sm:$0xff]  }
 0xc6f   :  { %v12201_v60 = vpack.c.bf16 %v12197_v35, %v12193_v61  ;;  %v12203_v8 = vpack.c.bf16 %v12199_v18, %v12195_v59  ;;  %v15059_v54 = vld [vmem:[#allocation27 + $0x48] sm:$0xff]   ;;  %v15061_v49 = vld [vmem:[#allocation27 + $0x40] sm:$0xff]  }
 0xc70   :  { %v12200_v15 = vpack.c.bf16 %v12196_v46, %v12192_v22  ;;  %v12202_v40 = vpack.c.bf16 %v12198_v12, %v12194_v25  ;;  %v15060_v58 = vld [vmem:[#allocation27 + $0x8] sm:$0xff]   ;;  %v15062_v61 = vld [vmem:[#allocation27] sm:$0xff]   ;;  %v12718_v12 = vld [vmem:[#allocation24] sm:$0x3] }
 0xc71   :  { %12632 = vmatprep.mubr.bf16.mxu0 %v12201_v60  ;;  %12675 = vmatprep.mubr.bf16.mxu1 %v12203_v8  ;;  %v12734_v60 = vld [vmem:[#allocation25] sm:$0x3]  ;;  %v12723_v8 = vrot.slane %v12718_v12, %v17171_v50 }
 0xc72   :  { %12633 = vmatmul.mubr.bf16.vlgmr.msra.gmra.mxu0 %v12200_v15  ;;  %12676 = vmatmul.mubr.bf16.vlgmr.msra.gmra.mxu1 %v12202_v40  ;;  %v12727_v15 = vrot.slane %v12718_v12, %v17169_v32 }
 0xc73   :  { %14516 = vmatpush3.bf16.msra.mxu0 %v15048_v19 }
 0xc74   :  { %14517 = vmatprep.subr.bf16.mxu0 %v15049_v4 }
 0xc77   :  { %14518 = vmatpush3.bf16.msra.mxu0 %v15050_v14 }
 0xc78   :  { %14519 = vmatprep.subr.bf16.mxu0 %v15051_v34 }
 0xc7b   :  { %14520 = vmatpush3.bf16.msra.mxu0 %v15052_v57 }
 0xc7c   :  { %14521 = vmatprep.subr.bf16.mxu0 %v15053_v51 }
 0xc7f   :  { %14522 = vmatpush3.bf16.msra.mxu0 %v15054_v30 }
 0xc80   :  { %14523 = vmatprep.subr.bf16.mxu0 %v15055_v10 }
 0xc83   :  { %14524 = vmatpush3.bf16.msra.mxu0 %v15056_v42 }
 0xc84   :  { %14525 = vmatprep.subr.bf16.mxu0 %v15057_v9 }
 0xc87   :  { %14526 = vmatpush3.bf16.msra.mxu0 %v15058_v11 }
 0xc88   :  { %14527 = vmatprep.subr.bf16.mxu0 %v15059_v54 }
 0xc8b   :  { %14528 = vmatpush3.bf16.msra.mxu0 %v15060_v58 }
 0xc8c   :  { %14529 = vmatprep.subr.bf16.mxu0 %v15061_v49 }
 0xc8f   :  { %14530 = vmatpush3.bf16.msra.mxu0 %v15062_v61 }
 0xd32   :  { %v12634_v45 = vpop.f32.mrf.mxu0  ;;  %v12677_v41 = vpop.f32.mrf.mxu1 }
 0xd33   :  { %v12635_v13 = vadd.f32 %v12634_v45, %v12273_v55  ;;  %v12743_v45 = vrot.slane %v12734_v60, %v17169_v32 }
 0xd34   :  { %v12636_v63 = vpop.f32.mrf.mxu0  ;;  %v12679_v27 = vpop.f32.mrf.mxu1 }
 0xd35   :  { %v12637_v5 = vadd.f32 %v12636_v63, %v12277_v3  ;;  %v12678_v1 = vadd.f32 %v12677_v41, %v12635_v13 }
 0xd36   :  { %v12638_v56 = vpop.f32.mrf.mxu0  ;;  %v12681_v16 = vpop.f32.mrf.mxu1 }
 0xd37   :  { %v12680_v36 = vadd.f32 %v12679_v27, %v12637_v5  ;;  %v12639_v31 = vadd.f32 %v12638_v56, %v12273_v55 }
 0xd38   :  { %v12640_v43 = vpop.f32.mrf.mxu0  ;;  %v12683_v48 = vpop.f32.mrf.mxu1 }
 0xd39   :  { %v12641_v24 = vadd.f32 %v12640_v43, %v12277_v3  ;;  %v12686_v6 = vadd.f32 %v12680_v36, %v12678_v1  ;;  %v12682_v23 = vadd.f32 %v12681_v16, %v12639_v31  ;;  %v12739_v3 = vrot.slane %v12734_v60, %v17171_v50 }
 0xd3b   :  { %v12684_v28 = vadd.f32 %v12683_v48, %v12641_v24  ;;  %12687 = vadd.xlane.f32.xlu0 %v12686_v6 }
 0xd3d   :  { %v12689_v33 = vadd.f32 %v12684_v28, %v12682_v23 }
 0xd3f   :  { %12690 = vadd.xlane.f32.xlu1 %v12689_v33 }
 0xdc4   :  { %v12688_v0 = vpop.xlane.xlu0 %12687 }
 0xdc5   :  { %v12692_v47 = vmul.f32 0.00390625, %v12688_v0 }
 0xdc7   :  { %v12694_v26 = vsub.f32 %v12678_v1, %v12692_v47  ;;  %v12695_v37 = vsub.f32 %v12680_v36, %v12692_v47 }
 0xdc8   :  { %v12691_v17 = vpop.xlane.xlu1 %12690 }
 0xdc9   :  { %v12693_v29 = vmul.f32 0.00390625, %v12691_v17  ;;  %v12698_v39 = vmul.f32 %v12694_v26, %v12694_v26  ;;  %v12699_v44 = vmul.f32 %v12695_v37, %v12695_v37 }
 0xdcb   :  { %v12696_v20 = vsub.f32 %v12682_v23, %v12693_v29  ;;  %v12697_v52 = vsub.f32 %v12684_v28, %v12693_v29  ;;  %v12702_v62 = vadd.f32 %v12699_v44, %v12698_v39 }
 0xdcd   :  { %12703 = vadd.xlane.f32.xlu0 %v12702_v62  ;;  %v12700_v53 = vmul.f32 %v12696_v20, %v12696_v20  ;;  %v12701_v21 = vmul.f32 %v12697_v52, %v12697_v52 }
 0xdcf   :  { %v12705_v7 = vadd.f32 %v12701_v21, %v12700_v53 }
 0xdd1   :  { %12706 = vadd.xlane.f32.xlu1 %v12705_v7 }
 0xe56   :  { %v12704_v35 = vpop.xlane.xlu0 %12703 }
 0xe57   :  { %v12708_v59 = vmul.f32 0.00390625, %v12704_v35 }
 0xe59   :  { %v12710_v18 = vadd.f32 1e-05, %v12708_v59 }
 0xe5a   :  { %v12707_v22 = vpop.xlane.xlu1 %12706 }
 0xe5b   :  { %15075 = vrsqrt.f32 %v12710_v18  ;;  %v12709_v46 = vmul.f32 0.00390625, %v12707_v22 }
 0xe5d   :  { %v12711_v25 = vadd.f32 1e-05, %v12709_v46 }
 0xe5f   :  { %15077 = vrsqrt.f32 %v12711_v25 }
 0xe68   :  { %v15076_v40 = vpop.eup %15075 }
 0xe69   :  { %v12714_v38 = vmul.f32 %v15076_v40, %v12694_v26  ;;  %v12715_v55 = vmul.f32 %v15076_v40, %v12695_v37  ;;  %v14498_v37 = vld [vmem:[#allocation28] ss:$0 sm:$0xff] }
 0xe6b   :  { %v12731_v41 = vmul.f32 %v12727_v15, %v12715_v55  ;;  %v12730_v13 = vmul.f32 %v12723_v8, %v12714_v38 }
 0xe6c   :  { %v15078_v63 = vpop.eup %15077 }
 0xe6d   :  { %v12716_v27 = vmul.f32 %v15078_v63, %v12696_v20  ;;  %v12717_v5 = vmul.f32 %v15078_v63, %v12697_v52  ;;  %v12747_v56 = vadd.f32 %v12743_v45, %v12731_v41  ;;  %v12746_v16 = vadd.f32 %v12739_v3, %v12730_v13 }
 0xe6f   :  { %v12733_v1 = vmul.f32 %v12727_v15, %v12717_v5  ;;  %v12732_v36 = vmul.f32 %v12723_v8, %v12716_v27  ;;  %v12751_v43 = vmul.f32 0.2, %v12747_v56  ;;  %v12750_v6 = vmul.f32 0.2, %v12746_v16 }
 0xe71   :  { %v12749_v31 = vadd.f32 %v12743_v45, %v12733_v1  ;;  %v12748_v24 = vadd.f32 %v12739_v3, %v12732_v36  ;;  %v12755_v28 = vmax.f32 %v12747_v56, %v12751_v43  ;;  %v12754_v50 = vmax.f32 %v12746_v16, %v12750_v6 }
 0xe73   :  { %v12753_v48 = vmul.f32 0.2, %v12749_v31  ;;  %v12752_v23 = vmul.f32 0.2, %v12748_v24 }
 0xe75   :  { %v12757_v33 = vmax.f32 %v12749_v31, %v12753_v48  ;;  %v12756_v0 = vmax.f32 %v12748_v24, %v12752_v23 }
 0xe77   :  { %v12759_v32 = vpack.c.bf16 %v12757_v33, %v12755_v28  ;;  %v12758_v47 = vpack.c.bf16 %v12756_v0, %v12754_v50 }
 0xe79   :  { %12927 = vmatprep.mubr.bf16.mxu0 %v12759_v32 }
 0xe7a   :  { %12928 = vmatmul.mubr.bf16.vlgmr.msra.gmra.mxu0 %v12758_v47 }
 0xf3a   :  { %v14531_v26 = vpop.f32.mrf.mxu0 }
 0xf3c   :  { %v14532_v17 = vpop.f32.mrf.mxu0 }
 0xf3d   :  { %v14533_v29 = vadd.f32 %v14532_v17, %v14531_v26 }
 0xf3e   :  { %v14534_v39 = vpop.f32.mrf.mxu0 }
 0xf3f   :  { %v12930_v44 = vadd.f32 %v14533_v29, %v14498_v37 }
 0xf40   :  { %v14535_v20 = vpop.f32.mrf.mxu0 }
 0xf41   :  { %12936 = vst [vmem:[%s16998_s19] sm:$0xff] %v12930_v44  ;;  %v14536_v52 = vadd.f32 %v14535_v20, %v14534_v39 }
 0xf43   :  { %v12933_v62 = vadd.f32 %v14536_v52, %v14498_v37 }
 0xf45   :  { %12937 = vst [vmem:[%s16998_s19 + $0x8] sm:$0xff] %v12933_v62 }
 0xf46   :  { %12942 = vsyncpa [#allocation3], 1 }
 0xf47   :  { %12943 = vsyncpa [#allocation5], 1 }
 0xf48   :  { %12944 = vsyncpa [#allocation8], 1 }
 0xf49   :  { %12945 = vsyncpa [#allocation11], 1 }
 0xf4a   :  { %12946 = vsyncpa [#allocation14], 1 }
 0xf4b   :  { %12947 = vsyncpa [#allocation17], 1 }
 0xf4c   :  { %12948 = vsyncpa [#allocation20], 1 }
 0xf4d   :  { %12949 = vsyncpa [#allocation23], 1 }
 0xf4e   :  { %12950 = vsyncpa [#allocation26], 1 }
 0xf4f   :  { %12951 = vsyncpa [#allocation29], 1 }

</bundles_post_ra>
